<compile_context>
chip_gen: v7x
topology: tpu7x:2x2x1
jax: 0.10.0
libtpu: 0.0.40
codegen_flags: <defaults>
</compile_context>

<pallas_src>
import numpy as np
import jax
import jax.numpy as jnp
from jax.experimental import pallas as pl
from jax.experimental.pallas import tpu as pltpu

CONV1 = dict(out_ch=6, k=8, stride=4, pad=1)
CONV2 = dict(out_ch=16, k=4, stride=2, pad=0)
HIDDEN = 128


def _conv_out(size, k, stride, pad):
    return (size + 2 * pad - k) // stride + 1


# ----------------------------------------------------------------------------
# One-time host-side prep: lower a Conv2d into a dense matmul
# ----------------------------------------------------------------------------
def _lower_conv(w, b, in_hw, stride, pad):
    """Lower a Conv2d to a dense matmul over the zero-padded NCHW-flattened input.

    w: (O, C, k, k) torch layout, b: (O,). The conv's input is (N, C, H, W); the
    caller zero-pads spatially by `pad` and flattens NCHW to (N, C*PH*PW).
    Returns (WL, bL, (OH, OW)) with WL: (C*PH*PW, O*OH*OW), bL: (1, O*OH*OW).
    Output columns are the conv output NCHW-flattened (c, oh, ow) — identical to
    torch's x.view(N, -1) ordering, so downstream weights need no permutation.
    """
    w = np.asarray(w, np.float32)
    b = np.asarray(b, np.float32)
    o_ch, c_ch, k, _ = w.shape
    h, wdt = in_hw
    ph, pw = h + 2 * pad, wdt + 2 * pad
    oh_n = (h + 2 * pad - k) // stride + 1
    ow_n = (wdt + 2 * pad - k) // stride + 1

    wl = np.zeros((c_ch * ph * pw, o_ch * oh_n * ow_n), np.float32)
    c_idx = np.arange(c_ch)
    o_idx = np.arange(o_ch)
    for oh in range(oh_n):
        for ow in range(ow_n):
            cols = o_idx * (oh_n * ow_n) + oh * ow_n + ow                 # (O,)
            for kh in range(k):
                for kw in range(k):
                    rows = (c_idx * ph + oh * stride + kh) * pw + (ow * stride + kw)  # (C,)
                    wl[np.ix_(rows, cols)] = w[:, :, kh, kw].T            # (C, O)
    bl = np.repeat(b, oh_n * ow_n)[None, :]
    return jnp.asarray(wl), jnp.asarray(bl), (oh_n, ow_n)


# ----------------------------------------------------------------------------
# Fused Pallas kernel: conv1 -> conv2 -> fc1 -> fc2 -> fc3 (all VMEM-resident)
# ----------------------------------------------------------------------------
def _critic_fused_kernel(x_ref, a_ref,
                         w1_ref, b1_ref, w2_ref, b2_ref,
                         wf1x_ref, wf1a_ref, bf1_ref,
                         wf2_ref, bf2_ref,
                         wf3_ref, bf3_ref,
                         o_ref):
    f32 = jnp.float32
    # conv1 (lowered dense GEMM over padded NCHW-flattened state) + ReLU
    h = jnp.dot(x_ref[...], w1_ref[...], preferred_element_type=f32) + b1_ref[...]
    h = jnp.maximum(h, 0.0)
    # conv2 (lowered) + ReLU -> columns already in torch .view(N,-1) order
    h = jnp.dot(h, w2_ref[...], preferred_element_type=f32) + b2_ref[...]
    h = jnp.maximum(h, 0.0)
    # fc1 on concat(features, action): weight split instead of in-kernel concat
    h = (jnp.dot(h, wf1x_ref[...], preferred_element_type=f32)
         + jnp.dot(a_ref[...], wf1a_ref[...], preferred_element_type=f32)
         + bf1_ref[...])
    h = jnp.maximum(h, 0.0)
    # fc2 + ReLU
    h = jnp.dot(h, wf2_ref[...], preferred_element_type=f32) + bf2_ref[...]
    h = jnp.maximum(h, 0.0)
    # fc3 + tanh
    h = jnp.dot(h, wf3_ref[...], preferred_element_type=f32) + bf3_ref[...]
    o_ref[...] = jnp.tanh(h).astype(o_ref.dtype)


# ----------------------------------------------------------------------------
# Parameters (deterministic, synthetic, torch-like layout) + one-time prep
# ----------------------------------------------------------------------------
def init_params(key, input_channel, action_dim, output_size, state_hw):
    H, W = state_hw
    h1 = _conv_out(H, CONV1["k"], CONV1["stride"], CONV1["pad"])
    w1 = _conv_out(W, CONV1["k"], CONV1["stride"], CONV1["pad"])
    h2 = _conv_out(h1, CONV2["k"], CONV2["stride"], CONV2["pad"])
    w2 = _conv_out(w1, CONV2["k"], CONV2["stride"], CONV2["pad"])
    feat_dim = CONV2["out_ch"] * h2 * w2
    fc_in = feat_dim + action_dim   # analogue of the repo's hardcoded 3173

    ks = jax.random.split(key, 10)

    def dense(kw, kb, fan_in, shape_w, shape_b):
        s = 1.0 / np.sqrt(float(fan_in))
        return (jax.random.uniform(kw, shape_w, jnp.float32, -s, s),
                jax.random.uniform(kb, shape_b, jnp.float32, -s, s))

    p = {}
    p["conv1_w"], p["conv1_b"] = dense(
        ks[0], ks[1], input_channel * CONV1["k"] ** 2,
        (CONV1["out_ch"], input_channel, CONV1["k"], CONV1["k"]), (CONV1["out_ch"],))
    p["conv2_w"], p["conv2_b"] = dense(
        ks[2], ks[3], CONV1["out_ch"] * CONV2["k"] ** 2,
        (CONV2["out_ch"], CONV1["out_ch"], CONV2["k"], CONV2["k"]), (CONV2["out_ch"],))
    p["fc1_w"], p["fc1_b"] = dense(ks[4], ks[5], fc_in, (fc_in, HIDDEN), (HIDDEN,))
    p["fc2_w"], p["fc2_b"] = dense(ks[6], ks[7], HIDDEN, (HIDDEN, HIDDEN), (HIDDEN,))
    p["fc3_w"], p["fc3_b"] = dense(ks[8], ks[9], HIDDEN, (HIDDEN, output_size),
                                   (output_size,))
    return p


def prepare_params(params, state_hw):
    """One-time host-side lowering of the conv weights + fc1 weight split."""
    H, W = state_hw
    w1l, b1l, (oh1, ow1) = _lower_conv(params["conv1_w"], params["conv1_b"],
                                       (H, W), CONV1["stride"], CONV1["pad"])
    w2l, b2l, (oh2, ow2) = _lower_conv(params["conv2_w"], params["conv2_b"],
                                       (oh1, ow1), CONV2["stride"], CONV2["pad"])
    feat_dim = CONV2["out_ch"] * oh2 * ow2
    fc1_w = jnp.asarray(params["fc1_w"], jnp.float32)
    return {
        "w1l": w1l, "b1l": b1l,
        "w2l": w2l, "b2l": b2l,
        "wf1x": fc1_w[:feat_dim, :],   # rows for NCHW-flattened CNN features
        "wf1a": fc1_w[feat_dim:, :],   # rows for the action
        "bf1": jnp.asarray(params["fc1_b"], jnp.float32)[None, :],
        "wf2": jnp.asarray(params["fc2_w"], jnp.float32),
        "bf2": jnp.asarray(params["fc2_b"], jnp.float32)[None, :],
        "wf3": jnp.asarray(params["fc3_w"], jnp.float32),
        "bf3": jnp.asarray(params["fc3_b"], jnp.float32)[None, :],
    }


# ----------------------------------------------------------------------------
# Forward pass: DefaultCriticCNN.forward((state, action))
# ----------------------------------------------------------------------------
@jax.jit
def critic_forward(prepped, state, action):
    if state.ndim == 3:                       # matches the unsqueeze(0) path
        state = state[None]
    if action.ndim == 1:
        action = action[None]
    n = state.shape[0]
    pad = CONV1["pad"]
    x_flat = jnp.pad(state.astype(jnp.float32),
                     ((0, 0), (0, 0), (pad, pad), (pad, pad))).reshape(n, -1)
    out_dim = prepped["wf3"].shape[1]
    # Gridless call: every operand is a full-array VMEM block (total ~7 MiB).
    # Note: for training-scale batches (256+), add an M-tile "parallel" grid axis;
    # at batch=2 a grid is pure pipeline overhead.
    return pl.pallas_call(
        _critic_fused_kernel,
        out_shape=jax.ShapeDtypeStruct((n, out_dim), jnp.float32),
        compiler_params=pltpu.CompilerParams(vmem_limit_bytes=32 * 1024 * 1024),
    )(x_flat, action.astype(jnp.float32),
      prepped["w1l"], prepped["b1l"], prepped["w2l"], prepped["b2l"],
      prepped["wf1x"], prepped["wf1a"], prepped["bf1"],
      prepped["wf2"], prepped["bf2"], prepped["wf3"], prepped["bf3"])


# ----------------------------------------------------------------------------
# Pure-JAX (XLA) reference, f32 precision — used only as a correctness check
# ----------------------------------------------------------------------------
def reference_forward(params, state, action):
    hi = jax.lax.Precision.HIGHEST
    if state.ndim == 3:
        state = state[None]
    x = state.astype(jnp.float32)
    y = jax.lax.conv_general_dilated(
        x, params["conv1_w"].astype(jnp.float32),
        window_strides=(CONV1["stride"],) * 2,
        padding=((CONV1["pad"], CONV1["pad"]),) * 2,
        dimension_numbers=("NCHW", "OIHW", "NCHW"), precision=hi)
    y = jnp.maximum(y + params["conv1_b"].reshape(1, -1, 1, 1), 0.0)
    y = jax.lax.conv_general_dilated(
        y, params["conv2_w"].astype(jnp.float32),
        window_strides=(CONV2["stride"],) * 2,
        padding=((CONV2["pad"], CONV2["pad"]),) * 2,
        dimension_numbers=("NCHW", "OIHW", "NCHW"), precision=hi)
    y = jnp.maximum(y + params["conv2_b"].reshape(1, -1, 1, 1), 0.0)
    feat = y.reshape(y.shape[0], -1)
    cat = jnp.concatenate([feat, action.astype(jnp.float32)], axis=-1)
    h = jnp.maximum(jnp.dot(cat, params["fc1_w"], precision=hi) + params["fc1_b"], 0.0)
    h = jnp.maximum(jnp.dot(h, params["fc2_w"], precision=hi) + params["fc2_b"], 0.0)
    return jnp.tanh(jnp.dot(h, params["fc3_w"], precision=hi) + params["fc3_b"])


if __name__ == "__main__":
    key = jax.random.PRNGKey(0)
    k_state, k_action, k_params = jax.random.split(key, 3)

    # 32x32 is the smallest spatial size the conv stack (k=8/s=4 then k=4/s=2) supports.
    batch, in_ch, H, W = 2, 4, 32, 32
    action_dim, output_size = 5, 1

    state = jax.random.normal(k_state, (batch, in_ch, H, W), jnp.float32)
    action = jax.random.normal(k_action, (batch, action_dim), jnp.float32)

    params = init_params(k_params, in_ch, action_dim, output_size, (H, W))
    prepped = prepare_params(params, (H, W))

    out = critic_forward(prepped, state, action)
    out = jax.block_until_ready(out)
    assert out.shape == (batch, output_size), out.shape

    ref = jax.block_until_ready(reference_forward(params, state, action))
    err = float(jnp.max(jnp.abs(out - ref)))
    assert err < 1e-3, f"mismatch vs reference: max abs err {err}"

    print("KERNEL_OK")
</pallas_src>

<mosaic_0001>
module attributes {stable_mosaic.version = 11 : i64} {
  func.func @_critic_fused_kernel(%arg0: memref<2x4624xf32, #tpu.memory_space<vmem>>, %arg1: memref<2x5xf32, #tpu.memory_space<vmem>>, %arg2: memref<4624x294xf32, #tpu.memory_space<vmem>>, %arg3: memref<1x294xf32, #tpu.memory_space<vmem>>, %arg4: memref<294x64xf32, #tpu.memory_space<vmem>>, %arg5: memref<1x64xf32, #tpu.memory_space<vmem>>, %arg6: memref<64x128xf32, #tpu.memory_space<vmem>>, %arg7: memref<5x128xf32, #tpu.memory_space<vmem>>, %arg8: memref<1x128xf32, #tpu.memory_space<vmem>>, %arg9: memref<128x128xf32, #tpu.memory_space<vmem>>, %arg10: memref<1x128xf32, #tpu.memory_space<vmem>>, %arg11: memref<128x1xf32, #tpu.memory_space<vmem>>, %arg12: memref<1x1xf32, #tpu.memory_space<vmem>>, %arg13: memref<2x1xf32, #tpu.memory_space<vmem>>) attributes {dimension_semantics = [], scalar_prefetch = 0 : i64, scratch_operands = 0 : i64, tpu.core_type = #tpu.core_type<tc>} {
    %c0 = arith.constant 0 : index
    %c0_0 = arith.constant 0 : index
    %0 = vector.load %arg0[%c0, %c0_0] : memref<2x4624xf32, #tpu.memory_space<vmem>>, vector<2x4624xf32>
    %c0_1 = arith.constant 0 : index
    %c0_2 = arith.constant 0 : index
    %1 = vector.load %arg2[%c0_1, %c0_2] : memref<4624x294xf32, #tpu.memory_space<vmem>>, vector<4624x294xf32>
    %cst = arith.constant dense<0.000000e+00> : vector<2x294xf32>
    %2 = tpu.matmul %0, %1, %cst {dimension_numbers = #tpu.dot_dimension_numbers<[1], [0], [0], [1], [0, 0, 1, 1], [], []>} : vector<2x4624xf32>, vector<4624x294xf32>, vector<2x294xf32> -> vector<2x294xf32>
    %c0_3 = arith.constant 0 : index
    %c0_4 = arith.constant 0 : index
    %3 = vector.load %arg3[%c0_3, %c0_4] : memref<1x294xf32, #tpu.memory_space<vmem>>, vector<1x294xf32>
    %4 = vector.broadcast %3 : vector<1x294xf32> to vector<2x294xf32>
    %5 = arith.addf %2, %4 : vector<2x294xf32>
    %cst_5 = arith.constant 0.000000e+00 : f32
    %6 = vector.broadcast %cst_5 : f32 to vector<2x294xf32>
    %7 = arith.maximumf %5, %6 : vector<2x294xf32>
    %c0_6 = arith.constant 0 : index
    %c0_7 = arith.constant 0 : index
    %8 = vector.load %arg4[%c0_6, %c0_7] : memref<294x64xf32, #tpu.memory_space<vmem>>, vector<294x64xf32>
    %cst_8 = arith.constant dense<0.000000e+00> : vector<2x64xf32>
    %9 = tpu.matmul %7, %8, %cst_8 {dimension_numbers = #tpu.dot_dimension_numbers<[1], [0], [0], [1], [0, 0, 1, 1], [], []>} : vector<2x294xf32>, vector<294x64xf32>, vector<2x64xf32> -> vector<2x64xf32>
    %c0_9 = arith.constant 0 : index
    %c0_10 = arith.constant 0 : index
    %10 = vector.load %arg5[%c0_9, %c0_10] : memref<1x64xf32, #tpu.memory_space<vmem>>, vector<1x64xf32>
    %11 = vector.broadcast %10 : vector<1x64xf32> to vector<2x64xf32>
    %12 = arith.addf %9, %11 : vector<2x64xf32>
    %cst_11 = arith.constant 0.000000e+00 : f32
    %13 = vector.broadcast %cst_11 : f32 to vector<2x64xf32>
    %14 = arith.maximumf %12, %13 : vector<2x64xf32>
    %c0_12 = arith.constant 0 : index
    %c0_13 = arith.constant 0 : index
    %15 = vector.load %arg6[%c0_12, %c0_13] : memref<64x128xf32, #tpu.memory_space<vmem>>, vector<64x128xf32>
    %cst_14 = arith.constant dense<0.000000e+00> : vector<2x128xf32>
    %16 = tpu.matmul %14, %15, %cst_14 {dimension_numbers = #tpu.dot_dimension_numbers<[1], [0], [0], [1], [0, 0, 1, 1], [], []>} : vector<2x64xf32>, vector<64x128xf32>, vector<2x128xf32> -> vector<2x128xf32>
    %c0_15 = arith.constant 0 : index
    %c0_16 = arith.constant 0 : index
    %17 = vector.load %arg1[%c0_15, %c0_16] : memref<2x5xf32, #tpu.memory_space<vmem>>, vector<2x5xf32>
    %c0_17 = arith.constant 0 : index
    %c0_18 = arith.constant 0 : index
    %18 = vector.load %arg7[%c0_17, %c0_18] : memref<5x128xf32, #tpu.memory_space<vmem>>, vector<5x128xf32>
    %cst_19 = arith.constant dense<0.000000e+00> : vector<2x128xf32>
    %19 = tpu.matmul %17, %18, %cst_19 {dimension_numbers = #tpu.dot_dimension_numbers<[1], [0], [0], [1], [0, 0, 1, 1], [], []>} : vector<2x5xf32>, vector<5x128xf32>, vector<2x128xf32> -> vector<2x128xf32>
    %20 = arith.addf %16, %19 : vector<2x128xf32>
    %c0_20 = arith.constant 0 : index
    %c0_21 = arith.constant 0 : index
    %21 = vector.load %arg8[%c0_20, %c0_21] : memref<1x128xf32, #tpu.memory_space<vmem>>, vector<1x128xf32>
    %22 = vector.broadcast %21 : vector<1x128xf32> to vector<2x128xf32>
    %23 = arith.addf %20, %22 : vector<2x128xf32>
    %cst_22 = arith.constant 0.000000e+00 : f32
    %24 = vector.broadcast %cst_22 : f32 to vector<2x128xf32>
    %25 = arith.maximumf %23, %24 : vector<2x128xf32>
    %c0_23 = arith.constant 0 : index
    %c0_24 = arith.constant 0 : index
    %26 = vector.load %arg9[%c0_23, %c0_24] : memref<128x128xf32, #tpu.memory_space<vmem>>, vector<128x128xf32>
    %cst_25 = arith.constant dense<0.000000e+00> : vector<2x128xf32>
    %27 = tpu.matmul %25, %26, %cst_25 {dimension_numbers = #tpu.dot_dimension_numbers<[1], [0], [0], [1], [0, 0, 1, 1], [], []>} : vector<2x128xf32>, vector<128x128xf32>, vector<2x128xf32> -> vector<2x128xf32>
    %c0_26 = arith.constant 0 : index
    %c0_27 = arith.constant 0 : index
    %28 = vector.load %arg10[%c0_26, %c0_27] : memref<1x128xf32, #tpu.memory_space<vmem>>, vector<1x128xf32>
    %29 = vector.broadcast %28 : vector<1x128xf32> to vector<2x128xf32>
    %30 = arith.addf %27, %29 : vector<2x128xf32>
    %cst_28 = arith.constant 0.000000e+00 : f32
    %31 = vector.broadcast %cst_28 : f32 to vector<2x128xf32>
    %32 = arith.maximumf %30, %31 : vector<2x128xf32>
    %c0_29 = arith.constant 0 : index
    %c0_30 = arith.constant 0 : index
    %33 = vector.load %arg11[%c0_29, %c0_30] : memref<128x1xf32, #tpu.memory_space<vmem>>, vector<128x1xf32>
    %cst_31 = arith.constant dense<0.000000e+00> : vector<2x1xf32>
    %34 = tpu.matmul %32, %33, %cst_31 {dimension_numbers = #tpu.dot_dimension_numbers<[1], [0], [0], [1], [0, 0, 1, 1], [], []>} : vector<2x128xf32>, vector<128x1xf32>, vector<2x1xf32> -> vector<2x1xf32>
    %c0_32 = arith.constant 0 : index
    %c0_33 = arith.constant 0 : index
    %35 = vector.load %arg12[%c0_32, %c0_33] : memref<1x1xf32, #tpu.memory_space<vmem>>, vector<1x1xf32>
    %36 = vector.broadcast %35 : vector<1x1xf32> to vector<2x1xf32>
    %37 = arith.addf %34, %36 : vector<2x1xf32>
    %38 = math.tanh %37 : vector<2x1xf32>
    %c0_34 = arith.constant 0 : index
    %c0_35 = arith.constant 0 : index
    %39 = vector.load %arg13[%c0_34, %c0_35] : memref<2x1xf32, #tpu.memory_space<vmem>>, vector<2x1xf32>
    tpu.vector_store %arg13[%c0_34, %c0_35], %38 {strides = array<i32>} : memref<2x1xf32, #tpu.memory_space<vmem>>, vector<2x1xf32>,
    return
  }
}

</mosaic_0001>

<bundles_post_ra>
// kernel: critic_forward.1
= control target key start
LH: loop header
LB: loop body
LE: loop exit
PB: predicated region body
PF: predicated region fallthrough
CT: control target
= control target key end

     0   :  { %vm2013_vm0 = vcmask 130048   ;;  %vm7992_vm1 = vmmov 0   ;;  %vm4746_vm2 = vcmask 1045504   ;;  %vm4742_vm3 = vcmask 310272   ;;  %s13897_s2 = inlined_call_operand.vmem [shape: f32[4624,294], index: 2, kind: input, shape index: {}]   ;;  %s13898_s0 = inlined_call_operand.vmem [shape: f32[2,4624], index: 0, kind: input, shape index: {}]   ;;  %s13899_s3 = inlined_call_operand.vmem [shape: f32[1,294], index: 3, kind: input, shape index: {}]   ;;  %s13900_s4 = inlined_call_operand.vmem [shape: f32[294,64], index: 4, kind: input, shape index: {}]   ;;  %s13901_s7 = inlined_call_operand.vmem [shape: f32[5,128], index: 7, kind: input, shape index: {}]   ;;  %s13902_s6 = inlined_call_operand.vmem [shape: f32[64,128], index: 6, kind: input, shape index: {}]   ;;  %s13903_s1 = inlined_call_operand.vmem [shape: f32[2,5], index: 1, kind: input, shape index: {}]   ;;  %s13904_s5 = inlined_call_operand.vmem [shape: f32[1,64], index: 5, kind: input, shape index: {}]   ;;  %s13905_s9 = inlined_call_operand.vmem [shape: f32[128,128], index: 9, kind: input, shape index: {}]   ;;  %s13906_s8 = inlined_call_operand.vmem [shape: f32[1,128], index: 8, kind: input, shape index: {}]   ;;  %s13907_s11 = inlined_call_operand.vmem [shape: f32[128,1], index: 11, kind: input, shape index: {}]   ;;  %s13908_s12 = inlined_call_operand.<no memory space> [shape: f32[1,1], index: 12, kind: input, shape index: {}]   ;;  %s13909_s10 = inlined_call_operand.vmem [shape: f32[1,128], index: 10, kind: input, shape index: {}]   ;;  %s13910_s13 = inlined_call_operand.vmem [shape: f32[2,1], index: 13, kind: output, shape index: {}]  }
   0x1   :  { %v57_v0 = vld [vmem:[%s13897_s2 + $0x8] sm:$0xff]  ;;  %v60_v1 = vld [vmem:[%s13897_s2 + $0x20] sm:$0xff]  ;;  %v59_v6 = vld [vmem:[%s13897_s2 + $0x18] sm:$0xff]  ;;  %vm4905_vm4 = vcmask 1044480   ;;  %vm4901_vm5 = vcmask 39936   ;;  %vm4979_vm6 = vcmask 523264  }
   0x2   :  { %v345_v2 = vld [vmem:[%s13897_s2 + $0x908] sm:$0xff]  ;;  %v6101_v3 = vpack.c.bf16 %v60_v1, %v57_v0  ;;  %v348_v4 = vld [vmem:[%s13897_s2 + $0x920] sm:$0xff]  ;;  %v347_v10 = vld [vmem:[%s13897_s2 + $0x918] sm:$0xff]  ;;  %vm5250_vm7 = vcmask 1024  }
   0x3   :  { %v56_v5 = vld [vmem:[%s13897_s2] sm:$0xff]  ;;  %v6293_v7 = vpack.c.bf16 %v348_v4, %v345_v2  ;;  %v63_v11 = vld [vmem:[%s13897_s2 + $0x38] sm:$0xff]  ;;  %v66_v13 = vld [vmem:[%s13897_s2 + $0x50] sm:$0xff] }
   0x4   :  { %v6103_v8 = vpack.c.bf16 %v59_v6, %v56_v5  ;;  %v344_v9 = vld [vmem:[%s13897_s2 + $0x900] sm:$0xff]  ;;  %6102 = vmatprep.subr.bf16.mxu1 %v6101_v3  ;;  %v351_v14 = vld [vmem:[%s13897_s2 + $0x938] sm:$0xff]  ;;  %v354_v15 = vld [vmem:[%s13897_s2 + $0x950] sm:$0xff]  ;;  %v6105_v16 = vpack.c.bf16 %v66_v13, %v63_v11 }
   0x5   :  { %v6295_v12 = vpack.c.bf16 %v347_v10, %v344_v9  ;;  %6294 = vmatprep.subr.bf16.mxu0 %v6293_v7  ;;  %v6297_v17 = vpack.c.bf16 %v354_v15, %v351_v14  ;;  %v62_v18 = vld [vmem:[%s13897_s2 + $0x30] sm:$0xff]  ;;  %v65_v19 = vld [vmem:[%s13897_s2 + $0x48] sm:$0xff]  ;;  %v72_v24 = vld [vmem:[%s13897_s2 + $0x80] sm:$0xff] }
   0x6   :  { %6104 = vmatpush1.bf16.msra.mxu1 %v6103_v8  ;;  %v350_v20 = vld [vmem:[%s13897_s2 + $0x930] sm:$0xff]  ;;  %v6107_v21 = vpack.c.bf16 %v65_v19, %v62_v18  ;;  %v353_v22 = vld [vmem:[%s13897_s2 + $0x948] sm:$0xff]  ;;  %v360_v28 = vld [vmem:[%s13897_s2 + $0x980] sm:$0xff] }
   0x7   :  { %6296 = vmatpush1.bf16.msra.mxu0 %v6295_v12  ;;  %v69_v23 = vld [vmem:[%s13897_s2 + $0x68] sm:$0xff]  ;;  %6106 = vmatprep.subr.bf16.mxu1 %v6105_v16  ;;  %v6299_v25 = vpack.c.bf16 %v353_v22, %v350_v20  ;;  %v68_v29 = vld [vmem:[%s13897_s2 + $0x60] sm:$0xff]  ;;  %v71_v31 = vld [vmem:[%s13897_s2 + $0x78] sm:$0xff] }
   0x8   :  { %6298 = vmatprep.subr.bf16.mxu0 %v6297_v17  ;;  %v6109_v26 = vpack.c.bf16 %v72_v24, %v69_v23  ;;  %v357_v27 = vld [vmem:[%s13897_s2 + $0x968] sm:$0xff]  ;;  %v356_v32 = vld [vmem:[%s13897_s2 + $0x960] sm:$0xff]  ;;  %v359_v33 = vld [vmem:[%s13897_s2 + $0x978] sm:$0xff]  ;;  %v6111_v34 = vpack.c.bf16 %v71_v31, %v68_v29 }
   0x9   :  { %v6301_v30 = vpack.c.bf16 %v360_v28, %v357_v27  ;;  %v75_v35 = vld [vmem:[%s13897_s2 + $0x98] sm:$0xff]  ;;  %v78_v36 = vld [vmem:[%s13897_s2 + $0xb0] sm:$0xff]  ;;  %v6303_v38 = vpack.c.bf16 %v359_v33, %v356_v32  ;;  %v77_v42 = vld [vmem:[%s13897_s2 + $0xa8] sm:$0xff] }
   0xa   :  { %6108 = vmatpush1.bf16.msra.mxu1 %v6107_v21  ;;  %v363_v37 = vld [vmem:[%s13897_s2 + $0x998] sm:$0xff]  ;;  %v6113_v39 = vpack.c.bf16 %v78_v36, %v75_v35  ;;  %v366_v40 = vld [vmem:[%s13897_s2 + $0x9b0] sm:$0xff]  ;;  %v365_v45 = vld [vmem:[%s13897_s2 + $0x9a8] sm:$0xff] }
   0xb   :  { %6300 = vmatpush1.bf16.msra.mxu0 %v6299_v25  ;;  %6110 = vmatprep.subr.bf16.mxu1 %v6109_v26  ;;  %v74_v41 = vld [vmem:[%s13897_s2 + $0x90] sm:$0xff]  ;;  %v6305_v43 = vpack.c.bf16 %v366_v40, %v363_v37  ;;  %v81_v46 = vld [vmem:[%s13897_s2 + $0xc8] sm:$0xff]  ;;  %v84_v47 = vld [vmem:[%s13897_s2 + $0xe0] sm:$0xff] }
   0xc   :  { %6302 = vmatprep.subr.bf16.mxu0 %v6301_v30  ;;  %v362_v44 = vld [vmem:[%s13897_s2 + $0x990] sm:$0xff]  ;;  %v369_v48 = vld [vmem:[%s13897_s2 + $0x9c8] sm:$0xff]  ;;  %v372_v49 = vld [vmem:[%s13897_s2 + $0x9e0] sm:$0xff]  ;;  %v6115_v50 = vpack.c.bf16 %v77_v42, %v74_v41  ;;  %v6117_v52 = vpack.c.bf16 %v84_v47, %v81_v46  ;;  %v1792_v46 = vlaneseq  ;;  %v7989_v47 = vmov 1983009808  }
   0xd   :  { %v6307_v51 = vpack.c.bf16 %v365_v45, %v362_v44  ;;  %v80_v53 = vld [vmem:[%s13897_s2 + $0xc0] sm:$0xff]  ;;  %v83_v54 = vld [vmem:[%s13897_s2 + $0xd8] sm:$0xff]  ;;  %v6309_v56 = vpack.c.bf16 %v372_v49, %v369_v48  ;;  %v90_v59 = vld [vmem:[%s13897_s2 + $0x110] sm:$0xff]  ;;  %v1819_v48 = vunpack.c.l.s4 %v7989_v47 }
   0xe   :  { %6112 = vmatpush1.bf16.msra.mxu1 %v6111_v34  ;;  %v368_v55 = vld [vmem:[%s13897_s2 + $0x9c0] sm:$0xff]  ;;  %v371_v57 = vld [vmem:[%s13897_s2 + $0x9d8] sm:$0xff]  ;;  %v378_v61 = vld [vmem:[%s13897_s2 + $0xa10] sm:$0xff]  ;;  %v6119_v62 = vpack.c.bf16 %v83_v54, %v80_v53 }
   0xf   :  { %6304 = vmatpush1.bf16.msra.mxu0 %v6303_v38  ;;  %6114 = vmatprep.subr.bf16.mxu1 %v6113_v39  ;;  %v87_v58 = vld [vmem:[%s13897_s2 + $0xf8] sm:$0xff]  ;;  %v6311_v63 = vpack.c.bf16 %v371_v57, %v368_v55  ;;  %v86_v1 = vld [vmem:[%s13897_s2 + $0xf0] sm:$0xff]  ;;  %v89_v2 = vld [vmem:[%s13897_s2 + $0x108] sm:$0xff] }
  0x10   :  { %6306 = vmatprep.subr.bf16.mxu0 %v6305_v43  ;;  %v375_v60 = vld [vmem:[%s13897_s2 + $0x9f8] sm:$0xff]  ;;  %v6121_v0 = vpack.c.bf16 %v90_v59, %v87_v58  ;;  %v374_v3 = vld [vmem:[%s13897_s2 + $0x9f0] sm:$0xff]  ;;  %v377_v5 = vld [vmem:[%s13897_s2 + $0xa08] sm:$0xff]  ;;  %v6123_v10 = vpack.c.bf16 %v89_v2, %v86_v1 }
  0x11   :  { %v6313_v4 = vpack.c.bf16 %v378_v61, %v375_v60  ;;  %v93_v6 = vld [vmem:[%s13897_s2 + $0x128] sm:$0xff]  ;;  %v96_v7 = vld [vmem:[%s13897_s2 + $0x140] sm:$0xff]  ;;  %v6315_v11 = vpack.c.bf16 %v377_v5, %v374_v3  ;;  %v95_v14 = vld [vmem:[%s13897_s2 + $0x138] sm:$0xff]  ;;  %v8315_v61 = vshrl.u32 %v1792_v46, 7 }
  0x12   :  { %6116 = vmatpush1.bf16.msra.mxu1 %v6115_v50  ;;  %v381_v8 = vld [vmem:[%s13897_s2 + $0xa28] sm:$0xff]  ;;  %v384_v9 = vld [vmem:[%s13897_s2 + $0xa40] sm:$0xff]  ;;  %v6125_v12 = vpack.c.bf16 %v96_v7, %v93_v6  ;;  %v383_v17 = vld [vmem:[%s13897_s2 + $0xa38] sm:$0xff] }
  0x13   :  { %6308 = vmatpush1.bf16.msra.mxu0 %v6307_v51  ;;  %6118 = vmatprep.subr.bf16.mxu1 %v6117_v52  ;;  %v92_v13 = vld [vmem:[%s13897_s2 + $0x120] sm:$0xff]  ;;  %v6317_v16 = vpack.c.bf16 %v384_v9, %v381_v8  ;;  %v99_v18 = vld [vmem:[%s13897_s2 + $0x158] sm:$0xff]  ;;  %v102_v19 = vld [vmem:[%s13897_s2 + $0x170] sm:$0xff] }
  0x14   :  { %6310 = vmatprep.subr.bf16.mxu0 %v6309_v56  ;;  %v380_v15 = vld [vmem:[%s13897_s2 + $0xa20] sm:$0xff]  ;;  %v387_v20 = vld [vmem:[%s13897_s2 + $0xa58] sm:$0xff]  ;;  %v390_v21 = vld [vmem:[%s13897_s2 + $0xa70] sm:$0xff]  ;;  %v6127_v22 = vpack.c.bf16 %v95_v14, %v92_v13  ;;  %v6129_v24 = vpack.c.bf16 %v102_v19, %v99_v18 }
  0x15   :  { %v6319_v23 = vpack.c.bf16 %v383_v17, %v380_v15  ;;  %v98_v25 = vld [vmem:[%s13897_s2 + $0x150] sm:$0xff]  ;;  %v101_v26 = vld [vmem:[%s13897_s2 + $0x168] sm:$0xff]  ;;  %v6321_v28 = vpack.c.bf16 %v390_v21, %v387_v20  ;;  %v108_v31 = vld [vmem:[%s13897_s2 + $0x1a0] sm:$0xff] }
  0x16   :  { %6120 = vmatpush1.bf16.msra.mxu1 %v6119_v62  ;;  %v386_v27 = vld [vmem:[%s13897_s2 + $0xa50] sm:$0xff]  ;;  %v389_v29 = vld [vmem:[%s13897_s2 + $0xa68] sm:$0xff]  ;;  %v396_v33 = vld [vmem:[%s13897_s2 + $0xaa0] sm:$0xff]  ;;  %v6131_v34 = vpack.c.bf16 %v101_v26, %v98_v25  ;;  %v1820_v62 = vunpack.c.0.s8 %v1819_v48 }
  0x17   :  { %6312 = vmatpush1.bf16.msra.mxu0 %v6311_v63  ;;  %6122 = vmatprep.subr.bf16.mxu1 %v6121_v0  ;;  %v105_v30 = vld [vmem:[%s13897_s2 + $0x188] sm:$0xff]  ;;  %v6323_v35 = vpack.c.bf16 %v389_v29, %v386_v27  ;;  %v104_v37 = vld [vmem:[%s13897_s2 + $0x180] sm:$0xff]  ;;  %v107_v38 = vld [vmem:[%s13897_s2 + $0x198] sm:$0xff] }
  0x18   :  { %6314 = vmatprep.subr.bf16.mxu0 %v6313_v4  ;;  %v393_v32 = vld [vmem:[%s13897_s2 + $0xa88] sm:$0xff]  ;;  %v6133_v36 = vpack.c.bf16 %v108_v31, %v105_v30  ;;  %v392_v39 = vld [vmem:[%s13897_s2 + $0xa80] sm:$0xff]  ;;  %v395_v41 = vld [vmem:[%s13897_s2 + $0xa98] sm:$0xff]  ;;  %v6135_v49 = vpack.c.bf16 %v107_v38, %v104_v37 }
  0x19   :  { %v6325_v40 = vpack.c.bf16 %v396_v33, %v393_v32  ;;  %v111_v42 = vld [vmem:[%s13897_s2 + $0x1b8] sm:$0xff]  ;;  %v114_v43 = vld [vmem:[%s13897_s2 + $0x1d0] sm:$0xff]  ;;  %v6327_v50 = vpack.c.bf16 %v395_v41, %v392_v39  ;;  %v113_v53 = vld [vmem:[%s13897_s2 + $0x1c8] sm:$0xff] }
  0x1a   :  { %6124 = vmatpush1.bf16.msra.mxu1 %v6123_v10  ;;  %v399_v44 = vld [vmem:[%s13897_s2 + $0xab8] sm:$0xff]  ;;  %v402_v45 = vld [vmem:[%s13897_s2 + $0xad0] sm:$0xff]  ;;  %v6137_v51 = vpack.c.bf16 %v114_v43, %v111_v42  ;;  %v401_v56 = vld [vmem:[%s13897_s2 + $0xac8] sm:$0xff] }
  0x1b   :  { %6316 = vmatpush1.bf16.msra.mxu0 %v6315_v11  ;;  %6126 = vmatprep.subr.bf16.mxu1 %v6125_v12  ;;  %v110_v52 = vld [vmem:[%s13897_s2 + $0x1b0] sm:$0xff]  ;;  %v6329_v55 = vpack.c.bf16 %v402_v45, %v399_v44  ;;  %v117_v57 = vld [vmem:[%s13897_s2 + $0x1e8] sm:$0xff]  ;;  %v120_v58 = vld [vmem:[%s13897_s2 + $0x200] sm:$0xff]  ;;  %v8342_v11 = vsub.s32 %v1820_v62, %v8315_v61 }
  0x1c   :  { %6318 = vmatprep.subr.bf16.mxu0 %v6317_v16  ;;  %v398_v54 = vld [vmem:[%s13897_s2 + $0xab0] sm:$0xff]  ;;  %v405_v59 = vld [vmem:[%s13897_s2 + $0xae8] sm:$0xff]  ;;  %v408_v60 = vld [vmem:[%s13897_s2 + $0xb00] sm:$0xff]  ;;  %v6139_v63 = vpack.c.bf16 %v113_v53, %v110_v52  ;;  %v6141_v1 = vpack.c.bf16 %v120_v58, %v117_v57 }
  0x1d   :  { %v6331_v0 = vpack.c.bf16 %v401_v56, %v398_v54  ;;  %v116_v2 = vld [vmem:[%s13897_s2 + $0x1e0] sm:$0xff]  ;;  %v119_v3 = vld [vmem:[%s13897_s2 + $0x1f8] sm:$0xff]  ;;  %v6333_v5 = vpack.c.bf16 %v408_v60, %v405_v59  ;;  %v126_v8 = vld [vmem:[%s13897_s2 + $0x230] sm:$0xff] }
  0x1e   :  { %6128 = vmatpush1.bf16.msra.mxu1 %v6127_v22  ;;  %v404_v4 = vld [vmem:[%s13897_s2 + $0xae0] sm:$0xff]  ;;  %v407_v6 = vld [vmem:[%s13897_s2 + $0xaf8] sm:$0xff]  ;;  %v414_v10 = vld [vmem:[%s13897_s2 + $0xb30] sm:$0xff]  ;;  %v6143_v12 = vpack.c.bf16 %v119_v3, %v116_v2 }
  0x1f   :  { %6320 = vmatpush1.bf16.msra.mxu0 %v6319_v23  ;;  %6130 = vmatprep.subr.bf16.mxu1 %v6129_v24  ;;  %v123_v7 = vld [vmem:[%s13897_s2 + $0x218] sm:$0xff]  ;;  %v122_v13 = vld [vmem:[%s13897_s2 + $0x210] sm:$0xff]  ;;  %v6335_v14 = vpack.c.bf16 %v407_v6, %v404_v4  ;;  %v125_v16 = vld [vmem:[%s13897_s2 + $0x228] sm:$0xff] }
  0x20   :  { %6322 = vmatprep.subr.bf16.mxu0 %v6321_v28  ;;  %v411_v9 = vld [vmem:[%s13897_s2 + $0xb18] sm:$0xff]  ;;  %v6145_v15 = vpack.c.bf16 %v126_v8, %v123_v7  ;;  %v410_v17 = vld [vmem:[%s13897_s2 + $0xb10] sm:$0xff]  ;;  %v413_v18 = vld [vmem:[%s13897_s2 + $0xb28] sm:$0xff]  ;;  %v6147_v27 = vpack.c.bf16 %v125_v16, %v122_v13 }
  0x21   :  { %v6337_v19 = vpack.c.bf16 %v414_v10, %v411_v9  ;;  %v129_v20 = vld [vmem:[%s13897_s2 + $0x248] sm:$0xff]  ;;  %v132_v21 = vld [vmem:[%s13897_s2 + $0x260] sm:$0xff]  ;;  %v6339_v29 = vpack.c.bf16 %v413_v18, %v410_v17  ;;  %v131_v32 = vld [vmem:[%s13897_s2 + $0x258] sm:$0xff] }
  0x22   :  { %6132 = vmatpush1.bf16.msra.mxu1 %v6131_v34  ;;  %v8365_v22 = vld [vmem:[%s13898_s0] sm:$0xff]  ;;  %v417_v23 = vld [vmem:[%s13897_s2 + $0xb48] sm:$0xff]  ;;  %v6149_v30 = vpack.c.bf16 %v132_v21, %v129_v20  ;;  %v135_v37 = vld [vmem:[%s13897_s2 + $0x278] sm:$0xff] }
  0x23   :  { %6324 = vmatpush1.bf16.msra.mxu0 %v6323_v35  ;;  %6134 = vmatprep.subr.bf16.mxu1 %v6133_v36  ;;  %v420_v24 = vld [vmem:[%s13897_s2 + $0xb60] sm:$0xff]  ;;  %v8375_v25 = vrot.slane %v8365_v22, %v8342_v11  ;;  %v8380_v26 = vld [vmem:[%s13898_s0 + $0x8] sm:$0xff]  ;;  %v419_v36 = vld [vmem:[%s13897_s2 + $0xb58] sm:$0xff]  ;;  %v1817_v13 = vcombine.high %v8365_v22, %v8365_v22 }
  0x24   :  { %6326 = vmatprep.subr.bf16.mxu0 %v6325_v40  ;;  %v1834_v28 = vcombine.high %v8380_v26, %v8380_v26  ;;  %v128_v31 = vld [vmem:[%s13897_s2 + $0x240] sm:$0xff]  ;;  %v6341_v35 = vpack.c.bf16 %v420_v24, %v417_v23  ;;  %v138_v38 = vld [vmem:[%s13897_s2 + $0x290] sm:$0xff]  ;;  %v423_v40 = vld [vmem:[%s13897_s2 + $0xb78] sm:$0xff] }
  0x25   :  { %v416_v33 = vld [vmem:[%s13897_s2 + $0xb40] sm:$0xff]  ;;  %v8395_v34 = vcombine.high %v8375_v25, %v8375_v25  ;;  %v426_v41 = vld [vmem:[%s13897_s2 + $0xb90] sm:$0xff]  ;;  %v6151_v42 = vpack.c.bf16 %v131_v32, %v128_v31  ;;  %v6153_v45 = vpack.c.bf16 %v138_v38, %v135_v37  ;;  %v137_v47 = vld [vmem:[%s13897_s2 + $0x288] sm:$0xff] }
  0x26   :  { %6136 = vmatpush1.bf16.msra.mxu1 %v6135_v49  ;;  %v8407_v39 = vrot.slane %v1834_v28, %v8342_v11  ;;  %v6343_v44 = vpack.c.bf16 %v419_v36, %v416_v33  ;;  %v134_v46 = vld [vmem:[%s13897_s2 + $0x270] sm:$0xff]  ;;  %v6345_v49 = vpack.c.bf16 %v426_v41, %v423_v40  ;;  %v144_v52 = vld [vmem:[%s13897_s2 + $0x2c0] sm:$0xff]  ;;  %v429_v53 = vld [vmem:[%s13897_s2 + $0xba8] sm:$0xff] }
  0x27   :  { %6328 = vmatpush1.bf16.msra.mxu0 %v6327_v50  ;;  %6138 = vmatprep.subr.bf16.mxu1 %v6137_v51  ;;  %v422_v48 = vld [vmem:[%s13897_s2 + $0xb70] sm:$0xff]  ;;  %v425_v50 = vld [vmem:[%s13897_s2 + $0xb88] sm:$0xff]  ;;  %v432_v54 = vld [vmem:[%s13897_s2 + $0xbc0] sm:$0xff] }
  0x28   :  { %6330 = vmatprep.subr.bf16.mxu0 %v6329_v55  ;;  %2080 = vmatprep.mubr.f32.mxu1 %v8395_v34  ;;  %v8418_v43 = vcombine.high %v8407_v39, %v8407_v39  ;;  %v141_v51 = vld [vmem:[%s13897_s2 + $0x2a8] sm:$0xff]  ;;  %v6155_v55 = vpack.c.bf16 %v137_v47, %v134_v46  ;;  %v6347_v56 = vpack.c.bf16 %v425_v50, %v422_v48  ;;  %v140_v58 = vld [vmem:[%s13897_s2 + $0x2a0] sm:$0xff]  ;;  %v143_v59 = vld [vmem:[%s13897_s2 + $0x2b8] sm:$0xff] }
  0x29   :  { %v6157_v57 = vpack.c.bf16 %v144_v52, %v141_v51  ;;  %v428_v60 = vld [vmem:[%s13897_s2 + $0xba0] sm:$0xff]  ;;  %v6349_v62 = vpack.c.bf16 %v432_v54, %v429_v53  ;;  %v435_v2 = vld [vmem:[%s13897_s2 + $0xbd8] sm:$0xff]  ;;  %v438_v3 = vld [vmem:[%s13897_s2 + $0xbf0] sm:$0xff]  ;;  %v6159_v4 = vpack.c.bf16 %v143_v59, %v140_v58 }
  0x2a   :  { %6140 = vmatpush1.bf16.msra.mxu1 %v6139_v63  ;;  %2293 = vmatprep.mubr.f32.mxu0 %v8418_v43  ;;  %v431_v63 = vld [vmem:[%s13897_s2 + $0xbb8] sm:$0xff]  ;;  %v146_v7 = vld [vmem:[%s13897_s2 + $0x2d0] sm:$0xff]  ;;  %v149_v8 = vld [vmem:[%s13897_s2 + $0x2e8] sm:$0xff]  ;;  %v6353_v10 = vpack.c.bf16 %v438_v3, %v435_v2 }
  0x2b   :  { %6332 = vmatpush1.bf16.msra.mxu0 %v6331_v0  ;;  %6142 = vmatprep.subr.bf16.mxu1 %v6141_v1  ;;  %v147_v0 = vld [vmem:[%s13897_s2 + $0x2d8] sm:$0xff]  ;;  %v150_v1 = vld [vmem:[%s13897_s2 + $0x2f0] sm:$0xff]  ;;  %v441_v16 = vld [vmem:[%s13897_s2 + $0xc08] sm:$0xff]  ;;  %v6163_v18 = vpack.c.bf16 %v149_v8, %v146_v7 }
  0x2c   :  { %6334 = vmatprep.subr.bf16.mxu0 %v6333_v5  ;;  %v6351_v5 = vpack.c.bf16 %v431_v63, %v428_v60  ;;  %v6161_v6 = vpack.c.bf16 %v150_v1, %v147_v0  ;;  %v434_v9 = vld [vmem:[%s13897_s2 + $0xbd0] sm:$0xff]  ;;  %v444_v17 = vld [vmem:[%s13897_s2 + $0xc20] sm:$0xff]  ;;  %v155_v22 = vld [vmem:[%s13897_s2 + $0x318] sm:$0xff] }
  0x2d   :  { %v152_v21 = vld [vmem:[%s13897_s2 + $0x300] sm:$0xff]  ;;  %v6357_v24 = vpack.c.bf16 %v444_v17, %v441_v16  ;;  %v159_v28 = vld [vmem:[%s13897_s2 + $0x338] sm:$0xff]  ;;  %v450_v32 = vld [vmem:[%s13897_s2 + $0xc50] sm:$0xff] }
  0x2e   :  { %6144 = vmatpush1.bf16.msra.mxu1 %v6143_v12  ;;  %v437_v12 = vld [vmem:[%s13897_s2 + $0xbe8] sm:$0xff]  ;;  %v440_v23 = vld [vmem:[%s13897_s2 + $0xc00] sm:$0xff]  ;;  %v447_v31 = vld [vmem:[%s13897_s2 + $0xc38] sm:$0xff]  ;;  %v6167_v33 = vpack.c.bf16 %v155_v22, %v152_v21 }
  0x2f   :  { %6336 = vmatpush1.bf16.msra.mxu0 %v6335_v14  ;;  %6146 = vmatprep.subr.bf16.mxu1 %v6145_v15  ;;  %v153_v14 = vld [vmem:[%s13897_s2 + $0x308] sm:$0xff]  ;;  %v156_v15 = vld [vmem:[%s13897_s2 + $0x320] sm:$0xff]  ;;  %v158_v37 = vld [vmem:[%s13897_s2 + $0x330] sm:$0xff]  ;;  %v6361_v41 = vpack.c.bf16 %v450_v32, %v447_v31 }
  0x30   :  { %6338 = vmatprep.subr.bf16.mxu0 %v6337_v19  ;;  %v6355_v19 = vpack.c.bf16 %v437_v12, %v434_v9  ;;  %v6165_v20 = vpack.c.bf16 %v156_v15, %v153_v14  ;;  %v161_v38 = vld [vmem:[%s13897_s2 + $0x348] sm:$0xff]  ;;  %v446_v40 = vld [vmem:[%s13897_s2 + $0xc30] sm:$0xff]  ;;  %v456_v48 = vld [vmem:[%s13897_s2 + $0xc80] sm:$0xff] }
  0x31   :  { %v453_v47 = vld [vmem:[%s13897_s2 + $0xc68] sm:$0xff]  ;;  %v164_v52 = vld [vmem:[%s13897_s2 + $0x360] sm:$0xff]  ;;  %v167_v53 = vld [vmem:[%s13897_s2 + $0x378] sm:$0xff] }
  0x32   :  { %6148 = vmatpush1.bf16.msra.mxu1 %v6147_v27  ;;  %v443_v27 = vld [vmem:[%s13897_s2 + $0xc18] sm:$0xff]  ;;  %v452_v54 = vld [vmem:[%s13897_s2 + $0xc60] sm:$0xff]  ;;  %v174_v58 = vld [vmem:[%s13897_s2 + $0x3b0] sm:$0xff] }
  0x33   :  { %6340 = vmatpush1.bf16.msra.mxu0 %v6339_v29  ;;  %6150 = vmatprep.subr.bf16.mxu1 %v6149_v30  ;;  %v162_v29 = vld [vmem:[%s13897_s2 + $0x350] sm:$0xff]  ;;  %v8514_v30 = vrot.slane %v1817_v13, %v8342_v11  ;;  %v459_v59 = vld [vmem:[%s13897_s2 + $0xc98] sm:$0xff]  ;;  %v173_v2 = vld [vmem:[%s13897_s2 + $0x3a8] sm:$0xff] }
  0x34   :  { %6342 = vmatprep.subr.bf16.mxu0 %v6341_v35  ;;  %v6359_v35 = vpack.c.bf16 %v443_v27, %v440_v23  ;;  %v6169_v36 = vpack.c.bf16 %v162_v29, %v159_v28  ;;  %v462_v60 = vld [vmem:[%s13897_s2 + $0xcb0] sm:$0xff]  ;;  %v180_v7 = vld [vmem:[%s13897_s2 + $0x3e0] sm:$0xff]  ;;  %v465_v8 = vld [vmem:[%s13897_s2 + $0xcc8] sm:$0xff] }
  0x35   :  { %v8542_v46 = vcombine.high %v8514_v30, %v8514_v30  ;;  %v170_v1 = vld [vmem:[%s13897_s2 + $0x390] sm:$0xff]  ;;  %v468_v9 = vld [vmem:[%s13897_s2 + $0xce0] sm:$0xff]  ;;  %v179_v15 = vld [vmem:[%s13897_s2 + $0x3d8] sm:$0xff] }
  0x36   :  { %6152 = vmatpush1.bf16.msra.mxu1 %v6151_v42  ;;  %v449_v42 = vld [vmem:[%s13897_s2 + $0xc48] sm:$0xff]  ;;  %v458_v3 = vld [vmem:[%s13897_s2 + $0xc90] sm:$0xff]  ;;  %v176_v14 = vld [vmem:[%s13897_s2 + $0x3c0] sm:$0xff]  ;;  %v6373_v17 = vpack.c.bf16 %v468_v9, %v465_v8 }
  0x37   :  { %6344 = vmatpush1.bf16.msra.mxu0 %v6343_v44  ;;  %6154 = vmatprep.subr.bf16.mxu1 %v6153_v45  ;;  %v165_v44 = vld [vmem:[%s13897_s2 + $0x368] sm:$0xff]  ;;  %v168_v45 = vld [vmem:[%s13897_s2 + $0x380] sm:$0xff]  ;;  %v6363_v50 = vpack.c.bf16 %v449_v42, %v446_v40  ;;  %v471_v21 = vld [vmem:[%s13897_s2 + $0xcf8] sm:$0xff]  ;;  %v6183_v23 = vpack.c.bf16 %v179_v15, %v176_v14 }
  0x38   :  { %6346 = vmatprep.subr.bf16.mxu0 %v6345_v49  ;;  %v6171_v49 = vpack.c.bf16 %v161_v38, %v158_v37  ;;  %v6173_v51 = vpack.c.bf16 %v168_v45, %v165_v44  ;;  %v464_v16 = vld [vmem:[%s13897_s2 + $0xcc0] sm:$0xff]  ;;  %v474_v22 = vld [vmem:[%s13897_s2 + $0xd10] sm:$0xff]  ;;  %v185_v29 = vld [vmem:[%s13897_s2 + $0x408] sm:$0xff] }
  0x39   :  { %v182_v28 = vld [vmem:[%s13897_s2 + $0x3f0] sm:$0xff]  ;;  %v6377_v32 = vpack.c.bf16 %v474_v22, %v471_v21  ;;  %v477_v37 = vld [vmem:[%s13897_s2 + $0xd28] sm:$0xff]  ;;  %v480_v38 = vld [vmem:[%s13897_s2 + $0xd40] sm:$0xff] }
  0x3a   :  { %6156 = vmatpush1.bf16.msra.mxu1 %v6155_v55  ;;  %v6365_v55 = vpack.c.bf16 %v456_v48, %v453_v47  ;;  %v470_v31 = vld [vmem:[%s13897_s2 + $0xcf0] sm:$0xff]  ;;  %v6187_v40 = vpack.c.bf16 %v185_v29, %v182_v28  ;;  %v191_v45 = vld [vmem:[%s13897_s2 + $0x438] sm:$0xff]  ;;  %v476_v47 = vld [vmem:[%s13897_s2 + $0xd20] sm:$0xff] }
  0x3b   :  { %6348 = vmatpush1.bf16.msra.mxu0 %v6347_v56  ;;  %6158 = vmatprep.subr.bf16.mxu1 %v6157_v57  ;;  %v455_v56 = vld [vmem:[%s13897_s2 + $0xc78] sm:$0xff]  ;;  %v200_v9 = vld [vmem:[%s13897_s2 + $0x480] sm:$0xff]  ;;  %v206_v22 = vld [vmem:[%s13897_s2 + $0x4b0] sm:$0xff] }
  0x3c   :  { %6350 = vmatprep.subr.bf16.mxu0 %v6349_v62  ;;  %v171_v57 = vld [vmem:[%s13897_s2 + $0x398] sm:$0xff]  ;;  %v6175_v62 = vpack.c.bf16 %v167_v53, %v164_v52  ;;  %v6367_v63 = vpack.c.bf16 %v455_v56, %v452_v54  ;;  %v8670_v52 = vld [vmem:[%s13898_s0 + $0x10] sm:$0xff]  ;;  %v497_v28 = vld [vmem:[%s13897_s2 + $0xdc8] sm:$0xff] }
  0x3d   :  { %v6177_v0 = vpack.c.bf16 %v174_v58, %v171_v57  ;;  %v479_v48 = vld [vmem:[%s13897_s2 + $0xd38] sm:$0xff]  ;;  %v486_v54 = vld [vmem:[%s13897_s2 + $0xd70] sm:$0xff]  ;;  %v213_v29 = vld [vmem:[%s13897_s2 + $0x4e8] sm:$0xff] }
  0x3e   :  { %6160 = vmatpush1.bf16.msra.mxu1 %v6159_v4  ;;  %v6369_v4 = vpack.c.bf16 %v462_v60, %v459_v59  ;;  %v483_v53 = vld [vmem:[%s13897_s2 + $0xd58] sm:$0xff]  ;;  %v6383_v57 = vpack.c.bf16 %v479_v48, %v476_v47  ;;  %v194_v59 = vld [vmem:[%s13897_s2 + $0x450] sm:$0xff]  ;;  %v197_v60 = vld [vmem:[%s13897_s2 + $0x468] sm:$0xff] }
  0x3f   :  { %6352 = vmatpush1.bf16.msra.mxu0 %v6351_v5  ;;  %6162 = vmatprep.subr.bf16.mxu1 %v6161_v6  ;;  %v461_v5 = vld [vmem:[%s13897_s2 + $0xca8] sm:$0xff]  ;;  %v491_v14 = vld [vmem:[%s13897_s2 + $0xd98] sm:$0xff]  ;;  %v222_v47 = vld [vmem:[%s13897_s2 + $0x530] sm:$0xff] }
  0x40   :  { %6354 = vmatprep.subr.bf16.mxu0 %v6353_v10  ;;  %v177_v6 = vld [vmem:[%s13897_s2 + $0x3c8] sm:$0xff]  ;;  %v6179_v10 = vpack.c.bf16 %v173_v2, %v170_v1  ;;  %v6371_v12 = vpack.c.bf16 %v461_v5, %v458_v3  ;;  %v204_v3 = vld [vmem:[%s13897_s2 + $0x4a0] sm:$0xff]  ;;  %v207_v15 = vld [vmem:[%s13897_s2 + $0x4b8] sm:$0xff] }
  0x41   :  { %v6181_v13 = vpack.c.bf16 %v180_v7, %v177_v6  ;;  %v485_v1 = vld [vmem:[%s13897_s2 + $0xd68] sm:$0xff]  ;;  %v492_v5 = vld [vmem:[%s13897_s2 + $0xda0] sm:$0xff]  ;;  %v6195_v6 = vpack.c.bf16 %v197_v60, %v194_v59  ;;  %v507_v48 = vld [vmem:[%s13897_s2 + $0xe18] sm:$0xff] }
  0x42   :  { %6164 = vmatpush1.bf16.msra.mxu1 %v6163_v18  ;;  %v467_v18 = vld [vmem:[%s13897_s2 + $0xcd8] sm:$0xff]  ;;  %v201_v2 = vld [vmem:[%s13897_s2 + $0x488] sm:$0xff] }
  0x43   :  { %6356 = vmatpush1.bf16.msra.mxu0 %v6355_v19  ;;  %6166 = vmatprep.subr.bf16.mxu1 %v6165_v20  ;;  %v183_v19 = vld [vmem:[%s13897_s2 + $0x3f8] sm:$0xff]  ;;  %v186_v20 = vld [vmem:[%s13897_s2 + $0x410] sm:$0xff]  ;;  %v6197_v8 = vpack.c.bf16 %v204_v3, %v201_v2  ;;  %v509_v59 = vld [vmem:[%s13897_s2 + $0xe28] sm:$0xff] }
  0x44   :  { %6358 = vmatprep.subr.bf16.mxu0 %v6357_v24  ;;  %v6375_v24 = vpack.c.bf16 %v467_v18, %v464_v16  ;;  %v6185_v27 = vpack.c.bf16 %v186_v20, %v183_v19  ;;  %v210_v16 = vld [vmem:[%s13897_s2 + $0x4d0] sm:$0xff]  ;;  %v225_v60 = vld [vmem:[%s13897_s2 + $0x548] sm:$0xff] }
  0x45   :  { %2081 = vmatmul.mubr.f32.vlgmr.msra.gmra.mrb[0].mxu1 %v8375_v25  ;;  %v498_v18 = vld [vmem:[%s13897_s2 + $0xdd0] sm:$0xff]  ;;  %v6201_v21 = vpack.c.bf16 %v210_v16, %v207_v15 }
  0x46   :  { %6168 = vmatpush1.bf16.msra.mxu1 %v6167_v33  ;;  %2294 = vmatmul.mubr.f32.vlgmr.msra.gmra.mrb[0].mxu0 %v8407_v39  ;;  %v473_v33 = vld [vmem:[%s13897_s2 + $0xd08] sm:$0xff] }
  0x47   :  { %6360 = vmatpush1.bf16.msra.mxu0 %v6359_v35  ;;  %6170 = vmatprep.subr.bf16.mxu1 %v6169_v36  ;;  %v189_v35 = vld [vmem:[%s13897_s2 + $0x428] sm:$0xff]  ;;  %v192_v36 = vld [vmem:[%s13897_s2 + $0x440] sm:$0xff]  ;;  %v6379_v42 = vpack.c.bf16 %v473_v33, %v470_v31 }
  0x48   :  { %6362 = vmatprep.subr.bf16.mxu0 %v6361_v41  ;;  %2151 = vmatprep.mubr.f32.mxu1 %v8542_v46  ;;  %v188_v41 = vld [vmem:[%s13897_s2 + $0x420] sm:$0xff]  ;;  %v6189_v44 = vpack.c.bf16 %v192_v36, %v189_v35 }
  0x49   :  { %v6191_v56 = vpack.c.bf16 %v191_v45, %v188_v41  ;;  %v216_v31 = vld [vmem:[%s13897_s2 + $0x500] sm:$0xff]  ;;  %v219_v45 = vld [vmem:[%s13897_s2 + $0x518] sm:$0xff] }
  0x4a   :  { %6172 = vmatpush1.bf16.msra.mxu1 %v6171_v49  ;;  %v6381_v49 = vpack.c.bf16 %v480_v38, %v477_v37  ;;  %v504_v33 = vld [vmem:[%s13897_s2 + $0xe00] sm:$0xff]  ;;  %v6205_v37 = vpack.c.bf16 %v216_v31, %v213_v29 }
  0x4b   :  { %6364 = vmatpush1.bf16.msra.mxu0 %v6363_v50  ;;  %6174 = vmatprep.subr.bf16.mxu1 %v6173_v51  ;;  %v195_v50 = vld [vmem:[%s13897_s2 + $0x458] sm:$0xff]  ;;  %v198_v51 = vld [vmem:[%s13897_s2 + $0x470] sm:$0xff]  ;;  %v212_v38 = vld [vmem:[%s13897_s2 + $0x4e0] sm:$0xff] }
  0x4c   :  { %6366 = vmatprep.subr.bf16.mxu0 %v6365_v55  ;;  %v8680_v55 = vrot.slane %v8670_v52, %v8342_v11  ;;  %v6193_v58 = vpack.c.bf16 %v198_v51, %v195_v50  ;;  %v500_v41 = vld [vmem:[%s13897_s2 + $0xde0] sm:$0xff] }
  0x4e   :  { %6176 = vmatpush1.bf16.msra.mxu1 %v6175_v62  ;;  %v482_v62 = vld [vmem:[%s13897_s2 + $0xd50] sm:$0xff] }
  0x4f   :  { %6368 = vmatpush1.bf16.msra.mxu0 %v6367_v63  ;;  %6178 = vmatprep.subr.bf16.mxu1 %v6177_v0  ;;  %v8693_v63 = vcombine.high %v8680_v55, %v8680_v55  ;;  %v6385_v0 = vpack.c.bf16 %v486_v54, %v483_v53  ;;  %v6387_v7 = vpack.c.bf16 %v485_v1, %v482_v62  ;;  %v218_v54 = vld [vmem:[%s13897_s2 + $0x510] sm:$0xff]  ;;  %v228_v62 = vld [vmem:[%s13897_s2 + $0x560] sm:$0xff] }
  0x50   :  { %6370 = vmatprep.subr.bf16.mxu0 %v6369_v4  ;;  %v489_v4 = vld [vmem:[%s13897_s2 + $0xd88] sm:$0xff]  ;;  %v6209_v53 = vpack.c.bf16 %v222_v47, %v219_v45  ;;  %v516_v1 = vld [vmem:[%s13897_s2 + $0xe60] sm:$0xff] }
  0x51   :  { %2364 = vmatprep.mubr.f32.mxu0 %v8693_v63 }
  0x52   :  { %6180 = vmatpush1.bf16.msra.mxu1 %v6179_v10  ;;  %v203_v10 = vld [vmem:[%s13897_s2 + $0x498] sm:$0xff] }
  0x53   :  { %6372 = vmatpush1.bf16.msra.mxu0 %v6371_v12  ;;  %6182 = vmatprep.subr.bf16.mxu1 %v6181_v13  ;;  %v488_v12 = vld [vmem:[%s13897_s2 + $0xd80] sm:$0xff]  ;;  %v6389_v13 = vpack.c.bf16 %v492_v5, %v489_v4  ;;  %v6199_v19 = vpack.c.bf16 %v203_v10, %v200_v9  ;;  %v6213_v4 = vpack.c.bf16 %v228_v62, %v225_v60  ;;  %v515_v9 = vld [vmem:[%s13897_s2 + $0xe58] sm:$0xff] }
  0x54   :  { %6374 = vmatprep.subr.bf16.mxu0 %v6373_v17  ;;  %v495_v17 = vld [vmem:[%s13897_s2 + $0xdb8] sm:$0xff]  ;;  %v6391_v20 = vpack.c.bf16 %v491_v14, %v488_v12  ;;  %v224_v5 = vld [vmem:[%s13897_s2 + $0x540] sm:$0xff]  ;;  %v234_v12 = vld [vmem:[%s13897_s2 + $0x590] sm:$0xff]  ;;  %v1851_v60 = vcombine.high %v8670_v52, %v8670_v52 }
  0x55   :  { %v231_v10 = vld [vmem:[%s13897_s2 + $0x578] sm:$0xff]  ;;  %v522_v14 = vld [vmem:[%s13897_s2 + $0xe90] sm:$0xff] }
  0x56   :  { %6184 = vmatpush1.bf16.msra.mxu1 %v6183_v23  ;;  %v209_v23 = vld [vmem:[%s13897_s2 + $0x4c8] sm:$0xff] }
  0x57   :  { %6376 = vmatpush1.bf16.msra.mxu0 %v6375_v24  ;;  %6186 = vmatprep.subr.bf16.mxu1 %v6185_v27  ;;  %v494_v24 = vld [vmem:[%s13897_s2 + $0xdb0] sm:$0xff]  ;;  %v6393_v27 = vpack.c.bf16 %v498_v18, %v495_v17  ;;  %v6203_v35 = vpack.c.bf16 %v209_v23, %v206_v22  ;;  %v6217_v17 = vpack.c.bf16 %v234_v12, %v231_v10  ;;  %v521_v22 = vld [vmem:[%s13897_s2 + $0xe88] sm:$0xff] }
  0x58   :  { %6378 = vmatprep.subr.bf16.mxu0 %v6377_v32  ;;  %v501_v32 = vld [vmem:[%s13897_s2 + $0xde8] sm:$0xff]  ;;  %v6395_v36 = vpack.c.bf16 %v497_v28, %v494_v24  ;;  %v230_v18 = vld [vmem:[%s13897_s2 + $0x570] sm:$0xff]  ;;  %v240_v24 = vld [vmem:[%s13897_s2 + $0x5c0] sm:$0xff]  ;;  %v8934_v12 = vrot.slane %v1851_v60, %v8342_v11 }
  0x59   :  { %v237_v23 = vld [vmem:[%s13897_s2 + $0x5a8] sm:$0xff]  ;;  %v528_v28 = vld [vmem:[%s13897_s2 + $0xec0] sm:$0xff]  ;;  %v546_v10 = vld [vmem:[%s13897_s2 + $0xf50] sm:$0xff] }
  0x5a   :  { %6188 = vmatpush1.bf16.msra.mxu1 %v6187_v40  ;;  %v215_v40 = vld [vmem:[%s13897_s2 + $0x4f8] sm:$0xff] }
  0x5b   :  { %6380 = vmatpush1.bf16.msra.mxu0 %v6379_v42  ;;  %6190 = vmatprep.subr.bf16.mxu1 %v6189_v44  ;;  %v6397_v42 = vpack.c.bf16 %v504_v33, %v501_v32  ;;  %v503_v44 = vld [vmem:[%s13897_s2 + $0xdf8] sm:$0xff]  ;;  %v6207_v50 = vpack.c.bf16 %v215_v40, %v212_v38  ;;  %v6221_v32 = vpack.c.bf16 %v240_v24, %v237_v23  ;;  %v236_v33 = vld [vmem:[%s13897_s2 + $0x5a0] sm:$0xff]  ;;  %v549_v23 = vld [vmem:[%s13897_s2 + $0xf68] sm:$0xff] }
  0x5c   :  { %6382 = vmatprep.subr.bf16.mxu0 %v6381_v49  ;;  %v510_v49 = vld [vmem:[%s13897_s2 + $0xe30] sm:$0xff]  ;;  %v6399_v51 = vpack.c.bf16 %v503_v44, %v500_v41  ;;  %v527_v38 = vld [vmem:[%s13897_s2 + $0xeb8] sm:$0xff]  ;;  %v552_v24 = vld [vmem:[%s13897_s2 + $0xf80] sm:$0xff] }
  0x5d   :  { %v243_v40 = vld [vmem:[%s13897_s2 + $0x5d8] sm:$0xff]  ;;  %v246_v41 = vld [vmem:[%s13897_s2 + $0x5f0] sm:$0xff] }
  0x5e   :  { %6192 = vmatpush1.bf16.msra.mxu1 %v6191_v56  ;;  %v221_v56 = vld [vmem:[%s13897_s2 + $0x528] sm:$0xff]  ;;  %v534_v44 = vld [vmem:[%s13897_s2 + $0xef0] sm:$0xff] }
  0x5f   :  { %6384 = vmatpush1.bf16.msra.mxu0 %v6383_v57  ;;  %6194 = vmatprep.subr.bf16.mxu1 %v6193_v58  ;;  %v506_v57 = vld [vmem:[%s13897_s2 + $0xe10] sm:$0xff]  ;;  %v6401_v58 = vpack.c.bf16 %v510_v49, %v507_v48  ;;  %v6211_v2 = vpack.c.bf16 %v221_v56, %v218_v54  ;;  %v6225_v48 = vpack.c.bf16 %v246_v41, %v243_v40  ;;  %v533_v54 = vld [vmem:[%s13897_s2 + $0xee8] sm:$0xff]  ;;  %v555_v41 = vld [vmem:[%s13897_s2 + $0xf98] sm:$0xff] }
  0x60   :  { %6386 = vmatprep.subr.bf16.mxu0 %v6385_v0  ;;  %v513_v0 = vld [vmem:[%s13897_s2 + $0xe48] sm:$0xff]  ;;  %v6403_v3 = vpack.c.bf16 %v509_v59, %v506_v57  ;;  %v242_v49 = vld [vmem:[%s13897_s2 + $0x5d0] sm:$0xff]  ;;  %v252_v57 = vld [vmem:[%s13897_s2 + $0x620] sm:$0xff] }
  0x61   :  { %v249_v56 = vld [vmem:[%s13897_s2 + $0x608] sm:$0xff]  ;;  %v540_v59 = vld [vmem:[%s13897_s2 + $0xf20] sm:$0xff]  ;;  %v270_v40 = vld [vmem:[%s13897_s2 + $0x6b0] sm:$0xff] }
  0x62   :  { %6196 = vmatpush1.bf16.msra.mxu1 %v6195_v6  ;;  %v227_v6 = vld [vmem:[%s13897_s2 + $0x558] sm:$0xff] }
  0x63   :  { %6388 = vmatpush1.bf16.msra.mxu0 %v6387_v7  ;;  %6198 = vmatprep.subr.bf16.mxu1 %v6197_v8  ;;  %v512_v7 = vld [vmem:[%s13897_s2 + $0xe40] sm:$0xff]  ;;  %v6405_v8 = vpack.c.bf16 %v516_v1, %v513_v0  ;;  %v6215_v15 = vpack.c.bf16 %v227_v6, %v224_v5  ;;  %v6229_v1 = vpack.c.bf16 %v252_v57, %v249_v56  ;;  %v539_v5 = vld [vmem:[%s13897_s2 + $0xf18] sm:$0xff]  ;;  %v561_v57 = vld [vmem:[%s13897_s2 + $0xfc8] sm:$0xff] }
  0x64   :  { %6390 = vmatprep.subr.bf16.mxu0 %v6389_v13  ;;  %v519_v13 = vld [vmem:[%s13897_s2 + $0xe78] sm:$0xff]  ;;  %v6407_v16 = vpack.c.bf16 %v515_v9, %v512_v7  ;;  %v258_v7 = vld [vmem:[%s13897_s2 + $0x650] sm:$0xff]  ;;  %v276_v56 = vld [vmem:[%s13897_s2 + $0x6e0] sm:$0xff] }
  0x65   :  { %v255_v6 = vld [vmem:[%s13897_s2 + $0x638] sm:$0xff] }
  0x66   :  { %6200 = vmatpush1.bf16.msra.mxu1 %v6199_v19  ;;  %v233_v19 = vld [vmem:[%s13897_s2 + $0x588] sm:$0xff]  ;;  %v543_v9 = vld [vmem:[%s13897_s2 + $0xf38] sm:$0xff] }
  0x67   :  { %6392 = vmatpush1.bf16.msra.mxu0 %v6391_v20  ;;  %6202 = vmatprep.subr.bf16.mxu1 %v6201_v21  ;;  %v518_v20 = vld [vmem:[%s13897_s2 + $0xe70] sm:$0xff]  ;;  %v6409_v21 = vpack.c.bf16 %v522_v14, %v519_v13  ;;  %v6219_v29 = vpack.c.bf16 %v233_v19, %v230_v18  ;;  %v6425_v18 = vpack.c.bf16 %v546_v10, %v543_v9  ;;  %v545_v19 = vld [vmem:[%s13897_s2 + $0xf48] sm:$0xff] }
  0x68   :  { %6394 = vmatprep.subr.bf16.mxu0 %v6393_v27  ;;  %v525_v27 = vld [vmem:[%s13897_s2 + $0xea8] sm:$0xff]  ;;  %v6411_v31 = vpack.c.bf16 %v521_v22, %v518_v20 }
  0x69   :  { %v261_v20 = vld [vmem:[%s13897_s2 + $0x668] sm:$0xff] }
  0x6a   :  { %6204 = vmatpush1.bf16.msra.mxu1 %v6203_v35  ;;  %v239_v35 = vld [vmem:[%s13897_s2 + $0x5b8] sm:$0xff] }
  0x6b   :  { %6396 = vmatpush1.bf16.msra.mxu0 %v6395_v36  ;;  %6206 = vmatprep.subr.bf16.mxu1 %v6205_v37  ;;  %v524_v36 = vld [vmem:[%s13897_s2 + $0xea0] sm:$0xff]  ;;  %v6413_v37 = vpack.c.bf16 %v528_v28, %v525_v27  ;;  %v6223_v45 = vpack.c.bf16 %v239_v35, %v236_v33  ;;  %v8967_v27 = vcombine.high %v8934_v12, %v8934_v12  ;;  %v263_v33 = vld [vmem:[%s13897_s2 + $0x678] sm:$0xff] }
  0x6c   :  { %6398 = vmatprep.subr.bf16.mxu0 %v6397_v42  ;;  %v531_v42 = vld [vmem:[%s13897_s2 + $0xed8] sm:$0xff]  ;;  %v6415_v47 = vpack.c.bf16 %v527_v38, %v524_v36  ;;  %v548_v35 = vld [vmem:[%s13897_s2 + $0xf60] sm:$0xff]  ;;  %v6429_v36 = vpack.c.bf16 %v552_v24, %v549_v23 }
  0x6d   :  { %v267_v38 = vld [vmem:[%s13897_s2 + $0x698] sm:$0xff] }
  0x6e   :  { %6208 = vmatpush1.bf16.msra.mxu1 %v6207_v50  ;;  %v245_v50 = vld [vmem:[%s13897_s2 + $0x5e8] sm:$0xff] }
  0x6f   :  { %6400 = vmatpush1.bf16.msra.mxu0 %v6399_v51  ;;  %6210 = vmatprep.subr.bf16.mxu1 %v6209_v53  ;;  %v530_v51 = vld [vmem:[%s13897_s2 + $0xed0] sm:$0xff]  ;;  %v6417_v53 = vpack.c.bf16 %v534_v44, %v531_v42  ;;  %v6227_v62 = vpack.c.bf16 %v245_v50, %v242_v49  ;;  %v269_v49 = vld [vmem:[%s13897_s2 + $0x6a8] sm:$0xff] }
  0x70   :  { %6402 = vmatprep.subr.bf16.mxu0 %v6401_v58  ;;  %v537_v58 = vld [vmem:[%s13897_s2 + $0xf08] sm:$0xff]  ;;  %v6419_v0 = vpack.c.bf16 %v533_v54, %v530_v51  ;;  %v558_v42 = vld [vmem:[%s13897_s2 + $0xfb0] sm:$0xff] }
  0x71   :  { %v6421_v52 = vpack.c.bf16 %v540_v59, %v537_v58  ;;  %v554_v50 = vld [vmem:[%s13897_s2 + $0xf90] sm:$0xff]  ;;  %v6433_v51 = vpack.c.bf16 %v558_v42, %v555_v41  ;;  %v273_v54 = vld [vmem:[%s13897_s2 + $0x6c8] sm:$0xff]  ;;  %v564_v58 = vld [vmem:[%s13897_s2 + $0xfe0] sm:$0xff] }
  0x72   :  { %6212 = vmatpush1.bf16.msra.mxu1 %v6211_v2  ;;  %v248_v2 = vld [vmem:[%s13897_s2 + $0x600] sm:$0xff] }
  0x73   :  { %6404 = vmatpush1.bf16.msra.mxu0 %v6403_v3  ;;  %6214 = vmatprep.subr.bf16.mxu1 %v6213_v4  ;;  %v251_v3 = vld [vmem:[%s13897_s2 + $0x618] sm:$0xff]  ;;  %v536_v4 = vld [vmem:[%s13897_s2 + $0xf00] sm:$0xff] }
  0x74   :  { %6406 = vmatprep.subr.bf16.mxu0 %v6405_v8  ;;  %v8925_v8 = vrot.slane %v8380_v26, %v8342_v11  ;;  %v6231_v13 = vpack.c.bf16 %v251_v3, %v248_v2  ;;  %v6423_v14 = vpack.c.bf16 %v539_v5, %v536_v4  ;;  %v254_v26 = vld [vmem:[%s13897_s2 + $0x630] sm:$0xff]  ;;  %v560_v2 = vld [vmem:[%s13897_s2 + $0xfc0] sm:$0xff]  ;;  %v6437_v3 = vpack.c.bf16 %v564_v58, %v561_v57  ;;  %v563_v4 = vld [vmem:[%s13897_s2 + $0xfd8] sm:$0xff] }
  0x75   :  { %v282_v5 = vld [vmem:[%s13897_s2 + $0x710] sm:$0xff]  ;;  %v6439_v10 = vpack.c.bf16 %v563_v4, %v560_v2  ;;  %v587_v2 = vld [vmem:[%s13897_s2 + $0x1098] sm:$0xff] }
  0x76   :  { %6216 = vmatpush1.bf16.msra.mxu1 %v6215_v15  ;;  %v6233_v15 = vpack.c.bf16 %v258_v7, %v255_v6  ;;  %v8956_v22 = vcombine.high %v8925_v8, %v8925_v8  ;;  %v567_v6 = vld [vmem:[%s13897_s2 + $0xff8] sm:$0xff]  ;;  %v570_v7 = vld [vmem:[%s13897_s2 + $0x1010] sm:$0xff] }
  0x77   :  { %6408 = vmatpush1.bf16.msra.mxu0 %v6407_v16  ;;  %6218 = vmatprep.subr.bf16.mxu1 %v6217_v17  ;;  %v257_v16 = vld [vmem:[%s13897_s2 + $0x648] sm:$0xff]  ;;  %v542_v17 = vld [vmem:[%s13897_s2 + $0xf30] sm:$0xff] }
  0x78   :  { %6410 = vmatprep.subr.bf16.mxu0 %v6409_v21  ;;  %v264_v21 = vld [vmem:[%s13897_s2 + $0x680] sm:$0xff]  ;;  %v6235_v28 = vpack.c.bf16 %v257_v16, %v254_v26  ;;  %v566_v26 = vld [vmem:[%s13897_s2 + $0xff0] sm:$0xff]  ;;  %v6441_v16 = vpack.c.bf16 %v570_v7, %v567_v6 }
  0x79   :  { %v306_v4 = vld [vmem:[%s13897_s2 + $0x7d0] sm:$0xff] }
  0x7a   :  { %6220 = vmatpush1.bf16.msra.mxu1 %v6219_v29  ;;  %v6427_v29 = vpack.c.bf16 %v545_v19, %v542_v17  ;;  %v569_v17 = vld [vmem:[%s13897_s2 + $0x1008] sm:$0xff]  ;;  %v288_v19 = vld [vmem:[%s13897_s2 + $0x740] sm:$0xff] }
  0x7b   :  { %6412 = vmatpush1.bf16.msra.mxu0 %v6411_v31  ;;  %6222 = vmatprep.subr.bf16.mxu1 %v6221_v32  ;;  %v6237_v31 = vpack.c.bf16 %v264_v21, %v261_v20  ;;  %v260_v32 = vld [vmem:[%s13897_s2 + $0x660] sm:$0xff]  ;;  %v573_v20 = vld [vmem:[%s13897_s2 + $0x1028] sm:$0xff]  ;;  %v6443_v24 = vpack.c.bf16 %v569_v17, %v566_v26 }
  0x7c   :  { %6414 = vmatprep.subr.bf16.mxu0 %v6413_v37  ;;  %v551_v37 = vld [vmem:[%s13897_s2 + $0xf78] sm:$0xff]  ;;  %v6239_v44 = vpack.c.bf16 %v263_v33, %v260_v32  ;;  %v576_v21 = vld [vmem:[%s13897_s2 + $0x1040] sm:$0xff]  ;;  %v593_v26 = vld [vmem:[%s13897_s2 + $0x10c8] sm:$0xff] }
  0x7d   :  { %v572_v32 = vld [vmem:[%s13897_s2 + $0x1020] sm:$0xff]  ;;  %v6445_v33 = vpack.c.bf16 %v576_v21, %v573_v20 }
  0x7e   :  { %6224 = vmatpush1.bf16.msra.mxu1 %v6223_v45  ;;  %v6431_v45 = vpack.c.bf16 %v551_v37, %v548_v35  ;;  %v575_v35 = vld [vmem:[%s13897_s2 + $0x1038] sm:$0xff]  ;;  %v294_v37 = vld [vmem:[%s13897_s2 + $0x770] sm:$0xff]  ;;  %v312_v17 = vld [vmem:[%s13897_s2 + $0x800] sm:$0xff] }
  0x7f   :  { %6416 = vmatpush1.bf16.msra.mxu0 %v6415_v47  ;;  %6226 = vmatprep.subr.bf16.mxu1 %v6225_v48  ;;  %v6241_v47 = vpack.c.bf16 %v270_v40, %v267_v38  ;;  %v266_v48 = vld [vmem:[%s13897_s2 + $0x690] sm:$0xff]  ;;  %v579_v38 = vld [vmem:[%s13897_s2 + $0x1058] sm:$0xff]  ;;  %v6447_v42 = vpack.c.bf16 %v575_v35, %v572_v32 }
  0x80   :  { %6418 = vmatprep.subr.bf16.mxu0 %v6417_v53  ;;  %v557_v53 = vld [vmem:[%s13897_s2 + $0xfa8] sm:$0xff]  ;;  %v6243_v59 = vpack.c.bf16 %v269_v49, %v266_v48  ;;  %v582_v40 = vld [vmem:[%s13897_s2 + $0x1070] sm:$0xff]  ;;  %v599_v32 = vld [vmem:[%s13897_s2 + $0x10f8] sm:$0xff] }
  0x81   :  { %v6435_v60 = vpack.c.bf16 %v557_v53, %v554_v50  ;;  %v578_v48 = vld [vmem:[%s13897_s2 + $0x1050] sm:$0xff]  ;;  %v6449_v49 = vpack.c.bf16 %v582_v40, %v579_v38  ;;  %v581_v50 = vld [vmem:[%s13897_s2 + $0x1068] sm:$0xff]  ;;  %v300_v53 = vld [vmem:[%s13897_s2 + $0x7a0] sm:$0xff] }
  0x82   :  { %6228 = vmatpush1.bf16.msra.mxu1 %v6227_v62  ;;  %v6245_v62 = vpack.c.bf16 %v276_v56, %v273_v54  ;;  %v585_v54 = vld [vmem:[%s13897_s2 + $0x1088] sm:$0xff]  ;;  %v588_v56 = vld [vmem:[%s13897_s2 + $0x10a0] sm:$0xff]  ;;  %v6451_v58 = vpack.c.bf16 %v581_v50, %v578_v48  ;;  %v318_v35 = vld [vmem:[%s13897_s2 + $0x830] sm:$0xff] }
  0x83   :  { %6420 = vmatpush1.bf16.msra.mxu0 %v6419_v0  ;;  %6230 = vmatprep.subr.bf16.mxu1 %v6229_v1  ;;  %v272_v0 = vld [vmem:[%s13897_s2 + $0x6c0] sm:$0xff]  ;;  %v275_v1 = vld [vmem:[%s13897_s2 + $0x6d8] sm:$0xff]  ;;  %v605_v48 = vld [vmem:[%s13897_s2 + $0x1128] sm:$0xff] }
  0x84   :  { %6422 = vmatprep.subr.bf16.mxu0 %v6421_v52  ;;  %v279_v52 = vld [vmem:[%s13897_s2 + $0x6f8] sm:$0xff]  ;;  %v6247_v9 = vpack.c.bf16 %v275_v1, %v272_v0  ;;  %v584_v0 = vld [vmem:[%s13897_s2 + $0x1080] sm:$0xff]  ;;  %v6453_v1 = vpack.c.bf16 %v588_v56, %v585_v54 }
  0x85   :  { %2152 = vmatmul.mubr.f32.vlgmr.msra.gmra.mrb[0].mxu1 %v8514_v30  ;;  %v6455_v7 = vpack.c.bf16 %v587_v2, %v584_v0  ;;  %v324_v50 = vld [vmem:[%s13897_s2 + $0x860] sm:$0xff]  ;;  %v611_v0 = vld [vmem:[%s13897_s2 + $0x1158] sm:$0xff]  ;;  %v330_v2 = vld [vmem:[%s13897_s2 + $0x890] sm:$0xff] }
  0x86   :  { %6232 = vmatpush1.bf16.msra.mxu1 %v6231_v13  ;;  %2365 = vmatmul.mubr.f32.vlgmr.msra.gmra.mrb[0].mxu0 %v8680_v55  ;;  %v6249_v13 = vpack.c.bf16 %v282_v5, %v279_v52  ;;  %v591_v52 = vld [vmem:[%s13897_s2 + $0x10b8] sm:$0xff]  ;;  %v594_v5 = vld [vmem:[%s13897_s2 + $0x10d0] sm:$0xff] }
  0x87   :  { %6424 = vmatpush1.bf16.msra.mxu0 %v6423_v14  ;;  %6234 = vmatprep.subr.bf16.mxu1 %v6233_v15  ;;  %v278_v14 = vld [vmem:[%s13897_s2 + $0x6f0] sm:$0xff]  ;;  %v281_v15 = vld [vmem:[%s13897_s2 + $0x708] sm:$0xff] }
  0x88   :  { %6426 = vmatprep.subr.bf16.mxu0 %v6425_v18  ;;  %2222 = vmatprep.mubr.f32.mxu1 %v8956_v22  ;;  %v285_v18 = vld [vmem:[%s13897_s2 + $0x728] sm:$0xff]  ;;  %v6251_v23 = vpack.c.bf16 %v281_v15, %v278_v14  ;;  %v590_v14 = vld [vmem:[%s13897_s2 + $0x10b0] sm:$0xff]  ;;  %v6457_v15 = vpack.c.bf16 %v594_v5, %v591_v52 }
  0x89   :  { %2435 = vmatprep.mubr.f32.mxu0 %v8967_v27  ;;  %v6459_v21 = vpack.c.bf16 %v593_v26, %v590_v14  ;;  %v617_v14 = vld [vmem:[%s13897_s2 + $0x1188] sm:$0xff]  ;;  %v336_v26 = vld [vmem:[%s13897_s2 + $0x8c0] sm:$0xff] }
  0x8a   :  { %6236 = vmatpush1.bf16.msra.mxu1 %v6235_v28  ;;  %v6253_v28 = vpack.c.bf16 %v288_v19, %v285_v18  ;;  %v597_v18 = vld [vmem:[%s13897_s2 + $0x10e8] sm:$0xff]  ;;  %v600_v19 = vld [vmem:[%s13897_s2 + $0x1100] sm:$0xff] }
  0x8b   :  { %6428 = vmatpush1.bf16.msra.mxu0 %v6427_v29  ;;  %6238 = vmatprep.subr.bf16.mxu1 %v6237_v31  ;;  %v284_v29 = vld [vmem:[%s13897_s2 + $0x720] sm:$0xff]  ;;  %v287_v31 = vld [vmem:[%s13897_s2 + $0x738] sm:$0xff] }
  0x8c   :  { %6430 = vmatprep.subr.bf16.mxu0 %v6429_v36  ;;  %v291_v36 = vld [vmem:[%s13897_s2 + $0x758] sm:$0xff]  ;;  %v6255_v41 = vpack.c.bf16 %v287_v31, %v284_v29  ;;  %v596_v29 = vld [vmem:[%s13897_s2 + $0x10e0] sm:$0xff]  ;;  %v6461_v31 = vpack.c.bf16 %v600_v19, %v597_v18 }
  0x8d   :  { %v6463_v40 = vpack.c.bf16 %v599_v32, %v596_v29  ;;  %v623_v29 = vld [vmem:[%s13897_s2 + $0x11b8] sm:$0xff]  ;;  %v342_v32 = vld [vmem:[%s13897_s2 + $0x8f0] sm:$0xff] }
  0x8e   :  { %6240 = vmatpush1.bf16.msra.mxu1 %v6239_v44  ;;  %v6257_v44 = vpack.c.bf16 %v294_v37, %v291_v36  ;;  %v603_v36 = vld [vmem:[%s13897_s2 + $0x1118] sm:$0xff]  ;;  %v606_v37 = vld [vmem:[%s13897_s2 + $0x1130] sm:$0xff] }
  0x8f   :  { %6432 = vmatpush1.bf16.msra.mxu0 %v6431_v45  ;;  %6242 = vmatprep.subr.bf16.mxu1 %v6241_v47  ;;  %v290_v45 = vld [vmem:[%s13897_s2 + $0x750] sm:$0xff]  ;;  %v293_v47 = vld [vmem:[%s13897_s2 + $0x768] sm:$0xff] }
  0x90   :  { %6434 = vmatprep.subr.bf16.mxu0 %v6433_v51  ;;  %v297_v51 = vld [vmem:[%s13897_s2 + $0x788] sm:$0xff]  ;;  %v6259_v57 = vpack.c.bf16 %v293_v47, %v290_v45  ;;  %v602_v45 = vld [vmem:[%s13897_s2 + $0x1110] sm:$0xff]  ;;  %v6465_v47 = vpack.c.bf16 %v606_v37, %v603_v36 }
  0x91   :  { %v6467_v56 = vpack.c.bf16 %v605_v48, %v602_v45  ;;  %v629_v45 = vld [vmem:[%s13897_s2 + $0x11e8] sm:$0xff]  ;;  %v1788_v48 = vld [vmem:[%s13897_s2 + $0x3620] sm:$0xff] }
  0x92   :  { %6244 = vmatpush1.bf16.msra.mxu1 %v6243_v59  ;;  %v6261_v59 = vpack.c.bf16 %v300_v53, %v297_v51  ;;  %v609_v51 = vld [vmem:[%s13897_s2 + $0x1148] sm:$0xff]  ;;  %v612_v53 = vld [vmem:[%s13897_s2 + $0x1160] sm:$0xff] }
  0x93   :  { %6436 = vmatpush1.bf16.msra.mxu0 %v6435_v60  ;;  %6246 = vmatprep.subr.bf16.mxu1 %v6245_v62  ;;  %v296_v60 = vld [vmem:[%s13897_s2 + $0x780] sm:$0xff]  ;;  %v299_v62 = vld [vmem:[%s13897_s2 + $0x798] sm:$0xff] }
  0x94   :  { %6438 = vmatprep.subr.bf16.mxu0 %v6437_v3  ;;  %v303_v3 = vld [vmem:[%s13897_s2 + $0x7b8] sm:$0xff]  ;;  %v6263_v6 = vpack.c.bf16 %v299_v62, %v296_v60  ;;  %v608_v60 = vld [vmem:[%s13897_s2 + $0x1140] sm:$0xff]  ;;  %v6469_v62 = vpack.c.bf16 %v612_v53, %v609_v51 }
  0x95   :  { %v6471_v5 = vpack.c.bf16 %v611_v0, %v608_v60  ;;  %v9311_v53 = vld [vmem:[%s13898_s0 + $0x18] sm:$0xff]  ;;  %v632_v60 = vld [vmem:[%s13897_s2 + $0x1200] sm:$0xff] }
  0x96   :  { %6248 = vmatpush1.bf16.msra.mxu1 %v6247_v9  ;;  %v6265_v9 = vpack.c.bf16 %v306_v4, %v303_v3  ;;  %v615_v3 = vld [vmem:[%s13897_s2 + $0x1178] sm:$0xff]  ;;  %v618_v4 = vld [vmem:[%s13897_s2 + $0x1190] sm:$0xff] }
  0x97   :  { %6440 = vmatpush1.bf16.msra.mxu0 %v6439_v10  ;;  %6250 = vmatprep.subr.bf16.mxu1 %v6249_v13  ;;  %v302_v10 = vld [vmem:[%s13897_s2 + $0x7b0] sm:$0xff]  ;;  %v305_v13 = vld [vmem:[%s13897_s2 + $0x7c8] sm:$0xff]  ;;  %v639_v0 = vld [vmem:[%s13897_s2 + $0x1238] sm:$0xff] }
  0x98   :  { %6442 = vmatprep.subr.bf16.mxu0 %v6441_v16  ;;  %v309_v16 = vld [vmem:[%s13897_s2 + $0x7e8] sm:$0xff]  ;;  %v6267_v20 = vpack.c.bf16 %v305_v13, %v302_v10  ;;  %v614_v10 = vld [vmem:[%s13897_s2 + $0x1170] sm:$0xff]  ;;  %v6473_v13 = vpack.c.bf16 %v618_v4, %v615_v3  ;;  %v9339_v4 = vrot.slane %v9311_v53, %v8342_v11 }
  0x99   :  { %v6475_v19 = vpack.c.bf16 %v617_v14, %v614_v10  ;;  %v109_v3 = vld [vmem:[%s13897_s2 + $0x1a8] sm:$0xff] }
  0x9a   :  { %6252 = vmatpush1.bf16.msra.mxu1 %v6251_v23  ;;  %v6269_v23 = vpack.c.bf16 %v312_v17, %v309_v16  ;;  %v621_v16 = vld [vmem:[%s13897_s2 + $0x11a8] sm:$0xff]  ;;  %v624_v17 = vld [vmem:[%s13897_s2 + $0x11c0] sm:$0xff] }
  0x9b   :  { %6444 = vmatpush1.bf16.msra.mxu0 %v6443_v24  ;;  %6254 = vmatprep.subr.bf16.mxu1 %v6253_v28  ;;  %v308_v24 = vld [vmem:[%s13897_s2 + $0x7e0] sm:$0xff]  ;;  %v311_v28 = vld [vmem:[%s13897_s2 + $0x7f8] sm:$0xff]  ;;  %v641_v14 = vld [vmem:[%s13897_s2 + $0x1248] sm:$0xff] }
  0x9c   :  { %6446 = vmatprep.subr.bf16.mxu0 %v6445_v33  ;;  %v315_v33 = vld [vmem:[%s13897_s2 + $0x818] sm:$0xff]  ;;  %v6271_v38 = vpack.c.bf16 %v311_v28, %v308_v24  ;;  %v620_v24 = vld [vmem:[%s13897_s2 + $0x11a0] sm:$0xff]  ;;  %v6477_v28 = vpack.c.bf16 %v624_v17, %v621_v16  ;;  %v645_v16 = vld [vmem:[%s13897_s2 + $0x1268] sm:$0xff] }
  0x9d   :  { %v6479_v37 = vpack.c.bf16 %v623_v29, %v620_v24  ;;  %v648_v17 = vld [vmem:[%s13897_s2 + $0x1280] sm:$0xff] }
  0x9e   :  { %6256 = vmatpush1.bf16.msra.mxu1 %v6255_v41  ;;  %v6273_v41 = vpack.c.bf16 %v318_v35, %v315_v33  ;;  %v627_v33 = vld [vmem:[%s13897_s2 + $0x11d8] sm:$0xff]  ;;  %v630_v35 = vld [vmem:[%s13897_s2 + $0x11f0] sm:$0xff]  ;;  %v64_v29 = vld [vmem:[%s13897_s2 + $0x40] sm:$0xff] }
  0x9f   :  { %6448 = vmatpush1.bf16.msra.mxu0 %v6447_v42  ;;  %6258 = vmatprep.subr.bf16.mxu1 %v6257_v44  ;;  %v314_v42 = vld [vmem:[%s13897_s2 + $0x810] sm:$0xff]  ;;  %v317_v44 = vld [vmem:[%s13897_s2 + $0x828] sm:$0xff] }
  0xa0   :  { %6450 = vmatprep.subr.bf16.mxu0 %v6449_v49  ;;  %v321_v49 = vld [vmem:[%s13897_s2 + $0x848] sm:$0xff]  ;;  %v6275_v54 = vpack.c.bf16 %v317_v44, %v314_v42  ;;  %v626_v42 = vld [vmem:[%s13897_s2 + $0x11d0] sm:$0xff]  ;;  %v6481_v44 = vpack.c.bf16 %v630_v35, %v627_v33  ;;  %v647_v33 = vld [vmem:[%s13897_s2 + $0x1278] sm:$0xff] }
  0xa1   :  { %v118_v35 = vld [vmem:[%s13897_s2 + $0x1f0] sm:$0xff] }
  0xa2   :  { %6260 = vmatpush1.bf16.msra.mxu1 %v6259_v57  ;;  %v6277_v57 = vpack.c.bf16 %v324_v50, %v321_v49  ;;  %v633_v49 = vld [vmem:[%s13897_s2 + $0x1208] sm:$0xff]  ;;  %v636_v50 = vld [vmem:[%s13897_s2 + $0x1220] sm:$0xff] }
  0xa3   :  { %6452 = vmatpush1.bf16.msra.mxu0 %v6451_v58  ;;  %6262 = vmatprep.subr.bf16.mxu1 %v6261_v59  ;;  %v320_v58 = vld [vmem:[%s13897_s2 + $0x840] sm:$0xff]  ;;  %v323_v59 = vld [vmem:[%s13897_s2 + $0x858] sm:$0xff] }
  0xa4   :  { %6454 = vmatprep.subr.bf16.mxu0 %v6453_v1  ;;  %v327_v1 = vld [vmem:[%s13897_s2 + $0x878] sm:$0xff]  ;;  %v6279_v52 = vpack.c.bf16 %v323_v59, %v320_v58  ;;  %v6485_v59 = vpack.c.bf16 %v636_v50, %v633_v49  ;;  %v124_v49 = vld [vmem:[%s13897_s2 + $0x220] sm:$0xff] }
  0xa5   :  { %v1787_v58 = vld [vmem:[%s13897_s2 + $0x3618] sm:$0xff] }
  0xa6   :  { %6264 = vmatpush1.bf16.msra.mxu1 %v6263_v6  ;;  %v6281_v6 = vpack.c.bf16 %v330_v2, %v327_v1  ;;  %v642_v1 = vld [vmem:[%s13897_s2 + $0x1250] sm:$0xff]  ;;  %v127_v50 = vld [vmem:[%s13897_s2 + $0x238] sm:$0xff] }
  0xa7   :  { %6456 = vmatpush1.bf16.msra.mxu0 %v6455_v7  ;;  %6266 = vmatprep.subr.bf16.mxu1 %v6265_v9  ;;  %v326_v7 = vld [vmem:[%s13897_s2 + $0x870] sm:$0xff]  ;;  %v329_v9 = vld [vmem:[%s13897_s2 + $0x888] sm:$0xff]  ;;  %v6489_v10 = vpack.c.bf16 %v642_v1, %v639_v0  ;;  %v659_v1 = vld [vmem:[%s13897_s2 + $0x12d8] sm:$0xff] }
  0xa8   :  { %6458 = vmatprep.subr.bf16.mxu0 %v6457_v15  ;;  %v333_v15 = vld [vmem:[%s13897_s2 + $0x8a8] sm:$0xff]  ;;  %v6283_v18 = vpack.c.bf16 %v329_v9, %v326_v7  ;;  %v106_v2 = vld [vmem:[%s13897_s2 + $0x190] sm:$0xff] }
  0xa9   :  { %v58_v7 = vld [vmem:[%s13897_s2 + $0x10] sm:$0xff]  ;;  %v61_v9 = vld [vmem:[%s13897_s2 + $0x28] sm:$0xff] }
  0xaa   :  { %6268 = vmatpush1.bf16.msra.mxu1 %v6267_v20  ;;  %v6285_v20 = vpack.c.bf16 %v336_v26, %v333_v15  ;;  %v112_v15 = vld [vmem:[%s13897_s2 + $0x1c0] sm:$0xff]  ;;  %v115_v26 = vld [vmem:[%s13897_s2 + $0x1d8] sm:$0xff] }
  0xab   :  { %6460 = vmatpush1.bf16.msra.mxu0 %v6459_v21  ;;  %6270 = vmatprep.subr.bf16.mxu1 %v6269_v23  ;;  %v332_v21 = vld [vmem:[%s13897_s2 + $0x8a0] sm:$0xff]  ;;  %v335_v23 = vld [vmem:[%s13897_s2 + $0x8b8] sm:$0xff]  ;;  %v7261_v24 = vpack.c.bf16 %v115_v26, %v112_v15  ;;  %v665_v26 = vld [vmem:[%s13897_s2 + $0x1308] sm:$0xff] }
  0xac   :  { %6462 = vmatprep.subr.bf16.mxu0 %v6461_v31  ;;  %v339_v31 = vld [vmem:[%s13897_s2 + $0x8d8] sm:$0xff]  ;;  %v6287_v36 = vpack.c.bf16 %v335_v23, %v332_v21  ;;  %v7990_v21 = vmov 0.0  }
  0xae   :  { %6272 = vmatpush1.bf16.msra.mxu1 %v6271_v38  ;;  %v6289_v38 = vpack.c.bf16 %v342_v32, %v339_v31  ;;  %v67_v31 = vld [vmem:[%s13897_s2 + $0x58] sm:$0xff]  ;;  %v6493_v32 = vpack.c.bf16 %v648_v17, %v645_v16  ;;  %v136_v16 = vld [vmem:[%s13897_s2 + $0x280] sm:$0xff] }
  0xaf   :  { %6464 = vmatpush1.bf16.msra.mxu0 %v6463_v40  ;;  %6274 = vmatprep.subr.bf16.mxu1 %v6273_v41  ;;  %v338_v40 = vld [vmem:[%s13897_s2 + $0x8d0] sm:$0xff]  ;;  %v341_v41 = vld [vmem:[%s13897_s2 + $0x8e8] sm:$0xff]  ;;  %v139_v17 = vld [vmem:[%s13897_s2 + $0x298] sm:$0xff] }
  0xb0   :  { %6466 = vmatprep.subr.bf16.mxu0 %v6465_v47  ;;  %v1785_v47 = vld [vmem:[%s13897_s2 + $0x3608] sm:$0xff]  ;;  %v6291_v51 = vpack.c.bf16 %v341_v41, %v338_v40  ;;  %v7263_v40 = vpack.c.bf16 %v67_v31, %v64_v29  ;;  %v668_v29 = vld [vmem:[%s13897_s2 + $0x1320] sm:$0xff] }
  0xb1   :  { %v88_v31 = vld [vmem:[%s13897_s2 + $0x100] sm:$0xff] }
  0xb2   :  { %6276 = vmatpush1.bf16.msra.mxu1 %v6275_v54  ;;  %v6483_v54 = vpack.c.bf16 %v629_v45, %v626_v42  ;;  %v70_v45 = vld [vmem:[%s13897_s2 + $0x70] sm:$0xff] }
  0xb3   :  { %6468 = vmatpush1.bf16.msra.mxu0 %v6467_v56  ;;  %6278 = vmatprep.subr.bf16.mxu1 %v6277_v57  ;;  %v7253_v56 = vpack.c.bf16 %v1788_v48, %v1785_v47  ;;  %v1784_v57 = vld [vmem:[%s13897_s2 + $0x3600] sm:$0xff]  ;;  %v73_v47 = vld [vmem:[%s13897_s2 + $0x88] sm:$0xff] }
  0xb4   :  { %6470 = vmatprep.subr.bf16.mxu0 %v6469_v62  ;;  %v635_v62 = vld [vmem:[%s13897_s2 + $0x1218] sm:$0xff] }
  0xb6   :  { %6280 = vmatpush1.bf16.msra.mxu1 %v6279_v52  ;;  %v7255_v52 = vpack.c.bf16 %v1787_v58, %v1784_v57  ;;  %v7269_v58 = vpack.c.bf16 %v127_v50, %v124_v49  ;;  %v677_v49 = vld [vmem:[%s13897_s2 + $0x1368] sm:$0xff]  ;;  %v148_v50 = vld [vmem:[%s13897_s2 + $0x2e0] sm:$0xff] }
  0xb7   :  { %6472 = vmatpush1.bf16.msra.mxu0 %v6471_v5  ;;  %6282 = vmatprep.subr.bf16.mxu1 %v6281_v6  ;;  %v6487_v5 = vpack.c.bf16 %v635_v62, %v632_v60  ;;  %v638_v6 = vld [vmem:[%s13897_s2 + $0x1230] sm:$0xff]  ;;  %v76_v60 = vld [vmem:[%s13897_s2 + $0xa0] sm:$0xff]  ;;  %v79_v62 = vld [vmem:[%s13897_s2 + $0xb8] sm:$0xff] }
  0xb8   :  { %6474 = vmatprep.subr.bf16.mxu0 %v6473_v13  ;;  %v7257_v13 = vpack.c.bf16 %v109_v3, %v106_v2  ;;  %v6491_v23 = vpack.c.bf16 %v641_v14, %v638_v6  ;;  %v130_v2 = vld [vmem:[%s13897_s2 + $0x250] sm:$0xff]  ;;  %v133_v3 = vld [vmem:[%s13897_s2 + $0x268] sm:$0xff]  ;;  %v7271_v6 = vpack.c.bf16 %v79_v62, %v76_v60  ;;  %v680_v60 = vld [vmem:[%s13897_s2 + $0x1380] sm:$0xff] }
  0xb9   :  { %v85_v14 = vld [vmem:[%s13897_s2 + $0xe8] sm:$0xff]  ;;  %v100_v62 = vld [vmem:[%s13897_s2 + $0x160] sm:$0xff] }
  0xba   :  { %6284 = vmatpush1.bf16.msra.mxu1 %v6283_v18  ;;  %v9368_v18 = vcombine.high %v9339_v4, %v9339_v4 }
  0xbb   :  { %6476 = vmatpush1.bf16.msra.mxu0 %v6475_v19  ;;  %6286 = vmatprep.subr.bf16.mxu1 %v6285_v20  ;;  %v5256_v19 = vld.sshfl [vmem:[%s13898_s0 + $0x48] sm:$0x3 pattern:$0x76325410]  ;;  %v7259_v20 = vpack.c.bf16 %v61_v9, %v58_v7  ;;  %v7273_v9 = vpack.c.bf16 %v133_v3, %v130_v2  ;;  %v683_v2 = vld [vmem:[%s13897_s2 + $0x1398] sm:$0xff]  ;;  %v202_v3 = vld [vmem:[%s13897_s2 + $0x490] sm:$0xff] }
  0xbc   :  { %6478 = vmatprep.subr.bf16.mxu0 %v6477_v28  ;;  %v644_v28 = vld [vmem:[%s13897_s2 + $0x1260] sm:$0xff] }
  0xbd   :  { %v6495_v41 = vpack.c.bf16 %v647_v33, %v644_v28  ;;  %v7277_v28 = vpack.c.bf16 %v139_v17, %v136_v16  ;;  %v689_v16 = vld [vmem:[%s13897_s2 + $0x13c8] sm:$0xff]  ;;  %v208_v17 = vld [vmem:[%s13897_s2 + $0x4c0] sm:$0xff] }
  0xbe   :  { %6288 = vmatpush1.bf16.msra.mxu1 %v6287_v36  ;;  %v121_v36 = vld [vmem:[%s13897_s2 + $0x208] sm:$0xff] }
  0xbf   :  { %6480 = vmatpush1.bf16.msra.mxu0 %v6479_v37  ;;  %6290 = vmatprep.subr.bf16.mxu1 %v6289_v38  ;;  %v651_v37 = vld [vmem:[%s13897_s2 + $0x1298] sm:$0xff]  ;;  %v654_v38 = vld [vmem:[%s13897_s2 + $0x12b0] sm:$0xff]  ;;  %v7265_v42 = vpack.c.bf16 %v121_v36, %v118_v35 }
  0xc0   :  { %6482 = vmatprep.subr.bf16.mxu0 %v6481_v44  ;;  %v650_v44 = vld [vmem:[%s13897_s2 + $0x1290] sm:$0xff]  ;;  %v6497_v48 = vpack.c.bf16 %v654_v38, %v651_v37  ;;  %v671_v35 = vld [vmem:[%s13897_s2 + $0x1338] sm:$0xff]  ;;  %v145_v37 = vld [vmem:[%s13897_s2 + $0x2c8] sm:$0xff] }
  0xc1   :  { %v142_v36 = vld [vmem:[%s13897_s2 + $0x2b0] sm:$0xff]  ;;  %v675_v38 = vld [vmem:[%s13897_s2 + $0x1358] sm:$0xff] }
  0xc2   :  { %6292 = vmatpush1.bf16.msra.mxu1 %v6291_v51  ;;  %v657_v51 = vld [vmem:[%s13897_s2 + $0x12c8] sm:$0xff] }
  0xc3   :  { %6484 = vmatpush1.bf16.msra.mxu0 %v6483_v54  ;;  %7254 = vmatprep.subr.bf16.mxu1 %v7253_v56  ;;  %v660_v54 = vld [vmem:[%s13897_s2 + $0x12e0] sm:$0xff]  ;;  %v7267_v56 = vpack.c.bf16 %v73_v47, %v70_v45  ;;  %v674_v45 = vld [vmem:[%s13897_s2 + $0x1350] sm:$0xff] }
  0xc4   :  { %6486 = vmatprep.subr.bf16.mxu0 %v6485_v59  ;;  %v656_v59 = vld [vmem:[%s13897_s2 + $0x12c0] sm:$0xff]  ;;  %v6501_v0 = vpack.c.bf16 %v660_v54, %v657_v51  ;;  %v94_v47 = vld [vmem:[%s13897_s2 + $0x130] sm:$0xff]  ;;  %v151_v51 = vld [vmem:[%s13897_s2 + $0x2f8] sm:$0xff] }
  0xc5   :  { %2223 = vmatmul.mubr.f32.vlgmr.msra.gmra.mrb[0].mxu1 %v8925_v8  ;;  %v6503_v7 = vpack.c.bf16 %v659_v1, %v656_v59  ;;  %v681_v54 = vld [vmem:[%s13897_s2 + $0x1388] sm:$0xff]  ;;  %v7285_v59 = vpack.c.bf16 %v151_v51, %v148_v50  ;;  %v223_v50 = vld [vmem:[%s13897_s2 + $0x538] sm:$0xff] }
  0xc6   :  { %2436 = vmatmul.mubr.f32.vlgmr.msra.gmra.mrb[0].mxu0 %v8934_v12  ;;  %7256 = vmatpush1.bf16.msra.mxu1 %v7255_v52  ;;  %v663_v52 = vld [vmem:[%s13897_s2 + $0x12f8] sm:$0xff]  ;;  %v705_v51 = vld [vmem:[%s13897_s2 + $0x1448] sm:$0xff] }
  0xc7   :  { %6488 = vmatpush1.bf16.msra.mxu0 %v6487_v5  ;;  %3358 = vmatprep.mubr.f32.mxu1 %v7990_v21  ;;  %v666_v5 = vld [vmem:[%s13897_s2 + $0x1310] sm:$0xff] }
  0xc8   :  { %6490 = vmatprep.subr.bf16.mxu0 %v6489_v10  ;;  %7258 = vmatprep.subr.bf16.mxu1 %v7257_v13  ;;  %v662_v10 = vld [vmem:[%s13897_s2 + $0x12f0] sm:$0xff]  ;;  %v6505_v15 = vpack.c.bf16 %v666_v5, %v663_v52  ;;  %v205_v52 = vld [vmem:[%s13897_s2 + $0x4a8] sm:$0xff]  ;;  %v687_v5 = vld [vmem:[%s13897_s2 + $0x13b8] sm:$0xff] }
  0xc9   :  { %5257 = vmatmul.mubr.msk.f32.vlgmr.msra.gmra.mrb[2].mxu1 %vm2013_vm0, %v5256_v19  ;;  %2506 = vmatprep.mubr.f32.mxu0 %v9368_v18  ;;  %v82_v13 = vld [vmem:[%s13897_s2 + $0xd0] sm:$0xff]  ;;  %v669_v19 = vld [vmem:[%s13897_s2 + $0x1328] sm:$0xff] }
  0xca   :  { %7260 = vmatpush3.bf16.msra.mxu1 %v7259_v20  ;;  %3429 = vmatprep.mubr.f32.mxu1 %v8395_v34  ;;  %v653_v34 = vld [vmem:[%s13897_s2 + $0x12a8] sm:$0xff]  ;;  %v672_v20 = vld [vmem:[%s13897_s2 + $0x1340] sm:$0xff] }
  0xcb   :  { %6492 = vmatpush1.bf16.msra.mxu0 %v6491_v23  ;;  %7262 = vmatprep.subr.bf16.mxu1 %v7261_v24  ;;  %v6499_v57 = vpack.c.bf16 %v653_v34, %v650_v44  ;;  %v7275_v23 = vpack.c.bf16 %v85_v14, %v82_v13  ;;  %v6507_v24 = vpack.c.bf16 %v665_v26, %v662_v10  ;;  %v686_v13 = vld [vmem:[%s13897_s2 + $0x13b0] sm:$0xff] }
  0xcc   :  { %6494 = vmatprep.subr.bf16.mxu0 %v6493_v32  ;;  %v91_v32 = vld [vmem:[%s13897_s2 + $0x118] sm:$0xff]  ;;  %v6509_v33 = vpack.c.bf16 %v672_v20, %v669_v19  ;;  %v7281_v44 = vpack.c.bf16 %v145_v37, %v142_v36  ;;  %v7289_v10 = vpack.c.bf16 %v205_v52, %v202_v3  ;;  %v154_v14 = vld [vmem:[%s13897_s2 + $0x310] sm:$0xff]  ;;  %v693_v20 = vld [vmem:[%s13897_s2 + $0x13e8] sm:$0xff] }
  0xcd   :  { %v211_v19 = vld [vmem:[%s13897_s2 + $0x4d8] sm:$0xff]  ;;  %v214_v37 = vld [vmem:[%s13897_s2 + $0x4f0] sm:$0xff]  ;;  %v229_v3 = vld [vmem:[%s13897_s2 + $0x568] sm:$0xff] }
  0xce   :  { %7264 = vmatpush3.bf16.msra.mxu1 %v7263_v40  ;;  %v678_v40 = vld [vmem:[%s13897_s2 + $0x1370] sm:$0xff]  ;;  %v695_v36 = vld [vmem:[%s13897_s2 + $0x13f8] sm:$0xff] }
  0xcf   :  { %6496 = vmatpush1.bf16.msra.mxu0 %v6495_v41  ;;  %7266 = vmatprep.subr.bf16.mxu1 %v7265_v42  ;;  %v7279_v41 = vpack.c.bf16 %v91_v32, %v88_v31  ;;  %v6511_v42 = vpack.c.bf16 %v671_v35, %v668_v29  ;;  %v6513_v34 = vpack.c.bf16 %v678_v40, %v675_v38  ;;  %v692_v31 = vld [vmem:[%s13897_s2 + $0x13e0] sm:$0xff]  ;;  %v217_v38 = vld [vmem:[%s13897_s2 + $0x508] sm:$0xff]  ;;  %v699_v40 = vld [vmem:[%s13897_s2 + $0x1418] sm:$0xff] }
  0xd0   :  { %6498 = vmatprep.subr.bf16.mxu0 %v6497_v48  ;;  %v97_v48 = vld [vmem:[%s13897_s2 + $0x148] sm:$0xff]  ;;  %v7293_v29 = vpack.c.bf16 %v211_v19, %v208_v17  ;;  %v160_v32 = vld [vmem:[%s13897_s2 + $0x340] sm:$0xff]  ;;  %v711_v52 = vld [vmem:[%s13897_s2 + $0x1478] sm:$0xff] }
  0xd1   :  { %v235_v17 = vld [vmem:[%s13897_s2 + $0x598] sm:$0xff]  ;;  %v717_v19 = vld [vmem:[%s13897_s2 + $0x14a8] sm:$0xff] }
  0xd2   :  { %7268 = vmatpush3.bf16.msra.mxu1 %v7267_v56  ;;  %v684_v56 = vld [vmem:[%s13897_s2 + $0x13a0] sm:$0xff] }
  0xd3   :  { %6500 = vmatpush1.bf16.msra.mxu0 %v6499_v57  ;;  %7270 = vmatprep.subr.bf16.mxu1 %v7269_v58  ;;  %v7283_v57 = vpack.c.bf16 %v97_v48, %v94_v47  ;;  %v6515_v58 = vpack.c.bf16 %v677_v49, %v674_v45  ;;  %v6517_v1 = vpack.c.bf16 %v684_v56, %v681_v54  ;;  %v166_v47 = vld [vmem:[%s13897_s2 + $0x370] sm:$0xff]  ;;  %v169_v48 = vld [vmem:[%s13897_s2 + $0x388] sm:$0xff]  ;;  %v220_v49 = vld [vmem:[%s13897_s2 + $0x520] sm:$0xff] }
  0xd4   :  { %6502 = vmatprep.subr.bf16.mxu0 %v6501_v0  ;;  %v103_v0 = vld [vmem:[%s13897_s2 + $0x178] sm:$0xff]  ;;  %v7297_v45 = vpack.c.bf16 %v217_v38, %v214_v37  ;;  %v708_v54 = vld [vmem:[%s13897_s2 + $0x1460] sm:$0xff]  ;;  %v7299_v56 = vpack.c.bf16 %v169_v48, %v166_v47  ;;  %v241_v37 = vld [vmem:[%s13897_s2 + $0x5c8] sm:$0xff] }
  0xd5   :  { %v723_v38 = vld [vmem:[%s13897_s2 + $0x14d8] sm:$0xff]  ;;  %v193_v47 = vld [vmem:[%s13897_s2 + $0x448] sm:$0xff] }
  0xd6   :  { %7272 = vmatpush3.bf16.msra.mxu1 %v7271_v6  ;;  %v690_v6 = vld [vmem:[%s13897_s2 + $0x13d0] sm:$0xff] }
  0xd7   :  { %6504 = vmatpush1.bf16.msra.mxu0 %v6503_v7  ;;  %7274 = vmatprep.subr.bf16.mxu1 %v7273_v9  ;;  %v7287_v7 = vpack.c.bf16 %v103_v0, %v100_v62  ;;  %v6519_v9 = vpack.c.bf16 %v683_v2, %v680_v60  ;;  %v6521_v26 = vpack.c.bf16 %v690_v6, %v687_v5  ;;  %v172_v60 = vld [vmem:[%s13897_s2 + $0x3a0] sm:$0xff]  ;;  %v175_v62 = vld [vmem:[%s13897_s2 + $0x3b8] sm:$0xff]  ;;  %v226_v2 = vld [vmem:[%s13897_s2 + $0x550] sm:$0xff] }
  0xd8   :  { %6506 = vmatprep.subr.bf16.mxu0 %v6505_v15  ;;  %v157_v15 = vld [vmem:[%s13897_s2 + $0x328] sm:$0xff]  ;;  %v6533_v0 = vpack.c.bf16 %v708_v54, %v705_v51  ;;  %v714_v5 = vld [vmem:[%s13897_s2 + $0x1490] sm:$0xff]  ;;  %v7303_v6 = vpack.c.bf16 %v175_v62, %v172_v60  ;;  %v732_v54 = vld [vmem:[%s13897_s2 + $0x1520] sm:$0xff] }
  0xd9   :  { %v729_v51 = vld [vmem:[%s13897_s2 + $0x1508] sm:$0xff]  ;;  %v199_v60 = vld [vmem:[%s13897_s2 + $0x478] sm:$0xff] }
  0xda   :  { %7276 = vmatpush3.bf16.msra.mxu1 %v7275_v23  ;;  %v696_v23 = vld [vmem:[%s13897_s2 + $0x1400] sm:$0xff]  ;;  %v6549_v62 = vpack.c.bf16 %v732_v54, %v729_v51 }
  0xdb   :  { %6508 = vmatpush1.bf16.msra.mxu0 %v6507_v24  ;;  %7278 = vmatprep.subr.bf16.mxu1 %v7277_v28  ;;  %v7291_v24 = vpack.c.bf16 %v157_v15, %v154_v14  ;;  %v6523_v28 = vpack.c.bf16 %v689_v16, %v686_v13  ;;  %v6525_v35 = vpack.c.bf16 %v696_v23, %v693_v20  ;;  %v178_v13 = vld [vmem:[%s13897_s2 + $0x3d0] sm:$0xff]  ;;  %v181_v14 = vld [vmem:[%s13897_s2 + $0x3e8] sm:$0xff]  ;;  %v232_v16 = vld [vmem:[%s13897_s2 + $0x580] sm:$0xff] }
  0xdc   :  { %6510 = vmatprep.subr.bf16.mxu0 %v6509_v33  ;;  %v163_v33 = vld [vmem:[%s13897_s2 + $0x358] sm:$0xff]  ;;  %v6537_v15 = vpack.c.bf16 %v714_v5, %v711_v52  ;;  %v720_v20 = vld [vmem:[%s13897_s2 + $0x14c0] sm:$0xff]  ;;  %v7307_v23 = vpack.c.bf16 %v181_v14, %v178_v13  ;;  %v738_v5 = vld [vmem:[%s13897_s2 + $0x1550] sm:$0xff] }
  0xdd   :  { %v735_v52 = vld [vmem:[%s13897_s2 + $0x1538] sm:$0xff]  ;;  %v250_v13 = vld [vmem:[%s13897_s2 + $0x610] sm:$0xff]  ;;  %v253_v14 = vld [vmem:[%s13897_s2 + $0x628] sm:$0xff] }
  0xde   :  { %7280 = vmatpush3.bf16.msra.mxu1 %v7279_v41  ;;  %v702_v41 = vld [vmem:[%s13897_s2 + $0x1430] sm:$0xff] }
  0xdf   :  { %6512 = vmatpush1.bf16.msra.mxu0 %v6511_v42  ;;  %7282 = vmatprep.subr.bf16.mxu1 %v7281_v44  ;;  %v7295_v42 = vpack.c.bf16 %v163_v33, %v160_v32  ;;  %v6527_v44 = vpack.c.bf16 %v695_v36, %v692_v31  ;;  %v184_v31 = vld [vmem:[%s13897_s2 + $0x400] sm:$0xff]  ;;  %v187_v32 = vld [vmem:[%s13897_s2 + $0x418] sm:$0xff]  ;;  %v6541_v33 = vpack.c.bf16 %v720_v20, %v717_v19  ;;  %v238_v36 = vld [vmem:[%s13897_s2 + $0x5b0] sm:$0xff] }
  0xe0   :  { %6514 = vmatprep.subr.bf16.mxu0 %v6513_v34  ;;  %v6529_v34 = vpack.c.bf16 %v702_v41, %v699_v40  ;;  %v726_v40 = vld [vmem:[%s13897_s2 + $0x14f0] sm:$0xff]  ;;  %v7311_v41 = vpack.c.bf16 %v187_v32, %v184_v31  ;;  %v741_v20 = vld [vmem:[%s13897_s2 + $0x1568] sm:$0xff]  ;;  %v740_v31 = vld [vmem:[%s13897_s2 + $0x1560] sm:$0xff] }
  0xe1   :  { %v6545_v48 = vpack.c.bf16 %v726_v40, %v723_v38  ;;  %v256_v32 = vld [vmem:[%s13897_s2 + $0x640] sm:$0xff]  ;;  %v313_v38 = vld [vmem:[%s13897_s2 + $0x808] sm:$0xff]  ;;  %v747_v40 = vld [vmem:[%s13897_s2 + $0x1598] sm:$0xff] }
  0xe2   :  { %7284 = vmatpush3.bf16.msra.mxu1 %v7283_v57 }
  0xe3   :  { %6516 = vmatpush1.bf16.msra.mxu0 %v6515_v58  ;;  %7286 = vmatprep.subr.bf16.mxu1 %v7285_v59  ;;  %v7301_v58 = vpack.c.bf16 %v223_v50, %v220_v49  ;;  %v704_v59 = vld [vmem:[%s13897_s2 + $0x1440] sm:$0xff]  ;;  %v247_v49 = vld [vmem:[%s13897_s2 + $0x5f8] sm:$0xff]  ;;  %v1868_v50 = vcombine.high %v9311_v53, %v9311_v53 }
  0xe4   :  { %6518 = vmatprep.subr.bf16.mxu0 %v6517_v1  ;;  %v707_v1 = vld [vmem:[%s13897_s2 + $0x1458] sm:$0xff]  ;;  %v196_v53 = vld [vmem:[%s13897_s2 + $0x460] sm:$0xff] }
  0xe6   :  { %7288 = vmatpush3.bf16.msra.mxu1 %v7287_v7  ;;  %v6535_v7 = vpack.c.bf16 %v707_v1, %v704_v59  ;;  %v728_v59 = vld [vmem:[%s13897_s2 + $0x1500] sm:$0xff]  ;;  %v298_v1 = vld [vmem:[%s13897_s2 + $0x790] sm:$0xff] }
  0xe7   :  { %6520 = vmatpush1.bf16.msra.mxu0 %v6519_v9  ;;  %7290 = vmatprep.subr.bf16.mxu1 %v7289_v10  ;;  %v7305_v9 = vpack.c.bf16 %v229_v3, %v226_v2  ;;  %v710_v10 = vld [vmem:[%s13897_s2 + $0x1470] sm:$0xff]  ;;  %v301_v2 = vld [vmem:[%s13897_s2 + $0x7a8] sm:$0xff]  ;;  %v9737_v3 = vrot.slane %v1868_v50, %v8342_v11  ;;  %v756_v50 = vld [vmem:[%s13897_s2 + $0x15e0] sm:$0xff] }
  0xe8   :  { %6522 = vmatprep.subr.bf16.mxu0 %v6521_v26  ;;  %v713_v26 = vld [vmem:[%s13897_s2 + $0x1488] sm:$0xff] }
  0xe9   :  { %3430 = vmatmul.mubr.f32.vlgmr.msra.gmra.mrb[4].mxu1 %v8375_v25  ;;  %v698_v25 = vld [vmem:[%s13897_s2 + $0x1410] sm:$0xff]  ;;  %v9765_v19 = vcombine.high %v9737_v3, %v9737_v3 }
  0xea   :  { %7292 = vmatpush3.bf16.msra.mxu1 %v7291_v24  ;;  %3499 = vmatprep.mubr.f32.mxu1 %v8542_v46  ;;  %v701_v46 = vld [vmem:[%s13897_s2 + $0x1428] sm:$0xff]  ;;  %v6539_v24 = vpack.c.bf16 %v713_v26, %v710_v10  ;;  %v734_v10 = vld [vmem:[%s13897_s2 + $0x1530] sm:$0xff] }
  0xeb   :  { %6524 = vmatpush1.bf16.msra.mxu0 %v6523_v28  ;;  %7294 = vmatprep.subr.bf16.mxu1 %v7293_v29  ;;  %v6531_v57 = vpack.c.bf16 %v701_v46, %v698_v25  ;;  %v7309_v28 = vpack.c.bf16 %v235_v17, %v232_v16  ;;  %v716_v29 = vld [vmem:[%s13897_s2 + $0x14a0] sm:$0xff]  ;;  %v190_v25 = vld [vmem:[%s13897_s2 + $0x430] sm:$0xff]  ;;  %v737_v26 = vld [vmem:[%s13897_s2 + $0x1548] sm:$0xff] }
  0xec   :  { %6526 = vmatprep.subr.bf16.mxu0 %v6525_v35  ;;  %v719_v35 = vld [vmem:[%s13897_s2 + $0x14b8] sm:$0xff]  ;;  %v244_v46 = vld [vmem:[%s13897_s2 + $0x5e0] sm:$0xff] }
  0xed   :  { %v304_v16 = vld [vmem:[%s13897_s2 + $0x7c0] sm:$0xff]  ;;  %v307_v17 = vld [vmem:[%s13897_s2 + $0x7d8] sm:$0xff] }
  0xee   :  { %7296 = vmatpush3.bf16.msra.mxu1 %v7295_v42  ;;  %v6543_v42 = vpack.c.bf16 %v719_v35, %v716_v29  ;;  %v7325_v29 = vpack.c.bf16 %v307_v17, %v304_v16  ;;  %v765_v16 = vld [vmem:[%s13897_s2 + $0x1628] sm:$0xff]  ;;  %v768_v17 = vld [vmem:[%s13897_s2 + $0x1640] sm:$0xff] }
  0xef   :  { %6528 = vmatpush1.bf16.msra.mxu0 %v6527_v44  ;;  %7298 = vmatprep.subr.bf16.mxu1 %v7297_v45  ;;  %v7313_v44 = vpack.c.bf16 %v241_v37, %v238_v36  ;;  %v722_v45 = vld [vmem:[%s13897_s2 + $0x14d0] sm:$0xff]  ;;  %v743_v36 = vld [vmem:[%s13897_s2 + $0x1578] sm:$0xff] }
  0xf0   :  { %6530 = vmatprep.subr.bf16.mxu0 %v6529_v34  ;;  %v725_v34 = vld [vmem:[%s13897_s2 + $0x14e8] sm:$0xff]  ;;  %v310_v37 = vld [vmem:[%s13897_s2 + $0x7f0] sm:$0xff] }
  0xf2   :  { %7300 = vmatpush3.bf16.msra.mxu1 %v7299_v56  ;;  %v7315_v56 = vpack.c.bf16 %v193_v47, %v190_v25  ;;  %v262_v25 = vld [vmem:[%s13897_s2 + $0x670] sm:$0xff]  ;;  %v265_v47 = vld [vmem:[%s13897_s2 + $0x688] sm:$0xff] }
  0xf3   :  { %6532 = vmatpush1.bf16.msra.mxu0 %v6531_v57  ;;  %7302 = vmatprep.subr.bf16.mxu1 %v7301_v58  ;;  %v6547_v57 = vpack.c.bf16 %v725_v34, %v722_v45  ;;  %v7317_v58 = vpack.c.bf16 %v247_v49, %v244_v46  ;;  %v7329_v45 = vpack.c.bf16 %v313_v38, %v310_v37  ;;  %v316_v34 = vld [vmem:[%s13897_s2 + $0x820] sm:$0xff]  ;;  %v319_v46 = vld [vmem:[%s13897_s2 + $0x838] sm:$0xff]  ;;  %v753_v49 = vld [vmem:[%s13897_s2 + $0x15c8] sm:$0xff] }
  0xf4   :  { %6534 = vmatprep.subr.bf16.mxu0 %v6533_v0  ;;  %v731_v0 = vld [vmem:[%s13897_s2 + $0x1518] sm:$0xff]  ;;  %v7331_v51 = vpack.c.bf16 %v265_v47, %v262_v25  ;;  %v774_v38 = vld [vmem:[%s13897_s2 + $0x1670] sm:$0xff]  ;;  %v773_v47 = vld [vmem:[%s13897_s2 + $0x1668] sm:$0xff] }
  0xf5   :  { %v771_v37 = vld [vmem:[%s13897_s2 + $0x1658] sm:$0xff] }
  0xf6   :  { %7304 = vmatpush3.bf16.msra.mxu1 %v7303_v6  ;;  %v7319_v6 = vpack.c.bf16 %v199_v60, %v196_v53  ;;  %v6565_v53 = vpack.c.bf16 %v756_v50, %v753_v49  ;;  %v755_v60 = vld [vmem:[%s13897_s2 + $0x15d8] sm:$0xff]  ;;  %v6577_v25 = vpack.c.bf16 %v774_v38, %v771_v37 }
  0xf7   :  { %6536 = vmatpush1.bf16.msra.mxu0 %v6535_v7  ;;  %7306 = vmatprep.subr.bf16.mxu1 %v7305_v9  ;;  %v6551_v7 = vpack.c.bf16 %v731_v0, %v728_v59  ;;  %v7321_v9 = vpack.c.bf16 %v301_v2, %v298_v1  ;;  %v271_v59 = vld [vmem:[%s13897_s2 + $0x6b8] sm:$0xff]  ;;  %v325_v0 = vld [vmem:[%s13897_s2 + $0x868] sm:$0xff]  ;;  %v762_v2 = vld [vmem:[%s13897_s2 + $0x1610] sm:$0xff] }
  0xf8   :  { %6538 = vmatprep.subr.bf16.mxu0 %v6537_v15  ;;  %v6553_v15 = vpack.c.bf16 %v738_v5, %v735_v52  ;;  %v759_v1 = vld [vmem:[%s13897_s2 + $0x15f8] sm:$0xff] }
  0xfa   :  { %7308 = vmatpush3.bf16.msra.mxu1 %v7307_v23  ;;  %v744_v23 = vld [vmem:[%s13897_s2 + $0x1580] sm:$0xff] }
  0xfb   :  { %6540 = vmatpush1.bf16.msra.mxu0 %v6539_v24  ;;  %7310 = vmatprep.subr.bf16.mxu1 %v7309_v28  ;;  %v7323_v24 = vpack.c.bf16 %v253_v14, %v250_v13  ;;  %v6555_v28 = vpack.c.bf16 %v737_v26, %v734_v10  ;;  %v6557_v35 = vpack.c.bf16 %v744_v23, %v741_v20  ;;  %v277_v10 = vld [vmem:[%s13897_s2 + $0x6e8] sm:$0xff]  ;;  %v331_v26 = vld [vmem:[%s13897_s2 + $0x898] sm:$0xff] }
  0xfc   :  { %6542 = vmatprep.subr.bf16.mxu0 %v6541_v33  ;;  %v259_v33 = vld [vmem:[%s13897_s2 + $0x658] sm:$0xff]  ;;  %v6569_v13 = vpack.c.bf16 %v762_v2, %v759_v1  ;;  %v761_v14 = vld [vmem:[%s13897_s2 + $0x1608] sm:$0xff] }
  0xfe   :  { %7312 = vmatpush3.bf16.msra.mxu1 %v7311_v41  ;;  %v750_v41 = vld [vmem:[%s13897_s2 + $0x15b0] sm:$0xff] }
  0xff   :  { %6544 = vmatpush1.bf16.msra.mxu0 %v6543_v42  ;;  %7314 = vmatprep.subr.bf16.mxu1 %v7313_v44  ;;  %v7327_v42 = vpack.c.bf16 %v259_v33, %v256_v32  ;;  %v6559_v44 = vpack.c.bf16 %v743_v36, %v740_v31  ;;  %v283_v31 = vld [vmem:[%s13897_s2 + $0x718] sm:$0xff]  ;;  %v6573_v32 = vpack.c.bf16 %v768_v17, %v765_v16  ;;  %v337_v36 = vld [vmem:[%s13897_s2 + $0x8c8] sm:$0xff] }
 0x100   :  { %6546 = vmatprep.subr.bf16.mxu0 %v6545_v48  ;;  %v6561_v48 = vpack.c.bf16 %v750_v41, %v747_v40  ;;  %v767_v33 = vld [vmem:[%s13897_s2 + $0x1638] sm:$0xff] }
 0x102   :  { %7316 = vmatpush3.bf16.msra.mxu1 %v7315_v56  ;;  %v7333_v56 = vpack.c.bf16 %v319_v46, %v316_v34  ;;  %v777_v34 = vld [vmem:[%s13897_s2 + $0x1688] sm:$0xff]  ;;  %v780_v46 = vld [vmem:[%s13897_s2 + $0x16a0] sm:$0xff] }
 0x103   :  { %6548 = vmatpush1.bf16.msra.mxu0 %v6547_v57  ;;  %7318 = vmatprep.subr.bf16.mxu1 %v7317_v58  ;;  %v752_v57 = vld [vmem:[%s13897_s2 + $0x15c0] sm:$0xff] }
 0x104   :  { %6550 = vmatprep.subr.bf16.mxu0 %v6549_v62  ;;  %v268_v58 = vld [vmem:[%s13897_s2 + $0x6a0] sm:$0xff]  ;;  %v322_v62 = vld [vmem:[%s13897_s2 + $0x850] sm:$0xff]  ;;  %v6567_v5 = vpack.c.bf16 %v755_v60, %v752_v57  ;;  %v295_v57 = vld [vmem:[%s13897_s2 + $0x778] sm:$0xff] }
 0x105   :  { %v7335_v52 = vpack.c.bf16 %v271_v59, %v268_v58  ;;  %v6581_v58 = vpack.c.bf16 %v780_v46, %v777_v34  ;;  %v779_v59 = vld [vmem:[%s13897_s2 + $0x1698] sm:$0xff]  ;;  %v397_v60 = vld [vmem:[%s13897_s2 + $0xaa8] sm:$0xff]  ;;  %v800_v46 = vld [vmem:[%s13897_s2 + $0x1740] sm:$0xff] }
 0x106   :  { %2507 = vmatmul.mubr.f32.vlgmr.msra.gmra.mrb[0].mxu0 %v9339_v4  ;;  %7320 = vmatpush3.bf16.msra.mxu1 %v7319_v6  ;;  %v7337_v6 = vpack.c.bf16 %v325_v0, %v322_v62  ;;  %v783_v62 = vld [vmem:[%s13897_s2 + $0x16b8] sm:$0xff]  ;;  %v786_v0 = vld [vmem:[%s13897_s2 + $0x16d0] sm:$0xff] }
 0x107   :  { %6552 = vmatpush1.bf16.msra.mxu0 %v6551_v7  ;;  %7322 = vmatprep.subr.bf16.mxu1 %v7321_v9  ;;  %v758_v7 = vld [vmem:[%s13897_s2 + $0x15f0] sm:$0xff] }
 0x108   :  { %6554 = vmatprep.subr.bf16.mxu0 %v6553_v15  ;;  %2577 = vmatprep.mubr.f32.mxu0 %v9765_v19  ;;  %v274_v9 = vld [vmem:[%s13897_s2 + $0x6d0] sm:$0xff]  ;;  %v328_v15 = vld [vmem:[%s13897_s2 + $0x880] sm:$0xff]  ;;  %v6571_v23 = vpack.c.bf16 %v761_v14, %v758_v7  ;;  %v349_v7 = vld [vmem:[%s13897_s2 + $0x928] sm:$0xff] }
 0x109   :  { %3500 = vmatmul.mubr.f32.vlgmr.msra.gmra.mrb[6].mxu1 %v8514_v30  ;;  %v746_v30 = vld [vmem:[%s13897_s2 + $0x1590] sm:$0xff]  ;;  %v7339_v20 = vpack.c.bf16 %v277_v10, %v274_v9  ;;  %v6585_v9 = vpack.c.bf16 %v786_v0, %v783_v62  ;;  %v785_v10 = vld [vmem:[%s13897_s2 + $0x16c8] sm:$0xff]  ;;  %v403_v14 = vld [vmem:[%s13897_s2 + $0xad8] sm:$0xff] }
 0x10a   :  { %7324 = vmatpush3.bf16.msra.mxu1 %v7323_v24  ;;  %3569 = vmatprep.mubr.f32.mxu1 %v8956_v22  ;;  %v749_v22 = vld [vmem:[%s13897_s2 + $0x15a8] sm:$0xff]  ;;  %v7341_v24 = vpack.c.bf16 %v331_v26, %v328_v15  ;;  %v792_v26 = vld [vmem:[%s13897_s2 + $0x1700] sm:$0xff]  ;;  %v806_v0 = vld [vmem:[%s13897_s2 + $0x1770] sm:$0xff] }
 0x10b   :  { %6556 = vmatpush1.bf16.msra.mxu0 %v6555_v28  ;;  %7326 = vmatprep.subr.bf16.mxu1 %v7325_v29  ;;  %v6563_v54 = vpack.c.bf16 %v749_v22, %v746_v30  ;;  %v764_v28 = vld [vmem:[%s13897_s2 + $0x1620] sm:$0xff]  ;;  %v289_v30 = vld [vmem:[%s13897_s2 + $0x748] sm:$0xff]  ;;  %v343_v22 = vld [vmem:[%s13897_s2 + $0x8f8] sm:$0xff] }
 0x10c   :  { %6558 = vmatprep.subr.bf16.mxu0 %v6557_v35  ;;  %v280_v29 = vld [vmem:[%s13897_s2 + $0x700] sm:$0xff]  ;;  %v334_v35 = vld [vmem:[%s13897_s2 + $0x8b0] sm:$0xff]  ;;  %v6575_v41 = vpack.c.bf16 %v767_v33, %v764_v28  ;;  %v789_v15 = vld [vmem:[%s13897_s2 + $0x16e8] sm:$0xff] }
 0x10d   :  { %v7343_v40 = vpack.c.bf16 %v283_v31, %v280_v29  ;;  %v355_v28 = vld [vmem:[%s13897_s2 + $0x958] sm:$0xff]  ;;  %v6589_v29 = vpack.c.bf16 %v792_v26, %v789_v15  ;;  %v409_v33 = vld [vmem:[%s13897_s2 + $0xb08] sm:$0xff]  ;;  %v812_v26 = vld [vmem:[%s13897_s2 + $0x17a0] sm:$0xff] }
 0x10e   :  { %7328 = vmatpush3.bf16.msra.mxu1 %v7327_v42  ;;  %v7345_v42 = vpack.c.bf16 %v337_v36, %v334_v35  ;;  %v791_v31 = vld [vmem:[%s13897_s2 + $0x16f8] sm:$0xff]  ;;  %v798_v36 = vld [vmem:[%s13897_s2 + $0x1730] sm:$0xff] }
 0x10f   :  { %6560 = vmatpush1.bf16.msra.mxu0 %v6559_v44  ;;  %7330 = vmatprep.subr.bf16.mxu1 %v7329_v45  ;;  %v770_v44 = vld [vmem:[%s13897_s2 + $0x1650] sm:$0xff]  ;;  %v795_v35 = vld [vmem:[%s13897_s2 + $0x1718] sm:$0xff] }
 0x110   :  { %6562 = vmatprep.subr.bf16.mxu0 %v6561_v48  ;;  %v286_v45 = vld [vmem:[%s13897_s2 + $0x730] sm:$0xff]  ;;  %v340_v48 = vld [vmem:[%s13897_s2 + $0x8e0] sm:$0xff]  ;;  %v6579_v50 = vpack.c.bf16 %v773_v47, %v770_v44  ;;  %v6593_v44 = vpack.c.bf16 %v798_v36, %v795_v35 }
 0x111   :  { %v7347_v49 = vpack.c.bf16 %v289_v30, %v286_v45  ;;  %v412_v45 = vld [vmem:[%s13897_s2 + $0xb20] sm:$0xff]  ;;  %v415_v30 = vld [vmem:[%s13897_s2 + $0xb38] sm:$0xff]  ;;  %v818_v36 = vld [vmem:[%s13897_s2 + $0x17d0] sm:$0xff] }
 0x112   :  { %7332 = vmatpush3.bf16.msra.mxu1 %v7331_v51  ;;  %v7349_v51 = vpack.c.bf16 %v343_v22, %v340_v48  ;;  %v804_v47 = vld [vmem:[%s13897_s2 + $0x1760] sm:$0xff]  ;;  %v7365_v34 = vpack.c.bf16 %v415_v30, %v412_v45 }
 0x113   :  { %6564 = vmatpush1.bf16.msra.mxu0 %v6563_v54  ;;  %7334 = vmatprep.subr.bf16.mxu1 %v7333_v56  ;;  %v776_v54 = vld [vmem:[%s13897_s2 + $0x1680] sm:$0xff] }
 0x114   :  { %6566 = vmatprep.subr.bf16.mxu0 %v6565_v53  ;;  %v292_v56 = vld [vmem:[%s13897_s2 + $0x760] sm:$0xff]  ;;  %v394_v53 = vld [vmem:[%s13897_s2 + $0xa90] sm:$0xff]  ;;  %v6583_v2 = vpack.c.bf16 %v779_v59, %v776_v54  ;;  %v803_v54 = vld [vmem:[%s13897_s2 + $0x1758] sm:$0xff] }
 0x115   :  { %v7351_v1 = vpack.c.bf16 %v295_v57, %v292_v56  ;;  %v418_v56 = vld [vmem:[%s13897_s2 + $0xb50] sm:$0xff]  ;;  %v421_v57 = vld [vmem:[%s13897_s2 + $0xb68] sm:$0xff]  ;;  %v10118_v45 = vld [vmem:[%s13898_s0 + $0x20] sm:$0xff] }
 0x116   :  { %7336 = vmatpush3.bf16.msra.mxu1 %v7335_v52  ;;  %v7353_v52 = vpack.c.bf16 %v397_v60, %v394_v53  ;;  %v810_v59 = vld [vmem:[%s13897_s2 + $0x1790] sm:$0xff]  ;;  %v6599_v60 = vpack.c.bf16 %v803_v54, %v800_v46  ;;  %v7369_v62 = vpack.c.bf16 %v421_v57, %v418_v56  ;;  %v10140_v54 = vrot.slane %v10118_v45, %v8342_v11  ;;  %v831_v56 = vld [vmem:[%s13897_s2 + $0x1838] sm:$0xff] }
 0x117   :  { %6568 = vmatpush1.bf16.msra.mxu0 %v6567_v5  ;;  %7338 = vmatprep.subr.bf16.mxu1 %v7337_v6  ;;  %v782_v5 = vld [vmem:[%s13897_s2 + $0x16b0] sm:$0xff] }
 0x118   :  { %6570 = vmatprep.subr.bf16.mxu0 %v6569_v13  ;;  %v346_v6 = vld [vmem:[%s13897_s2 + $0x910] sm:$0xff]  ;;  %v400_v13 = vld [vmem:[%s13897_s2 + $0xac0] sm:$0xff]  ;;  %v6587_v17 = vpack.c.bf16 %v785_v10, %v782_v5  ;;  %v809_v5 = vld [vmem:[%s13897_s2 + $0x1788] sm:$0xff] }
 0x119   :  { %v7355_v16 = vpack.c.bf16 %v349_v7, %v346_v6  ;;  %v424_v6 = vld [vmem:[%s13897_s2 + $0xb80] sm:$0xff]  ;;  %v427_v7 = vld [vmem:[%s13897_s2 + $0xb98] sm:$0xff]  ;;  %v834_v57 = vld [vmem:[%s13897_s2 + $0x1850] sm:$0xff] }
 0x11a   :  { %7340 = vmatpush3.bf16.msra.mxu1 %v7339_v20  ;;  %v7357_v20 = vpack.c.bf16 %v403_v14, %v400_v13  ;;  %v816_v10 = vld [vmem:[%s13897_s2 + $0x17c0] sm:$0xff]  ;;  %v6603_v14 = vpack.c.bf16 %v809_v5, %v806_v0  ;;  %v7373_v15 = vpack.c.bf16 %v427_v7, %v424_v6  ;;  %v445_v0 = vld [vmem:[%s13897_s2 + $0xc28] sm:$0xff]  ;;  %v499_v5 = vld [vmem:[%s13897_s2 + $0xdd8] sm:$0xff]  ;;  %v10168_v6 = vcombine.high %v10140_v54, %v10140_v54 }
 0x11b   :  { %6572 = vmatpush1.bf16.msra.mxu0 %v6571_v23  ;;  %7342 = vmatprep.subr.bf16.mxu1 %v7341_v24  ;;  %v788_v23 = vld [vmem:[%s13897_s2 + $0x16e0] sm:$0xff]  ;;  %v837_v7 = vld [vmem:[%s13897_s2 + $0x1868] sm:$0xff] }
 0x11c   :  { %6574 = vmatprep.subr.bf16.mxu0 %v6573_v32  ;;  %v352_v24 = vld [vmem:[%s13897_s2 + $0x940] sm:$0xff]  ;;  %v406_v32 = vld [vmem:[%s13897_s2 + $0xaf0] sm:$0xff]  ;;  %v6591_v38 = vpack.c.bf16 %v791_v31, %v788_v23  ;;  %v815_v23 = vld [vmem:[%s13897_s2 + $0x17b8] sm:$0xff] }
 0x11d   :  { %v7359_v37 = vpack.c.bf16 %v355_v28, %v352_v24  ;;  %v430_v24 = vld [vmem:[%s13897_s2 + $0xbb0] sm:$0xff]  ;;  %v433_v28 = vld [vmem:[%s13897_s2 + $0xbc8] sm:$0xff] }
 0x11e   :  { %7344 = vmatpush3.bf16.msra.mxu1 %v7343_v40  ;;  %v7361_v40 = vpack.c.bf16 %v409_v33, %v406_v32  ;;  %v822_v31 = vld [vmem:[%s13897_s2 + $0x17f0] sm:$0xff]  ;;  %v6607_v33 = vpack.c.bf16 %v815_v23, %v812_v26  ;;  %v7377_v35 = vpack.c.bf16 %v433_v28, %v430_v24  ;;  %v448_v26 = vld [vmem:[%s13897_s2 + $0xc40] sm:$0xff]  ;;  %v505_v24 = vld [vmem:[%s13897_s2 + $0xe08] sm:$0xff] }
 0x11f   :  { %6576 = vmatpush1.bf16.msra.mxu0 %v6575_v41  ;;  %7346 = vmatprep.subr.bf16.mxu1 %v7345_v42  ;;  %v358_v41 = vld [vmem:[%s13897_s2 + $0x970] sm:$0xff]  ;;  %v361_v42 = vld [vmem:[%s13897_s2 + $0x988] sm:$0xff]  ;;  %v843_v28 = vld [vmem:[%s13897_s2 + $0x1898] sm:$0xff] }
 0x120   :  { %6578 = vmatprep.subr.bf16.mxu0 %v6577_v25  ;;  %v801_v25 = vld [vmem:[%s13897_s2 + $0x1748] sm:$0xff]  ;;  %v7363_v48 = vpack.c.bf16 %v361_v42, %v358_v41  ;;  %v436_v41 = vld [vmem:[%s13897_s2 + $0xbe0] sm:$0xff]  ;;  %v439_v42 = vld [vmem:[%s13897_s2 + $0xbf8] sm:$0xff] }
 0x121   :  { %v502_v23 = vld [vmem:[%s13897_s2 + $0xdf0] sm:$0xff] }
 0x122   :  { %7348 = vmatpush3.bf16.msra.mxu1 %v7347_v49  ;;  %v364_v49 = vld [vmem:[%s13897_s2 + $0x9a0] sm:$0xff] }
 0x123   :  { %6580 = vmatpush1.bf16.msra.mxu0 %v6579_v50  ;;  %7350 = vmatprep.subr.bf16.mxu1 %v7349_v51  ;;  %v367_v50 = vld [vmem:[%s13897_s2 + $0x9b8] sm:$0xff]  ;;  %v6597_v51 = vpack.c.bf16 %v804_v47, %v801_v25  ;;  %v7381_v47 = vpack.c.bf16 %v439_v42, %v436_v41  ;;  %v852_v41 = vld [vmem:[%s13897_s2 + $0x18e0] sm:$0xff] }
 0x124   :  { %6582 = vmatprep.subr.bf16.mxu0 %v6581_v58  ;;  %v807_v58 = vld [vmem:[%s13897_s2 + $0x1778] sm:$0xff]  ;;  %v7367_v53 = vpack.c.bf16 %v367_v50, %v364_v49  ;;  %v490_v50 = vld [vmem:[%s13897_s2 + $0xd90] sm:$0xff] }
 0x125   :  { %v827_v49 = vld [vmem:[%s13897_s2 + $0x1818] sm:$0xff] }
 0x126   :  { %7352 = vmatpush3.bf16.msra.mxu1 %v7351_v1  ;;  %v370_v1 = vld [vmem:[%s13897_s2 + $0x9d0] sm:$0xff] }
 0x127   :  { %6584 = vmatpush1.bf16.msra.mxu0 %v6583_v2  ;;  %7354 = vmatprep.subr.bf16.mxu1 %v7353_v52  ;;  %v373_v2 = vld [vmem:[%s13897_s2 + $0x9e8] sm:$0xff]  ;;  %v6601_v52 = vpack.c.bf16 %v810_v59, %v807_v58 }
 0x128   :  { %6586 = vmatprep.subr.bf16.mxu0 %v6585_v9  ;;  %v813_v9 = vld [vmem:[%s13897_s2 + $0x17a8] sm:$0xff]  ;;  %v7371_v13 = vpack.c.bf16 %v373_v2, %v370_v1  ;;  %v6617_v1 = vpack.c.bf16 %v834_v57, %v831_v56 }
 0x129   :  { %3570 = vmatmul.mubr.f32.vlgmr.msra.gmra.mrb[8].mxu1 %v8925_v8  ;;  %v794_v8 = vld [vmem:[%s13897_s2 + $0x1710] sm:$0xff]  ;;  %v833_v2 = vld [vmem:[%s13897_s2 + $0x1848] sm:$0xff] }
 0x12a   :  { %7356 = vmatpush3.bf16.msra.mxu1 %v7355_v16  ;;  %3639 = vmatprep.mubr.f32.mxu1 %v8418_v43  ;;  %v797_v43 = vld [vmem:[%s13897_s2 + $0x1728] sm:$0xff]  ;;  %v376_v16 = vld [vmem:[%s13897_s2 + $0xa00] sm:$0xff] }
 0x12b   :  { %6588 = vmatpush1.bf16.msra.mxu0 %v6587_v17  ;;  %7358 = vmatprep.subr.bf16.mxu1 %v7357_v20  ;;  %v6595_v22 = vpack.c.bf16 %v797_v43, %v794_v8  ;;  %v379_v17 = vld [vmem:[%s13897_s2 + $0xa18] sm:$0xff]  ;;  %v6605_v20 = vpack.c.bf16 %v816_v10, %v813_v9  ;;  %v821_v8 = vld [vmem:[%s13897_s2 + $0x17e8] sm:$0xff]  ;;  %v828_v43 = vld [vmem:[%s13897_s2 + $0x1820] sm:$0xff] }
 0x12c   :  { %6590 = vmatprep.subr.bf16.mxu0 %v6589_v29  ;;  %v819_v29 = vld [vmem:[%s13897_s2 + $0x17d8] sm:$0xff]  ;;  %v7375_v32 = vpack.c.bf16 %v379_v17, %v376_v16  ;;  %v6611_v25 = vpack.c.bf16 %v821_v8, %v818_v36  ;;  %v840_v9 = vld [vmem:[%s13897_s2 + $0x1880] sm:$0xff]  ;;  %v457_v36 = vld [vmem:[%s13897_s2 + $0xc88] sm:$0xff] }
 0x12d   :  { %v451_v16 = vld [vmem:[%s13897_s2 + $0xc58] sm:$0xff]  ;;  %v6621_v17 = vpack.c.bf16 %v840_v9, %v837_v7  ;;  %v849_v8 = vld [vmem:[%s13897_s2 + $0x18c8] sm:$0xff] }
 0x12e   :  { %7360 = vmatpush3.bf16.msra.mxu1 %v7359_v37  ;;  %v382_v37 = vld [vmem:[%s13897_s2 + $0xa30] sm:$0xff] }
 0x12f   :  { %6592 = vmatpush1.bf16.msra.mxu0 %v6591_v38  ;;  %7362 = vmatprep.subr.bf16.mxu1 %v7361_v40  ;;  %v385_v38 = vld [vmem:[%s13897_s2 + $0xa48] sm:$0xff]  ;;  %v6609_v40 = vpack.c.bf16 %v822_v31, %v819_v29  ;;  %v846_v29 = vld [vmem:[%s13897_s2 + $0x18b0] sm:$0xff]  ;;  %v7391_v31 = vpack.c.bf16 %v451_v16, %v448_v26  ;;  %v863_v26 = vld [vmem:[%s13897_s2 + $0x1938] sm:$0xff] }
 0x130   :  { %6594 = vmatprep.subr.bf16.mxu0 %v6593_v44  ;;  %v825_v44 = vld [vmem:[%s13897_s2 + $0x1808] sm:$0xff]  ;;  %v7379_v30 = vpack.c.bf16 %v385_v38, %v382_v37  ;;  %v6625_v37 = vpack.c.bf16 %v846_v29, %v843_v28  ;;  %v508_v38 = vld [vmem:[%s13897_s2 + $0xe20] sm:$0xff]  ;;  %v526_v16 = vld [vmem:[%s13897_s2 + $0xeb0] sm:$0xff] }
 0x131   :  { %v6613_v46 = vpack.c.bf16 %v828_v43, %v825_v44 }
 0x132   :  { %7364 = vmatpush3.bf16.msra.mxu1 %v7363_v48  ;;  %v824_v48 = vld [vmem:[%s13897_s2 + $0x1800] sm:$0xff] }
 0x133   :  { %6596 = vmatpush1.bf16.msra.mxu0 %v6595_v22  ;;  %7366 = vmatprep.subr.bf16.mxu1 %v7365_v34  ;;  %v388_v22 = vld [vmem:[%s13897_s2 + $0xa60] sm:$0xff]  ;;  %v391_v34 = vld [vmem:[%s13897_s2 + $0xa78] sm:$0xff]  ;;  %v6615_v59 = vpack.c.bf16 %v827_v49, %v824_v48  ;;  %v6629_v48 = vpack.c.bf16 %v852_v41, %v849_v8 }
 0x134   :  { %6598 = vmatprep.subr.bf16.mxu0 %v6597_v51  ;;  %v493_v51 = vld [vmem:[%s13897_s2 + $0xda8] sm:$0xff]  ;;  %v7383_v58 = vpack.c.bf16 %v391_v34, %v388_v22  ;;  %v851_v22 = vld [vmem:[%s13897_s2 + $0x18d8] sm:$0xff]  ;;  %v514_v34 = vld [vmem:[%s13897_s2 + $0xe50] sm:$0xff] }
 0x135   :  { %v855_v49 = vld [vmem:[%s13897_s2 + $0x18f8] sm:$0xff] }
 0x136   :  { %7368 = vmatpush3.bf16.msra.mxu1 %v7367_v53  ;;  %v7385_v53 = vpack.c.bf16 %v493_v51, %v490_v50  ;;  %v858_v50 = vld [vmem:[%s13897_s2 + $0x1910] sm:$0xff] }
 0x137   :  { %6600 = vmatpush1.bf16.msra.mxu0 %v6599_v60  ;;  %7370 = vmatprep.subr.bf16.mxu1 %v7369_v62  ;;  %v830_v60 = vld [vmem:[%s13897_s2 + $0x1830] sm:$0xff] }
 0x138   :  { %6602 = vmatprep.subr.bf16.mxu0 %v6601_v52  ;;  %v442_v62 = vld [vmem:[%s13897_s2 + $0xc10] sm:$0xff]  ;;  %v496_v52 = vld [vmem:[%s13897_s2 + $0xdc0] sm:$0xff] }
 0x139   :  { %v7387_v10 = vpack.c.bf16 %v445_v0, %v442_v62  ;;  %v857_v62 = vld [vmem:[%s13897_s2 + $0x1908] sm:$0xff]  ;;  %v520_v0 = vld [vmem:[%s13897_s2 + $0xe80] sm:$0xff] }
 0x13a   :  { %7372 = vmatpush3.bf16.msra.mxu1 %v7371_v13  ;;  %v6619_v13 = vpack.c.bf16 %v833_v2, %v830_v60  ;;  %v6633_v60 = vpack.c.bf16 %v858_v50, %v855_v49  ;;  %v861_v2 = vld [vmem:[%s13897_s2 + $0x1928] sm:$0xff] }
 0x13b   :  { %6604 = vmatpush1.bf16.msra.mxu0 %v6603_v14  ;;  %7374 = vmatprep.subr.bf16.mxu1 %v7373_v15  ;;  %v7389_v14 = vpack.c.bf16 %v499_v5, %v496_v52  ;;  %v836_v15 = vld [vmem:[%s13897_s2 + $0x1860] sm:$0xff] }
 0x13c   :  { %6606 = vmatprep.subr.bf16.mxu0 %v6605_v20  ;;  %v839_v20 = vld [vmem:[%s13897_s2 + $0x1878] sm:$0xff]  ;;  %v864_v52 = vld [vmem:[%s13897_s2 + $0x1940] sm:$0xff] }
 0x13e   :  { %7376 = vmatpush3.bf16.msra.mxu1 %v7375_v32  ;;  %v6623_v32 = vpack.c.bf16 %v839_v20, %v836_v15  ;;  %v6637_v15 = vpack.c.bf16 %v864_v52, %v861_v2  ;;  %v867_v20 = vld [vmem:[%s13897_s2 + $0x1958] sm:$0xff] }
 0x13f   :  { %6608 = vmatpush1.bf16.msra.mxu0 %v6607_v33  ;;  %7378 = vmatprep.subr.bf16.mxu1 %v7377_v35  ;;  %v7393_v33 = vpack.c.bf16 %v505_v24, %v502_v23  ;;  %v454_v35 = vld [vmem:[%s13897_s2 + $0xc70] sm:$0xff] }
 0x140   :  { %6610 = vmatprep.subr.bf16.mxu0 %v6609_v40  ;;  %v511_v40 = vld [vmem:[%s13897_s2 + $0xe38] sm:$0xff]  ;;  %v7395_v42 = vpack.c.bf16 %v457_v36, %v454_v35  ;;  %v870_v23 = vld [vmem:[%s13897_s2 + $0x1970] sm:$0xff]  ;;  %v869_v35 = vld [vmem:[%s13897_s2 + $0x1968] sm:$0xff] }
 0x141   :  { %v7397_v43 = vpack.c.bf16 %v511_v40, %v508_v38  ;;  %v532_v36 = vld [vmem:[%s13897_s2 + $0xee0] sm:$0xff] }
 0x142   :  { %7380 = vmatpush3.bf16.msra.mxu1 %v7379_v30  ;;  %v848_v30 = vld [vmem:[%s13897_s2 + $0x18c0] sm:$0xff] }
 0x143   :  { %6612 = vmatpush1.bf16.msra.mxu0 %v6611_v25  ;;  %7382 = vmatprep.subr.bf16.mxu1 %v7381_v47  ;;  %v460_v25 = vld [vmem:[%s13897_s2 + $0xca0] sm:$0xff]  ;;  %v463_v47 = vld [vmem:[%s13897_s2 + $0xcb8] sm:$0xff]  ;;  %v6631_v56 = vpack.c.bf16 %v851_v22, %v848_v30 }
 0x144   :  { %6614 = vmatprep.subr.bf16.mxu0 %v6613_v46  ;;  %v517_v46 = vld [vmem:[%s13897_s2 + $0xe68] sm:$0xff]  ;;  %v7399_v51 = vpack.c.bf16 %v463_v47, %v460_v25  ;;  %v876_v38 = vld [vmem:[%s13897_s2 + $0x19a0] sm:$0xff]  ;;  %v875_v25 = vld [vmem:[%s13897_s2 + $0x1998] sm:$0xff] }
 0x145   :  { %v7401_v57 = vpack.c.bf16 %v517_v46, %v514_v34  ;;  %v586_v47 = vld [vmem:[%s13897_s2 + $0x1090] sm:$0xff]  ;;  %v879_v22 = vld [vmem:[%s13897_s2 + $0x19b8] sm:$0xff] }
 0x146   :  { %2578 = vmatmul.mubr.f32.vlgmr.msra.gmra.mrb[0].mxu0 %v9737_v3  ;;  %7384 = vmatpush3.bf16.msra.mxu1 %v7383_v58  ;;  %v854_v58 = vld [vmem:[%s13897_s2 + $0x18f0] sm:$0xff] }
 0x147   :  { %6616 = vmatpush1.bf16.msra.mxu0 %v6615_v59  ;;  %7386 = vmatprep.subr.bf16.mxu1 %v7385_v53  ;;  %v466_v59 = vld [vmem:[%s13897_s2 + $0xcd0] sm:$0xff]  ;;  %v469_v53 = vld [vmem:[%s13897_s2 + $0xce8] sm:$0xff]  ;;  %v6635_v7 = vpack.c.bf16 %v857_v62, %v854_v58 }
 0x148   :  { %6618 = vmatprep.subr.bf16.mxu0 %v6617_v1  ;;  %2648 = vmatprep.mubr.f32.mxu0 %v10168_v6  ;;  %v523_v1 = vld [vmem:[%s13897_s2 + $0xe98] sm:$0xff]  ;;  %v7403_v5 = vpack.c.bf16 %v469_v53, %v466_v59  ;;  %v882_v34 = vld [vmem:[%s13897_s2 + $0x19d0] sm:$0xff]  ;;  %v881_v59 = vld [vmem:[%s13897_s2 + $0x19c8] sm:$0xff] }
 0x149   :  { %3640 = vmatmul.mubr.f32.vlgmr.msra.gmra.mrb[10].mxu1 %v8407_v39  ;;  %v842_v39 = vld [vmem:[%s13897_s2 + $0x1890] sm:$0xff]  ;;  %v7405_v9 = vpack.c.bf16 %v523_v1, %v520_v0  ;;  %v6649_v58 = vpack.c.bf16 %v882_v34, %v879_v22  ;;  %v592_v53 = vld [vmem:[%s13897_s2 + $0x10c0] sm:$0xff]  ;;  %v885_v62 = vld [vmem:[%s13897_s2 + $0x19e8] sm:$0xff] }
 0x14a   :  { %7388 = vmatpush3.bf16.msra.mxu1 %v7387_v10  ;;  %3709 = vmatprep.mubr.f32.mxu1 %v8693_v63  ;;  %v845_v63 = vld [vmem:[%s13897_s2 + $0x18a8] sm:$0xff]  ;;  %v860_v10 = vld [vmem:[%s13897_s2 + $0x1920] sm:$0xff]  ;;  %v902_v22 = vld [vmem:[%s13897_s2 + $0x1a70] sm:$0xff] }
 0x14b   :  { %6620 = vmatpush1.bf16.msra.mxu0 %v6619_v13  ;;  %7390 = vmatprep.subr.bf16.mxu1 %v7389_v14  ;;  %v6627_v44 = vpack.c.bf16 %v845_v63, %v842_v39  ;;  %v472_v13 = vld [vmem:[%s13897_s2 + $0xd00] sm:$0xff]  ;;  %v475_v14 = vld [vmem:[%s13897_s2 + $0xd18] sm:$0xff]  ;;  %v6639_v28 = vpack.c.bf16 %v863_v26, %v860_v10  ;;  %v6641_v39 = vpack.c.bf16 %v870_v23, %v867_v20  ;;  %v873_v63 = vld [vmem:[%s13897_s2 + $0x1988] sm:$0xff] }
 0x14c   :  { %6622 = vmatprep.subr.bf16.mxu0 %v6621_v17  ;;  %v529_v17 = vld [vmem:[%s13897_s2 + $0xec8] sm:$0xff]  ;;  %v7407_v24 = vpack.c.bf16 %v475_v14, %v472_v13  ;;  %v6645_v30 = vpack.c.bf16 %v876_v38, %v873_v63  ;;  %v888_v0 = vld [vmem:[%s13897_s2 + $0x1a00] sm:$0xff]  ;;  %v887_v13 = vld [vmem:[%s13897_s2 + $0x19f8] sm:$0xff] }
 0x14d   :  { %v7409_v29 = vpack.c.bf16 %v529_v17, %v526_v16  ;;  %v6653_v10 = vpack.c.bf16 %v888_v0, %v885_v62  ;;  %v598_v14 = vld [vmem:[%s13897_s2 + $0x10f0] sm:$0xff]  ;;  %v891_v26 = vld [vmem:[%s13897_s2 + $0x1a18] sm:$0xff]  ;;  %v896_v63 = vld [vmem:[%s13897_s2 + $0x1a40] sm:$0xff] }
 0x14e   :  { %7392 = vmatpush3.bf16.msra.mxu1 %v7391_v31  ;;  %v866_v31 = vld [vmem:[%s13897_s2 + $0x1950] sm:$0xff]  ;;  %v556_v38 = vld [vmem:[%s13897_s2 + $0xfa0] sm:$0xff] }
 0x14f   :  { %6624 = vmatpush1.bf16.msra.mxu0 %v6623_v32  ;;  %7394 = vmatprep.subr.bf16.mxu1 %v7393_v33  ;;  %v478_v32 = vld [vmem:[%s13897_s2 + $0xd30] sm:$0xff]  ;;  %v481_v33 = vld [vmem:[%s13897_s2 + $0xd48] sm:$0xff]  ;;  %v6643_v8 = vpack.c.bf16 %v869_v35, %v866_v31  ;;  %v604_v31 = vld [vmem:[%s13897_s2 + $0x1120] sm:$0xff] }
 0x150   :  { %6626 = vmatprep.subr.bf16.mxu0 %v6625_v37  ;;  %v535_v37 = vld [vmem:[%s13897_s2 + $0xef8] sm:$0xff]  ;;  %v7411_v40 = vpack.c.bf16 %v481_v33, %v478_v32  ;;  %v894_v16 = vld [vmem:[%s13897_s2 + $0x1a30] sm:$0xff]  ;;  %v897_v33 = vld [vmem:[%s13897_s2 + $0x1a48] sm:$0xff] }
 0x151   :  { %v7413_v41 = vpack.c.bf16 %v535_v37, %v532_v36  ;;  %v607_v32 = vld [vmem:[%s13897_s2 + $0x1138] sm:$0xff]  ;;  %v562_v34 = vld [vmem:[%s13897_s2 + $0xfd0] sm:$0xff]  ;;  %v908_v62 = vld [vmem:[%s13897_s2 + $0x1aa0] sm:$0xff] }
 0x152   :  { %7396 = vmatpush3.bf16.msra.mxu1 %v7395_v42  ;;  %v872_v42 = vld [vmem:[%s13897_s2 + $0x1980] sm:$0xff]  ;;  %v7429_v37 = vpack.c.bf16 %v607_v32, %v604_v31 }
 0x153   :  { %6628 = vmatpush1.bf16.msra.mxu0 %v6627_v44  ;;  %7398 = vmatprep.subr.bf16.mxu1 %v7397_v43  ;;  %v484_v44 = vld [vmem:[%s13897_s2 + $0xd60] sm:$0xff]  ;;  %v487_v43 = vld [vmem:[%s13897_s2 + $0xd78] sm:$0xff]  ;;  %v6647_v49 = vpack.c.bf16 %v875_v25, %v872_v42  ;;  %v610_v42 = vld [vmem:[%s13897_s2 + $0x1150] sm:$0xff] }
 0x154   :  { %6630 = vmatprep.subr.bf16.mxu0 %v6629_v48  ;;  %v589_v48 = vld [vmem:[%s13897_s2 + $0x10a8] sm:$0xff]  ;;  %v7415_v46 = vpack.c.bf16 %v487_v43, %v484_v44  ;;  %v903_v43 = vld [vmem:[%s13897_s2 + $0x1a78] sm:$0xff]  ;;  %v568_v0 = vld [vmem:[%s13897_s2 + $0x1000] sm:$0xff] }
 0x155   :  { %v7417_v50 = vpack.c.bf16 %v589_v48, %v586_v47  ;;  %v613_v44 = vld [vmem:[%s13897_s2 + $0x1168] sm:$0xff] }
 0x156   :  { %7400 = vmatpush3.bf16.msra.mxu1 %v7399_v51  ;;  %v878_v51 = vld [vmem:[%s13897_s2 + $0x19b0] sm:$0xff]  ;;  %v7433_v48 = vpack.c.bf16 %v613_v44, %v610_v42 }
 0x157   :  { %6632 = vmatpush1.bf16.msra.mxu0 %v6631_v56  ;;  %7402 = vmatprep.subr.bf16.mxu1 %v7401_v57  ;;  %v538_v56 = vld [vmem:[%s13897_s2 + $0xf10] sm:$0xff]  ;;  %v541_v57 = vld [vmem:[%s13897_s2 + $0xf28] sm:$0xff]  ;;  %v6651_v2 = vpack.c.bf16 %v881_v59, %v878_v51  ;;  %v616_v51 = vld [vmem:[%s13897_s2 + $0x1180] sm:$0xff] }
 0x158   :  { %6634 = vmatprep.subr.bf16.mxu0 %v6633_v60  ;;  %v595_v60 = vld [vmem:[%s13897_s2 + $0x10d8] sm:$0xff]  ;;  %v7419_v1 = vpack.c.bf16 %v541_v57, %v538_v56  ;;  %v909_v57 = vld [vmem:[%s13897_s2 + $0x1aa8] sm:$0xff] }
 0x159   :  { %v7421_v52 = vpack.c.bf16 %v595_v60, %v592_v53  ;;  %v619_v56 = vld [vmem:[%s13897_s2 + $0x1198] sm:$0xff] }
 0x15a   :  { %7404 = vmatpush3.bf16.msra.mxu1 %v7403_v5  ;;  %v884_v5 = vld [vmem:[%s13897_s2 + $0x19e0] sm:$0xff]  ;;  %v7437_v60 = vpack.c.bf16 %v619_v56, %v616_v51 }
 0x15b   :  { %6636 = vmatpush1.bf16.msra.mxu0 %v6635_v7  ;;  %7406 = vmatprep.subr.bf16.mxu1 %v7405_v9  ;;  %v544_v7 = vld [vmem:[%s13897_s2 + $0xf40] sm:$0xff]  ;;  %v547_v9 = vld [vmem:[%s13897_s2 + $0xf58] sm:$0xff]  ;;  %v6655_v20 = vpack.c.bf16 %v887_v13, %v884_v5  ;;  %v622_v5 = vld [vmem:[%s13897_s2 + $0x11b0] sm:$0xff] }
 0x15c   :  { %6638 = vmatprep.subr.bf16.mxu0 %v6637_v15  ;;  %v601_v15 = vld [vmem:[%s13897_s2 + $0x1108] sm:$0xff]  ;;  %v7423_v17 = vpack.c.bf16 %v547_v9, %v544_v7  ;;  %v915_v9 = vld [vmem:[%s13897_s2 + $0x1ad8] sm:$0xff]  ;;  %v936_v51 = vld [vmem:[%s13897_s2 + $0x1b80] sm:$0xff] }
 0x15d   :  { %v7425_v23 = vpack.c.bf16 %v601_v15, %v598_v14  ;;  %v625_v7 = vld [vmem:[%s13897_s2 + $0x11c8] sm:$0xff] }
 0x15e   :  { %7408 = vmatpush3.bf16.msra.mxu1 %v7407_v24  ;;  %v550_v24 = vld [vmem:[%s13897_s2 + $0xf70] sm:$0xff]  ;;  %v7441_v15 = vpack.c.bf16 %v625_v7, %v622_v5 }
 0x15f   :  { %6640 = vmatpush1.bf16.msra.mxu0 %v6639_v28  ;;  %7410 = vmatprep.subr.bf16.mxu1 %v7409_v29  ;;  %v553_v28 = vld [vmem:[%s13897_s2 + $0xf88] sm:$0xff]  ;;  %v6657_v29 = vpack.c.bf16 %v894_v16, %v891_v26  ;;  %v914_v26 = vld [vmem:[%s13897_s2 + $0x1ad0] sm:$0xff] }
 0x160   :  { %6642 = vmatprep.subr.bf16.mxu0 %v6641_v39  ;;  %v900_v39 = vld [vmem:[%s13897_s2 + $0x1a60] sm:$0xff]  ;;  %v7427_v35 = vpack.c.bf16 %v553_v28, %v550_v24  ;;  %v574_v16 = vld [vmem:[%s13897_s2 + $0x1030] sm:$0xff]  ;;  %v631_v24 = vld [vmem:[%s13897_s2 + $0x11f8] sm:$0xff]  ;;  %v1885_v28 = vcombine.high %v10118_v45, %v10118_v45 }
 0x161   :  { %v580_v45 = vld [vmem:[%s13897_s2 + $0x1060] sm:$0xff]  ;;  %v942_v5 = vld [vmem:[%s13897_s2 + $0x1bb0] sm:$0xff] }
 0x162   :  { %7412 = vmatpush3.bf16.msra.mxu1 %v7411_v40  ;;  %v559_v40 = vld [vmem:[%s13897_s2 + $0xfb8] sm:$0xff] }
 0x163   :  { %6644 = vmatpush1.bf16.msra.mxu0 %v6643_v8  ;;  %7414 = vmatprep.subr.bf16.mxu1 %v7413_v41  ;;  %v6661_v8 = vpack.c.bf16 %v900_v39, %v897_v33  ;;  %v899_v41 = vld [vmem:[%s13897_s2 + $0x1a58] sm:$0xff]  ;;  %v7431_v25 = vpack.c.bf16 %v559_v40, %v556_v38  ;;  %v920_v39 = vld [vmem:[%s13897_s2 + $0x1b00] sm:$0xff]  ;;  %v685_v38 = vld [vmem:[%s13897_s2 + $0x13a8] sm:$0xff]  ;;  %v10539_v40 = vrot.slane %v1885_v28, %v8342_v11 }
 0x164   :  { %6646 = vmatprep.subr.bf16.mxu0 %v6645_v30  ;;  %v906_v30 = vld [vmem:[%s13897_s2 + $0x1a90] sm:$0xff]  ;;  %v6663_v47 = vpack.c.bf16 %v899_v41, %v896_v63  ;;  %v944_v28 = vld [vmem:[%s13897_s2 + $0x1bc0] sm:$0xff] }
 0x165   :  { %v682_v63 = vld [vmem:[%s13897_s2 + $0x1390] sm:$0xff] }
 0x166   :  { %7416 = vmatpush3.bf16.msra.mxu1 %v7415_v46  ;;  %v565_v46 = vld [vmem:[%s13897_s2 + $0xfe8] sm:$0xff]  ;;  %v930_v41 = vld [vmem:[%s13897_s2 + $0x1b50] sm:$0xff] }
 0x167   :  { %6648 = vmatpush1.bf16.msra.mxu0 %v6647_v49  ;;  %7418 = vmatprep.subr.bf16.mxu1 %v7417_v50  ;;  %v6665_v49 = vpack.c.bf16 %v906_v30, %v903_v43  ;;  %v905_v50 = vld [vmem:[%s13897_s2 + $0x1a88] sm:$0xff]  ;;  %v7435_v59 = vpack.c.bf16 %v565_v46, %v562_v34  ;;  %v7449_v43 = vpack.c.bf16 %v685_v38, %v682_v63  ;;  %v926_v30 = vld [vmem:[%s13897_s2 + $0x1b30] sm:$0xff]  ;;  %v688_v34 = vld [vmem:[%s13897_s2 + $0x13c0] sm:$0xff] }
 0x168   :  { %6650 = vmatprep.subr.bf16.mxu0 %v6649_v58  ;;  %v912_v58 = vld [vmem:[%s13897_s2 + $0x1ac0] sm:$0xff]  ;;  %v6667_v53 = vpack.c.bf16 %v905_v50, %v902_v22  ;;  %v929_v22 = vld [vmem:[%s13897_s2 + $0x1b48] sm:$0xff]  ;;  %v691_v46 = vld [vmem:[%s13897_s2 + $0x13d8] sm:$0xff] }
 0x169   :  { %3710 = vmatmul.mubr.f32.vlgmr.msra.gmra.mrb[12].mxu1 %v8680_v55  ;;  %v890_v55 = vld [vmem:[%s13897_s2 + $0x1a10] sm:$0xff]  ;;  %v933_v50 = vld [vmem:[%s13897_s2 + $0x1b68] sm:$0xff] }
 0x16a   :  { %7420 = vmatpush3.bf16.msra.mxu1 %v7419_v1  ;;  %3779 = vmatprep.mubr.f32.mxu1 %v8967_v27  ;;  %v893_v27 = vld [vmem:[%s13897_s2 + $0x1a28] sm:$0xff]  ;;  %v571_v1 = vld [vmem:[%s13897_s2 + $0x1018] sm:$0xff]  ;;  %v950_v38 = vld [vmem:[%s13897_s2 + $0x1bf0] sm:$0xff] }
 0x16b   :  { %6652 = vmatpush1.bf16.msra.mxu0 %v6651_v2  ;;  %7422 = vmatprep.subr.bf16.mxu1 %v7421_v52  ;;  %v6659_v36 = vpack.c.bf16 %v893_v27, %v890_v55  ;;  %v6669_v2 = vpack.c.bf16 %v912_v58, %v909_v57  ;;  %v911_v52 = vld [vmem:[%s13897_s2 + $0x1ab8] sm:$0xff]  ;;  %v7439_v13 = vpack.c.bf16 %v571_v1, %v568_v0  ;;  %v628_v55 = vld [vmem:[%s13897_s2 + $0x11e0] sm:$0xff]  ;;  %v694_v1 = vld [vmem:[%s13897_s2 + $0x13f0] sm:$0xff] }
 0x16c   :  { %6654 = vmatprep.subr.bf16.mxu0 %v6653_v10  ;;  %v918_v10 = vld [vmem:[%s13897_s2 + $0x1af0] sm:$0xff]  ;;  %v6671_v14 = vpack.c.bf16 %v911_v52, %v908_v62  ;;  %v924_v27 = vld [vmem:[%s13897_s2 + $0x1b20] sm:$0xff]  ;;  %v7445_v33 = vpack.c.bf16 %v631_v24, %v628_v55  ;;  %v6683_v57 = vpack.c.bf16 %v929_v22, %v926_v30  ;;  %v7453_v58 = vpack.c.bf16 %v691_v46, %v688_v34  ;;  %v935_v0 = vld [vmem:[%s13897_s2 + $0x1b78] sm:$0xff] }
 0x16d   :  { %v6685_v62 = vpack.c.bf16 %v936_v51, %v933_v50  ;;  %v939_v52 = vld [vmem:[%s13897_s2 + $0x1b98] sm:$0xff]  ;;  %v956_v46 = vld [vmem:[%s13897_s2 + $0x1c20] sm:$0xff] }
 0x16e   :  { %7424 = vmatpush3.bf16.msra.mxu1 %v7423_v17  ;;  %v577_v17 = vld [vmem:[%s13897_s2 + $0x1048] sm:$0xff]  ;;  %v715_v30 = vld [vmem:[%s13897_s2 + $0x1498] sm:$0xff]  ;;  %v664_v50 = vld [vmem:[%s13897_s2 + $0x1300] sm:$0xff] }
 0x16f   :  { %6656 = vmatpush1.bf16.msra.mxu0 %v6655_v20  ;;  %7426 = vmatprep.subr.bf16.mxu1 %v7425_v23  ;;  %v6673_v20 = vpack.c.bf16 %v918_v10, %v915_v9  ;;  %v917_v23 = vld [vmem:[%s13897_s2 + $0x1ae8] sm:$0xff]  ;;  %v7443_v31 = vpack.c.bf16 %v577_v17, %v574_v16  ;;  %v703_v16 = vld [vmem:[%s13897_s2 + $0x1438] sm:$0xff] }
 0x170   :  { %6658 = vmatprep.subr.bf16.mxu0 %v6657_v29  ;;  %v921_v29 = vld [vmem:[%s13897_s2 + $0x1b08] sm:$0xff]  ;;  %v6675_v32 = vpack.c.bf16 %v917_v23, %v914_v26  ;;  %v700_v26 = vld [vmem:[%s13897_s2 + $0x1420] sm:$0xff]  ;;  %v667_v51 = vld [vmem:[%s13897_s2 + $0x1318] sm:$0xff] }
 0x171   :  { %v945_v17 = vld [vmem:[%s13897_s2 + $0x1bc8] sm:$0xff]  ;;  %v7461_v24 = vpack.c.bf16 %v703_v16, %v700_v26 }
 0x172   :  { %7428 = vmatpush3.bf16.msra.mxu1 %v7427_v35  ;;  %v583_v35 = vld [vmem:[%s13897_s2 + $0x1078] sm:$0xff] }
 0x173   :  { %6660 = vmatpush1.bf16.msra.mxu0 %v6659_v36  ;;  %7430 = vmatprep.subr.bf16.mxu1 %v7429_v37  ;;  %v6677_v36 = vpack.c.bf16 %v924_v27, %v921_v29  ;;  %v923_v37 = vld [vmem:[%s13897_s2 + $0x1b18] sm:$0xff]  ;;  %v7447_v42 = vpack.c.bf16 %v583_v35, %v580_v45  ;;  %v652_v29 = vld [vmem:[%s13897_s2 + $0x12a0] sm:$0xff]  ;;  %v954_v35 = vld [vmem:[%s13897_s2 + $0x1c10] sm:$0xff] }
 0x174   :  { %6662 = vmatprep.subr.bf16.mxu0 %v6661_v8  ;;  %v927_v8 = vld [vmem:[%s13897_s2 + $0x1b38] sm:$0xff]  ;;  %v6679_v44 = vpack.c.bf16 %v923_v37, %v920_v39  ;;  %v709_v39 = vld [vmem:[%s13897_s2 + $0x1468] sm:$0xff] }
 0x175   :  { %v655_v27 = vld [vmem:[%s13897_s2 + $0x12b8] sm:$0xff] }
 0x176   :  { %7432 = vmatpush3.bf16.msra.mxu1 %v7431_v25  ;;  %v634_v25 = vld [vmem:[%s13897_s2 + $0x1210] sm:$0xff]  ;;  %v951_v45 = vld [vmem:[%s13897_s2 + $0x1bf8] sm:$0xff] }
 0x177   :  { %6664 = vmatpush1.bf16.msra.mxu0 %v6663_v47  ;;  %7434 = vmatprep.subr.bf16.mxu1 %v7433_v48  ;;  %v637_v47 = vld [vmem:[%s13897_s2 + $0x1228] sm:$0xff]  ;;  %v6681_v48 = vpack.c.bf16 %v930_v41, %v927_v8  ;;  %v658_v8 = vld [vmem:[%s13897_s2 + $0x12d0] sm:$0xff] }
 0x178   :  { %6666 = vmatprep.subr.bf16.mxu0 %v6665_v49  ;;  %v10567_v49 = vcombine.high %v10539_v40, %v10539_v40  ;;  %v7451_v56 = vpack.c.bf16 %v637_v47, %v634_v25  ;;  %v661_v41 = vld [vmem:[%s13897_s2 + $0x12e8] sm:$0xff]  ;;  %v960_v47 = vld [vmem:[%s13897_s2 + $0x1c40] sm:$0xff] }
 0x179   :  { %v957_v25 = vld [vmem:[%s13897_s2 + $0x1c28] sm:$0xff] }
 0x17a   :  { %7436 = vmatpush3.bf16.msra.mxu1 %v7435_v59  ;;  %v932_v59 = vld [vmem:[%s13897_s2 + $0x1b60] sm:$0xff] }
 0x17b   :  { %6668 = vmatpush1.bf16.msra.mxu0 %v6667_v53  ;;  %7438 = vmatprep.subr.bf16.mxu1 %v7437_v60  ;;  %v640_v53 = vld [vmem:[%s13897_s2 + $0x1240] sm:$0xff]  ;;  %v643_v60 = vld [vmem:[%s13897_s2 + $0x1258] sm:$0xff]  ;;  %v6687_v9 = vpack.c.bf16 %v935_v0, %v932_v59  ;;  %v721_v59 = vld [vmem:[%s13897_s2 + $0x14c8] sm:$0xff] }
 0x17c   :  { %6670 = vmatprep.subr.bf16.mxu0 %v6669_v2  ;;  %v697_v2 = vld [vmem:[%s13897_s2 + $0x1408] sm:$0xff]  ;;  %v7455_v7 = vpack.c.bf16 %v643_v60, %v640_v53  ;;  %v963_v60 = vld [vmem:[%s13897_s2 + $0x1c58] sm:$0xff] }
 0x17d   :  { %v7457_v10 = vpack.c.bf16 %v697_v2, %v694_v1  ;;  %v7471_v1 = vpack.c.bf16 %v667_v51, %v664_v50  ;;  %v790_v50 = vld [vmem:[%s13897_s2 + $0x16f0] sm:$0xff]  ;;  %v793_v51 = vld [vmem:[%s13897_s2 + $0x1708] sm:$0xff] }
 0x17e   :  { %7440 = vmatpush3.bf16.msra.mxu1 %v7439_v13  ;;  %v646_v13 = vld [vmem:[%s13897_s2 + $0x1270] sm:$0xff] }
 0x17f   :  { %6672 = vmatpush1.bf16.msra.mxu0 %v6671_v14  ;;  %7442 = vmatprep.subr.bf16.mxu1 %v7441_v15  ;;  %v649_v14 = vld [vmem:[%s13897_s2 + $0x1288] sm:$0xff]  ;;  %v6689_v15 = vpack.c.bf16 %v942_v5, %v939_v52  ;;  %v962_v5 = vld [vmem:[%s13897_s2 + $0x1c50] sm:$0xff] }
 0x180   :  { %6674 = vmatprep.subr.bf16.mxu0 %v6673_v20  ;;  %v948_v20 = vld [vmem:[%s13897_s2 + $0x1be0] sm:$0xff]  ;;  %v7459_v23 = vpack.c.bf16 %v649_v14, %v646_v13  ;;  %v727_v14 = vld [vmem:[%s13897_s2 + $0x14f8] sm:$0xff] }
 0x181   :  { %v724_v13 = vld [vmem:[%s13897_s2 + $0x14e0] sm:$0xff] }
 0x182   :  { %7444 = vmatpush3.bf16.msra.mxu1 %v7443_v31  ;;  %v6693_v31 = vpack.c.bf16 %v948_v20, %v945_v17  ;;  %v7477_v17 = vpack.c.bf16 %v727_v14, %v724_v13  ;;  %v968_v20 = vld [vmem:[%s13897_s2 + $0x1c80] sm:$0xff] }
 0x183   :  { %6676 = vmatpush1.bf16.msra.mxu0 %v6675_v32  ;;  %7446 = vmatprep.subr.bf16.mxu1 %v7445_v33  ;;  %v947_v32 = vld [vmem:[%s13897_s2 + $0x1bd8] sm:$0xff]  ;;  %v706_v33 = vld [vmem:[%s13897_s2 + $0x1450] sm:$0xff]  ;;  %v992_v14 = vld [vmem:[%s13897_s2 + $0x1d40] sm:$0xff] }
 0x184   :  { %6678 = vmatprep.subr.bf16.mxu0 %v6677_v36  ;;  %v7463_v36 = vpack.c.bf16 %v655_v27, %v652_v29  ;;  %v6695_v37 = vpack.c.bf16 %v947_v32, %v944_v28  ;;  %v7465_v63 = vpack.c.bf16 %v709_v39, %v706_v33  ;;  %v971_v28 = vld [vmem:[%s13897_s2 + $0x1c98] sm:$0xff]  ;;  %v778_v29 = vld [vmem:[%s13897_s2 + $0x1690] sm:$0xff]  ;;  %v781_v27 = vld [vmem:[%s13897_s2 + $0x16a8] sm:$0xff] }
 0x185   :  { %v978_v32 = vld [vmem:[%s13897_s2 + $0x1cd0] sm:$0xff]  ;;  %v6711_v39 = vpack.c.bf16 %v971_v28, %v968_v20  ;;  %v805_v20 = vld [vmem:[%s13897_s2 + $0x1768] sm:$0xff] }
 0x186   :  { %2649 = vmatmul.mubr.f32.vlgmr.msra.gmra.mrb[0].mxu0 %v10140_v54  ;;  %7448 = vmatpush3.bf16.msra.mxu1 %v7447_v42  ;;  %v6697_v42 = vpack.c.bf16 %v954_v35, %v951_v45  ;;  %v7481_v45 = vpack.c.bf16 %v781_v27, %v778_v29  ;;  %v974_v35 = vld [vmem:[%s13897_s2 + $0x1cb0] sm:$0xff] }
 0x187   :  { %6680 = vmatpush1.bf16.msra.mxu0 %v6679_v44  ;;  %7450 = vmatprep.subr.bf16.mxu1 %v7449_v43  ;;  %v953_v44 = vld [vmem:[%s13897_s2 + $0x1c08] sm:$0xff]  ;;  %v712_v43 = vld [vmem:[%s13897_s2 + $0x1480] sm:$0xff]  ;;  %v998_v27 = vld [vmem:[%s13897_s2 + $0x1d70] sm:$0xff] }
 0x188   :  { %6682 = vmatprep.subr.bf16.mxu0 %v6681_v48  ;;  %2719 = vmatprep.mubr.f32.mxu0 %v10567_v49  ;;  %v7467_v48 = vpack.c.bf16 %v661_v41, %v658_v8  ;;  %v6699_v22 = vpack.c.bf16 %v953_v44, %v950_v38  ;;  %v7469_v34 = vpack.c.bf16 %v715_v30, %v712_v43  ;;  %v977_v38 = vld [vmem:[%s13897_s2 + $0x1cc8] sm:$0xff]  ;;  %v784_v8 = vld [vmem:[%s13897_s2 + $0x16c0] sm:$0xff]  ;;  %v787_v41 = vld [vmem:[%s13897_s2 + $0x16d8] sm:$0xff] }
 0x189   :  { %3780 = vmatmul.mubr.f32.vlgmr.msra.gmra.mrb[14].mxu1 %v8934_v12  ;;  %v938_v12 = vld [vmem:[%s13897_s2 + $0x1b90] sm:$0xff]  ;;  %v984_v44 = vld [vmem:[%s13897_s2 + $0x1d00] sm:$0xff]  ;;  %v6715_v30 = vpack.c.bf16 %v977_v38, %v974_v35  ;;  %v811_v35 = vld [vmem:[%s13897_s2 + $0x1798] sm:$0xff] }
 0x18a   :  { %7452 = vmatpush3.bf16.msra.mxu1 %v7451_v56  ;;  %3849 = vmatprep.mubr.f32.mxu1 %v9368_v18  ;;  %v941_v18 = vld [vmem:[%s13897_s2 + $0x1ba8] sm:$0xff]  ;;  %v6701_v56 = vpack.c.bf16 %v960_v47, %v957_v25  ;;  %v7485_v25 = vpack.c.bf16 %v787_v41, %v784_v8  ;;  %v980_v47 = vld [vmem:[%s13897_s2 + $0x1ce0] sm:$0xff] }
 0x18b   :  { %6684 = vmatpush1.bf16.msra.mxu0 %v6683_v57  ;;  %7454 = vmatprep.subr.bf16.mxu1 %v7453_v58  ;;  %v6691_v55 = vpack.c.bf16 %v941_v18, %v938_v12  ;;  %v959_v57 = vld [vmem:[%s13897_s2 + $0x1c38] sm:$0xff]  ;;  %v718_v58 = vld [vmem:[%s13897_s2 + $0x14b0] sm:$0xff]  ;;  %v965_v12 = vld [vmem:[%s13897_s2 + $0x1c68] sm:$0xff] }
 0x18c   :  { %6686 = vmatprep.subr.bf16.mxu0 %v6685_v62  ;;  %v966_v62 = vld [vmem:[%s13897_s2 + $0x1c70] sm:$0xff]  ;;  %v6703_v2 = vpack.c.bf16 %v959_v57, %v956_v46  ;;  %v7473_v52 = vpack.c.bf16 %v721_v59, %v718_v58  ;;  %v972_v18 = vld [vmem:[%s13897_s2 + $0x1ca0] sm:$0xff]  ;;  %v6707_v16 = vpack.c.bf16 %v965_v12, %v962_v5  ;;  %v983_v46 = vld [vmem:[%s13897_s2 + $0x1cf8] sm:$0xff] }
 0x18d   :  { %v990_v57 = vld [vmem:[%s13897_s2 + $0x1d30] sm:$0xff]  ;;  %v6719_v59 = vpack.c.bf16 %v983_v46, %v980_v47  ;;  %v799_v5 = vld [vmem:[%s13897_s2 + $0x1738] sm:$0xff]  ;;  %v1004_v41 = vld [vmem:[%s13897_s2 + $0x1da0] sm:$0xff] }
 0x18e   :  { %7456 = vmatpush3.bf16.msra.mxu1 %v7455_v7  ;;  %v670_v7 = vld [vmem:[%s13897_s2 + $0x1330] sm:$0xff]  ;;  %v817_v47 = vld [vmem:[%s13897_s2 + $0x17c8] sm:$0xff] }
 0x18f   :  { %6688 = vmatpush1.bf16.msra.mxu0 %v6687_v9  ;;  %7458 = vmatprep.subr.bf16.mxu1 %v7457_v10  ;;  %v673_v9 = vld [vmem:[%s13897_s2 + $0x1348] sm:$0xff]  ;;  %v6705_v10 = vpack.c.bf16 %v966_v62, %v963_v60  ;;  %v7489_v60 = vpack.c.bf16 %v793_v51, %v790_v50  ;;  %v742_v62 = vld [vmem:[%s13897_s2 + $0x1570] sm:$0xff] }
 0x190   :  { %6690 = vmatprep.subr.bf16.mxu0 %v6689_v15  ;;  %v969_v15 = vld [vmem:[%s13897_s2 + $0x1c88] sm:$0xff]  ;;  %v7475_v26 = vpack.c.bf16 %v673_v9, %v670_v7  ;;  %v996_v9 = vld [vmem:[%s13897_s2 + $0x1d60] sm:$0xff]  ;;  %v1010_v51 = vld [vmem:[%s13897_s2 + $0x1dd0] sm:$0xff] }
 0x191   :  { %v993_v7 = vld [vmem:[%s13897_s2 + $0x1d48] sm:$0xff] }
 0x192   :  { %7460 = vmatpush3.bf16.msra.mxu1 %v7459_v23  ;;  %v676_v23 = vld [vmem:[%s13897_s2 + $0x1360] sm:$0xff] }
 0x193   :  { %6692 = vmatpush1.bf16.msra.mxu0 %v6691_v55  ;;  %7462 = vmatprep.subr.bf16.mxu1 %v7461_v24  ;;  %v679_v55 = vld [vmem:[%s13897_s2 + $0x1378] sm:$0xff]  ;;  %v6709_v24 = vpack.c.bf16 %v972_v18, %v969_v15  ;;  %v748_v15 = vld [vmem:[%s13897_s2 + $0x15a0] sm:$0xff] }
 0x194   :  { %6694 = vmatprep.subr.bf16.mxu0 %v6693_v31  ;;  %v975_v31 = vld [vmem:[%s13897_s2 + $0x1cb8] sm:$0xff]  ;;  %v7479_v33 = vpack.c.bf16 %v679_v55, %v676_v23  ;;  %v1002_v55 = vld [vmem:[%s13897_s2 + $0x1d90] sm:$0xff] }
 0x195   :  { %v751_v18 = vld [vmem:[%s13897_s2 + $0x15b8] sm:$0xff] }
 0x196   :  { %7464 = vmatpush3.bf16.msra.mxu1 %v7463_v36  ;;  %v730_v36 = vld [vmem:[%s13897_s2 + $0x1510] sm:$0xff]  ;;  %v999_v23 = vld [vmem:[%s13897_s2 + $0x1d78] sm:$0xff] }
 0x197   :  { %6696 = vmatpush1.bf16.msra.mxu0 %v6695_v37  ;;  %7466 = vmatprep.subr.bf16.mxu1 %v7465_v63  ;;  %v733_v37 = vld [vmem:[%s13897_s2 + $0x1528] sm:$0xff]  ;;  %v6713_v63 = vpack.c.bf16 %v978_v32, %v975_v31  ;;  %v754_v31 = vld [vmem:[%s13897_s2 + $0x15d0] sm:$0xff] }
 0x198   :  { %6698 = vmatprep.subr.bf16.mxu0 %v6697_v42  ;;  %v10693_v53 = vpop.f32.mrb[0].mxu1  ;;  %v981_v42 = vld [vmem:[%s13897_s2 + $0x1ce8] sm:$0xff]  ;;  %v7483_v43 = vpack.c.bf16 %v733_v37, %v730_v36  ;;  %v1008_v37 = vld [vmem:[%s13897_s2 + $0x1dc0] sm:$0xff] }
 0x199   :  { %v10701_v0 = vpop.f32.mrb[1].mxu1  ;;  %v757_v32 = vld [vmem:[%s13897_s2 + $0x15e8] sm:$0xff] }
 0x19a   :  { %7468 = vmatpush3.bf16.msra.mxu1 %v7467_v48  ;;  %v736_v48 = vld [vmem:[%s13897_s2 + $0x1540] sm:$0xff]  ;;  %v1005_v36 = vld [vmem:[%s13897_s2 + $0x1da8] sm:$0xff] }
 0x19b   :  { %6700 = vmatpush1.bf16.msra.mxu0 %v6699_v22  ;;  %7470 = vmatprep.subr.bf16.mxu1 %v7469_v34  ;;  %v739_v22 = vld [vmem:[%s13897_s2 + $0x1558] sm:$0xff]  ;;  %v6717_v34 = vpack.c.bf16 %v984_v44, %v981_v42  ;;  %v760_v42 = vld [vmem:[%s13897_s2 + $0x1600] sm:$0xff] }
 0x19c   :  { %6702 = vmatprep.subr.bf16.mxu0 %v6701_v56  ;;  %v987_v56 = vld [vmem:[%s13897_s2 + $0x1d18] sm:$0xff]  ;;  %v7487_v58 = vpack.c.bf16 %v739_v22, %v736_v48  ;;  %v1014_v22 = vld [vmem:[%s13897_s2 + $0x1df0] sm:$0xff] }
 0x19d   :  { %v763_v44 = vld [vmem:[%s13897_s2 + $0x1618] sm:$0xff] }
 0x19e   :  { %7472 = vmatpush3.bf16.msra.mxu1 %v7471_v1  ;;  %v745_v1 = vld [vmem:[%s13897_s2 + $0x1588] sm:$0xff]  ;;  %v1011_v48 = vld [vmem:[%s13897_s2 + $0x1dd8] sm:$0xff] }
 0x19f   :  { %6704 = vmatpush1.bf16.msra.mxu0 %v6703_v2  ;;  %7474 = vmatprep.subr.bf16.mxu1 %v7473_v52  ;;  %v6721_v2 = vpack.c.bf16 %v990_v57, %v987_v56  ;;  %v796_v52 = vld [vmem:[%s13897_s2 + $0x1720] sm:$0xff]  ;;  %v766_v56 = vld [vmem:[%s13897_s2 + $0x1630] sm:$0xff]  ;;  %v769_v57 = vld [vmem:[%s13897_s2 + $0x1648] sm:$0xff] }
 0x1a0   :  { %6706 = vmatprep.subr.bf16.mxu0 %v6705_v10  ;;  %v7491_v10 = vpack.c.bf16 %v745_v1, %v742_v62  ;;  %v7493_v13 = vpack.c.bf16 %v799_v5, %v796_v52  ;;  %v1017_v62 = vld [vmem:[%s13897_s2 + $0x1e08] sm:$0xff]  ;;  %v1020_v1 = vld [vmem:[%s13897_s2 + $0x1e20] sm:$0xff] }
 0x1a2   :  { %7476 = vmatpush3.bf16.msra.mxu1 %v7475_v26  ;;  %v6725_v26 = vpack.c.bf16 %v996_v9, %v993_v7  ;;  %v1016_v7 = vld [vmem:[%s13897_s2 + $0x1e00] sm:$0xff] }
 0x1a3   :  { %6708 = vmatpush1.bf16.msra.mxu0 %v6707_v16  ;;  %7478 = vmatprep.subr.bf16.mxu1 %v7477_v17  ;;  %v995_v16 = vld [vmem:[%s13897_s2 + $0x1d58] sm:$0xff]  ;;  %v802_v17 = vld [vmem:[%s13897_s2 + $0x1750] sm:$0xff]  ;;  %v772_v9 = vld [vmem:[%s13897_s2 + $0x1660] sm:$0xff] }
 0x1a4   :  { %6710 = vmatprep.subr.bf16.mxu0 %v6709_v24  ;;  %v7495_v24 = vpack.c.bf16 %v751_v18, %v748_v15  ;;  %v6727_v28 = vpack.c.bf16 %v995_v16, %v992_v14  ;;  %v7497_v29 = vpack.c.bf16 %v805_v20, %v802_v17  ;;  %v874_v14 = vld [vmem:[%s13897_s2 + $0x1990] sm:$0xff]  ;;  %v877_v15 = vld [vmem:[%s13897_s2 + $0x19a8] sm:$0xff] }
 0x1a5   :  { %v1026_v16 = vld [vmem:[%s13897_s2 + $0x1e50] sm:$0xff] }
 0x1a6   :  { %7480 = vmatpush3.bf16.msra.mxu1 %v7479_v33  ;;  %v6729_v33 = vpack.c.bf16 %v1002_v55, %v999_v23  ;;  %v7513_v23 = vpack.c.bf16 %v877_v15, %v874_v14  ;;  %v1022_v55 = vld [vmem:[%s13897_s2 + $0x1e30] sm:$0xff] }
 0x1a7   :  { %6712 = vmatpush1.bf16.msra.mxu0 %v6711_v39  ;;  %7482 = vmatprep.subr.bf16.mxu1 %v7481_v45  ;;  %v1001_v39 = vld [vmem:[%s13897_s2 + $0x1d88] sm:$0xff]  ;;  %v808_v45 = vld [vmem:[%s13897_s2 + $0x1780] sm:$0xff] }
 0x1a8   :  { %6714 = vmatprep.subr.bf16.mxu0 %v6713_v63  ;;  %v7499_v63 = vpack.c.bf16 %v757_v32, %v754_v31  ;;  %v6731_v38 = vpack.c.bf16 %v1001_v39, %v998_v27  ;;  %v7501_v8 = vpack.c.bf16 %v811_v35, %v808_v45  ;;  %v1025_v27 = vld [vmem:[%s13897_s2 + $0x1e48] sm:$0xff]  ;;  %v880_v31 = vld [vmem:[%s13897_s2 + $0x19c0] sm:$0xff]  ;;  %v883_v32 = vld [vmem:[%s13897_s2 + $0x19d8] sm:$0xff] }
 0x1a9   :  { %3850 = vmatmul.mubr.f32.vlgmr.msra.gmra.mrb[16].mxu1 %v9339_v4  ;;  %v986_v4 = vld [vmem:[%s13897_s2 + $0x1d10] sm:$0xff]  ;;  %v1029_v39 = vld [vmem:[%s13897_s2 + $0x1e68] sm:$0xff]  ;;  %v1032_v45 = vld [vmem:[%s13897_s2 + $0x1e80] sm:$0xff] }
 0x1aa   :  { %7484 = vmatpush3.bf16.msra.mxu1 %v7483_v43  ;;  %3919 = vmatprep.mubr.f32.mxu1 %v9765_v19  ;;  %v989_v19 = vld [vmem:[%s13897_s2 + $0x1d28] sm:$0xff]  ;;  %v6733_v43 = vpack.c.bf16 %v1008_v37, %v1005_v36  ;;  %v6747_v36 = vpack.c.bf16 %v1025_v27, %v1022_v55  ;;  %v7517_v37 = vpack.c.bf16 %v883_v32, %v880_v31  ;;  %v904_v55 = vld [vmem:[%s13897_s2 + $0x1a80] sm:$0xff] }
 0x1ab   :  { %6716 = vmatpush1.bf16.msra.mxu0 %v6715_v30  ;;  %7486 = vmatprep.subr.bf16.mxu1 %v7485_v25  ;;  %v6723_v12 = vpack.c.bf16 %v989_v19, %v986_v4  ;;  %v1007_v30 = vld [vmem:[%s13897_s2 + $0x1db8] sm:$0xff]  ;;  %v814_v25 = vld [vmem:[%s13897_s2 + $0x17b0] sm:$0xff]  ;;  %v7507_v19 = vpack.c.bf16 %v769_v57, %v766_v56  ;;  %v1041_v57 = vld [vmem:[%s13897_s2 + $0x1ec8] sm:$0xff] }
 0x1ac   :  { %6718 = vmatprep.subr.bf16.mxu0 %v6717_v34  ;;  %v7503_v34 = vpack.c.bf16 %v763_v44, %v760_v42  ;;  %v6735_v46 = vpack.c.bf16 %v1007_v30, %v1004_v41  ;;  %v7505_v50 = vpack.c.bf16 %v817_v47, %v814_v25  ;;  %v823_v4 = vld [vmem:[%s13897_s2 + $0x17f8] sm:$0xff]  ;;  %v6749_v41 = vpack.c.bf16 %v1032_v45, %v1029_v39  ;;  %v886_v44 = vld [vmem:[%s13897_s2 + $0x19f0] sm:$0xff]  ;;  %v1052_v39 = vld [vmem:[%s13897_s2 + $0x1f20] sm:$0xff] }
 0x1ad   :  { %v1031_v42 = vld [vmem:[%s13897_s2 + $0x1e78] sm:$0xff]  ;;  %v1038_v25 = vld [vmem:[%s13897_s2 + $0x1eb0] sm:$0xff]  ;;  %v856_v45 = vld [vmem:[%s13897_s2 + $0x1900] sm:$0xff] }
 0x1ae   :  { %7488 = vmatpush3.bf16.msra.mxu1 %v7487_v58  ;;  %v6737_v58 = vpack.c.bf16 %v1014_v22, %v1011_v48  ;;  %v1035_v30 = vld [vmem:[%s13897_s2 + $0x1e98] sm:$0xff] }
 0x1af   :  { %6720 = vmatpush1.bf16.msra.mxu0 %v6719_v59  ;;  %7490 = vmatprep.subr.bf16.mxu1 %v7489_v60  ;;  %v1013_v59 = vld [vmem:[%s13897_s2 + $0x1de8] sm:$0xff]  ;;  %v820_v60 = vld [vmem:[%s13897_s2 + $0x17e0] sm:$0xff]  ;;  %v895_v56 = vld [vmem:[%s13897_s2 + $0x1a38] sm:$0xff] }
 0x1b0   :  { %6722 = vmatprep.subr.bf16.mxu0 %v6721_v2  ;;  %v10924_v2 = vld [vmem:[%s13898_s0 + $0x28] sm:$0xff]  ;;  %v6739_v52 = vpack.c.bf16 %v1013_v59, %v1010_v51  ;;  %v7509_v5 = vpack.c.bf16 %v823_v4, %v820_v60  ;;  %v892_v51 = vld [vmem:[%s13897_s2 + $0x1a20] sm:$0xff] }
 0x1b1   :  { %v10946_v18 = vrot.slane %v10924_v2, %v8342_v11  ;;  %v7525_v4 = vpack.c.bf16 %v895_v56, %v892_v51 }
 0x1b2   :  { %7492 = vmatpush3.bf16.msra.mxu1 %v7491_v10  ;;  %v775_v10 = vld [vmem:[%s13897_s2 + $0x1678] sm:$0xff] }
 0x1b3   :  { %6724 = vmatpush1.bf16.msra.mxu0 %v6723_v12  ;;  %7494 = vmatprep.subr.bf16.mxu1 %v7493_v13  ;;  %v6741_v12 = vpack.c.bf16 %v1020_v1, %v1017_v62  ;;  %v1019_v13 = vld [vmem:[%s13897_s2 + $0x1e18] sm:$0xff]  ;;  %v7511_v17 = vpack.c.bf16 %v775_v10, %v772_v9  ;;  %v1040_v62 = vld [vmem:[%s13897_s2 + $0x1ec0] sm:$0xff]  ;;  %v901_v9 = vld [vmem:[%s13897_s2 + $0x1a68] sm:$0xff] }
 0x1b4   :  { %6726 = vmatprep.subr.bf16.mxu0 %v6725_v26  ;;  %v1023_v26 = vld [vmem:[%s13897_s2 + $0x1e38] sm:$0xff]  ;;  %v6743_v20 = vpack.c.bf16 %v1019_v13, %v1016_v7  ;;  %v844_v1 = vld [vmem:[%s13897_s2 + $0x18a0] sm:$0xff]  ;;  %v898_v7 = vld [vmem:[%s13897_s2 + $0x1a50] sm:$0xff] }
 0x1b5   :  { %v1047_v10 = vld [vmem:[%s13897_s2 + $0x1ef8] sm:$0xff]  ;;  %v7529_v15 = vpack.c.bf16 %v901_v9, %v898_v7  ;;  %v1074_v7 = vld [vmem:[%s13897_s2 + $0x1fd0] sm:$0xff] }
 0x1b6   :  { %7496 = vmatpush3.bf16.msra.mxu1 %v7495_v24  ;;  %v826_v24 = vld [vmem:[%s13897_s2 + $0x1810] sm:$0xff] }
 0x1b7   :  { %6728 = vmatpush1.bf16.msra.mxu0 %v6727_v28  ;;  %7498 = vmatprep.subr.bf16.mxu1 %v7497_v29  ;;  %v829_v28 = vld [vmem:[%s13897_s2 + $0x1828] sm:$0xff]  ;;  %v6745_v29 = vpack.c.bf16 %v1026_v16, %v1023_v26  ;;  %v1046_v26 = vld [vmem:[%s13897_s2 + $0x1ef0] sm:$0xff] }
 0x1b8   :  { %6730 = vmatprep.subr.bf16.mxu0 %v6729_v33  ;;  %v10974_v33 = vcombine.high %v10946_v18, %v10946_v18  ;;  %v7515_v35 = vpack.c.bf16 %v829_v28, %v826_v24  ;;  %v850_v16 = vld [vmem:[%s13897_s2 + $0x18d0] sm:$0xff]  ;;  %v907_v24 = vld [vmem:[%s13897_s2 + $0x1a98] sm:$0xff]  ;;  %v1053_v28 = vld [vmem:[%s13897_s2 + $0x1f28] sm:$0xff] }
 0x1b9   :  { %v7533_v32 = vpack.c.bf16 %v907_v24, %v904_v55  ;;  %v1080_v55 = vld [vmem:[%s13897_s2 + $0x2000] sm:$0xff] }
 0x1ba   :  { %7500 = vmatpush3.bf16.msra.mxu1 %v7499_v63  ;;  %v1028_v63 = vld [vmem:[%s13897_s2 + $0x1e60] sm:$0xff] }
 0x1bb   :  { %6732 = vmatpush1.bf16.msra.mxu0 %v6731_v38  ;;  %7502 = vmatprep.subr.bf16.mxu1 %v7501_v8  ;;  %v832_v38 = vld [vmem:[%s13897_s2 + $0x1840] sm:$0xff]  ;;  %v835_v8 = vld [vmem:[%s13897_s2 + $0x1858] sm:$0xff]  ;;  %v6751_v48 = vpack.c.bf16 %v1031_v42, %v1028_v63  ;;  %v910_v63 = vld [vmem:[%s13897_s2 + $0x1ab0] sm:$0xff] }
 0x1bc   :  { %6734 = vmatprep.subr.bf16.mxu0 %v6733_v43  ;;  %v889_v43 = vld [vmem:[%s13897_s2 + $0x1a08] sm:$0xff]  ;;  %v7519_v47 = vpack.c.bf16 %v835_v8, %v832_v38  ;;  %v1059_v8 = vld [vmem:[%s13897_s2 + $0x1f58] sm:$0xff] }
 0x1bd   :  { %v7521_v22 = vpack.c.bf16 %v889_v43, %v886_v44  ;;  %v913_v38 = vld [vmem:[%s13897_s2 + $0x1ac8] sm:$0xff] }
 0x1be   :  { %7504 = vmatpush3.bf16.msra.mxu1 %v7503_v34  ;;  %v838_v34 = vld [vmem:[%s13897_s2 + $0x1870] sm:$0xff]  ;;  %v7537_v43 = vpack.c.bf16 %v913_v38, %v910_v63 }
 0x1bf   :  { %6736 = vmatpush1.bf16.msra.mxu0 %v6735_v46  ;;  %7506 = vmatprep.subr.bf16.mxu1 %v7505_v50  ;;  %v841_v46 = vld [vmem:[%s13897_s2 + $0x1888] sm:$0xff]  ;;  %v6753_v50 = vpack.c.bf16 %v1038_v25, %v1035_v30  ;;  %v1058_v30 = vld [vmem:[%s13897_s2 + $0x1f50] sm:$0xff] }
 0x1c0   :  { %6738 = vmatprep.subr.bf16.mxu0 %v6737_v58  ;;  %v1044_v58 = vld [vmem:[%s13897_s2 + $0x1ee0] sm:$0xff]  ;;  %v7523_v59 = vpack.c.bf16 %v841_v46, %v838_v34  ;;  %v862_v25 = vld [vmem:[%s13897_s2 + $0x1930] sm:$0xff]  ;;  %v919_v34 = vld [vmem:[%s13897_s2 + $0x1af8] sm:$0xff] }
 0x1c1   :  { %v1065_v46 = vld [vmem:[%s13897_s2 + $0x1f88] sm:$0xff]  ;;  %v1086_v63 = vld [vmem:[%s13897_s2 + $0x2030] sm:$0xff] }
 0x1c2   :  { %7508 = vmatpush3.bf16.msra.mxu1 %v7507_v19  ;;  %v847_v19 = vld [vmem:[%s13897_s2 + $0x18b8] sm:$0xff] }
 0x1c3   :  { %6740 = vmatpush1.bf16.msra.mxu0 %v6739_v52  ;;  %7510 = vmatprep.subr.bf16.mxu1 %v7509_v5  ;;  %v6757_v52 = vpack.c.bf16 %v1044_v58, %v1041_v57  ;;  %v1043_v5 = vld [vmem:[%s13897_s2 + $0x1ed8] sm:$0xff]  ;;  %v7527_v13 = vpack.c.bf16 %v847_v19, %v844_v1  ;;  %v1064_v57 = vld [vmem:[%s13897_s2 + $0x1f80] sm:$0xff]  ;;  %v970_v1 = vld [vmem:[%s13897_s2 + $0x1c90] sm:$0xff] }
 0x1c4   :  { %6742 = vmatprep.subr.bf16.mxu0 %v6741_v12  ;;  %v1050_v12 = vld [vmem:[%s13897_s2 + $0x1f10] sm:$0xff]  ;;  %v6759_v14 = vpack.c.bf16 %v1043_v5, %v1040_v62  ;;  %v868_v58 = vld [vmem:[%s13897_s2 + $0x1960] sm:$0xff]  ;;  %v1067_v62 = vld [vmem:[%s13897_s2 + $0x1f98] sm:$0xff] }
 0x1c5   :  { %v973_v19 = vld [vmem:[%s13897_s2 + $0x1ca8] sm:$0xff]  ;;  %v1071_v5 = vld [vmem:[%s13897_s2 + $0x1fb8] sm:$0xff] }
 0x1c6   :  { %2720 = vmatmul.mubr.f32.vlgmr.msra.gmra.mrb[0].mxu0 %v10539_v40  ;;  %7512 = vmatpush3.bf16.msra.mxu1 %v7511_v17  ;;  %v853_v17 = vld [vmem:[%s13897_s2 + $0x18e8] sm:$0xff] }
 0x1c7   :  { %6744 = vmatpush1.bf16.msra.mxu0 %v6743_v20  ;;  %7514 = vmatprep.subr.bf16.mxu1 %v7513_v23  ;;  %v6761_v20 = vpack.c.bf16 %v1050_v12, %v1047_v10  ;;  %v1049_v23 = vld [vmem:[%s13897_s2 + $0x1f08] sm:$0xff]  ;;  %v7531_v27 = vpack.c.bf16 %v853_v17, %v850_v16  ;;  %v6775_v10 = vpack.c.bf16 %v1067_v62, %v1064_v57  ;;  %v976_v17 = vld [vmem:[%s13897_s2 + $0x1cc0] sm:$0xff]  ;;  %v994_v57 = vld [vmem:[%s13897_s2 + $0x1d50] sm:$0xff] }
 0x1c8   :  { %6746 = vmatprep.subr.bf16.mxu0 %v6745_v29  ;;  %2790 = vmatprep.mubr.f32.mxu0 %v10974_v33  ;;  %v1056_v29 = vld [vmem:[%s13897_s2 + $0x1f40] sm:$0xff]  ;;  %v6763_v31 = vpack.c.bf16 %v1049_v23, %v1046_v26  ;;  %v7545_v12 = vpack.c.bf16 %v973_v19, %v970_v1  ;;  %v6777_v26 = vpack.c.bf16 %v1074_v7, %v1071_v5  ;;  %v1073_v16 = vld [vmem:[%s13897_s2 + $0x1fc8] sm:$0xff]  ;;  %v1094_v5 = vld [vmem:[%s13897_s2 + $0x2070] sm:$0xff] }
 0x1c9   :  { %3920 = vmatmul.mubr.f32.vlgmr.msra.gmra.mrb[18].mxu1 %v9737_v3  ;;  %v1034_v3 = vld [vmem:[%s13897_s2 + $0x1e90] sm:$0xff]  ;;  %v1077_v23 = vld [vmem:[%s13897_s2 + $0x1fe8] sm:$0xff] }
 0x1ca   :  { %7516 = vmatpush3.bf16.msra.mxu1 %v7515_v35  ;;  %3989 = vmatprep.mubr.f32.mxu1 %v10168_v6  ;;  %v1037_v6 = vld [vmem:[%s13897_s2 + $0x1ea8] sm:$0xff]  ;;  %v859_v35 = vld [vmem:[%s13897_s2 + $0x1918] sm:$0xff]  ;;  %v946_v7 = vld [vmem:[%s13897_s2 + $0x1bd0] sm:$0xff] }
 0x1cb   :  { %6748 = vmatpush1.bf16.msra.mxu0 %v6747_v36  ;;  %7518 = vmatprep.subr.bf16.mxu1 %v7517_v37  ;;  %v6755_v60 = vpack.c.bf16 %v1037_v6, %v1034_v3  ;;  %v6765_v36 = vpack.c.bf16 %v1056_v29, %v1053_v28  ;;  %v1055_v37 = vld [vmem:[%s13897_s2 + $0x1f38] sm:$0xff]  ;;  %v7535_v42 = vpack.c.bf16 %v859_v35, %v856_v45  ;;  %v916_v3 = vld [vmem:[%s13897_s2 + $0x1ae0] sm:$0xff]  ;;  %v982_v35 = vld [vmem:[%s13897_s2 + $0x1cf0] sm:$0xff] }
 0x1cc   :  { %6750 = vmatprep.subr.bf16.mxu0 %v6749_v41  ;;  %v1062_v41 = vld [vmem:[%s13897_s2 + $0x1f70] sm:$0xff]  ;;  %v6767_v44 = vpack.c.bf16 %v1055_v37, %v1052_v39  ;;  %v7541_v56 = vpack.c.bf16 %v919_v34, %v916_v3  ;;  %v6781_v39 = vpack.c.bf16 %v1080_v55, %v1077_v23  ;;  %v1079_v45 = vld [vmem:[%s13897_s2 + $0x1ff8] sm:$0xff]  ;;  %v1100_v23 = vld [vmem:[%s13897_s2 + $0x20a0] sm:$0xff] }
 0x1cd   :  { %v1083_v37 = vld [vmem:[%s13897_s2 + $0x2018] sm:$0xff]  ;;  %v952_v55 = vld [vmem:[%s13897_s2 + $0x1c00] sm:$0xff] }
 0x1ce   :  { %7520 = vmatpush3.bf16.msra.mxu1 %v7519_v47  ;;  %v865_v47 = vld [vmem:[%s13897_s2 + $0x1948] sm:$0xff] }
 0x1cf   :  { %6752 = vmatpush1.bf16.msra.mxu0 %v6751_v48  ;;  %7522 = vmatprep.subr.bf16.mxu1 %v7521_v22  ;;  %v6769_v48 = vpack.c.bf16 %v1062_v41, %v1059_v8  ;;  %v1061_v22 = vld [vmem:[%s13897_s2 + $0x1f68] sm:$0xff]  ;;  %v7539_v6 = vpack.c.bf16 %v865_v47, %v862_v25  ;;  %v991_v25 = vld [vmem:[%s13897_s2 + $0x1d38] sm:$0xff] }
 0x1d0   :  { %6754 = vmatprep.subr.bf16.mxu0 %v6753_v50  ;;  %v1068_v50 = vld [vmem:[%s13897_s2 + $0x1fa0] sm:$0xff]  ;;  %v6771_v51 = vpack.c.bf16 %v1061_v22, %v1058_v30  ;;  %v1089_v47 = vld [vmem:[%s13897_s2 + $0x2048] sm:$0xff] }
 0x1d1   :  { %v988_v30 = vld [vmem:[%s13897_s2 + $0x1d20] sm:$0xff] }
 0x1d2   :  { %7524 = vmatpush3.bf16.msra.mxu1 %v7523_v59  ;;  %v871_v59 = vld [vmem:[%s13897_s2 + $0x1978] sm:$0xff]  ;;  %v7557_v34 = vpack.c.bf16 %v991_v25, %v988_v30 }
 0x1d3   :  { %6756 = vmatpush1.bf16.msra.mxu0 %v6755_v60  ;;  %7526 = vmatprep.subr.bf16.mxu1 %v7525_v4  ;;  %v11139_v60 = vpop.f32.mrb[2].mxu1  ;;  %v6773_v4 = vpack.c.bf16 %v1068_v50, %v1065_v46  ;;  %v7543_v9 = vpack.c.bf16 %v871_v59, %v868_v58  ;;  %v1088_v46 = vld [vmem:[%s13897_s2 + $0x2040] sm:$0xff]  ;;  %v997_v58 = vld [vmem:[%s13897_s2 + $0x1d68] sm:$0xff]  ;;  %v1095_v59 = vld [vmem:[%s13897_s2 + $0x2078] sm:$0xff] }
 0x1d4   :  { %6758 = vmatprep.subr.bf16.mxu0 %v6757_v52  ;;  %v11150_v52 = vpop.f32.mrb[3].mxu1  ;;  %v940_v50 = vld [vmem:[%s13897_s2 + $0x1ba0] sm:$0xff]  ;;  %v7561_v19 = vpack.c.bf16 %v997_v58, %v994_v57 }
 0x1d5   :  { %v1790_v58 = vld [vmem:[%s13899_s3] sm:$0x7] }
 0x1d6   :  { %7528 = vmatpush3.bf16.msra.mxu1 %v7527_v13  ;;  %v1070_v13 = vld [vmem:[%s13897_s2 + $0x1fb0] sm:$0xff] }
 0x1d7   :  { %6760 = vmatpush1.bf16.msra.mxu0 %v6759_v14  ;;  %7530 = vmatprep.subr.bf16.mxu1 %v7529_v15  ;;  %v922_v14 = vld [vmem:[%s13897_s2 + $0x1b10] sm:$0xff]  ;;  %v925_v15 = vld [vmem:[%s13897_s2 + $0x1b28] sm:$0xff]  ;;  %v6779_v28 = vpack.c.bf16 %v1073_v16, %v1070_v13  ;;  %v1000_v13 = vld [vmem:[%s13897_s2 + $0x1d80] sm:$0xff] }
 0x1d8   :  { %6762 = vmatprep.subr.bf16.mxu0 %v6761_v20  ;;  %v979_v20 = vld [vmem:[%s13897_s2 + $0x1cd8] sm:$0xff]  ;;  %v7547_v24 = vpack.c.bf16 %v925_v15, %v922_v14  ;;  %v1101_v15 = vld [vmem:[%s13897_s2 + $0x20a8] sm:$0xff] }
 0x1d9   :  { %v7549_v29 = vpack.c.bf16 %v979_v20, %v976_v17  ;;  %v1003_v14 = vld [vmem:[%s13897_s2 + $0x1d98] sm:$0xff] }
 0x1da   :  { %7532 = vmatpush3.bf16.msra.mxu1 %v7531_v27  ;;  %v1076_v27 = vld [vmem:[%s13897_s2 + $0x1fe0] sm:$0xff]  ;;  %v7565_v20 = vpack.c.bf16 %v1003_v14, %v1000_v13  ;;  %v1021_v13 = vld [vmem:[%s13897_s2 + $0x1e28] sm:$0xff] }
 0x1db   :  { %6764 = vmatpush1.bf16.msra.mxu0 %v6763_v31  ;;  %7534 = vmatprep.subr.bf16.mxu1 %v7533_v32  ;;  %v928_v31 = vld [vmem:[%s13897_s2 + $0x1b40] sm:$0xff]  ;;  %v931_v32 = vld [vmem:[%s13897_s2 + $0x1b58] sm:$0xff]  ;;  %v6783_v8 = vpack.c.bf16 %v1079_v45, %v1076_v27  ;;  %v1006_v27 = vld [vmem:[%s13897_s2 + $0x1db0] sm:$0xff] }
 0x1dc   :  { %6766 = vmatprep.subr.bf16.mxu0 %v6765_v36  ;;  %v985_v36 = vld [vmem:[%s13897_s2 + $0x1d08] sm:$0xff]  ;;  %v7551_v38 = vpack.c.bf16 %v931_v32, %v928_v31  ;;  %v1107_v32 = vld [vmem:[%s13897_s2 + $0x20d8] sm:$0xff] }
 0x1dd   :  { %v7553_v41 = vpack.c.bf16 %v985_v36, %v982_v35  ;;  %v1009_v31 = vld [vmem:[%s13897_s2 + $0x1dc8] sm:$0xff] }
 0x1de   :  { %7536 = vmatpush3.bf16.msra.mxu1 %v7535_v42  ;;  %v934_v42 = vld [vmem:[%s13897_s2 + $0x1b70] sm:$0xff]  ;;  %v7569_v36 = vpack.c.bf16 %v1009_v31, %v1006_v27 }
 0x1df   :  { %6768 = vmatpush1.bf16.msra.mxu0 %v6767_v44  ;;  %7538 = vmatprep.subr.bf16.mxu1 %v7537_v43  ;;  %v937_v44 = vld [vmem:[%s13897_s2 + $0x1b88] sm:$0xff]  ;;  %v6785_v43 = vpack.c.bf16 %v1086_v63, %v1083_v37  ;;  %v1106_v37 = vld [vmem:[%s13897_s2 + $0x20d0] sm:$0xff] }
 0x1e0   :  { %6770 = vmatprep.subr.bf16.mxu0 %v6769_v48  ;;  %v1092_v48 = vld [vmem:[%s13897_s2 + $0x2060] sm:$0xff]  ;;  %v7555_v22 = vpack.c.bf16 %v937_v44, %v934_v42  ;;  %v958_v63 = vld [vmem:[%s13897_s2 + $0x1c30] sm:$0xff]  ;;  %v1015_v42 = vld [vmem:[%s13897_s2 + $0x1df8] sm:$0xff]  ;;  %v1902_v44 = vcombine.high %v10924_v2, %v10924_v2 }
 0x1e1   :  { %v964_v2 = vld [vmem:[%s13897_s2 + $0x1c60] sm:$0xff] }
 0x1e2   :  { %7540 = vmatpush3.bf16.msra.mxu1 %v7539_v6  ;;  %v943_v6 = vld [vmem:[%s13897_s2 + $0x1bb8] sm:$0xff] }
 0x1e3   :  { %6772 = vmatpush1.bf16.msra.mxu0 %v6771_v51  ;;  %7542 = vmatprep.subr.bf16.mxu1 %v7541_v56  ;;  %v6789_v51 = vpack.c.bf16 %v1092_v48, %v1089_v47  ;;  %v1091_v56 = vld [vmem:[%s13897_s2 + $0x2058] sm:$0xff]  ;;  %v7559_v62 = vpack.c.bf16 %v943_v6, %v940_v50  ;;  %v1112_v48 = vld [vmem:[%s13897_s2 + $0x2100] sm:$0xff]  ;;  %v1066_v50 = vld [vmem:[%s13897_s2 + $0x1f90] sm:$0xff] }
 0x1e4   :  { %6774 = vmatprep.subr.bf16.mxu0 %v6773_v4  ;;  %v1098_v4 = vld [vmem:[%s13897_s2 + $0x2090] sm:$0xff]  ;;  %v6791_v1 = vpack.c.bf16 %v1091_v56, %v1088_v46  ;;  %v1115_v46 = vld [vmem:[%s13897_s2 + $0x2118] sm:$0xff]  ;;  %v1069_v6 = vld [vmem:[%s13897_s2 + $0x1fa8] sm:$0xff]  ;;  %v1802_v56 = vsub.s32 2, %v8315_v61 }
 0x1e6   :  { %7544 = vmatpush3.bf16.msra.mxu1 %v7543_v9  ;;  %v949_v9 = vld [vmem:[%s13897_s2 + $0x1be8] sm:$0xff] }
 0x1e7   :  { %6776 = vmatpush1.bf16.msra.mxu0 %v6775_v10  ;;  %7546 = vmatprep.subr.bf16.mxu1 %v7545_v12  ;;  %v6793_v10 = vpack.c.bf16 %v1098_v4, %v1095_v59  ;;  %v1097_v12 = vld [vmem:[%s13897_s2 + $0x2088] sm:$0xff]  ;;  %v7563_v16 = vpack.c.bf16 %v949_v9, %v946_v7  ;;  %v1119_v59 = vld [vmem:[%s13897_s2 + $0x2138] sm:$0xff]  ;;  %v1122_v4 = vld [vmem:[%s13897_s2 + $0x2150] sm:$0xff]  ;;  %v6807_v7 = vpack.c.bf16 %v1115_v46, %v1112_v48 }
 0x1e8   :  { %6778 = vmatprep.subr.bf16.mxu0 %v6777_v26  ;;  %v1104_v26 = vld [vmem:[%s13897_s2 + $0x20c0] sm:$0xff]  ;;  %v6795_v17 = vpack.c.bf16 %v1097_v12, %v1094_v5  ;;  %v1803_v5 = vrot.slane %v1790_v58, %v1802_v56  ;;  %v7577_v9 = vpack.c.bf16 %v1069_v6, %v1066_v50  ;;  %v1018_v12 = vld [vmem:[%s13897_s2 + $0x1e10] sm:$0xff]  ;;  %v1033_v48 = vld [vmem:[%s13897_s2 + $0x1e88] sm:$0xff] }
 0x1e9   :  { %3990 = vmatmul.mubr.f32.vlgmr.msra.gmra.mrb[20].mxu1 %v10140_v54  ;;  %v1082_v54 = vld [vmem:[%s13897_s2 + $0x2010] sm:$0xff]  ;;  %v7579_v31 = vpack.c.bf16 %v1021_v13, %v1018_v12  ;;  %v1140_v46 = vld [vmem:[%s13897_s2 + $0x21e0] sm:$0xff] }
 0x1ea   :  { %7548 = vmatpush3.bf16.msra.mxu1 %v7547_v24  ;;  %4059 = vmatprep.mubr.f32.mxu1 %v10567_v49  ;;  %v1085_v49 = vld [vmem:[%s13897_s2 + $0x2028] sm:$0xff]  ;;  %v955_v24 = vld [vmem:[%s13897_s2 + $0x1c18] sm:$0xff]  ;;  %v1036_v58 = vld [vmem:[%s13897_s2 + $0x1ea0] sm:$0xff] }
 0x1eb   :  { %6780 = vmatpush1.bf16.msra.mxu0 %v6779_v28  ;;  %7550 = vmatprep.subr.bf16.mxu1 %v7549_v29  ;;  %v6787_v3 = vpack.c.bf16 %v1085_v49, %v1082_v54  ;;  %v6797_v28 = vpack.c.bf16 %v1104_v26, %v1101_v15  ;;  %v1103_v29 = vld [vmem:[%s13897_s2 + $0x20b8] sm:$0xff]  ;;  %v7567_v45 = vpack.c.bf16 %v955_v24, %v952_v55  ;;  %v1012_v54 = vld [vmem:[%s13897_s2 + $0x1de0] sm:$0xff]  ;;  %v1125_v55 = vld [vmem:[%s13897_s2 + $0x2168] sm:$0xff] }
 0x1ec   :  { %6782 = vmatprep.subr.bf16.mxu0 %v6781_v39  ;;  %v1110_v39 = vld [vmem:[%s13897_s2 + $0x20f0] sm:$0xff]  ;;  %v6799_v35 = vpack.c.bf16 %v1103_v29, %v1100_v23  ;;  %v1116_v49 = vld [vmem:[%s13897_s2 + $0x2120] sm:$0xff]  ;;  %v7573_v47 = vpack.c.bf16 %v1015_v42, %v1012_v54  ;;  %v6809_v15 = vpack.c.bf16 %v1122_v4, %v1119_v59  ;;  %v1081_v54 = vld [vmem:[%s13897_s2 + $0x2008] sm:$0xff] }
 0x1ed   :  { %v1072_v26 = vld [vmem:[%s13897_s2 + $0x1fc0] sm:$0xff]  ;;  %v1131_v42 = vld [vmem:[%s13897_s2 + $0x2198] sm:$0xff]  ;;  %v1142_v13 = vld [vmem:[%s13897_s2 + $0x21f0] sm:$0xff] }
 0x1ee   :  { %7552 = vmatpush3.bf16.msra.mxu1 %v7551_v38  ;;  %v961_v38 = vld [vmem:[%s13897_s2 + $0x1c48] sm:$0xff]  ;;  %v1128_v24 = vld [vmem:[%s13897_s2 + $0x2180] sm:$0xff]  ;;  %v1039_v59 = vld [vmem:[%s13897_s2 + $0x1eb8] sm:$0xff] }
 0x1ef   :  { %6784 = vmatpush1.bf16.msra.mxu0 %v6783_v8  ;;  %7554 = vmatprep.subr.bf16.mxu1 %v7553_v41  ;;  %v6801_v8 = vpack.c.bf16 %v1110_v39, %v1107_v32  ;;  %v1109_v41 = vld [vmem:[%s13897_s2 + $0x20e8] sm:$0xff]  ;;  %v7571_v30 = vpack.c.bf16 %v961_v38, %v958_v63  ;;  %v6813_v38 = vpack.c.bf16 %v1128_v24, %v1125_v55  ;;  %v1152_v24 = vld [vmem:[%s13897_s2 + $0x2240] sm:$0xff] }
 0x1f0   :  { %6786 = vmatprep.subr.bf16.mxu0 %v6785_v43  ;;  %v1113_v43 = vld [vmem:[%s13897_s2 + $0x2108] sm:$0xff]  ;;  %v6803_v25 = vpack.c.bf16 %v1109_v41, %v1106_v37  ;;  %v1078_v41 = vld [vmem:[%s13897_s2 + $0x1ff0] sm:$0xff] }
 0x1f1   :  { %v1149_v55 = vld [vmem:[%s13897_s2 + $0x2228] sm:$0xff] }
 0x1f2   :  { %7556 = vmatpush3.bf16.msra.mxu1 %v7555_v22  ;;  %v967_v22 = vld [vmem:[%s13897_s2 + $0x1c78] sm:$0xff] }
 0x1f3   :  { %6788 = vmatpush1.bf16.msra.mxu0 %v6787_v3  ;;  %7558 = vmatprep.subr.bf16.mxu1 %v7557_v34  ;;  %v5300_v3 = vpop.f32.mrb[4].mxu1  ;;  %v6805_v34 = vpack.c.bf16 %v1116_v49, %v1113_v43 }
 0x1f4   :  { %6790 = vmatprep.subr.bf16.mxu0 %v6789_v51  ;;  %v11349_v51 = vrot.slane %v1902_v44, %v8342_v11  ;;  %v5301_v57 = vpop.f32.mrb[5].mxu1  ;;  %v1134_v44 = vld [vmem:[%s13897_s2 + $0x21b0] sm:$0xff] }
 0x1f5   :  { %v5335_v14 = vpop.f32.mrb[6].mxu1 }
 0x1f6   :  { %7560 = vmatpush3.bf16.msra.mxu1 %v7559_v62  ;;  %v5302_v62 = vadd.f32 %v5301_v57, %v5300_v3  ;;  %v5336_v23 = vpop.f32.mrb[7].mxu1  ;;  %v1087_v3 = vld [vmem:[%s13897_s2 + $0x2038] sm:$0xff]  ;;  %v1136_v57 = vld [vmem:[%s13897_s2 + $0x21c0] sm:$0xff] }
 0x1f7   :  { %6792 = vmatpush1.bf16.msra.mxu0 %v6791_v1  ;;  %7562 = vmatprep.subr.bf16.mxu1 %v7561_v19  ;;  %v7575_v1 = vpack.c.bf16 %v967_v22, %v964_v2  ;;  %v1118_v19 = vld [vmem:[%s13897_s2 + $0x2130] sm:$0xff]  ;;  %v6817_v2 = vpack.c.bf16 %v1134_v44, %v1131_v42  ;;  %v1084_v22 = vld [vmem:[%s13897_s2 + $0x2020] sm:$0xff] }
 0x1f8   :  { %6794 = vmatprep.subr.bf16.mxu0 %v6793_v10  ;;  %v1121_v10 = vld [vmem:[%s13897_s2 + $0x2148] sm:$0xff]  ;;  %v7589_v56 = vpack.c.bf16 %v1087_v3, %v1084_v22  ;;  %v1154_v42 = vld [vmem:[%s13897_s2 + $0x2250] sm:$0xff] }
 0x1f9   :  { %v6811_v27 = vpack.c.bf16 %v1121_v10, %v1118_v19  ;;  %v1093_v19 = vld [vmem:[%s13897_s2 + $0x2068] sm:$0xff]  ;;  %v1054_v44 = vld [vmem:[%s13897_s2 + $0x1f30] sm:$0xff] }
 0x1fa   :  { %7564 = vmatpush3.bf16.msra.mxu1 %v7563_v16  ;;  %v1075_v16 = vld [vmem:[%s13897_s2 + $0x1fd8] sm:$0xff] }
 0x1fb   :  { %6796 = vmatpush1.bf16.msra.mxu0 %v6795_v17  ;;  %7566 = vmatprep.subr.bf16.mxu1 %v7565_v20  ;;  %v11381_v17 = vcombine.high %v11349_v51, %v11349_v51  ;;  %v3432_v20 = vadd.f32 %v5302_v62, %v1803_v5  ;;  %v7581_v39 = vpack.c.bf16 %v1075_v16, %v1072_v26  ;;  %v1139_v62 = vld [vmem:[%s13897_s2 + $0x21d8] sm:$0xff]  ;;  %v1145_v16 = vld [vmem:[%s13897_s2 + $0x2208] sm:$0xff] }
 0x1fc   :  { %6798 = vmatprep.subr.bf16.mxu0 %v6797_v28  ;;  %v5337_v28 = vadd.f32 %v5336_v23, %v5335_v14  ;;  %v5370_v29 = vpop.f32.mrb[8].mxu1  ;;  %v1143_v5 = vld [vmem:[%s13897_s2 + $0x21f8] sm:$0xff]  ;;  %v6823_v10 = vpack.c.bf16 %v1139_v62, %v1136_v57  ;;  %v1042_v14 = vld [vmem:[%s13897_s2 + $0x1ed0] sm:$0xff]  ;;  %v1165_v62 = vld [vmem:[%s13897_s2 + $0x22a8] sm:$0xff] }
 0x1fd   :  { %v5371_v32 = vpop.f32.mrb[9].mxu1  ;;  %v1099_v23 = vld [vmem:[%s13897_s2 + $0x2098] sm:$0xff] }
 0x1fe   :  { %7568 = vmatpush3.bf16.msra.mxu1 %v7567_v45  ;;  %v1124_v45 = vld [vmem:[%s13897_s2 + $0x2160] sm:$0xff]  ;;  %v3502_v37 = vadd.f32 %v5337_v28, %v3432_v20  ;;  %v5372_v63 = vadd.f32 %v5371_v32, %v5370_v29  ;;  %v6827_v29 = vpack.c.bf16 %v1145_v16, %v1142_v13  ;;  %v1063_v57 = vld [vmem:[%s13897_s2 + $0x1f78] sm:$0xff]  ;;  %v1117_v13 = vld [vmem:[%s13897_s2 + $0x2128] sm:$0xff] }
 0x1ff   :  { %6800 = vmatpush1.bf16.msra.mxu0 %v6799_v35  ;;  %7570 = vmatprep.subr.bf16.mxu1 %v7569_v36  ;;  %v1024_v35 = vld [vmem:[%s13897_s2 + $0x1e40] sm:$0xff]  ;;  %v1027_v36 = vld [vmem:[%s13897_s2 + $0x1e58] sm:$0xff] }
 0x200   :  { %6802 = vmatprep.subr.bf16.mxu0 %v6801_v8  ;;  %v1127_v8 = vld [vmem:[%s13897_s2 + $0x2178] sm:$0xff]  ;;  %v11416_v43 = vadd.f32 %v5372_v63, %v3502_v37  ;;  %v7583_v49 = vpack.c.bf16 %v1027_v36, %v1024_v35  ;;  %v1096_v20 = vld [vmem:[%s13897_s2 + $0x2080] sm:$0xff]  ;;  %v1102_v36 = vld [vmem:[%s13897_s2 + $0x20b0] sm:$0xff] }
 0x201   :  { %v1048_v32 = vld [vmem:[%s13897_s2 + $0x1f00] sm:$0xff]  ;;  %v1151_v35 = vld [vmem:[%s13897_s2 + $0x2238] sm:$0xff]  ;;  %v1105_v37 = vld [vmem:[%s13897_s2 + $0x20c8] sm:$0xff] }
 0x202   :  { %7572 = vmatpush3.bf16.msra.mxu1 %v7571_v30  ;;  %v6815_v30 = vpack.c.bf16 %v1127_v8, %v1124_v45  ;;  %v6829_v45 = vpack.c.bf16 %v1152_v24, %v1149_v55  ;;  %v1155_v63 = vld [vmem:[%s13897_s2 + $0x2258] sm:$0xff] }
 0x203   :  { %6804 = vmatpush1.bf16.msra.mxu0 %v6803_v25  ;;  %7574 = vmatprep.subr.bf16.mxu1 %v7573_v47  ;;  %v7585_v25 = vpack.c.bf16 %v1081_v54, %v1078_v41  ;;  %v1030_v47 = vld [vmem:[%s13897_s2 + $0x1e70] sm:$0xff]  ;;  %v7601_v54 = vpack.c.bf16 %v1105_v37, %v1102_v36  ;;  %v1171_v16 = vld [vmem:[%s13897_s2 + $0x22d8] sm:$0xff] }
 0x204   :  { %6806 = vmatprep.subr.bf16.mxu0 %v6805_v34  ;;  %v1137_v34 = vld [vmem:[%s13897_s2 + $0x21c8] sm:$0xff]  ;;  %v7587_v50 = vpack.c.bf16 %v1033_v48, %v1030_v47  ;;  %v1111_v47 = vld [vmem:[%s13897_s2 + $0x20f8] sm:$0xff]  ;;  %v1182_v37 = vld [vmem:[%s13897_s2 + $0x2330] sm:$0xff] }
 0x205   :  { %v6821_v4 = vpack.c.bf16 %v1140_v46, %v1137_v34  ;;  %v1179_v36 = vld [vmem:[%s13897_s2 + $0x2318] sm:$0xff] }
 0x206   :  { %2791 = vmatmul.mubr.f32.vlgmr.msra.gmra.mrb[0].mxu0 %v10946_v18  ;;  %7576 = vmatpush3.bf16.msra.mxu1 %v7575_v1  ;;  %v1090_v1 = vld [vmem:[%s13897_s2 + $0x2050] sm:$0xff] }
 0x207   :  { %6808 = vmatpush1.bf16.msra.mxu0 %v6807_v7  ;;  %7578 = vmatprep.subr.bf16.mxu1 %v7577_v9  ;;  %v1146_v7 = vld [vmem:[%s13897_s2 + $0x2210] sm:$0xff]  ;;  %v7591_v9 = vpack.c.bf16 %v1039_v59, %v1036_v58  ;;  %v7593_v12 = vpack.c.bf16 %v1093_v19, %v1090_v1  ;;  %v1163_v59 = vld [vmem:[%s13897_s2 + $0x2298] sm:$0xff] }
 0x208   :  { %6810 = vmatprep.subr.bf16.mxu0 %v6809_v15  ;;  %2861 = vmatprep.mubr.f32.mxu0 %v11381_v17  ;;  %v1045_v15 = vld [vmem:[%s13897_s2 + $0x1ee8] sm:$0xff]  ;;  %v6825_v26 = vpack.c.bf16 %v1146_v7, %v1143_v5  ;;  %v1167_v19 = vld [vmem:[%s13897_s2 + $0x22b8] sm:$0xff]  ;;  %v1170_v5 = vld [vmem:[%s13897_s2 + $0x22d0] sm:$0xff] }
 0x209   :  { %4060 = vmatmul.mubr.f32.vlgmr.msra.gmra.mrb[22].mxu1 %v10539_v40  ;;  %v1130_v40 = vld [vmem:[%s13897_s2 + $0x2190] sm:$0xff]  ;;  %v7595_v28 = vpack.c.bf16 %v1045_v15, %v1042_v14  ;;  %v6841_v14 = vpack.c.bf16 %v1170_v5, %v1167_v19  ;;  %v1169_v15 = vld [vmem:[%s13897_s2 + $0x22c8] sm:$0xff] }
 0x20a   :  { %7580 = vmatpush3.bf16.msra.mxu1 %v7579_v31  ;;  %4129 = vmatprep.mubr.f32.mxu1 %v10974_v33  ;;  %v1133_v33 = vld [vmem:[%s13897_s2 + $0x21a8] sm:$0xff]  ;;  %v1148_v31 = vld [vmem:[%s13897_s2 + $0x2220] sm:$0xff] }
 0x20b   :  { %6812 = vmatpush1.bf16.msra.mxu0 %v6811_v27  ;;  %7582 = vmatprep.subr.bf16.mxu1 %v7581_v39  ;;  %v6819_v6 = vpack.c.bf16 %v1133_v33, %v1130_v40  ;;  %v7597_v27 = vpack.c.bf16 %v1099_v23, %v1096_v20  ;;  %v1051_v39 = vld [vmem:[%s13897_s2 + $0x1f18] sm:$0xff]  ;;  %v6831_v41 = vpack.c.bf16 %v1151_v35, %v1148_v31  ;;  %v1108_v40 = vld [vmem:[%s13897_s2 + $0x20e0] sm:$0xff]  ;;  %v1173_v20 = vld [vmem:[%s13897_s2 + $0x22e8] sm:$0xff] }
 0x20c   :  { %6814 = vmatprep.subr.bf16.mxu0 %v6813_v38  ;;  %v1158_v38 = vld [vmem:[%s13897_s2 + $0x2270] sm:$0xff]  ;;  %v7599_v8 = vpack.c.bf16 %v1051_v39, %v1048_v32  ;;  %v1164_v33 = vld [vmem:[%s13897_s2 + $0x22a0] sm:$0xff]  ;;  %v1123_v31 = vld [vmem:[%s13897_s2 + $0x2158] sm:$0xff] }
 0x20d   :  { %v1176_v23 = vld [vmem:[%s13897_s2 + $0x2300] sm:$0xff]  ;;  %v1175_v39 = vld [vmem:[%s13897_s2 + $0x22f8] sm:$0xff]  ;;  %v1177_v35 = vld [vmem:[%s13897_s2 + $0x2308] sm:$0xff] }
 0x20e   :  { %7584 = vmatpush3.bf16.msra.mxu1 %v7583_v49  ;;  %v1057_v49 = vld [vmem:[%s13897_s2 + $0x1f48] sm:$0xff]  ;;  %v6845_v32 = vpack.c.bf16 %v1176_v23, %v1173_v20  ;;  %v1147_v20 = vld [vmem:[%s13897_s2 + $0x2218] sm:$0xff] }
 0x20f   :  { %6816 = vmatpush1.bf16.msra.mxu0 %v6815_v30  ;;  %7586 = vmatprep.subr.bf16.mxu1 %v7585_v25  ;;  %v6833_v30 = vpack.c.bf16 %v1158_v38, %v1155_v63  ;;  %v1157_v25 = vld [vmem:[%s13897_s2 + $0x2268] sm:$0xff]  ;;  %v7603_v3 = vpack.c.bf16 %v1057_v49, %v1054_v44  ;;  %v1180_v44 = vld [vmem:[%s13897_s2 + $0x2320] sm:$0xff]  ;;  %v1183_v49 = vld [vmem:[%s13897_s2 + $0x2338] sm:$0xff] }
 0x210   :  { %6818 = vmatprep.subr.bf16.mxu0 %v6817_v2  ;;  %v1161_v2 = vld [vmem:[%s13897_s2 + $0x2288] sm:$0xff]  ;;  %v6835_v46 = vpack.c.bf16 %v1157_v25, %v1154_v42  ;;  %v6849_v42 = vpack.c.bf16 %v1182_v37, %v1179_v36  ;;  %v1188_v25 = vld [vmem:[%s13897_s2 + $0x2360] sm:$0xff] }
 0x211   :  { %v6837_v58 = vpack.c.bf16 %v1164_v33, %v1161_v2  ;;  %v1184_v2 = vld [vmem:[%s13897_s2 + $0x2340] sm:$0xff]  ;;  %v1141_v19 = vld [vmem:[%s13897_s2 + $0x21e8] sm:$0xff] }
 0x212   :  { %7588 = vmatpush3.bf16.msra.mxu1 %v7587_v50  ;;  %v7605_v50 = vpack.c.bf16 %v1111_v47, %v1108_v40  ;;  %v1132_v33 = vld [vmem:[%s13897_s2 + $0x21a0] sm:$0xff]  ;;  %v1153_v36 = vld [vmem:[%s13897_s2 + $0x2248] sm:$0xff] }
 0x213   :  { %6820 = vmatpush1.bf16.msra.mxu0 %v6819_v6  ;;  %7590 = vmatprep.subr.bf16.mxu1 %v7589_v56  ;;  %v1160_v6 = vld [vmem:[%s13897_s2 + $0x2280] sm:$0xff] }
 0x214   :  { %6822 = vmatprep.subr.bf16.mxu0 %v6821_v4  ;;  %v1060_v56 = vld [vmem:[%s13897_s2 + $0x1f60] sm:$0xff]  ;;  %v1162_v4 = vld [vmem:[%s13897_s2 + $0x2290] sm:$0xff] }
 0x215   :  { %v7607_v7 = vpack.c.bf16 %v1063_v57, %v1060_v56  ;;  %v1194_v56 = vld [vmem:[%s13897_s2 + $0x2390] sm:$0xff] }
 0x216   :  { %7592 = vmatpush3.bf16.msra.mxu1 %v7591_v9  ;;  %v6839_v9 = vpack.c.bf16 %v1163_v59, %v1160_v6  ;;  %v1191_v6 = vld [vmem:[%s13897_s2 + $0x2378] sm:$0xff] }
 0x217   :  { %6824 = vmatpush1.bf16.msra.mxu0 %v6823_v10  ;;  %7594 = vmatprep.subr.bf16.mxu1 %v7593_v12  ;;  %v7609_v10 = vpack.c.bf16 %v1165_v62, %v1162_v4  ;;  %v1166_v12 = vld [vmem:[%s13897_s2 + $0x22b0] sm:$0xff]  ;;  %v6857_v5 = vpack.c.bf16 %v1194_v56, %v1191_v6 }
 0x218   :  { %6826 = vmatprep.subr.bf16.mxu0 %v6825_v26  ;;  %v1168_v26 = vld [vmem:[%s13897_s2 + $0x22c0] sm:$0xff]  ;;  %v6843_v24 = vpack.c.bf16 %v1169_v15, %v1166_v12  ;;  %v1190_v4 = vld [vmem:[%s13897_s2 + $0x2370] sm:$0xff]  ;;  %v1197_v12 = vld [vmem:[%s13897_s2 + $0x23a8] sm:$0xff] }
 0x219   :  { %v1138_v62 = vld [vmem:[%s13897_s2 + $0x21d0] sm:$0xff] }
 0x21a   :  { %7596 = vmatpush3.bf16.msra.mxu1 %v7595_v28  ;;  %v7613_v28 = vpack.c.bf16 %v1171_v16, %v1168_v26  ;;  %v1196_v26 = vld [vmem:[%s13897_s2 + $0x23a0] sm:$0xff] }
 0x21b   :  { %6828 = vmatpush1.bf16.msra.mxu0 %v6827_v29  ;;  %7598 = vmatprep.subr.bf16.mxu1 %v7597_v27  ;;  %v1172_v29 = vld [vmem:[%s13897_s2 + $0x22e0] sm:$0xff] }
 0x21c   :  { %6830 = vmatprep.subr.bf16.mxu0 %v6829_v45  ;;  %v5405_v48 = vpop.f32.mrb[10].mxu1  ;;  %v1120_v27 = vld [vmem:[%s13897_s2 + $0x2140] sm:$0xff]  ;;  %v1174_v45 = vld [vmem:[%s13897_s2 + $0x22f0] sm:$0xff]  ;;  %v6847_v38 = vpack.c.bf16 %v1175_v39, %v1172_v29  ;;  %v1203_v29 = vld [vmem:[%s13897_s2 + $0x23d8] sm:$0xff] }
 0x21d   :  { %v5406_v22 = vpop.f32.mrb[11].mxu1  ;;  %v7615_v63 = vpack.c.bf16 %v1123_v31, %v1120_v27  ;;  %v1144_v16 = vld [vmem:[%s13897_s2 + $0x2200] sm:$0xff]  ;;  %v1206_v27 = vld [vmem:[%s13897_s2 + $0x23f0] sm:$0xff] }
 0x21e   :  { %7600 = vmatpush3.bf16.msra.mxu1 %v7599_v8  ;;  %v5407_v34 = vadd.f32 %v5406_v22, %v5405_v48  ;;  %v7617_v8 = vpack.c.bf16 %v1177_v35, %v1174_v45  ;;  %v7621_v48 = vpack.c.bf16 %v1183_v49, %v1180_v44  ;;  %v1135_v22 = vld [vmem:[%s13897_s2 + $0x21b8] sm:$0xff]  ;;  %v7631_v31 = vpack.c.bf16 %v1147_v20, %v1144_v16  ;;  %v1202_v45 = vld [vmem:[%s13897_s2 + $0x23d0] sm:$0xff]  ;;  %v1208_v44 = vld [vmem:[%s13897_s2 + $0x2400] sm:$0xff] }
 0x21f   :  { %6832 = vmatpush1.bf16.msra.mxu0 %v6831_v41  ;;  %7602 = vmatprep.subr.bf16.mxu1 %v7601_v54  ;;  %v1126_v41 = vld [vmem:[%s13897_s2 + $0x2170] sm:$0xff]  ;;  %v1129_v54 = vld [vmem:[%s13897_s2 + $0x2188] sm:$0xff]  ;;  %v7623_v57 = vpack.c.bf16 %v1135_v22, %v1132_v33  ;;  %v6865_v37 = vpack.c.bf16 %v1206_v27, %v1203_v29  ;;  %v1211_v33 = vld [vmem:[%s13897_s2 + $0x2418] sm:$0xff] }
 0x220   :  { %6834 = vmatprep.subr.bf16.mxu0 %v6833_v30  ;;  %v11558_v1 = vadd.f32 %v5407_v34, %v11416_v43  ;;  %v1114_v43 = vld [vmem:[%s13897_s2 + $0x2110] sm:$0xff]  ;;  %v1185_v30 = vld [vmem:[%s13897_s2 + $0x2348] sm:$0xff]  ;;  %v7619_v40 = vpack.c.bf16 %v1129_v54, %v1126_v41  ;;  %v1187_v34 = vld [vmem:[%s13897_s2 + $0x2358] sm:$0xff] }
 0x221   :  { %v7611_v55 = vpack.c.bf16 %v1117_v13, %v1114_v43  ;;  %v1200_v43 = vld [vmem:[%s13897_s2 + $0x23c0] sm:$0xff]  ;;  %v7627_v13 = vpack.c.bf16 %v1141_v19, %v1138_v62  ;;  %v1150_v35 = vld [vmem:[%s13897_s2 + $0x2230] sm:$0xff]  ;;  %v1209_v41 = vld [vmem:[%s13897_s2 + $0x2408] sm:$0xff] }
 0x222   :  { %7604 = vmatpush3.bf16.msra.mxu1 %v7603_v3  ;;  %v6853_v3 = vpack.c.bf16 %v1188_v25, %v1185_v30  ;;  %v6861_v23 = vpack.c.bf16 %v1200_v43, %v1197_v12  ;;  %v1212_v54 = vld [vmem:[%s13897_s2 + $0x2420] sm:$0xff]  ;;  %v1258_v22 = vld [vmem:[%s13897_s2 + $0x2590] sm:$0xff]  ;;  %v1217_v19 = vld [vmem:[%s13897_s2 + $0x2448] sm:$0xff] }
 0x223   :  { %6836 = vmatpush1.bf16.msra.mxu0 %v6835_v46  ;;  %7606 = vmatprep.subr.bf16.mxu1 %v7605_v50  ;;  %v1186_v46 = vld [vmem:[%s13897_s2 + $0x2350] sm:$0xff]  ;;  %v1189_v50 = vld [vmem:[%s13897_s2 + $0x2368] sm:$0xff]  ;;  %v1219_v16 = vld [vmem:[%s13897_s2 + $0x2458] sm:$0xff] }
 0x224   :  { %6838 = vmatprep.subr.bf16.mxu0 %v6837_v58  ;;  %v6855_v58 = vpack.c.bf16 %v1187_v34, %v1184_v2  ;;  %v7625_v59 = vpack.c.bf16 %v1189_v50, %v1186_v46  ;;  %v6869_v2 = vpack.c.bf16 %v1212_v54, %v1209_v41  ;;  %v1215_v46 = vld [vmem:[%s13897_s2 + $0x2438] sm:$0xff]  ;;  %v1218_v50 = vld [vmem:[%s13897_s2 + $0x2450] sm:$0xff] }
 0x225   :  { %v6873_v62 = vpack.c.bf16 %v1218_v50, %v1215_v46  ;;  %v1230_v29 = vld [vmem:[%s13897_s2 + $0x24b0] sm:$0xff] }
 0x226   :  { %7608 = vmatpush3.bf16.msra.mxu1 %v7607_v7  ;;  %v1193_v7 = vld [vmem:[%s13897_s2 + $0x2388] sm:$0xff]  ;;  %v1238_v46 = vld [vmem:[%s13897_s2 + $0x24f0] sm:$0xff] }
 0x227   :  { %6840 = vmatpush1.bf16.msra.mxu0 %v6839_v9  ;;  %7610 = vmatprep.subr.bf16.mxu1 %v7609_v10  ;;  %v1192_v9 = vld [vmem:[%s13897_s2 + $0x2380] sm:$0xff]  ;;  %v1195_v10 = vld [vmem:[%s13897_s2 + $0x2398] sm:$0xff]  ;;  %v1234_v50 = vld [vmem:[%s13897_s2 + $0x24d0] sm:$0xff] }
 0x228   :  { %6842 = vmatprep.subr.bf16.mxu0 %v6841_v14  ;;  %v6859_v14 = vpack.c.bf16 %v1193_v7, %v1190_v4  ;;  %v7629_v15 = vpack.c.bf16 %v1195_v10, %v1192_v9  ;;  %v1213_v4 = vld [vmem:[%s13897_s2 + $0x2428] sm:$0xff]  ;;  %v1267_v7 = vld [vmem:[%s13897_s2 + $0x25d8] sm:$0xff]  ;;  %v1224_v10 = vld [vmem:[%s13897_s2 + $0x2480] sm:$0xff] }
 0x229   :  { %4130 = vmatmul.mubr.f32.vlgmr.msra.gmra.mrb[24].mxu1 %v10946_v18  ;;  %v1178_v18 = vld [vmem:[%s13897_s2 + $0x2310] sm:$0xff]  ;;  %v1221_v9 = vld [vmem:[%s13897_s2 + $0x2468] sm:$0xff] }
 0x22a   :  { %7612 = vmatpush3.bf16.msra.mxu1 %v7611_v55  ;;  %4199 = vmatprep.mubr.f32.mxu1 %v11381_v17  ;;  %v1181_v17 = vld [vmem:[%s13897_s2 + $0x2328] sm:$0xff]  ;;  %v1199_v55 = vld [vmem:[%s13897_s2 + $0x23b8] sm:$0xff]  ;;  %v6877_v20 = vpack.c.bf16 %v1224_v10, %v1221_v9  ;;  %v1244_v9 = vld [vmem:[%s13897_s2 + $0x2520] sm:$0xff] }
 0x22b   :  { %6844 = vmatpush1.bf16.msra.mxu0 %v6843_v24  ;;  %7614 = vmatprep.subr.bf16.mxu1 %v7613_v28  ;;  %v6851_v47 = vpack.c.bf16 %v1181_v17, %v1178_v18  ;;  %v1198_v24 = vld [vmem:[%s13897_s2 + $0x23b0] sm:$0xff]  ;;  %v1201_v28 = vld [vmem:[%s13897_s2 + $0x23c8] sm:$0xff]  ;;  %v7635_v17 = vpack.c.bf16 %v1153_v36, %v1150_v35  ;;  %v1240_v10 = vld [vmem:[%s13897_s2 + $0x2500] sm:$0xff] }
 0x22c   :  { %6846 = vmatprep.subr.bf16.mxu0 %v6845_v32  ;;  %v6863_v32 = vpack.c.bf16 %v1199_v55, %v1196_v26  ;;  %v7633_v39 = vpack.c.bf16 %v1201_v28, %v1198_v24  ;;  %v1216_v26 = vld [vmem:[%s13897_s2 + $0x2440] sm:$0xff]  ;;  %v1270_v55 = vld [vmem:[%s13897_s2 + $0x25f0] sm:$0xff]  ;;  %v1273_v24 = vld [vmem:[%s13897_s2 + $0x2608] sm:$0xff] }
 0x22d   :  { %v1227_v28 = vld [vmem:[%s13897_s2 + $0x2498] sm:$0xff]  ;;  %v7647_v27 = vpack.c.bf16 %v1219_v16, %v1216_v26  ;;  %v1229_v36 = vld [vmem:[%s13897_s2 + $0x24a8] sm:$0xff]  ;;  %v1254_v16 = vld [vmem:[%s13897_s2 + $0x2570] sm:$0xff] }
 0x22e   :  { %7616 = vmatpush3.bf16.msra.mxu1 %v7615_v63  ;;  %v1205_v63 = vld [vmem:[%s13897_s2 + $0x23e8] sm:$0xff]  ;;  %v6881_v35 = vpack.c.bf16 %v1230_v29, %v1227_v28  ;;  %v1251_v26 = vld [vmem:[%s13897_s2 + $0x2558] sm:$0xff]  ;;  %v1246_v28 = vld [vmem:[%s13897_s2 + $0x2530] sm:$0xff] }
 0x22f   :  { %6848 = vmatpush1.bf16.msra.mxu0 %v6847_v38  ;;  %7618 = vmatprep.subr.bf16.mxu1 %v7617_v8  ;;  %v1204_v38 = vld [vmem:[%s13897_s2 + $0x23e0] sm:$0xff]  ;;  %v1207_v8 = vld [vmem:[%s13897_s2 + $0x23f8] sm:$0xff]  ;;  %v6867_v30 = vpack.c.bf16 %v1205_v63, %v1202_v45  ;;  %v1225_v45 = vld [vmem:[%s13897_s2 + $0x2488] sm:$0xff] }
 0x230   :  { %6850 = vmatprep.subr.bf16.mxu0 %v6849_v42  ;;  %v7637_v25 = vpack.c.bf16 %v1207_v8, %v1204_v38  ;;  %v1279_v63 = vld [vmem:[%s13897_s2 + $0x2638] sm:$0xff]  ;;  %v1233_v38 = vld [vmem:[%s13897_s2 + $0x24c8] sm:$0xff]  ;;  %v1236_v8 = vld [vmem:[%s13897_s2 + $0x24e0] sm:$0xff] }
 0x231   :  { %v1249_v29 = vld [vmem:[%s13897_s2 + $0x2548] sm:$0xff] }
 0x232   :  { %7620 = vmatpush3.bf16.msra.mxu1 %v7619_v40  ;;  %v1156_v40 = vld [vmem:[%s13897_s2 + $0x2260] sm:$0xff] }
 0x233   :  { %6852 = vmatpush1.bf16.msra.mxu0 %v6851_v47  ;;  %7622 = vmatprep.subr.bf16.mxu1 %v7621_v48  ;;  %v1159_v47 = vld [vmem:[%s13897_s2 + $0x2278] sm:$0xff]  ;;  %v11748_v48 = vld [vmem:[%s13898_s0 + $0x30] sm:$0xff] }
 0x234   :  { %6854 = vmatprep.subr.bf16.mxu0 %v6853_v3  ;;  %v1261_v3 = vld [vmem:[%s13897_s2 + $0x25a8] sm:$0xff]  ;;  %v7639_v6 = vpack.c.bf16 %v1159_v47, %v1156_v40  ;;  %v11770_v56 = vrot.slane %v11748_v48, %v8342_v11  ;;  %v1239_v47 = vld [vmem:[%s13897_s2 + $0x24f8] sm:$0xff] }
 0x235   :  { %v1285_v40 = vld [vmem:[%s13897_s2 + $0x2668] sm:$0xff] }
 0x236   :  { %7624 = vmatpush3.bf16.msra.mxu1 %v7623_v57  ;;  %v6871_v57 = vpack.c.bf16 %v1211_v33, %v1208_v44  ;;  %v1934_v43 = vcombine.high %v11770_v56, %v11770_v56  ;;  %v1231_v44 = vld [vmem:[%s13897_s2 + $0x24b8] sm:$0xff] }
 0x237   :  { %6856 = vmatpush1.bf16.msra.mxu0 %v6855_v58  ;;  %7626 = vmatprep.subr.bf16.mxu1 %v7625_v59  ;;  %v7641_v58 = vpack.c.bf16 %v1261_v3, %v1258_v22  ;;  %v1210_v59 = vld [vmem:[%s13897_s2 + $0x2410] sm:$0xff] }
 0x238   :  { %6858 = vmatprep.subr.bf16.mxu0 %v6857_v5  ;;  %v1264_v5 = vld [vmem:[%s13897_s2 + $0x25c0] sm:$0xff]  ;;  %v7643_v12 = vpack.c.bf16 %v1213_v4, %v1210_v59  ;;  %v1291_v59 = vld [vmem:[%s13897_s2 + $0x2698] sm:$0xff]  ;;  %v1245_v4 = vld [vmem:[%s13897_s2 + $0x2528] sm:$0xff] }
 0x23a   :  { %7628 = vmatpush3.bf16.msra.mxu1 %v7627_v13 }
 0x23b   :  { %6860 = vmatpush1.bf16.msra.mxu0 %v6859_v14  ;;  %7630 = vmatprep.subr.bf16.mxu1 %v7629_v15  ;;  %v7645_v14 = vpack.c.bf16 %v1267_v7, %v1264_v5  ;;  %v1220_v15 = vld [vmem:[%s13897_s2 + $0x2460] sm:$0xff] }
 0x23c   :  { %6862 = vmatprep.subr.bf16.mxu0 %v6861_v23  ;;  %v5440_v18 = vpop.f32.mrb[12].mxu1  ;;  %v1223_v23 = vld [vmem:[%s13897_s2 + $0x2478] sm:$0xff] }
 0x23d   :  { %v5441_v42 = vpop.f32.mrb[13].mxu1 }
 0x23e   :  { %7632 = vmatpush3.bf16.msra.mxu1 %v7631_v31  ;;  %v5442_v49 = vadd.f32 %v5441_v42, %v5440_v18  ;;  %v6879_v31 = vpack.c.bf16 %v1223_v23, %v1220_v15  ;;  %v1232_v42 = vld [vmem:[%s13897_s2 + $0x24c0] sm:$0xff]  ;;  %v1297_v15 = vld [vmem:[%s13897_s2 + $0x26c8] sm:$0xff] }
 0x23f   :  { %6864 = vmatpush1.bf16.msra.mxu0 %v6863_v32  ;;  %7634 = vmatprep.subr.bf16.mxu1 %v7633_v39  ;;  %v7649_v32 = vpack.c.bf16 %v1273_v24, %v1270_v55  ;;  %v1226_v39 = vld [vmem:[%s13897_s2 + $0x2490] sm:$0xff] }
 0x240   :  { %6866 = vmatprep.subr.bf16.mxu0 %v6865_v37  ;;  %v11760_v34 = vadd.f32 %v5442_v49, %v11558_v1  ;;  %v1214_v1 = vld [vmem:[%s13897_s2 + $0x2430] sm:$0xff]  ;;  %v1276_v37 = vld [vmem:[%s13897_s2 + $0x2620] sm:$0xff]  ;;  %v6883_v41 = vpack.c.bf16 %v1229_v36, %v1226_v39  ;;  %v6885_v49 = vpack.c.bf16 %v1236_v8, %v1233_v38  ;;  %v1303_v39 = vld [vmem:[%s13897_s2 + $0x26f8] sm:$0xff] }
 0x241   :  { %v6875_v13 = vpack.c.bf16 %v1217_v19, %v1214_v1  ;;  %v7653_v54 = vpack.c.bf16 %v1279_v63, %v1276_v37  ;;  %v1288_v1 = vld [vmem:[%s13897_s2 + $0x2680] sm:$0xff]  ;;  %v1250_v24 = vld [vmem:[%s13897_s2 + $0x2550] sm:$0xff]  ;;  %v7667_v37 = vpack.c.bf16 %v1249_v29, %v1246_v28  ;;  %v1919_v63 = vcombine.high %v11748_v48, %v11748_v48  ;;  %v1259_v48 = vld [vmem:[%s13897_s2 + $0x2598] sm:$0xff] }
 0x242   :  { %7636 = vmatpush3.bf16.msra.mxu1 %v7635_v17  ;;  %v1228_v17 = vld [vmem:[%s13897_s2 + $0x24a0] sm:$0xff]  ;;  %v7661_v7 = vpack.c.bf16 %v1291_v59, %v1288_v1  ;;  %v1269_v1 = vld [vmem:[%s13897_s2 + $0x25e8] sm:$0xff] }
 0x243   :  { %6868 = vmatpush1.bf16.msra.mxu0 %v6867_v30  ;;  %7638 = vmatprep.subr.bf16.mxu1 %v7637_v25  ;;  %v1235_v30 = vld [vmem:[%s13897_s2 + $0x24d8] sm:$0xff]  ;;  %v1282_v25 = vld [vmem:[%s13897_s2 + $0x2650] sm:$0xff]  ;;  %v7655_v33 = vpack.c.bf16 %v1231_v44, %v1228_v17  ;;  %v1272_v59 = vld [vmem:[%s13897_s2 + $0x2600] sm:$0xff] }
 0x244   :  { %6870 = vmatprep.subr.bf16.mxu0 %v6869_v2  ;;  %v1242_v2 = vld [vmem:[%s13897_s2 + $0x2510] sm:$0xff]  ;;  %v6887_v22 = vpack.c.bf16 %v1235_v30, %v1232_v42  ;;  %v7657_v3 = vpack.c.bf16 %v1285_v40, %v1282_v25  ;;  %v1255_v42 = vld [vmem:[%s13897_s2 + $0x2578] sm:$0xff]  ;;  %v1321_v28 = vld [vmem:[%s13897_s2 + $0x2788] sm:$0xff] }
 0x245   :  { %v1354_v44 = vld [vmem:[%s13897_s2 + $0x2890] sm:$0xff]  ;;  %v1263_v25 = vld [vmem:[%s13897_s2 + $0x25b8] sm:$0xff] }
 0x246   :  { %2862 = vmatmul.mubr.f32.vlgmr.msra.gmra.mrb[0].mxu0 %v11349_v51  ;;  %7640 = vmatpush3.bf16.msra.mxu1 %v7639_v6  ;;  %v1237_v6 = vld [vmem:[%s13897_s2 + $0x24e8] sm:$0xff]  ;;  %v1266_v40 = vld [vmem:[%s13897_s2 + $0x25d0] sm:$0xff] }
 0x247   :  { %6872 = vmatpush1.bf16.msra.mxu0 %v6871_v57  ;;  %7642 = vmatprep.subr.bf16.mxu1 %v7641_v58  ;;  %v6889_v57 = vpack.c.bf16 %v1242_v2, %v1239_v47  ;;  %v1241_v58 = vld [vmem:[%s13897_s2 + $0x2508] sm:$0xff]  ;;  %v7659_v19 = vpack.c.bf16 %v1237_v6, %v1234_v50  ;;  %v11974_v2 = vrot.slane %v1919_v63, %v8342_v11  ;;  %v1324_v63 = vld [vmem:[%s13897_s2 + $0x27a0] sm:$0xff] }
 0x248   :  { %6874 = vmatprep.subr.bf16.mxu0 %v6873_v62  ;;  %2932 = vmatprep.mubr.f32.mxu0 %v1934_v43  ;;  %v1248_v62 = vld [vmem:[%s13897_s2 + $0x2540] sm:$0xff]  ;;  %v6891_v5 = vpack.c.bf16 %v1241_v58, %v1238_v46  ;;  %v1309_v46 = vld [vmem:[%s13897_s2 + $0x2728] sm:$0xff]  ;;  %v6905_v50 = vpack.c.bf16 %v1266_v40, %v1263_v25  ;;  %v1363_v58 = vld [vmem:[%s13897_s2 + $0x28d8] sm:$0xff] }
 0x249   :  { %4200 = vmatmul.mubr.f32.vlgmr.msra.gmra.mrb[26].mxu1 %v11349_v51  ;;  %v1222_v51 = vld [vmem:[%s13897_s2 + $0x2470] sm:$0xff]  ;;  %v1265_v6 = vld [vmem:[%s13897_s2 + $0x25c8] sm:$0xff] }
 0x24a   :  { %7644 = vmatpush3.bf16.msra.mxu1 %v7643_v12  ;;  %4269 = vmatprep.mubr.f32.mxu1 %v1934_v43  ;;  %v7651_v18 = vpack.c.bf16 %v1225_v45, %v1222_v51  ;;  %v1243_v12 = vld [vmem:[%s13897_s2 + $0x2518] sm:$0xff]  ;;  %v6893_v43 = vpack.c.bf16 %v1248_v62, %v1245_v4  ;;  %v1257_v45 = vld [vmem:[%s13897_s2 + $0x2588] sm:$0xff]  ;;  %v12002_v62 = vcombine.high %v11974_v2, %v11974_v2  ;;  %v1286_v25 = vld [vmem:[%s13897_s2 + $0x2670] sm:$0xff] }
 0x24b   :  { %6876 = vmatpush1.bf16.msra.mxu0 %v6875_v13  ;;  %7646 = vmatprep.subr.bf16.mxu1 %v7645_v14  ;;  %v1247_v13 = vld [vmem:[%s13897_s2 + $0x2538] sm:$0xff]  ;;  %v1294_v14 = vld [vmem:[%s13897_s2 + $0x26b0] sm:$0xff] }
 0x24c   :  { %6878 = vmatprep.subr.bf16.mxu0 %v6877_v20  ;;  %v7663_v20 = vpack.c.bf16 %v1243_v12, %v1240_v10  ;;  %v6895_v23 = vpack.c.bf16 %v1247_v13, %v1244_v9  ;;  %v7665_v55 = vpack.c.bf16 %v1297_v15, %v1294_v14  ;;  %v1312_v9 = vld [vmem:[%s13897_s2 + $0x2740] sm:$0xff]  ;;  %v1315_v10 = vld [vmem:[%s13897_s2 + $0x2758] sm:$0xff]  ;;  %v6909_v12 = vpack.c.bf16 %v1272_v59, %v1269_v1  ;;  %v1366_v13 = vld [vmem:[%s13897_s2 + $0x28f0] sm:$0xff] }
 0x24d   :  { %v1369_v14 = vld [vmem:[%s13897_s2 + $0x2908] sm:$0xff]  ;;  %v1275_v15 = vld [vmem:[%s13897_s2 + $0x2618] sm:$0xff]  ;;  %v1330_v40 = vld [vmem:[%s13897_s2 + $0x27d0] sm:$0xff] }
 0x24e   :  { %7648 = vmatpush3.bf16.msra.mxu1 %v7647_v27  ;;  %v6897_v27 = vpack.c.bf16 %v1254_v16, %v1251_v26  ;;  %v1278_v26 = vld [vmem:[%s13897_s2 + $0x2630] sm:$0xff]  ;;  %v7679_v16 = vpack.c.bf16 %v1315_v10, %v1312_v9  ;;  %v1292_v1 = vld [vmem:[%s13897_s2 + $0x26a0] sm:$0xff]  ;;  %v1393_v9 = vld [vmem:[%s13897_s2 + $0x29c8] sm:$0xff] }
 0x24f   :  { %6880 = vmatpush1.bf16.msra.mxu0 %v6879_v31  ;;  %7650 = vmatprep.subr.bf16.mxu1 %v7649_v32  ;;  %v1253_v31 = vld [vmem:[%s13897_s2 + $0x2568] sm:$0xff]  ;;  %v1300_v32 = vld [vmem:[%s13897_s2 + $0x26e0] sm:$0xff]  ;;  %v6913_v29 = vpack.c.bf16 %v1278_v26, %v1275_v15  ;;  %v1299_v10 = vld [vmem:[%s13897_s2 + $0x26d8] sm:$0xff] }
 0x250   :  { %6882 = vmatprep.subr.bf16.mxu0 %v6881_v35  ;;  %v1260_v35 = vld [vmem:[%s13897_s2 + $0x25a0] sm:$0xff]  ;;  %v6899_v8 = vpack.c.bf16 %v1253_v31, %v1250_v24  ;;  %v1318_v24 = vld [vmem:[%s13897_s2 + $0x2770] sm:$0xff] }
 0x251   :  { %v6901_v17 = vpack.c.bf16 %v1260_v35, %v1257_v45  ;;  %v1372_v31 = vld [vmem:[%s13897_s2 + $0x2920] sm:$0xff]  ;;  %v7683_v45 = vpack.c.bf16 %v1321_v28, %v1318_v24  ;;  %v1298_v15 = vld [vmem:[%s13897_s2 + $0x26d0] sm:$0xff]  ;;  %v1399_v24 = vld [vmem:[%s13897_s2 + $0x29f8] sm:$0xff] }
 0x252   :  { %7652 = vmatpush3.bf16.msra.mxu1 %v7651_v18  ;;  %v7669_v18 = vpack.c.bf16 %v1303_v39, %v1300_v32  ;;  %v1375_v32 = vld [vmem:[%s13897_s2 + $0x2938] sm:$0xff]  ;;  %v1281_v39 = vld [vmem:[%s13897_s2 + $0x2648] sm:$0xff]  ;;  %v1336_v59 = vld [vmem:[%s13897_s2 + $0x2800] sm:$0xff] }
 0x253   :  { %6884 = vmatpush1.bf16.msra.mxu0 %v6883_v41  ;;  %7654 = vmatprep.subr.bf16.mxu1 %v7653_v54  ;;  %v1256_v41 = vld [vmem:[%s13897_s2 + $0x2580] sm:$0xff]  ;;  %v1342_v26 = vld [vmem:[%s13897_s2 + $0x2830] sm:$0xff] }
 0x254   :  { %6886 = vmatprep.subr.bf16.mxu0 %v6885_v49  ;;  %v1252_v54 = vld [vmem:[%s13897_s2 + $0x2560] sm:$0xff]  ;;  %v1357_v49 = vld [vmem:[%s13897_s2 + $0x28a8] sm:$0xff] }
 0x255   :  { %v7671_v47 = vpack.c.bf16 %v1255_v42, %v1252_v54  ;;  %v1381_v54 = vld [vmem:[%s13897_s2 + $0x2968] sm:$0xff]  ;;  %v1287_v42 = vld [vmem:[%s13897_s2 + $0x2678] sm:$0xff] }
 0x256   :  { %7656 = vmatpush3.bf16.msra.mxu1 %v7655_v33  ;;  %v6903_v33 = vpack.c.bf16 %v1259_v48, %v1256_v41  ;;  %v1378_v41 = vld [vmem:[%s13897_s2 + $0x2950] sm:$0xff] }
 0x257   :  { %6888 = vmatpush1.bf16.msra.mxu0 %v6887_v22  ;;  %7658 = vmatprep.subr.bf16.mxu1 %v7657_v3  ;;  %v7673_v22 = vpack.c.bf16 %v1357_v49, %v1354_v44  ;;  %v1306_v3 = vld [vmem:[%s13897_s2 + $0x2710] sm:$0xff]  ;;  %v7689_v49 = vpack.c.bf16 %v1381_v54, %v1378_v41  ;;  %v1453_v41 = vld [vmem:[%s13897_s2 + $0x2ba8] sm:$0xff] }
 0x258   :  { %6890 = vmatprep.subr.bf16.mxu0 %v6889_v57  ;;  %v1360_v57 = vld [vmem:[%s13897_s2 + $0x28c0] sm:$0xff]  ;;  %v7675_v4 = vpack.c.bf16 %v1309_v46, %v1306_v3  ;;  %v1387_v3 = vld [vmem:[%s13897_s2 + $0x2998] sm:$0xff]  ;;  %v1293_v46 = vld [vmem:[%s13897_s2 + $0x26a8] sm:$0xff] }
 0x25a   :  { %7660 = vmatpush3.bf16.msra.mxu1 %v7659_v19 }
 0x25b   :  { %6892 = vmatpush1.bf16.msra.mxu0 %v6891_v5  ;;  %7662 = vmatprep.subr.bf16.mxu1 %v7661_v7  ;;  %v7677_v5 = vpack.c.bf16 %v1363_v58, %v1360_v57  ;;  %v1268_v7 = vld [vmem:[%s13897_s2 + $0x25e0] sm:$0xff] }
 0x25c   :  { %6894 = vmatprep.subr.bf16.mxu0 %v6893_v43  ;;  %v5475_v51 = vpop.f32.mrb[14].mxu1  ;;  %v1271_v43 = vld [vmem:[%s13897_s2 + $0x25f8] sm:$0xff] }
 0x25d   :  { %v5476_v36 = vpop.f32.mrb[15].mxu1 }
 0x25e   :  { %7664 = vmatpush3.bf16.msra.mxu1 %v7663_v20  ;;  %v5477_v38 = vadd.f32 %v5476_v36, %v5475_v51  ;;  %v6911_v20 = vpack.c.bf16 %v1271_v43, %v1268_v7  ;;  %v1284_v51 = vld [vmem:[%s13897_s2 + $0x2660] sm:$0xff]  ;;  %v7685_v36 = vpack.c.bf16 %v1375_v32, %v1372_v31  ;;  %v1390_v7 = vld [vmem:[%s13897_s2 + $0x29b0] sm:$0xff] }
 0x25f   :  { %6896 = vmatpush1.bf16.msra.mxu0 %v6895_v23  ;;  %7666 = vmatprep.subr.bf16.mxu1 %v7665_v55  ;;  %v7681_v23 = vpack.c.bf16 %v1369_v14, %v1366_v13  ;;  %v1274_v55 = vld [vmem:[%s13897_s2 + $0x2610] sm:$0xff]  ;;  %v7697_v14 = vpack.c.bf16 %v1393_v9, %v1390_v7  ;;  %v1465_v9 = vld [vmem:[%s13897_s2 + $0x2c08] sm:$0xff] }
 0x260   :  { %6898 = vmatprep.subr.bf16.mxu0 %v6897_v27  ;;  %v11965_v30 = vadd.f32 %v5477_v38, %v11760_v34  ;;  %v1262_v34 = vld [vmem:[%s13897_s2 + $0x25b0] sm:$0xff]  ;;  %v1277_v27 = vld [vmem:[%s13897_s2 + $0x2628] sm:$0xff]  ;;  %v1327_v38 = vld [vmem:[%s13897_s2 + $0x27b8] sm:$0xff] }
 0x261   :  { %v6907_v19 = vpack.c.bf16 %v1265_v6, %v1262_v34  ;;  %v6915_v35 = vpack.c.bf16 %v1277_v27, %v1274_v55  ;;  %v7687_v48 = vpack.c.bf16 %v1327_v38, %v1324_v63  ;;  %v1384_v34 = vld [vmem:[%s13897_s2 + $0x2980] sm:$0xff]  ;;  %v12162_v63 = vld [vmem:[%s13898_s0 + $0x38] sm:$0xff]  ;;  %v1462_v7 = vld [vmem:[%s13897_s2 + $0x2bf0] sm:$0xff] }
 0x262   :  { %7668 = vmatpush3.bf16.msra.mxu1 %v7667_v37  ;;  %v1280_v37 = vld [vmem:[%s13897_s2 + $0x2640] sm:$0xff]  ;;  %v7693_v58 = vpack.c.bf16 %v1387_v3, %v1384_v34  ;;  %v1459_v3 = vld [vmem:[%s13897_s2 + $0x2bd8] sm:$0xff] }
 0x263   :  { %6900 = vmatpush1.bf16.msra.mxu0 %v6899_v8  ;;  %7670 = vmatprep.subr.bf16.mxu1 %v7669_v18  ;;  %v6917_v8 = vpack.c.bf16 %v1284_v51, %v1281_v39  ;;  %v1283_v18 = vld [vmem:[%s13897_s2 + $0x2658] sm:$0xff]  ;;  %v1396_v55 = vld [vmem:[%s13897_s2 + $0x29e0] sm:$0xff] }
 0x264   :  { %6902 = vmatprep.subr.bf16.mxu0 %v6901_v17  ;;  %v1290_v17 = vld [vmem:[%s13897_s2 + $0x2690] sm:$0xff]  ;;  %v6919_v44 = vpack.c.bf16 %v1283_v18, %v1280_v37  ;;  %v1308_v27 = vld [vmem:[%s13897_s2 + $0x2720] sm:$0xff]  ;;  %v1351_v37 = vld [vmem:[%s13897_s2 + $0x2878] sm:$0xff] }
 0x265   :  { %v1304_v39 = vld [vmem:[%s13897_s2 + $0x2700] sm:$0xff]  ;;  %v1450_v18 = vld [vmem:[%s13897_s2 + $0x2b90] sm:$0xff] }
 0x266   :  { %7672 = vmatpush3.bf16.msra.mxu1 %v7671_v47  ;;  %v1333_v47 = vld [vmem:[%s13897_s2 + $0x27e8] sm:$0xff]  ;;  %v1456_v34 = vld [vmem:[%s13897_s2 + $0x2bc0] sm:$0xff] }
 0x267   :  { %6904 = vmatpush1.bf16.msra.mxu0 %v6903_v33  ;;  %7674 = vmatprep.subr.bf16.mxu1 %v7673_v22  ;;  %v6921_v33 = vpack.c.bf16 %v1290_v17, %v1287_v42  ;;  %v1289_v22 = vld [vmem:[%s13897_s2 + $0x2688] sm:$0xff]  ;;  %v7691_v6 = vpack.c.bf16 %v1333_v47, %v1330_v40  ;;  %v1311_v42 = vld [vmem:[%s13897_s2 + $0x2738] sm:$0xff]  ;;  %v1314_v17 = vld [vmem:[%s13897_s2 + $0x2750] sm:$0xff] }
 0x268   :  { %6906 = vmatprep.subr.bf16.mxu0 %v6905_v50  ;;  %v1296_v50 = vld [vmem:[%s13897_s2 + $0x26c0] sm:$0xff]  ;;  %v6923_v57 = vpack.c.bf16 %v1289_v22, %v1286_v25  ;;  %v7705_v25 = vpack.c.bf16 %v1453_v41, %v1450_v18  ;;  %v1402_v40 = vld [vmem:[%s13897_s2 + $0x2a10] sm:$0xff]  ;;  %v1405_v47 = vld [vmem:[%s13897_s2 + $0x2a28] sm:$0xff] }
 0x269   :  { %4270 = vmatmul.mubr.f32.vlgmr.msra.gmra.mrb[28].mxu1 %v11770_v56  ;;  %v1313_v22 = vld [vmem:[%s13897_s2 + $0x2748] sm:$0xff] }
 0x26a   :  { %7676 = vmatpush3.bf16.msra.mxu1 %v7675_v4  ;;  %4339 = vmatprep.mubr.f32.mxu1 %v12002_v62  ;;  %v1339_v4 = vld [vmem:[%s13897_s2 + $0x2818] sm:$0xff] }
 0x26b   :  { %6908 = vmatpush1.bf16.msra.mxu0 %v6907_v19  ;;  %7678 = vmatprep.subr.bf16.mxu1 %v7677_v5  ;;  %v6925_v19 = vpack.c.bf16 %v1296_v50, %v1293_v46  ;;  %v1295_v5 = vld [vmem:[%s13897_s2 + $0x26b8] sm:$0xff]  ;;  %v7695_v43 = vpack.c.bf16 %v1339_v4, %v1336_v59  ;;  %v1317_v46 = vld [vmem:[%s13897_s2 + $0x2768] sm:$0xff]  ;;  %v1320_v50 = vld [vmem:[%s13897_s2 + $0x2780] sm:$0xff] }
 0x26c   :  { %6910 = vmatprep.subr.bf16.mxu0 %v6909_v12  ;;  %v1302_v12 = vld [vmem:[%s13897_s2 + $0x26f0] sm:$0xff]  ;;  %v6927_v13 = vpack.c.bf16 %v1295_v5, %v1292_v1  ;;  %v7709_v1 = vpack.c.bf16 %v1459_v3, %v1456_v34  ;;  %v1316_v59 = vld [vmem:[%s13897_s2 + $0x2760] sm:$0xff]  ;;  %v1319_v5 = vld [vmem:[%s13897_s2 + $0x2778] sm:$0xff] }
 0x26d   :  { %v1408_v4 = vld [vmem:[%s13897_s2 + $0x2a40] sm:$0xff] }
 0x26e   :  { %7680 = vmatpush3.bf16.msra.mxu1 %v7679_v16  ;;  %v1345_v16 = vld [vmem:[%s13897_s2 + $0x2848] sm:$0xff] }
 0x26f   :  { %6912 = vmatpush1.bf16.msra.mxu0 %v6911_v20  ;;  %7682 = vmatprep.subr.bf16.mxu1 %v7681_v23  ;;  %v6929_v20 = vpack.c.bf16 %v1302_v12, %v1299_v10  ;;  %v1301_v23 = vld [vmem:[%s13897_s2 + $0x26e8] sm:$0xff]  ;;  %v7699_v32 = vpack.c.bf16 %v1345_v16, %v1342_v26  ;;  %v1323_v10 = vld [vmem:[%s13897_s2 + $0x2798] sm:$0xff]  ;;  %v1326_v12 = vld [vmem:[%s13897_s2 + $0x27b0] sm:$0xff] }
 0x270   :  { %6914 = vmatprep.subr.bf16.mxu0 %v6913_v29  ;;  %v1305_v29 = vld [vmem:[%s13897_s2 + $0x2708] sm:$0xff]  ;;  %v6945_v16 = vpack.c.bf16 %v1326_v12, %v1323_v10  ;;  %v1346_v12 = vld [vmem:[%s13897_s2 + $0x2850] sm:$0xff] }
 0x271   :  { %v6933_v38 = vpack.c.bf16 %v1308_v27, %v1305_v29  ;;  %v1417_v26 = vld [vmem:[%s13897_s2 + $0x2a88] sm:$0xff] }
 0x272   :  { %7684 = vmatpush3.bf16.msra.mxu1 %v7683_v45  ;;  %v6931_v45 = vpack.c.bf16 %v1301_v23, %v1298_v15  ;;  %v1414_v15 = vld [vmem:[%s13897_s2 + $0x2a70] sm:$0xff]  ;;  %v1468_v23 = vld [vmem:[%s13897_s2 + $0x2c20] sm:$0xff] }
 0x273   :  { %6916 = vmatpush1.bf16.msra.mxu0 %v6915_v35  ;;  %7686 = vmatprep.subr.bf16.mxu1 %v7685_v36  ;;  %v7701_v35 = vpack.c.bf16 %v1399_v24, %v1396_v55  ;;  %v1348_v36 = vld [vmem:[%s13897_s2 + $0x2860] sm:$0xff]  ;;  %v1471_v55 = vld [vmem:[%s13897_s2 + $0x2c38] sm:$0xff]  ;;  %v1329_v24 = vld [vmem:[%s13897_s2 + $0x27c8] sm:$0xff]  ;;  %v7715_v29 = vpack.c.bf16 %v1417_v26, %v1414_v15 }
 0x274   :  { %6918 = vmatprep.subr.bf16.mxu0 %v6917_v8  ;;  %v1307_v8 = vld [vmem:[%s13897_s2 + $0x2718] sm:$0xff]  ;;  %v1349_v15 = vld [vmem:[%s13897_s2 + $0x2868] sm:$0xff]  ;;  %v1492_v26 = vld [vmem:[%s13897_s2 + $0x2ce0] sm:$0xff] }
 0x276   :  { %7688 = vmatpush3.bf16.msra.mxu1 %v7687_v48  ;;  %v7703_v48 = vpack.c.bf16 %v1351_v37, %v1348_v36  ;;  %v1474_v36 = vld [vmem:[%s13897_s2 + $0x2c50] sm:$0xff]  ;;  %v1477_v37 = vld [vmem:[%s13897_s2 + $0x2c68] sm:$0xff] }
 0x277   :  { %6920 = vmatpush1.bf16.msra.mxu0 %v6919_v44  ;;  %7690 = vmatprep.subr.bf16.mxu1 %v7689_v49  ;;  %v12184_v44 = vrot.slane %v12162_v63, %v8342_v11  ;;  %v6935_v49 = vpack.c.bf16 %v1307_v8, %v1304_v39  ;;  %v1420_v39 = vld [vmem:[%s13897_s2 + $0x2aa0] sm:$0xff]  ;;  %v1338_v8 = vld [vmem:[%s13897_s2 + $0x2810] sm:$0xff] }
 0x278   :  { %6922 = vmatprep.subr.bf16.mxu0 %v6921_v33  ;;  %v6937_v33 = vpack.c.bf16 %v1314_v17, %v1311_v42  ;;  %v7721_v42 = vpack.c.bf16 %v1477_v37, %v1474_v36  ;;  %v1334_v17 = vld [vmem:[%s13897_s2 + $0x27f0] sm:$0xff]  ;;  %v1549_v37 = vld [vmem:[%s13897_s2 + $0x2ea8] sm:$0xff] }
 0x279   :  { %v1546_v36 = vld [vmem:[%s13897_s2 + $0x2e90] sm:$0xff] }
 0x27a   :  { %7692 = vmatpush3.bf16.msra.mxu1 %v7691_v6  ;;  %v7707_v6 = vpack.c.bf16 %v1405_v47, %v1402_v40  ;;  %v1480_v40 = vld [vmem:[%s13897_s2 + $0x2c80] sm:$0xff]  ;;  %v1483_v47 = vld [vmem:[%s13897_s2 + $0x2c98] sm:$0xff] }
 0x27b   :  { %6924 = vmatpush1.bf16.msra.mxu0 %v6923_v57  ;;  %7694 = vmatprep.subr.bf16.mxu1 %v7693_v58  ;;  %v12213_v57 = vcombine.high %v12184_v44, %v12184_v44 }
 0x27c   :  { %6926 = vmatprep.subr.bf16.mxu0 %v6925_v19  ;;  %v5510_v28 = vpop.f32.mrb[16].mxu1  ;;  %v6941_v19 = vpack.c.bf16 %v1320_v50, %v1317_v46  ;;  %v7725_v46 = vpack.c.bf16 %v1483_v47, %v1480_v40  ;;  %v1340_v50 = vld [vmem:[%s13897_s2 + $0x2820] sm:$0xff]  ;;  %v1555_v47 = vld [vmem:[%s13897_s2 + $0x2ed8] sm:$0xff] }
 0x27d   :  { %v5511_v31 = vpop.f32.mrb[17].mxu1  ;;  %v1552_v40 = vld [vmem:[%s13897_s2 + $0x2ec0] sm:$0xff] }
 0x27e   :  { %7696 = vmatpush3.bf16.msra.mxu1 %v7695_v43  ;;  %v5512_v51 = vadd.f32 %v5511_v31, %v5510_v28  ;;  %v1332_v28 = vld [vmem:[%s13897_s2 + $0x27e0] sm:$0xff]  ;;  %v7717_v31 = vpack.c.bf16 %v1471_v55, %v1468_v23  ;;  %v1353_v23 = vld [vmem:[%s13897_s2 + $0x2888] sm:$0xff] }
 0x27f   :  { %6928 = vmatpush1.bf16.msra.mxu0 %v6927_v13  ;;  %7698 = vmatprep.subr.bf16.mxu1 %v7697_v14  ;;  %v6943_v13 = vpack.c.bf16 %v1319_v5, %v1316_v59  ;;  %v7713_v14 = vpack.c.bf16 %v1465_v9, %v1462_v7  ;;  %v1343_v59 = vld [vmem:[%s13897_s2 + $0x2838] sm:$0xff]  ;;  %v1350_v5 = vld [vmem:[%s13897_s2 + $0x2870] sm:$0xff]  ;;  %v1356_v55 = vld [vmem:[%s13897_s2 + $0x28a0] sm:$0xff] }
 0x280   :  { %6930 = vmatprep.subr.bf16.mxu0 %v6929_v20  ;;  %v12174_v54 = vadd.f32 %v5512_v51, %v11965_v30  ;;  %v1310_v30 = vld [vmem:[%s13897_s2 + $0x2730] sm:$0xff]  ;;  %v1325_v20 = vld [vmem:[%s13897_s2 + $0x27a8] sm:$0xff]  ;;  %v1423_v51 = vld [vmem:[%s13897_s2 + $0x2ab8] sm:$0xff]  ;;  %v6959_v9 = vpack.c.bf16 %v1343_v59, %v1340_v50  ;;  %v7741_v50 = vpack.c.bf16 %v1555_v47, %v1552_v40 }
 0x281   :  { %v6939_v58 = vpack.c.bf16 %v1313_v22, %v1310_v30  ;;  %v7719_v18 = vpack.c.bf16 %v1423_v51, %v1420_v39  ;;  %v1337_v30 = vld [vmem:[%s13897_s2 + $0x2808] sm:$0xff]  ;;  %v1344_v22 = vld [vmem:[%s13897_s2 + $0x2840] sm:$0xff]  ;;  %v1447_v51 = vld [vmem:[%s13897_s2 + $0x2b78] sm:$0xff] }
 0x282   :  { %7700 = vmatpush3.bf16.msra.mxu1 %v7699_v32  ;;  %v1328_v32 = vld [vmem:[%s13897_s2 + $0x27c0] sm:$0xff]  ;;  %v6955_v3 = vpack.c.bf16 %v1337_v30, %v1334_v17  ;;  %v1358_v17 = vld [vmem:[%s13897_s2 + $0x28b0] sm:$0xff]  ;;  %v1361_v30 = vld [vmem:[%s13897_s2 + $0x28c8] sm:$0xff] }
 0x283   :  { %6932 = vmatpush1.bf16.msra.mxu0 %v6931_v45  ;;  %7702 = vmatprep.subr.bf16.mxu1 %v7701_v35  ;;  %v6949_v45 = vpack.c.bf16 %v1332_v28, %v1329_v24  ;;  %v1331_v35 = vld [vmem:[%s13897_s2 + $0x27d8] sm:$0xff]  ;;  %v1444_v39 = vld [vmem:[%s13897_s2 + $0x2b60] sm:$0xff] }
 0x284   :  { %6934 = vmatprep.subr.bf16.mxu0 %v6933_v38  ;;  %v1335_v38 = vld [vmem:[%s13897_s2 + $0x27f8] sm:$0xff]  ;;  %v6951_v41 = vpack.c.bf16 %v1331_v35, %v1328_v32  ;;  %v1352_v32 = vld [vmem:[%s13897_s2 + $0x2880] sm:$0xff] }
 0x285   :  { %v1355_v35 = vld [vmem:[%s13897_s2 + $0x2898] sm:$0xff]  ;;  %v1392_v40 = vld [vmem:[%s13897_s2 + $0x29c0] sm:$0xff] }
 0x286   :  { %2933 = vmatmul.mubr.f32.vlgmr.msra.gmra.mrb[0].mxu0 %v11770_v56  ;;  %7704 = vmatpush3.bf16.msra.mxu1 %v7703_v48  ;;  %v1411_v56 = vld [vmem:[%s13897_s2 + $0x2a58] sm:$0xff]  ;;  %v1426_v48 = vld [vmem:[%s13897_s2 + $0x2ad0] sm:$0xff] }
 0x287   :  { %6936 = vmatpush1.bf16.msra.mxu0 %v6935_v49  ;;  %7706 = vmatprep.subr.bf16.mxu1 %v7705_v25  ;;  %v7711_v43 = vpack.c.bf16 %v1411_v56, %v1408_v4  ;;  %v1429_v49 = vld [vmem:[%s13897_s2 + $0x2ae8] sm:$0xff]  ;;  %v6953_v25 = vpack.c.bf16 %v1338_v8, %v1335_v38  ;;  %v1486_v4 = vld [vmem:[%s13897_s2 + $0x2cb0] sm:$0xff]  ;;  %v1359_v38 = vld [vmem:[%s13897_s2 + $0x28b8] sm:$0xff]  ;;  %v7735_v8 = vpack.c.bf16 %v1447_v51, %v1444_v39 }
 0x288   :  { %6938 = vmatprep.subr.bf16.mxu0 %v6937_v33  ;;  %3003 = vmatprep.mubr.f32.mxu0 %v12002_v62  ;;  %v1322_v62 = vld [vmem:[%s13897_s2 + $0x2790] sm:$0xff]  ;;  %v1341_v33 = vld [vmem:[%s13897_s2 + $0x2828] sm:$0xff]  ;;  %v7723_v34 = vpack.c.bf16 %v1429_v49, %v1426_v48  ;;  %v1379_v39 = vld [vmem:[%s13897_s2 + $0x2958] sm:$0xff] }
 0x289   :  { %4340 = vmatmul.mubr.f32.vlgmr.msra.gmra.mrb[30].mxu1 %v11974_v2  ;;  %v6947_v27 = vpack.c.bf16 %v1325_v20, %v1322_v62  ;;  %v1489_v56 = vld [vmem:[%s13897_s2 + $0x2cc8] sm:$0xff]  ;;  %v1498_v48 = vld [vmem:[%s13897_s2 + $0x2d10] sm:$0xff] }
 0x28a   :  { %7708 = vmatpush3.bf16.msra.mxu1 %v7707_v6  ;;  %4409 = vmatprep.mubr.f32.mxu1 %v12213_v57  ;;  %v1432_v6 = vld [vmem:[%s13897_s2 + $0x2b00] sm:$0xff]  ;;  %v7729_v10 = vpack.c.bf16 %v1489_v56, %v1486_v4  ;;  %v1501_v49 = vld [vmem:[%s13897_s2 + $0x2d28] sm:$0xff]  ;;  %v1367_v4 = vld [vmem:[%s13897_s2 + $0x28f8] sm:$0xff] }
 0x28b   :  { %6940 = vmatpush1.bf16.msra.mxu0 %v6939_v58  ;;  %7710 = vmatprep.subr.bf16.mxu1 %v7709_v1  ;;  %v1435_v58 = vld [vmem:[%s13897_s2 + $0x2b18] sm:$0xff]  ;;  %v6957_v1 = vpack.c.bf16 %v1344_v22, %v1341_v33  ;;  %v1365_v33 = vld [vmem:[%s13897_s2 + $0x28e8] sm:$0xff]  ;;  %v1368_v22 = vld [vmem:[%s13897_s2 + $0x2900] sm:$0xff] }
 0x28c   :  { %6942 = vmatprep.subr.bf16.mxu0 %v6941_v19  ;;  %v1347_v19 = vld [vmem:[%s13897_s2 + $0x2858] sm:$0xff]  ;;  %v7727_v7 = vpack.c.bf16 %v1435_v58, %v1432_v6  ;;  %v1364_v6 = vld [vmem:[%s13897_s2 + $0x28e0] sm:$0xff]  ;;  %v6973_v59 = vpack.c.bf16 %v1368_v22, %v1365_v33  ;;  %v1558_v56 = vld [vmem:[%s13897_s2 + $0x2ef0] sm:$0xff] }
 0x28d   :  { %v6961_v62 = vpack.c.bf16 %v1350_v5, %v1347_v19  ;;  %v1504_v58 = vld [vmem:[%s13897_s2 + $0x2d40] sm:$0xff]  ;;  %v1561_v19 = vld [vmem:[%s13897_s2 + $0x2f08] sm:$0xff]  ;;  %v1371_v5 = vld [vmem:[%s13897_s2 + $0x2918] sm:$0xff] }
 0x28e   :  { %7712 = vmatpush3.bf16.msra.mxu1 %v7711_v43  ;;  %v1438_v43 = vld [vmem:[%s13897_s2 + $0x2b30] sm:$0xff] }
 0x28f   :  { %6944 = vmatpush1.bf16.msra.mxu0 %v6943_v13  ;;  %7714 = vmatprep.subr.bf16.mxu1 %v7713_v14  ;;  %v1441_v13 = vld [vmem:[%s13897_s2 + $0x2b48] sm:$0xff]  ;;  %v1570_v51 = vld [vmem:[%s13897_s2 + $0x2f50] sm:$0xff] }
 0x290   :  { %6946 = vmatprep.subr.bf16.mxu0 %v6945_v16  ;;  %v1495_v16 = vld [vmem:[%s13897_s2 + $0x2cf8] sm:$0xff]  ;;  %v7731_v28 = vpack.c.bf16 %v1441_v13, %v1438_v43  ;;  %v1370_v43 = vld [vmem:[%s13897_s2 + $0x2910] sm:$0xff] }
 0x291   :  { %v1510_v13 = vld [vmem:[%s13897_s2 + $0x2d70] sm:$0xff] }
 0x292   :  { %7716 = vmatpush3.bf16.msra.mxu1 %v7715_v29  ;;  %v1936_v29 = vcombine.high %v12162_v63, %v12162_v63  ;;  %v6965_v63 = vpack.c.bf16 %v1356_v55, %v1353_v23  ;;  %v1380_v23 = vld [vmem:[%s13897_s2 + $0x2960] sm:$0xff] }
 0x293   :  { %6948 = vmatpush1.bf16.msra.mxu0 %v6947_v27  ;;  %7718 = vmatprep.subr.bf16.mxu1 %v7717_v31  ;;  %v6963_v27 = vpack.c.bf16 %v1349_v15, %v1346_v12  ;;  %v7733_v31 = vpack.c.bf16 %v1495_v16, %v1492_v26  ;;  %v7745_v12 = vpack.c.bf16 %v1561_v19, %v1558_v56  ;;  %v1373_v15 = vld [vmem:[%s13897_s2 + $0x2928] sm:$0xff]  ;;  %v1564_v26 = vld [vmem:[%s13897_s2 + $0x2f20] sm:$0xff]  ;;  %v1567_v16 = vld [vmem:[%s13897_s2 + $0x2f38] sm:$0xff] }
 0x294   :  { %6950 = vmatprep.subr.bf16.mxu0 %v6949_v45  ;;  %v1398_v56 = vld [vmem:[%s13897_s2 + $0x29f0] sm:$0xff] }
 0x296   :  { %7720 = vmatpush3.bf16.msra.mxu1 %v7719_v18  ;;  %v12392_v18 = vrot.slane %v1936_v29, %v8342_v11  ;;  %v1376_v29 = vld [vmem:[%s13897_s2 + $0x2940] sm:$0xff] }
 0x297   :  { %6952 = vmatpush1.bf16.msra.mxu0 %v6951_v41  ;;  %7722 = vmatprep.subr.bf16.mxu1 %v7721_v42  ;;  %v6967_v41 = vpack.c.bf16 %v1355_v35, %v1352_v32  ;;  %v7737_v42 = vpack.c.bf16 %v1549_v37, %v1546_v36  ;;  %v1383_v35 = vld [vmem:[%s13897_s2 + $0x2978] sm:$0xff]  ;;  %v1386_v36 = vld [vmem:[%s13897_s2 + $0x2990] sm:$0xff] }
 0x298   :  { %6954 = vmatprep.subr.bf16.mxu0 %v6953_v25 }
 0x29a   :  { %7724 = vmatpush3.bf16.msra.mxu1 %v7723_v34  ;;  %v7739_v34 = vpack.c.bf16 %v1501_v49, %v1498_v48  ;;  %v1385_v48 = vld [vmem:[%s13897_s2 + $0x2988] sm:$0xff]  ;;  %v1576_v49 = vld [vmem:[%s13897_s2 + $0x2f80] sm:$0xff] }
 0x29b   :  { %6956 = vmatpush1.bf16.msra.mxu0 %v6955_v3  ;;  %7726 = vmatprep.subr.bf16.mxu1 %v7725_v46  ;;  %v12420_v3 = vcombine.high %v12392_v18, %v12392_v18  ;;  %v6971_v46 = vpack.c.bf16 %v1361_v30, %v1358_v17  ;;  %v6985_v17 = vpack.c.bf16 %v1386_v36, %v1383_v35  ;;  %v1389_v30 = vld [vmem:[%s13897_s2 + $0x29a8] sm:$0xff]  ;;  %v1642_v35 = vld [vmem:[%s13897_s2 + $0x3190] sm:$0xff] }
 0x29c   :  { %v5545_v14 = vpop.f32.mrb[18].mxu1  ;;  %6958 = vmatprep.subr.bf16.mxu0 %v6957_v1  ;;  %v1507_v1 = vld [vmem:[%s13897_s2 + $0x2d58] sm:$0xff]  ;;  %v1645_v36 = vld [vmem:[%s13897_s2 + $0x31a8] sm:$0xff] }
 0x29d   :  { %v5546_v20 = vpop.f32.mrb[19].mxu1 }
 0x29e   :  { %v5547_v24 = vadd.f32 %v5546_v20, %v5545_v14  ;;  %7728 = vmatpush3.bf16.msra.mxu1 %v7727_v7  ;;  %v1374_v7 = vld [vmem:[%s13897_s2 + $0x2930] sm:$0xff]  ;;  %v1513_v14 = vld [vmem:[%s13897_s2 + $0x2d88] sm:$0xff] }
 0x29f   :  { %6960 = vmatpush1.bf16.msra.mxu0 %v6959_v9  ;;  %7730 = vmatprep.subr.bf16.mxu1 %v7729_v10  ;;  %v7743_v9 = vpack.c.bf16 %v1507_v1, %v1504_v58  ;;  %v6975_v10 = vpack.c.bf16 %v1367_v4, %v1364_v6  ;;  %v1377_v20 = vld [vmem:[%s13897_s2 + $0x2948] sm:$0xff]  ;;  %v7747_v55 = vpack.c.bf16 %v1513_v14, %v1510_v13  ;;  %v1391_v58 = vld [vmem:[%s13897_s2 + $0x29b8] sm:$0xff]  ;;  %v1582_v1 = vld [vmem:[%s13897_s2 + $0x2fb0] sm:$0xff] }
 0x2a0   :  { %v12374_v45 = vadd.f32 %v5547_v24, %v12174_v54  ;;  %6962 = vmatprep.subr.bf16.mxu0 %v6961_v62  ;;  %v1362_v54 = vld [vmem:[%s13897_s2 + $0x28d0] sm:$0xff]  ;;  %v6977_v62 = vpack.c.bf16 %v1374_v7, %v1371_v5  ;;  %v6979_v24 = vpack.c.bf16 %v1373_v15, %v1370_v43  ;;  %v6981_v32 = vpack.c.bf16 %v1380_v23, %v1377_v20  ;;  %v1395_v4 = vld [vmem:[%s13897_s2 + $0x29d8] sm:$0xff]  ;;  %v1397_v14 = vld [vmem:[%s13897_s2 + $0x29e8] sm:$0xff] }
 0x2a1   :  { %v6969_v25 = vpack.c.bf16 %v1362_v54, %v1359_v38  ;;  %v6983_v38 = vpack.c.bf16 %v1379_v39, %v1376_v29  ;;  %v6989_v6 = vpack.c.bf16 %v1392_v40, %v1389_v30  ;;  %v6993_v13 = vpack.c.bf16 %v1398_v56, %v1395_v4  ;;  %v1591_v15 = vld [vmem:[%s13897_s2 + $0x2ff8] sm:$0xff]  ;;  %v1404_v20 = vld [vmem:[%s13897_s2 + $0x2a20] sm:$0xff]  ;;  %v1654_v4 = vld [vmem:[%s13897_s2 + $0x31f0] sm:$0xff] }
 0x2a2   :  { %7732 = vmatpush3.bf16.msra.mxu1 %v7731_v28  ;;  %v7749_v28 = vpack.c.bf16 %v1567_v16, %v1564_v26  ;;  %v1401_v16 = vld [vmem:[%s13897_s2 + $0x2a08] sm:$0xff]  ;;  %v1648_v30 = vld [vmem:[%s13897_s2 + $0x31c0] sm:$0xff]  ;;  %v1651_v40 = vld [vmem:[%s13897_s2 + $0x31d8] sm:$0xff] }
 0x2a3   :  { %6964 = vmatpush1.bf16.msra.mxu0 %v6963_v27  ;;  %7734 = vmatprep.subr.bf16.mxu1 %v7733_v31  ;;  %v1516_v27 = vld [vmem:[%s13897_s2 + $0x2da0] sm:$0xff]  ;;  %v1519_v31 = vld [vmem:[%s13897_s2 + $0x2db8] sm:$0xff]  ;;  %v1657_v56 = vld [vmem:[%s13897_s2 + $0x3208] sm:$0xff] }
 0x2a4   :  { %6966 = vmatprep.subr.bf16.mxu0 %v6965_v63  ;;  %v1573_v63 = vld [vmem:[%s13897_s2 + $0x2f68] sm:$0xff]  ;;  %v7751_v37 = vpack.c.bf16 %v1519_v31, %v1516_v27  ;;  %v1540_v27 = vld [vmem:[%s13897_s2 + $0x2e60] sm:$0xff]  ;;  %v1543_v31 = vld [vmem:[%s13897_s2 + $0x2e78] sm:$0xff] }
 0x2a5   :  { %v7753_v54 = vpack.c.bf16 %v1573_v63, %v1570_v51  ;;  %v6997_v51 = vpack.c.bf16 %v1404_v20, %v1401_v16  ;;  %v1403_v63 = vld [vmem:[%s13897_s2 + $0x2a18] sm:$0xff]  ;;  %v1428_v16 = vld [vmem:[%s13897_s2 + $0x2ae0] sm:$0xff] }
 0x2a6   :  { %7736 = vmatpush3.bf16.msra.mxu1 %v7735_v8  ;;  %v1382_v8 = vld [vmem:[%s13897_s2 + $0x2970] sm:$0xff] }
 0x2a7   :  { %6968 = vmatpush1.bf16.msra.mxu0 %v6967_v41  ;;  %7738 = vmatprep.subr.bf16.mxu1 %v7737_v42  ;;  %v1522_v41 = vld [vmem:[%s13897_s2 + $0x2dd0] sm:$0xff]  ;;  %v1525_v42 = vld [vmem:[%s13897_s2 + $0x2de8] sm:$0xff]  ;;  %v6987_v33 = vpack.c.bf16 %v1385_v48, %v1382_v8 }
 0x2a8   :  { %6970 = vmatprep.subr.bf16.mxu0 %v6969_v25  ;;  %v1579_v25 = vld [vmem:[%s13897_s2 + $0x2f98] sm:$0xff]  ;;  %v7755_v47 = vpack.c.bf16 %v1525_v42, %v1522_v41  ;;  %v7769_v41 = vpack.c.bf16 %v1645_v36, %v1642_v35  ;;  %v1406_v42 = vld [vmem:[%s13897_s2 + $0x2a30] sm:$0xff]  ;;  %v1597_v48 = vld [vmem:[%s13897_s2 + $0x3028] sm:$0xff] }
 0x2a9   :  { %4410 = vmatmul.mubr.f32.vlgmr.msra.gmra.mrb[32].mxu1 %v12184_v44  ;;  %v7757_v22 = vpack.c.bf16 %v1579_v25, %v1576_v49  ;;  %v1409_v25 = vld [vmem:[%s13897_s2 + $0x2a48] sm:$0xff]  ;;  %v1431_v35 = vld [vmem:[%s13897_s2 + $0x2af8] sm:$0xff]  ;;  %v1434_v36 = vld [vmem:[%s13897_s2 + $0x2b10] sm:$0xff] }
 0x2aa   :  { %7740 = vmatpush3.bf16.msra.mxu1 %v7739_v34  ;;  %4479 = vmatprep.mubr.f32.mxu1 %v12420_v3  ;;  %v1388_v34 = vld [vmem:[%s13897_s2 + $0x29a0] sm:$0xff] }
 0x2ab   :  { %6972 = vmatpush1.bf16.msra.mxu0 %v6971_v46  ;;  %7742 = vmatprep.subr.bf16.mxu1 %v7741_v50  ;;  %v1528_v46 = vld [vmem:[%s13897_s2 + $0x2e00] sm:$0xff]  ;;  %v1531_v50 = vld [vmem:[%s13897_s2 + $0x2e18] sm:$0xff]  ;;  %v6991_v5 = vpack.c.bf16 %v1391_v58, %v1388_v34 }
 0x2ac   :  { %6974 = vmatprep.subr.bf16.mxu0 %v6973_v59  ;;  %v1585_v59 = vld [vmem:[%s13897_s2 + $0x2fc8] sm:$0xff]  ;;  %v7759_v19 = vpack.c.bf16 %v1531_v50, %v1528_v46  ;;  %v7003_v46 = vpack.c.bf16 %v1409_v25, %v1406_v42  ;;  %v7773_v50 = vpack.c.bf16 %v1651_v40, %v1648_v30  ;;  %v1600_v58 = vld [vmem:[%s13897_s2 + $0x3040] sm:$0xff]  ;;  %v1675_v25 = vld [vmem:[%s13897_s2 + $0x3298] sm:$0xff] }
 0x2ad   :  { %v7761_v7 = vpack.c.bf16 %v1585_v59, %v1582_v1  ;;  %v1415_v59 = vld [vmem:[%s13897_s2 + $0x2a78] sm:$0xff]  ;;  %v1621_v42 = vld [vmem:[%s13897_s2 + $0x30e8] sm:$0xff]  ;;  %v1440_v40 = vld [vmem:[%s13897_s2 + $0x2b40] sm:$0xff] }
 0x2ae   :  { %7744 = vmatpush3.bf16.msra.mxu1 %v7743_v9  ;;  %v1394_v9 = vld [vmem:[%s13897_s2 + $0x29d0] sm:$0xff]  ;;  %v1437_v30 = vld [vmem:[%s13897_s2 + $0x2b28] sm:$0xff] }
 0x2af   :  { %6976 = vmatpush1.bf16.msra.mxu0 %v6975_v10  ;;  %7746 = vmatprep.subr.bf16.mxu1 %v7745_v12  ;;  %v1534_v10 = vld [vmem:[%s13897_s2 + $0x2e30] sm:$0xff]  ;;  %v1537_v12 = vld [vmem:[%s13897_s2 + $0x2e48] sm:$0xff] }
 0x2b0   :  { %6978 = vmatprep.subr.bf16.mxu0 %v6977_v62  ;;  %v1588_v62 = vld [vmem:[%s13897_s2 + $0x2fe0] sm:$0xff] }
 0x2b1   :  { %v7765_v29 = vpack.c.bf16 %v1591_v15, %v1588_v62  ;;  %v1660_v62 = vld [vmem:[%s13897_s2 + $0x3220] sm:$0xff]  ;;  %v1663_v15 = vld [vmem:[%s13897_s2 + $0x3238] sm:$0xff] }
 0x2b2   :  { %7748 = vmatpush3.bf16.msra.mxu1 %v7747_v55  ;;  %v7763_v55 = vpack.c.bf16 %v1537_v12, %v1534_v10  ;;  %v7777_v10 = vpack.c.bf16 %v1657_v56, %v1654_v4  ;;  %v1606_v12 = vld [vmem:[%s13897_s2 + $0x3070] sm:$0xff]  ;;  %v1443_v4 = vld [vmem:[%s13897_s2 + $0x2b58] sm:$0xff] }
 0x2b3   :  { %6980 = vmatpush1.bf16.msra.mxu0 %v6979_v24  ;;  %7750 = vmatprep.subr.bf16.mxu1 %v7749_v28  ;;  %v1400_v24 = vld [vmem:[%s13897_s2 + $0x2a00] sm:$0xff]  ;;  %v6995_v28 = vpack.c.bf16 %v1397_v14, %v1394_v9  ;;  %v1421_v14 = vld [vmem:[%s13897_s2 + $0x2aa8] sm:$0xff]  ;;  %v1446_v56 = vld [vmem:[%s13897_s2 + $0x2b70] sm:$0xff] }
 0x2b4   :  { %6982 = vmatprep.subr.bf16.mxu0 %v6981_v32  ;;  %v12580_v32 = vld [vmem:[%s13898_s0 + $0x40] sm:$0xff]  ;;  %v6999_v8 = vpack.c.bf16 %v1403_v63, %v1400_v24  ;;  %v1669_v63 = vld [vmem:[%s13897_s2 + $0x3268] sm:$0xff] }
 0x2b5   :  { %v1424_v24 = vld [vmem:[%s13897_s2 + $0x2ac0] sm:$0xff] }
 0x2b6   :  { %7752 = vmatpush3.bf16.msra.mxu1 %v7751_v37  ;;  %v1407_v37 = vld [vmem:[%s13897_s2 + $0x2a38] sm:$0xff] }
 0x2b7   :  { %6984 = vmatpush1.bf16.msra.mxu0 %v6983_v38  ;;  %7754 = vmatprep.subr.bf16.mxu1 %v7753_v54  ;;  %v7767_v38 = vpack.c.bf16 %v1543_v31, %v1540_v27  ;;  %v12602_v54 = vrot.slane %v12580_v32, %v8342_v11  ;;  %v1427_v31 = vld [vmem:[%s13897_s2 + $0x2ad8] sm:$0xff] }
 0x2b8   :  { %6986 = vmatprep.subr.bf16.mxu0 %v6985_v17  ;;  %v1594_v17 = vld [vmem:[%s13897_s2 + $0x3010] sm:$0xff] }
 0x2b9   :  { %v12631_v34 = vcombine.high %v12602_v54, %v12602_v54 }
 0x2ba   :  { %7756 = vmatpush3.bf16.msra.mxu1 %v7755_v47  ;;  %v1413_v47 = vld [vmem:[%s13897_s2 + $0x2a68] sm:$0xff] }
 0x2bb   :  { %6988 = vmatpush1.bf16.msra.mxu0 %v6987_v33  ;;  %7758 = vmatprep.subr.bf16.mxu1 %v7757_v22  ;;  %v1416_v33 = vld [vmem:[%s13897_s2 + $0x2a80] sm:$0xff]  ;;  %v7771_v22 = vpack.c.bf16 %v1597_v48, %v1594_v17  ;;  %v7017_v17 = vpack.c.bf16 %v1434_v36, %v1431_v35  ;;  %v1433_v48 = vld [vmem:[%s13897_s2 + $0x2b08] sm:$0xff]  ;;  %v1738_v35 = vld [vmem:[%s13897_s2 + $0x3490] sm:$0xff] }
 0x2bc   :  { %v5580_v43 = vpop.f32.mrb[20].mxu1  ;;  %6990 = vmatprep.subr.bf16.mxu0 %v6989_v6  ;;  %v1412_v6 = vld [vmem:[%s13897_s2 + $0x2a60] sm:$0xff]  ;;  %v7005_v1 = vpack.c.bf16 %v1416_v33, %v1413_v47  ;;  %v1741_v36 = vld [vmem:[%s13897_s2 + $0x34a8] sm:$0xff] }
 0x2bd   :  { %v5581_v26 = vpop.f32.mrb[21].mxu1  ;;  %v7007_v9 = vpack.c.bf16 %v1415_v59, %v1412_v6  ;;  %v1627_v6 = vld [vmem:[%s13897_s2 + $0x3118] sm:$0xff]  ;;  %v1681_v59 = vld [vmem:[%s13897_s2 + $0x32c8] sm:$0xff] }
 0x2be   :  { %v5582_v23 = vadd.f32 %v5581_v26, %v5580_v43  ;;  %7760 = vmatpush3.bf16.msra.mxu1 %v7759_v19  ;;  %v1419_v19 = vld [vmem:[%s13897_s2 + $0x2a98] sm:$0xff]  ;;  %v1609_v43 = vld [vmem:[%s13897_s2 + $0x3088] sm:$0xff] }
 0x2bf   :  { %6992 = vmatpush1.bf16.msra.mxu0 %v6991_v5  ;;  %7762 = vmatprep.subr.bf16.mxu1 %v7761_v7  ;;  %v1422_v5 = vld [vmem:[%s13897_s2 + $0x2ab0] sm:$0xff]  ;;  %v1425_v26 = vld [vmem:[%s13897_s2 + $0x2ac8] sm:$0xff]  ;;  %v7779_v20 = vpack.c.bf16 %v1609_v43, %v1606_v12  ;;  %v7025_v43 = vpack.c.bf16 %v1446_v56, %v1443_v4 }
 0x2c0   :  { %v12583_v39 = vadd.f32 %v5582_v23, %v12374_v45  ;;  %6994 = vmatprep.subr.bf16.mxu0 %v6993_v13  ;;  %v1410_v45 = vld [vmem:[%s13897_s2 + $0x2a50] sm:$0xff]  ;;  %v7009_v13 = vpack.c.bf16 %v1422_v5, %v1419_v19  ;;  %v7013_v27 = vpack.c.bf16 %v1428_v16, %v1425_v26  ;;  %v1449_v26 = vld [vmem:[%s13897_s2 + $0x2b88] sm:$0xff]  ;;  %v1452_v16 = vld [vmem:[%s13897_s2 + $0x2ba0] sm:$0xff] }
 0x2c1   :  { %v7001_v49 = vpack.c.bf16 %v1410_v45, %v1407_v37  ;;  %v7015_v45 = vpack.c.bf16 %v1427_v31, %v1424_v24  ;;  %v1639_v31 = vld [vmem:[%s13897_s2 + $0x3178] sm:$0xff]  ;;  %v1750_v4 = vld [vmem:[%s13897_s2 + $0x34f0] sm:$0xff]  ;;  %v1753_v56 = vld [vmem:[%s13897_s2 + $0x3508] sm:$0xff] }
 0x2c2   :  { %7764 = vmatpush3.bf16.msra.mxu1 %v7763_v55  ;;  %v7781_v55 = vpack.c.bf16 %v1663_v15, %v1660_v62  ;;  %v1687_v62 = vld [vmem:[%s13897_s2 + $0x32f8] sm:$0xff] }
 0x2c3   :  { %6996 = vmatpush1.bf16.msra.mxu0 %v6995_v28  ;;  %7766 = vmatprep.subr.bf16.mxu1 %v7765_v29  ;;  %v1612_v28 = vld [vmem:[%s13897_s2 + $0x30a0] sm:$0xff]  ;;  %v1615_v29 = vld [vmem:[%s13897_s2 + $0x30b8] sm:$0xff] }
 0x2c4   :  { %6998 = vmatprep.subr.bf16.mxu0 %v6997_v51  ;;  %v1666_v51 = vld [vmem:[%s13897_s2 + $0x3250] sm:$0xff]  ;;  %v7783_v37 = vpack.c.bf16 %v1615_v29, %v1612_v28  ;;  %v1448_v29 = vld [vmem:[%s13897_s2 + $0x2b80] sm:$0xff] }
 0x2c6   :  { %3004 = vmatmul.mubr.f32.vlgmr.msra.gmra.mrb[0].mxu0 %v11974_v2  ;;  %7768 = vmatpush3.bf16.msra.mxu1 %v7767_v38  ;;  %v1603_v2 = vld [vmem:[%s13897_s2 + $0x3058] sm:$0xff]  ;;  %v7785_v38 = vpack.c.bf16 %v1669_v63, %v1666_v51 }
 0x2c7   :  { %7000 = vmatpush1.bf16.msra.mxu0 %v6999_v8  ;;  %7770 = vmatprep.subr.bf16.mxu1 %v7769_v41  ;;  %v7775_v7 = vpack.c.bf16 %v1603_v2, %v1600_v58  ;;  %v1430_v8 = vld [vmem:[%s13897_s2 + $0x2af0] sm:$0xff]  ;;  %v7021_v58 = vpack.c.bf16 %v1440_v40, %v1437_v30  ;;  %v1439_v2 = vld [vmem:[%s13897_s2 + $0x2b38] sm:$0xff]  ;;  %v1461_v40 = vld [vmem:[%s13897_s2 + $0x2be8] sm:$0xff] }
 0x2c8   :  { %7002 = vmatprep.subr.bf16.mxu0 %v7001_v49  ;;  %3074 = vmatprep.mubr.f32.mxu0 %v12213_v57  ;;  %v1418_v57 = vld [vmem:[%s13897_s2 + $0x2a90] sm:$0xff]  ;;  %v1672_v49 = vld [vmem:[%s13897_s2 + $0x3280] sm:$0xff]  ;;  %v7019_v33 = vpack.c.bf16 %v1433_v48, %v1430_v8  ;;  %v1451_v63 = vld [vmem:[%s13897_s2 + $0x2b98] sm:$0xff] }
 0x2c9   :  { %4480 = vmatmul.mubr.f32.vlgmr.msra.gmra.mrb[34].mxu1 %v12392_v18  ;;  %v7011_v23 = vpack.c.bf16 %v1421_v14, %v1418_v57  ;;  %v1618_v41 = vld [vmem:[%s13897_s2 + $0x30d0] sm:$0xff]  ;;  %v1633_v57 = vld [vmem:[%s13897_s2 + $0x3148] sm:$0xff]  ;;  %v1684_v14 = vld [vmem:[%s13897_s2 + $0x32e0] sm:$0xff]  ;;  %v7031_v8 = vpack.c.bf16 %v1451_v63, %v1448_v29 }
 0x2ca   :  { %7772 = vmatpush3.bf16.msra.mxu1 %v7771_v22  ;;  %4549 = vmatprep.mubr.f32.mxu1 %v12631_v34  ;;  %v7787_v47 = vpack.c.bf16 %v1621_v42, %v1618_v41  ;;  %v7789_v22 = vpack.c.bf16 %v1675_v25, %v1672_v49  ;;  %v7797_v28 = vpack.c.bf16 %v1687_v62, %v1684_v14  ;;  %v1454_v42 = vld [vmem:[%s13897_s2 + $0x2bb0] sm:$0xff]  ;;  %v1693_v48 = vld [vmem:[%s13897_s2 + $0x3328] sm:$0xff]  ;;  %v1744_v25 = vld [vmem:[%s13897_s2 + $0x34c0] sm:$0xff] }
 0x2cb   :  { %7004 = vmatpush1.bf16.msra.mxu0 %v7003_v46  ;;  %7774 = vmatprep.subr.bf16.mxu1 %v7773_v50  ;;  %v1436_v46 = vld [vmem:[%s13897_s2 + $0x2b20] sm:$0xff]  ;;  %v7801_v41 = vpack.c.bf16 %v1741_v36, %v1738_v35  ;;  %v1747_v30 = vld [vmem:[%s13897_s2 + $0x34d8] sm:$0xff]  ;;  %v1469_v14 = vld [vmem:[%s13897_s2 + $0x2c28] sm:$0xff] }
 0x2cc   :  { %7006 = vmatprep.subr.bf16.mxu0 %v7005_v1  ;;  %v1624_v50 = vld [vmem:[%s13897_s2 + $0x3100] sm:$0xff]  ;;  %v1678_v1 = vld [vmem:[%s13897_s2 + $0x32b0] sm:$0xff]  ;;  %v7023_v5 = vpack.c.bf16 %v1439_v2, %v1436_v46  ;;  %v1699_v2 = vld [vmem:[%s13897_s2 + $0x3358] sm:$0xff] }
 0x2cd   :  { %v7791_v19 = vpack.c.bf16 %v1627_v6, %v1624_v50  ;;  %v7805_v50 = vpack.c.bf16 %v1747_v30, %v1744_v25  ;;  %v1460_v6 = vld [vmem:[%s13897_s2 + $0x2be0] sm:$0xff]  ;;  %v1711_v29 = vld [vmem:[%s13897_s2 + $0x33b8] sm:$0xff]  ;;  %v1765_v63 = vld [vmem:[%s13897_s2 + $0x3568] sm:$0xff] }
 0x2ce   :  { %7776 = vmatpush3.bf16.msra.mxu1 %v7775_v7  ;;  %v7793_v7 = vpack.c.bf16 %v1681_v59, %v1678_v1  ;;  %v1463_v59 = vld [vmem:[%s13897_s2 + $0x2bf8] sm:$0xff]  ;;  %v1756_v62 = vld [vmem:[%s13897_s2 + $0x3520] sm:$0xff]  ;;  %v1482_v36 = vld [vmem:[%s13897_s2 + $0x2c90] sm:$0xff] }
 0x2cf   :  { %7008 = vmatpush1.bf16.msra.mxu0 %v7007_v9  ;;  %7778 = vmatprep.subr.bf16.mxu1 %v7777_v10  ;;  %v1442_v9 = vld [vmem:[%s13897_s2 + $0x2b50] sm:$0xff]  ;;  %v1479_v35 = vld [vmem:[%s13897_s2 + $0x2c78] sm:$0xff]  ;;  %v1485_v25 = vld [vmem:[%s13897_s2 + $0x2ca8] sm:$0xff] }
 0x2d0   :  { %7010 = vmatprep.subr.bf16.mxu0 %v7009_v13  ;;  %v1630_v10 = vld [vmem:[%s13897_s2 + $0x3130] sm:$0xff]  ;;  %v1445_v13 = vld [vmem:[%s13897_s2 + $0x2b68] sm:$0xff]  ;;  %v1488_v30 = vld [vmem:[%s13897_s2 + $0x2cc0] sm:$0xff] }
 0x2d1   :  { %v7027_v24 = vpack.c.bf16 %v1445_v13, %v1442_v9  ;;  %v7039_v9 = vpack.c.bf16 %v1463_v59, %v1460_v6  ;;  %v1723_v6 = vld [vmem:[%s13897_s2 + $0x3418] sm:$0xff]  ;;  %v1777_v59 = vld [vmem:[%s13897_s2 + $0x35c8] sm:$0xff] }
 0x2d2   :  { %7780 = vmatpush3.bf16.msra.mxu1 %v7779_v20 }
 0x2d3   :  { %7012 = vmatpush1.bf16.msra.mxu0 %v7011_v23  ;;  %7782 = vmatprep.subr.bf16.mxu1 %v7781_v55  ;;  %v7795_v23 = vpack.c.bf16 %v1633_v57, %v1630_v10  ;;  %v1953_v55 = vcombine.high %v12580_v32, %v12580_v32  ;;  %v7029_v32 = vpack.c.bf16 %v1452_v16, %v1449_v26  ;;  %v1466_v57 = vld [vmem:[%s13897_s2 + $0x2c10] sm:$0xff]  ;;  %v1473_v26 = vld [vmem:[%s13897_s2 + $0x2c48] sm:$0xff]  ;;  %v1476_v16 = vld [vmem:[%s13897_s2 + $0x2c60] sm:$0xff] }
 0x2d4   :  { %7014 = vmatprep.subr.bf16.mxu0 %v7013_v27  ;;  %v1636_v27 = vld [vmem:[%s13897_s2 + $0x3160] sm:$0xff]  ;;  %v7809_v10 = vpack.c.bf16 %v1753_v56, %v1750_v4  ;;  %v1491_v4 = vld [vmem:[%s13897_s2 + $0x2cd8] sm:$0xff]  ;;  %v1494_v56 = vld [vmem:[%s13897_s2 + $0x2cf0] sm:$0xff] }
 0x2d6   :  { %7784 = vmatpush3.bf16.msra.mxu1 %v7783_v37  ;;  %v1455_v37 = vld [vmem:[%s13897_s2 + $0x2bb8] sm:$0xff] }
 0x2d7   :  { %7016 = vmatpush1.bf16.msra.mxu0 %v7015_v45  ;;  %7786 = vmatprep.subr.bf16.mxu1 %v7785_v38  ;;  %v7799_v45 = vpack.c.bf16 %v1639_v31, %v1636_v27  ;;  %v12810_v38 = vrot.slane %v1953_v55, %v8342_v11  ;;  %v1457_v11 = vld [vmem:[%s13897_s2 + $0x2bc8] sm:$0xff]  ;;  %v7045_v27 = vpack.c.bf16 %v1476_v16, %v1473_v26  ;;  %v1475_v31 = vld [vmem:[%s13897_s2 + $0x2c58] sm:$0xff]  ;;  %v1500_v16 = vld [vmem:[%s13897_s2 + $0x2d20] sm:$0xff] }
 0x2d8   :  { %7018 = vmatprep.subr.bf16.mxu0 %v7017_v17  ;;  %v1690_v17 = vld [vmem:[%s13897_s2 + $0x3310] sm:$0xff]  ;;  %v7035_v46 = vpack.c.bf16 %v1457_v11, %v1454_v42  ;;  %v1717_v42 = vld [vmem:[%s13897_s2 + $0x33e8] sm:$0xff]  ;;  %v1771_v11 = vld [vmem:[%s13897_s2 + $0x3598] sm:$0xff] }
 0x2d9   :  { %v1497_v26 = vld [vmem:[%s13897_s2 + $0x2d08] sm:$0xff] }
 0x2da   :  { %7788 = vmatpush3.bf16.msra.mxu1 %v7787_v47  ;;  %v1464_v47 = vld [vmem:[%s13897_s2 + $0x2c00] sm:$0xff] }
 0x2db   :  { %7020 = vmatpush1.bf16.msra.mxu0 %v7019_v33  ;;  %7790 = vmatprep.subr.bf16.mxu1 %v7789_v22  ;;  %v7803_v33 = vpack.c.bf16 %v1693_v48, %v1690_v17  ;;  %v12838_v22 = vcombine.high %v12810_v38, %v12810_v38  ;;  %v7037_v1 = vpack.c.bf16 %v1464_v47, %v1461_v40  ;;  %v1481_v48 = vld [vmem:[%s13897_s2 + $0x2c88] sm:$0xff] }
 0x2dc   :  { %v5615_v12 = vpop.f32.mrb[22].mxu1  ;;  %7022 = vmatprep.subr.bf16.mxu0 %v7021_v58  ;;  %v1696_v58 = vld [vmem:[%s13897_s2 + $0x3340] sm:$0xff]  ;;  %v7049_v17 = vpack.c.bf16 %v1482_v36, %v1479_v35  ;;  %v1503_v35 = vld [vmem:[%s13897_s2 + $0x2d38] sm:$0xff]  ;;  %v1506_v36 = vld [vmem:[%s13897_s2 + $0x2d50] sm:$0xff] }
 0x2dd   :  { %v5616_v15 = vpop.f32.mrb[23].mxu1 }
 0x2de   :  { %v5617_v20 = vadd.f32 %v5616_v15, %v5615_v12  ;;  %7792 = vmatpush3.bf16.msra.mxu1 %v7791_v19  ;;  %v1467_v19 = vld [vmem:[%s13897_s2 + $0x2c18] sm:$0xff]  ;;  %v1702_v12 = vld [vmem:[%s13897_s2 + $0x3370] sm:$0xff] }
 0x2df   :  { %7024 = vmatpush1.bf16.msra.mxu0 %v7023_v5  ;;  %7794 = vmatprep.subr.bf16.mxu1 %v7793_v7  ;;  %v1470_v5 = vld [vmem:[%s13897_s2 + $0x2c30] sm:$0xff]  ;;  %v7807_v7 = vpack.c.bf16 %v1699_v2, %v1696_v58  ;;  %v1759_v15 = vld [vmem:[%s13897_s2 + $0x3538] sm:$0xff]  ;;  %v7053_v58 = vpack.c.bf16 %v1488_v30, %v1485_v25  ;;  %v7991_v25 = vmov 0.0|0.0  }
 0x2e0   :  { %v12792_v51 = vadd.f32 %v5617_v20, %v12583_v39  ;;  %7026 = vmatprep.subr.bf16.mxu0 %v7025_v43  ;;  %v1458_v39 = vld [vmem:[%s13897_s2 + $0x2bd0] sm:$0xff]  ;;  %v1705_v43 = vld [vmem:[%s13897_s2 + $0x3388] sm:$0xff]  ;;  %v7041_v13 = vpack.c.bf16 %v1470_v5, %v1467_v19  ;;  %v7813_v55 = vpack.c.bf16 %v1759_v15, %v1756_v62  ;;  %v1487_v2 = vld [vmem:[%s13897_s2 + $0x2cb8] sm:$0xff] }
 0x2e1   :  { %v7033_v49 = vpack.c.bf16 %v1458_v39, %v1455_v37  ;;  %v7811_v20 = vpack.c.bf16 %v1705_v43, %v1702_v12  ;;  %v7057_v43 = vpack.c.bf16 %v1494_v56, %v1491_v4  ;;  %v1783_v62 = vld [vmem:[%s13897_s2 + $0x35f8] sm:$0xff]  ;;  %v1520_v56 = vld [vmem:[%s13897_s2 + $0x2dc0] sm:$0xff] }
 0x2e2   :  { %7796 = vmatpush3.bf16.msra.mxu1 %v7795_v23  ;;  %v7043_v23 = vpack.c.bf16 %v1469_v14, %v1466_v57  ;;  %v1729_v57 = vld [vmem:[%s13897_s2 + $0x3448] sm:$0xff]  ;;  %v1780_v14 = vld [vmem:[%s13897_s2 + $0x35e0] sm:$0xff] }
 0x2e3   :  { %7028 = vmatpush1.bf16.msra.mxu0 %v7027_v24  ;;  %7798 = vmatprep.subr.bf16.mxu1 %v7797_v28  ;;  %v1472_v24 = vld [vmem:[%s13897_s2 + $0x2c40] sm:$0xff] }
 0x2e4   :  { %7030 = vmatprep.subr.bf16.mxu0 %v7029_v32  ;;  %v1708_v28 = vld [vmem:[%s13897_s2 + $0x33a0] sm:$0xff]  ;;  %v1762_v32 = vld [vmem:[%s13897_s2 + $0x3550] sm:$0xff]  ;;  %v7047_v39 = vpack.c.bf16 %v1475_v31, %v1472_v24  ;;  %v7829_v24 = vpack.c.bf16 %v1783_v62, %v1780_v14  ;;  %v7061_v31 = vpack.c.bf16 %v1500_v16, %v1497_v26  ;;  %v1535_v26 = vld [vmem:[%s13897_s2 + $0x2e38] sm:$0xff] }
 0x2e5   :  { %v7815_v37 = vpack.c.bf16 %v1711_v29, %v1708_v28  ;;  %v1732_v28 = vld [vmem:[%s13897_s2 + $0x3460] sm:$0xff]  ;;  %v1735_v29 = vld [vmem:[%s13897_s2 + $0x3478] sm:$0xff] }
 0x2e6   :  { %7800 = vmatpush3.bf16.msra.mxu1 %v7799_v45  ;;  %v7817_v45 = vpack.c.bf16 %v1765_v63, %v1762_v32  ;;  %v1496_v32 = vld [vmem:[%s13897_s2 + $0x2d00] sm:$0xff]  ;;  %v1499_v63 = vld [vmem:[%s13897_s2 + $0x2d18] sm:$0xff] }
 0x2e7   :  { %7032 = vmatpush1.bf16.msra.mxu0 %v7031_v8  ;;  %7802 = vmatprep.subr.bf16.mxu1 %v7801_v41  ;;  %v1478_v8 = vld [vmem:[%s13897_s2 + $0x2c70] sm:$0xff]  ;;  %v1539_v16 = vld [vmem:[%s13897_s2 + $0x2e58] sm:$0xff] }
 0x2e8   :  { %7034 = vmatprep.subr.bf16.mxu0 %v7033_v49  ;;  %v1714_v41 = vld [vmem:[%s13897_s2 + $0x33d0] sm:$0xff]  ;;  %v1768_v49 = vld [vmem:[%s13897_s2 + $0x3580] sm:$0xff]  ;;  %v7051_v47 = vpack.c.bf16 %v1481_v48, %v1478_v8  ;;  %v7065_v8 = vpack.c.bf16 %v1506_v36, %v1503_v35 }
 0x2e9   :  { %4550 = vmatmul.mubr.f32.vlgmr.msra.gmra.mrb[36].mxu1 %v12602_v54  ;;  %v7819_v40 = vpack.c.bf16 %v1717_v42, %v1714_v41  ;;  %v1502_v41 = vld [vmem:[%s13897_s2 + $0x2d30] sm:$0xff]  ;;  %v1505_v42 = vld [vmem:[%s13897_s2 + $0x2d48] sm:$0xff]  ;;  %v1512_v48 = vld [vmem:[%s13897_s2 + $0x2d80] sm:$0xff] }
 0x2ea   :  { %7804 = vmatpush3.bf16.msra.mxu1 %v7803_v33  ;;  %4619 = vmatprep.mubr.f32.mxu1 %v12838_v22  ;;  %v7821_v33 = vpack.c.bf16 %v1771_v11, %v1768_v49  ;;  %v7067_v11 = vpack.c.bf16 %v1505_v42, %v1502_v41  ;;  %v1554_v41 = vld [vmem:[%s13897_s2 + $0x2ed0] sm:$0xff] }
 0x2eb   :  { %7036 = vmatpush1.bf16.msra.mxu0 %v7035_v46  ;;  %7806 = vmatprep.subr.bf16.mxu1 %v7805_v50  ;;  %v1484_v46 = vld [vmem:[%s13897_s2 + $0x2ca0] sm:$0xff] }
 0x2ec   :  { %7038 = vmatprep.subr.bf16.mxu0 %v7037_v1  ;;  %v1720_v50 = vld [vmem:[%s13897_s2 + $0x3400] sm:$0xff]  ;;  %v1774_v1 = vld [vmem:[%s13897_s2 + $0x35b0] sm:$0xff]  ;;  %v7055_v5 = vpack.c.bf16 %v1487_v2, %v1484_v46  ;;  %v1521_v2 = vld [vmem:[%s13897_s2 + $0x2dc8] sm:$0xff] }
 0x2ed   :  { %v7823_v19 = vpack.c.bf16 %v1723_v6, %v1720_v50  ;;  %v1517_v6 = vld [vmem:[%s13897_s2 + $0x2da8] sm:$0xff] }
 0x2ee   :  { %7808 = vmatpush3.bf16.msra.mxu1 %v7807_v7  ;;  %v7825_v7 = vpack.c.bf16 %v1777_v59, %v1774_v1  ;;  %v1524_v1 = vld [vmem:[%s13897_s2 + $0x2de0] sm:$0xff] }
 0x2ef   :  { %7040 = vmatpush1.bf16.msra.mxu0 %v7039_v9  ;;  %7810 = vmatprep.subr.bf16.mxu1 %v7809_v10  ;;  %v1490_v9 = vld [vmem:[%s13897_s2 + $0x2cd0] sm:$0xff]  ;;  %v7077_v4 = vpack.c.bf16 %v1524_v1, %v1521_v2  ;;  %v1569_v2 = vld [vmem:[%s13897_s2 + $0x2f48] sm:$0xff]  ;;  %v1572_v1 = vld [vmem:[%s13897_s2 + $0x2f60] sm:$0xff] }
 0x2f0   :  { %7042 = vmatprep.subr.bf16.mxu0 %v7041_v13  ;;  %v1726_v10 = vld [vmem:[%s13897_s2 + $0x3430] sm:$0xff]  ;;  %v1493_v13 = vld [vmem:[%s13897_s2 + $0x2ce8] sm:$0xff] }
 0x2f2   :  { %7812 = vmatpush3.bf16.msra.mxu1 %v7811_v20 }
 0x2f3   :  { %7044 = vmatpush1.bf16.msra.mxu0 %v7043_v23  ;;  %7814 = vmatprep.subr.bf16.mxu1 %v7813_v55  ;;  %v7827_v23 = vpack.c.bf16 %v1729_v57, %v1726_v10  ;;  %v7059_v55 = vpack.c.bf16 %v1493_v13, %v1490_v9  ;;  %v1526_v57 = vld [vmem:[%s13897_s2 + $0x2df0] sm:$0xff]  ;;  %v1536_v13 = vld [vmem:[%s13897_s2 + $0x2e40] sm:$0xff] }
 0x2f4   :  { %7046 = vmatprep.subr.bf16.mxu0 %v7045_v27 }
 0x2f6   :  { %7816 = vmatpush3.bf16.msra.mxu1 %v7815_v37  ;;  %v7063_v37 = vpack.c.bf16 %v1499_v63, %v1496_v32  ;;  %v1545_v32 = vld [vmem:[%s13897_s2 + $0x2e88] sm:$0xff]  ;;  %v1548_v63 = vld [vmem:[%s13897_s2 + $0x2ea0] sm:$0xff] }
 0x2f7   :  { %7048 = vmatpush1.bf16.msra.mxu0 %v7047_v39  ;;  %7818 = vmatprep.subr.bf16.mxu1 %v7817_v45  ;;  %v1786_v39 = vld [vmem:[%s13897_s2 + $0x3610] sm:$0xff]  ;;  %v1789_v45 = vld [vmem:[%s13897_s2 + $0x3628] sm:$0xff] }
 0x2f8   :  { %7050 = vmatprep.subr.bf16.mxu0 %v7049_v17  ;;  %v1509_v17 = vld [vmem:[%s13897_s2 + $0x2d68] sm:$0xff]  ;;  %v7834_v49 = vpack.c.bf16 %v1789_v45, %v1786_v39  ;;  %v1544_v39 = vld [vmem:[%s13897_s2 + $0x2e80] sm:$0xff]  ;;  %v1547_v45 = vld [vmem:[%s13897_s2 + $0x2e98] sm:$0xff] }
 0x2f9   :  { %v7069_v30 = vpack.c.bf16 %v1512_v48, %v1509_v17  ;;  %v1550_v17 = vld [vmem:[%s13897_s2 + $0x2eb0] sm:$0xff]  ;;  %v1553_v48 = vld [vmem:[%s13897_s2 + $0x2ec8] sm:$0xff] }
 0x2fa   :  { %7820 = vmatpush3.bf16.msra.mxu1 %v7819_v40  ;;  %v1508_v40 = vld [vmem:[%s13897_s2 + $0x2d60] sm:$0xff] }
 0x2fb   :  { %7052 = vmatpush1.bf16.msra.mxu0 %v7051_v47  ;;  %7822 = vmatprep.subr.bf16.mxu1 %v7821_v33  ;;  %v1511_v47 = vld [vmem:[%s13897_s2 + $0x2d78] sm:$0xff]  ;;  %v1518_v33 = vld [vmem:[%s13897_s2 + $0x2db0] sm:$0xff] }
 0x2fc   :  { %v5650_v12 = vpop.f32.mrb[24].mxu1  ;;  %7054 = vmatprep.subr.bf16.mxu0 %v7053_v58  ;;  %v7071_v46 = vpack.c.bf16 %v1511_v47, %v1508_v40  ;;  %v7987_v58 = vld.sshfl [vmem:[%s13898_s0 + $0x48] sm:$0x3 pattern:$0x76325410]  ;;  %v1556_v47 = vld [vmem:[%s13897_s2 + $0x2ee0] sm:$0xff] }
 0x2fd   :  { %v5651_v15 = vpop.f32.mrb[25].mxu1 }
 0x2fe   :  { %v5652_v20 = vadd.f32 %v5651_v15, %v5650_v12  ;;  %7824 = vmatpush3.bf16.msra.mxu1 %v7823_v19  ;;  %v1523_v19 = vld [vmem:[%s13897_s2 + $0x2dd8] sm:$0xff]  ;;  %v1529_v12 = vld [vmem:[%s13897_s2 + $0x2e08] sm:$0xff]  ;;  %v1532_v15 = vld [vmem:[%s13897_s2 + $0x2e20] sm:$0xff] }
 0x2ff   :  { %7056 = vmatpush1.bf16.msra.mxu0 %v7055_v5  ;;  %7826 = vmatprep.subr.bf16.mxu1 %v7825_v7  ;;  %v1527_v5 = vld [vmem:[%s13897_s2 + $0x2df8] sm:$0xff]  ;;  %v1530_v7 = vld [vmem:[%s13897_s2 + $0x2e10] sm:$0xff]  ;;  %v7079_v9 = vpack.c.bf16 %v1523_v19, %v1520_v56  ;;  %v7083_v14 = vpack.c.bf16 %v1529_v12, %v1526_v57  ;;  %v1568_v56 = vld [vmem:[%s13897_s2 + $0x2f40] sm:$0xff] }
 0x300   :  { %v12993_v27 = vadd.f32 %v5652_v20, %v12792_v51  ;;  %7058 = vmatprep.subr.bf16.mxu0 %v7057_v43  ;;  %v7831_v51 = vpack.c.bf16 %v1735_v29, %v1732_v28  ;;  %v7081_v10 = vpack.c.bf16 %v1530_v7, %v1527_v5  ;;  %v1533_v43 = vld [vmem:[%s13897_s2 + $0x2e28] sm:$0xff]  ;;  %v1542_v20 = vld [vmem:[%s13897_s2 + $0x2e70] sm:$0xff]  ;;  %v1571_v19 = vld [vmem:[%s13897_s2 + $0x2f58] sm:$0xff] }
 0x301   :  { %v7085_v62 = vpack.c.bf16 %v1536_v13, %v1533_v43  ;;  %v1538_v28 = vld [vmem:[%s13897_s2 + $0x2e50] sm:$0xff]  ;;  %v1541_v29 = vld [vmem:[%s13897_s2 + $0x2e68] sm:$0xff]  ;;  %v1575_v5 = vld [vmem:[%s13897_s2 + $0x2f78] sm:$0xff] }
 0x302   :  { %7828 = vmatpush3.bf16.msra.mxu1 %v7827_v23  ;;  %v7087_v23 = vpack.c.bf16 %v1535_v26, %v1532_v15  ;;  %v7091_v36 = vpack.c.bf16 %v1541_v29, %v1538_v28  ;;  %v1578_v7 = vld [vmem:[%s13897_s2 + $0x2f90] sm:$0xff]  ;;  %v1577_v12 = vld [vmem:[%s13897_s2 + $0x2f88] sm:$0xff]  ;;  %v1584_v13 = vld [vmem:[%s13897_s2 + $0x2fc0] sm:$0xff] }
 0x303   :  { %7060 = vmatpush1.bf16.msra.mxu0 %v7059_v55  ;;  %7830 = vmatprep.subr.bf16.mxu1 %v7829_v24  ;;  %v7089_v24 = vpack.c.bf16 %v1542_v20, %v1539_v16  ;;  %v1574_v57 = vld [vmem:[%s13897_s2 + $0x2f70] sm:$0xff]  ;;  %v1581_v43 = vld [vmem:[%s13897_s2 + $0x2fa8] sm:$0xff]  ;;  %v1580_v15 = vld [vmem:[%s13897_s2 + $0x2fa0] sm:$0xff] }
 0x304   :  { %7062 = vmatprep.subr.bf16.mxu0 %v7061_v31  ;;  %v1583_v26 = vld [vmem:[%s13897_s2 + $0x2fb8] sm:$0xff]  ;;  %v1590_v20 = vld [vmem:[%s13897_s2 + $0x2ff0] sm:$0xff]  ;;  %v1589_v29 = vld [vmem:[%s13897_s2 + $0x2fe8] sm:$0xff] }
 0x305   :  { %v1587_v16 = vld [vmem:[%s13897_s2 + $0x2fd8] sm:$0xff]  ;;  %v1586_v28 = vld [vmem:[%s13897_s2 + $0x2fd0] sm:$0xff] }
 0x306   :  { %3075 = vmatmul.mubr.f32.vlgmr.msra.gmra.mrb[0].mxu0 %v12184_v44  ;;  %7832 = vmatpush3.bf16.msra.mxu1 %v7831_v51  ;;  %v1515_v44 = vld [vmem:[%s13897_s2 + $0x2d98] sm:$0xff] }
 0x307   :  { %7064 = vmatpush1.bf16.msra.mxu0 %v7063_v37  ;;  %7833 = vmatprep.subr.bf16.mxu1 %v7991_v25  ;;  %v7073_v50 = vpack.c.bf16 %v1518_v33, %v1515_v44  ;;  %v7093_v37 = vpack.c.bf16 %v1548_v63, %v1545_v32  ;;  %v1559_v44 = vld [vmem:[%s13897_s2 + $0x2ef8] sm:$0xff]  ;;  %v1593_v32 = vld [vmem:[%s13897_s2 + $0x3008] sm:$0xff]  ;;  %v1596_v63 = vld [vmem:[%s13897_s2 + $0x3020] sm:$0xff] }
 0x308   :  { %7066 = vmatprep.subr.bf16.mxu0 %v7065_v8  ;;  %3145 = vmatprep.mubr.f32.mxu0 %v12420_v3  ;;  %v1514_v3 = vld [vmem:[%s13897_s2 + $0x2d90] sm:$0xff]  ;;  %v1551_v8 = vld [vmem:[%s13897_s2 + $0x2eb8] sm:$0xff] }
 0x309   :  { %4620 = vmatmul.mubr.f32.vlgmr.msra.gmra.mrb[38].mxu1 %v12810_v38  ;;  %v7075_v59 = vpack.c.bf16 %v1517_v6, %v1514_v3  ;;  %v7097_v42 = vpack.c.bf16 %v1554_v41, %v1551_v8  ;;  %v1563_v33 = vld [vmem:[%s13897_s2 + $0x2f18] sm:$0xff]  ;;  %v1562_v6 = vld [vmem:[%s13897_s2 + $0x2f10] sm:$0xff] }
 0x30a   :  { %7835 = vmatpush3.bf16.msra.mxu1 %v7834_v49  ;;  %5991 = vmatprep.mubr.msk.f32.mxu1 %vm7992_vm1, %v7990_v21  ;;  %v1557_v49 = vld [vmem:[%s13897_s2 + $0x2ee8] sm:$0xff]  ;;  %v1595_v8 = vld [vmem:[%s13897_s2 + $0x3018] sm:$0xff] }
 0x30b   :  { %7068 = vmatpush1.bf16.msra.mxu0 %v7067_v11  ;;  %v1560_v11 = vld [vmem:[%s13897_s2 + $0x2f00] sm:$0xff]  ;;  %v1599_v41 = vld [vmem:[%s13897_s2 + $0x3038] sm:$0xff] }
 0x30c   :  { %7070 = vmatprep.subr.bf16.mxu0 %v7069_v30  ;;  %v7099_v30 = vpack.c.bf16 %v1553_v48, %v1550_v17  ;;  %v7101_v40 = vpack.c.bf16 %v1560_v11, %v1557_v49  ;;  %v1598_v17 = vld [vmem:[%s13897_s2 + $0x3030] sm:$0xff]  ;;  %v1601_v48 = vld [vmem:[%s13897_s2 + $0x3048] sm:$0xff]  ;;  %v1608_v11 = vld [vmem:[%s13897_s2 + $0x3080] sm:$0xff] }
 0x30d   :  { %5992 = vmatmul.mubr.msk.f32.vlgmr.msra.gmra.mrb[40].mxu1 %vm2013_vm0, %v7987_v58  ;;  %v1565_v58 = vld [vmem:[%s13897_s2 + $0x2f28] sm:$0xff] }
 0x30e   :  { %v1605_v49 = vld [vmem:[%s13897_s2 + $0x3068] sm:$0xff] }
 0x30f   :  { %7072 = vmatpush1.bf16.msra.mxu0 %v7071_v46  ;;  %v1566_v46 = vld [vmem:[%s13897_s2 + $0x2f30] sm:$0xff] }
 0x310   :  { %7074 = vmatprep.subr.bf16.mxu0 %v7073_v50  ;;  %v7103_v50 = vpack.c.bf16 %v1559_v44, %v1556_v47  ;;  %v7105_v3 = vpack.c.bf16 %v1566_v46, %v1563_v33  ;;  %v1604_v47 = vld [vmem:[%s13897_s2 + $0x3060] sm:$0xff]  ;;  %v1607_v44 = vld [vmem:[%s13897_s2 + $0x3078] sm:$0xff] }
 0x311   :  { %v1611_v33 = vld [vmem:[%s13897_s2 + $0x3098] sm:$0xff] }
 0x313   :  { %7076 = vmatpush1.bf16.msra.mxu0 %v7075_v59  ;;  %v7107_v59 = vpack.c.bf16 %v1565_v58, %v1562_v6  ;;  %v1617_v6 = vld [vmem:[%s13897_s2 + $0x30c8] sm:$0xff]  ;;  %v1620_v58 = vld [vmem:[%s13897_s2 + $0x30e0] sm:$0xff] }
 0x314   :  { %7078 = vmatprep.subr.bf16.mxu0 %v7077_v4  ;;  %v7109_v4 = vpack.c.bf16 %v1572_v1, %v1569_v2  ;;  %v7141_v1 = vpack.c.bf16 %v1620_v58, %v1617_v6  ;;  %v4718_v6 = vld [vmem:[%s13900_s4 + $0xa0] sm:$0xff] }
 0x317   :  { %7080 = vmatpush1.bf16.msra.mxu0 %v7079_v9  ;;  %v7111_v9 = vpack.c.bf16 %v1571_v19, %v1568_v56  ;;  %v1623_v56 = vld [vmem:[%s13897_s2 + $0x30f8] sm:$0xff]  ;;  %v1626_v19 = vld [vmem:[%s13897_s2 + $0x3110] sm:$0xff] }
 0x318   :  { %7082 = vmatprep.subr.bf16.mxu0 %v7081_v10  ;;  %v7113_v10 = vpack.c.bf16 %v1578_v7, %v1575_v5  ;;  %v7145_v7 = vpack.c.bf16 %v1626_v19, %v1623_v56  ;;  %v1662_v56 = vld [vmem:[%s13897_s2 + $0x3230] sm:$0xff] }
 0x31b   :  { %7084 = vmatpush1.bf16.msra.mxu0 %v7083_v14  ;;  %v7115_v14 = vpack.c.bf16 %v1577_v12, %v1574_v57  ;;  %v1629_v57 = vld [vmem:[%s13897_s2 + $0x3128] sm:$0xff]  ;;  %v1632_v12 = vld [vmem:[%s13897_s2 + $0x3140] sm:$0xff] }
 0x31c   :  { %v5685_v55 = vpop.f32.mrb[26].mxu1  ;;  %7086 = vmatprep.subr.bf16.mxu0 %v7085_v62  ;;  %v7117_v62 = vpack.c.bf16 %v1584_v13, %v1581_v43  ;;  %v7149_v13 = vpack.c.bf16 %v1632_v12, %v1629_v57  ;;  %v4720_v57 = vld [vmem:[%s13900_s4 + $0xb0] sm:$0xff]  ;;  %v4721_v12 = vld [vmem:[%s13900_s4 + $0xb8] sm:$0xff] }
 0x31d   :  { %v5686_v31 = vpop.f32.mrb[27].mxu1 }
 0x31e   :  { %v5687_v35 = vadd.f32 %v5686_v31, %v5685_v55 }
 0x31f   :  { %7088 = vmatpush1.bf16.msra.mxu0 %v7087_v23  ;;  %v7119_v23 = vpack.c.bf16 %v1583_v26, %v1580_v15  ;;  %v1635_v15 = vld [vmem:[%s13897_s2 + $0x3158] sm:$0xff]  ;;  %v1638_v26 = vld [vmem:[%s13897_s2 + $0x3170] sm:$0xff] }
 0x320   :  { %v13108_v51 = vadd.f32 %v5687_v35, %v12993_v27  ;;  %7090 = vmatprep.subr.bf16.mxu0 %v7089_v24  ;;  %v7095_v27 = vpack.c.bf16 %v1547_v45, %v1544_v39  ;;  %v7121_v24 = vpack.c.bf16 %v1590_v20, %v1587_v16  ;;  %v7125_v39 = vpack.c.bf16 %v1596_v63, %v1593_v32  ;;  %v1592_v45 = vld [vmem:[%s13897_s2 + $0x3000] sm:$0xff] }
 0x323   :  { %7092 = vmatpush1.bf16.msra.mxu0 %v7091_v36  ;;  %v7123_v36 = vpack.c.bf16 %v1589_v29, %v1586_v28  ;;  %v1641_v29 = vld [vmem:[%s13897_s2 + $0x3188] sm:$0xff] }
 0x324   :  { %7094 = vmatprep.subr.bf16.mxu0 %v7093_v37 }
 0x327   :  { %7096 = vmatpush1.bf16.msra.mxu0 %v7095_v27  ;;  %v1602_v27 = vld [vmem:[%s13897_s2 + $0x3050] sm:$0xff] }
 0x328   :  { %7098 = vmatprep.subr.bf16.mxu0 %v7097_v42  ;;  %v7129_v42 = vpack.c.bf16 %v1602_v27, %v1599_v41  ;;  %v1650_v41 = vld [vmem:[%s13897_s2 + $0x31d0] sm:$0xff] }
 0x329   :  { %v1646_v27 = vld [vmem:[%s13897_s2 + $0x31b0] sm:$0xff] }
 0x32b   :  { %7100 = vmatpush1.bf16.msra.mxu0 %v7099_v30  ;;  %v7131_v30 = vpack.c.bf16 %v1601_v48, %v1598_v17  ;;  %v1653_v17 = vld [vmem:[%s13897_s2 + $0x31e8] sm:$0xff]  ;;  %v1656_v48 = vld [vmem:[%s13897_s2 + $0x3200] sm:$0xff] }
 0x32c   :  { %7102 = vmatprep.subr.bf16.mxu0 %v7101_v40  ;;  %v7133_v40 = vpack.c.bf16 %v1608_v11, %v1605_v49  ;;  %v4714_v49 = vld [vmem:[%s13900_s4 + $0x80] sm:$0xff]  ;;  %v4715_v11 = vld [vmem:[%s13900_s4 + $0x88] sm:$0xff]  ;;  %v7165_v58 = vpack.c.bf16 %v1656_v48, %v1653_v17  ;;  %v1670_v17 = vld [vmem:[%s13897_s2 + $0x3270] sm:$0xff] }
 0x32d   :  { %v1673_v48 = vld [vmem:[%s13897_s2 + $0x3288] sm:$0xff] }
 0x32f   :  { %7104 = vmatpush1.bf16.msra.mxu0 %v7103_v50  ;;  %v1610_v50 = vld [vmem:[%s13897_s2 + $0x3090] sm:$0xff] }
 0x330   :  { %7106 = vmatprep.subr.bf16.mxu0 %v7105_v3  ;;  %v1613_v3 = vld [vmem:[%s13897_s2 + $0x30a8] sm:$0xff] }
 0x331   :  { %v7139_v2 = vpack.c.bf16 %v1613_v3, %v1610_v50  ;;  %v4700_v50 = vld [vmem:[%s13900_s4 + $0x10] sm:$0xff]  ;;  %v4701_v3 = vld [vmem:[%s13900_s4 + $0x18] sm:$0xff] }
 0x332   :  { %v7842_v19 = vpack.c.bf16 %v4701_v3, %v4700_v50  ;;  %v1683_v50 = vld [vmem:[%s13897_s2 + $0x32d8] sm:$0xff]  ;;  %v1686_v3 = vld [vmem:[%s13897_s2 + $0x32f0] sm:$0xff] }
 0x333   :  { %7108 = vmatpush1.bf16.msra.mxu0 %v7107_v59  ;;  %v1616_v59 = vld [vmem:[%s13897_s2 + $0x30c0] sm:$0xff] }
 0x334   :  { %7110 = vmatprep.subr.bf16.mxu0 %v7109_v4  ;;  %v1619_v4 = vld [vmem:[%s13897_s2 + $0x30d8] sm:$0xff] }
 0x335   :  { %v7143_v5 = vpack.c.bf16 %v1619_v4, %v1616_v59  ;;  %v4719_v59 = vld [vmem:[%s13900_s4 + $0xa8] sm:$0xff]  ;;  %v1659_v4 = vld [vmem:[%s13897_s2 + $0x3218] sm:$0xff] }
 0x337   :  { %7112 = vmatpush1.bf16.msra.mxu0 %v7111_v9  ;;  %v1622_v9 = vld [vmem:[%s13897_s2 + $0x30f0] sm:$0xff] }
 0x338   :  { %7114 = vmatprep.subr.bf16.mxu0 %v7113_v10  ;;  %v1625_v10 = vld [vmem:[%s13897_s2 + $0x3108] sm:$0xff] }
 0x339   :  { %v7147_v43 = vpack.c.bf16 %v1625_v10, %v1622_v9  ;;  %v4703_v9 = vld [vmem:[%s13900_s4 + $0x28] sm:$0xff] }
 0x33b   :  { %7116 = vmatpush1.bf16.msra.mxu0 %v7115_v14  ;;  %v1628_v14 = vld [vmem:[%s13897_s2 + $0x3120] sm:$0xff] }
 0x33c   :  { %v5720_v55 = vpop.f32.mrb[28].mxu1  ;;  %7118 = vmatprep.subr.bf16.mxu0 %v7117_v62  ;;  %v1631_v62 = vld [vmem:[%s13897_s2 + $0x3138] sm:$0xff] }
 0x33d   :  { %v5721_v31 = vpop.f32.mrb[29].mxu1  ;;  %v7151_v16 = vpack.c.bf16 %v1631_v62, %v1628_v14  ;;  %v1661_v14 = vld [vmem:[%s13897_s2 + $0x3228] sm:$0xff] }
 0x33e   :  { %v5722_v35 = vadd.f32 %v5721_v31, %v5720_v55  ;;  %v1634_v55 = vld [vmem:[%s13897_s2 + $0x3150] sm:$0xff]  ;;  %v1644_v31 = vld [vmem:[%s13897_s2 + $0x31a0] sm:$0xff]  ;;  %v1665_v62 = vld [vmem:[%s13897_s2 + $0x3248] sm:$0xff] }
 0x33f   :  { %7120 = vmatpush1.bf16.msra.mxu0 %v7119_v23  ;;  %v7153_v23 = vpack.c.bf16 %v1638_v26, %v1635_v15  ;;  %v1668_v15 = vld [vmem:[%s13897_s2 + $0x3260] sm:$0xff] }
 0x340   :  { %v13207_v37 = vadd.f32 %v5722_v35, %v13108_v51  ;;  %7122 = vmatprep.subr.bf16.mxu0 %v7121_v24  ;;  %v7127_v51 = vpack.c.bf16 %v1595_v8, %v1592_v45  ;;  %v1637_v24 = vld [vmem:[%s13897_s2 + $0x3168] sm:$0xff]  ;;  %v1643_v45 = vld [vmem:[%s13897_s2 + $0x3198] sm:$0xff] }
 0x341   :  { %v7155_v63 = vpack.c.bf16 %v1637_v24, %v1634_v55  ;;  %v1647_v8 = vld [vmem:[%s13897_s2 + $0x31b8] sm:$0xff]  ;;  %v4722_v24 = vld [vmem:[%s13900_s4 + $0xc0] sm:$0xff] }
 0x343   :  { %7124 = vmatpush1.bf16.msra.mxu0 %v7123_v36  ;;  %v7157_v36 = vpack.c.bf16 %v1644_v31, %v1641_v29  ;;  %v7173_v29 = vpack.c.bf16 %v1668_v15, %v1665_v62  ;;  %v1664_v31 = vld [vmem:[%s13897_s2 + $0x3240] sm:$0xff]  ;;  %v1694_v15 = vld [vmem:[%s13897_s2 + $0x3330] sm:$0xff] }
 0x344   :  { %7126 = vmatprep.subr.bf16.mxu0 %v7125_v39  ;;  %v1640_v39 = vld [vmem:[%s13897_s2 + $0x3180] sm:$0xff] }
 0x346   :  { %3146 = vmatmul.mubr.f32.vlgmr.msra.gmra.mrb[0].mxu0 %v12392_v18  ;;  %v1614_v18 = vld [vmem:[%s13897_s2 + $0x30b0] sm:$0xff] }
 0x347   :  { %7128 = vmatpush1.bf16.msra.mxu0 %v7127_v51  ;;  %3216 = vmatprep.mubr.f32.mxu0 %v12631_v34  ;;  %v7135_v34 = vpack.c.bf16 %v1607_v44, %v1604_v47  ;;  %v7137_v46 = vpack.c.bf16 %v1614_v18, %v1611_v33  ;;  %v7161_v51 = vpack.c.bf16 %v1650_v41, %v1647_v8  ;;  %v4699_v47 = vld [vmem:[%s13900_s4 + $0x8] sm:$0xff]  ;;  %v4716_v44 = vld [vmem:[%s13900_s4 + $0x90] sm:$0xff]  ;;  %v4717_v33 = vld [vmem:[%s13900_s4 + $0x98] sm:$0xff] }
 0x348   :  { %7130 = vmatprep.subr.bf16.mxu0 %v7129_v42  ;;  %v1649_v42 = vld [vmem:[%s13897_s2 + $0x31c8] sm:$0xff]  ;;  %v4706_v8 = vld [vmem:[%s13900_s4 + $0x40] sm:$0xff] }
 0x349   :  { %v7163_v18 = vpack.c.bf16 %v1649_v42, %v1646_v27  ;;  %v4707_v41 = vld [vmem:[%s13900_s4 + $0x48] sm:$0xff]  ;;  %v4724_v27 = vld [vmem:[%s13900_s4 + $0xd0] sm:$0xff] }
 0x34b   :  { %7132 = vmatpush1.bf16.msra.mxu0 %v7131_v30  ;;  %v4698_v30 = vld [vmem:[%s13900_s4] sm:$0xff] }
 0x34c   :  { %7134 = vmatprep.subr.bf16.mxu0 %v7133_v40  ;;  %v7836_v40 = vpack.c.bf16 %v4715_v11, %v4714_v49  ;;  %v1677_v49 = vld [vmem:[%s13897_s2 + $0x32a8] sm:$0xff]  ;;  %v1680_v11 = vld [vmem:[%s13897_s2 + $0x32c0] sm:$0xff] }
 0x34e   :  { %7837 = vmatprep.subr.bf16.mxu1 %v7836_v40 }
 0x34f   :  { %7136 = vmatpush1.bf16.msra.mxu0 %v7135_v34  ;;  %v7838_v34 = vpack.c.bf16 %v4699_v47, %v4698_v30  ;;  %v7854_v30 = vpack.c.bf16 %v4707_v41, %v4706_v8  ;;  %v4708_v47 = vld [vmem:[%s13900_s4 + $0x50] sm:$0xff]  ;;  %v1712_v41 = vld [vmem:[%s13897_s2 + $0x33c0] sm:$0xff] }
 0x350   :  { %7138 = vmatprep.subr.bf16.mxu0 %v7137_v46  ;;  %v7840_v46 = vpack.c.bf16 %v4717_v33, %v4716_v44  ;;  %v4709_v44 = vld [vmem:[%s13900_s4 + $0x58] sm:$0xff]  ;;  %v7179_v33 = vpack.c.bf16 %v1673_v48, %v1670_v17  ;;  %v1718_v48 = vld [vmem:[%s13897_s2 + $0x33f0] sm:$0xff] }
 0x351   :  { %7839 = vmatpush3.bf16.msra.mxu1 %v7838_v34  ;;  %v1676_v34 = vld [vmem:[%s13897_s2 + $0x32a0] sm:$0xff] }
 0x352   :  { %7841 = vmatprep.subr.bf16.mxu1 %v7840_v46  ;;  %v1679_v46 = vld [vmem:[%s13897_s2 + $0x32b8] sm:$0xff] }
 0x353   :  { %7140 = vmatpush1.bf16.msra.mxu0 %v7139_v2  ;;  %v1652_v2 = vld [vmem:[%s13897_s2 + $0x31e0] sm:$0xff] }
 0x354   :  { %7142 = vmatprep.subr.bf16.mxu0 %v7141_v1  ;;  %v1655_v1 = vld [vmem:[%s13897_s2 + $0x31f8] sm:$0xff] }
 0x355   :  { %v7167_v10 = vpack.c.bf16 %v1655_v1, %v1652_v2  ;;  %7843 = vmatpush3.bf16.msra.mxu1 %v7842_v19  ;;  %v7185_v1 = vpack.c.bf16 %v1686_v3, %v1683_v50  ;;  %v1689_v19 = vld [vmem:[%s13897_s2 + $0x3308] sm:$0xff] }
 0x357   :  { %7144 = vmatpush1.bf16.msra.mxu0 %v7143_v5  ;;  %v7844_v5 = vpack.c.bf16 %v4719_v59, %v4718_v6  ;;  %v7858_v6 = vpack.c.bf16 %v4709_v44, %v4708_v47  ;;  %v1682_v59 = vld [vmem:[%s13897_s2 + $0x32d0] sm:$0xff]  ;;  %v1724_v44 = vld [vmem:[%s13897_s2 + $0x3420] sm:$0xff] }
 0x358   :  { %7146 = vmatprep.subr.bf16.mxu0 %v7145_v7  ;;  %v4702_v7 = vld [vmem:[%s13900_s4 + $0x20] sm:$0xff] }
 0x359   :  { %v7846_v26 = vpack.c.bf16 %v4703_v9, %v4702_v7  ;;  %7845 = vmatprep.subr.bf16.mxu1 %v7844_v5  ;;  %v1692_v5 = vld [vmem:[%s13897_s2 + $0x3320] sm:$0xff] }
 0x35b   :  { %7148 = vmatpush1.bf16.msra.mxu0 %v7147_v43  ;;  %v7169_v43 = vpack.c.bf16 %v1662_v56, %v1659_v4  ;;  %7847 = vmatpush3.bf16.msra.mxu1 %v7846_v26  ;;  %v1685_v4 = vld [vmem:[%s13897_s2 + $0x32e8] sm:$0xff] }
 0x35c   :  { %v5755_v20 = vpop.f32.mrb[30].mxu1  ;;  %7150 = vmatprep.subr.bf16.mxu0 %v7149_v13  ;;  %v1658_v13 = vld [vmem:[%s13897_s2 + $0x3210] sm:$0xff]  ;;  %v7187_v9 = vpack.c.bf16 %v1685_v4, %v1682_v59  ;;  %v1697_v26 = vld [vmem:[%s13897_s2 + $0x3348] sm:$0xff]  ;;  %v1740_v59 = vld [vmem:[%s13897_s2 + $0x34a0] sm:$0xff] }
 0x35d   :  { %v5756_v28 = vpop.f32.mrb[31].mxu1  ;;  %v7171_v55 = vpack.c.bf16 %v1661_v14, %v1658_v13  ;;  %v1695_v13 = vld [vmem:[%s13897_s2 + $0x3338] sm:$0xff]  ;;  %v1698_v14 = vld [vmem:[%s13897_s2 + $0x3350] sm:$0xff] }
 0x35e   :  { %v5757_v32 = vadd.f32 %v5756_v28, %v5755_v20  ;;  %v4704_v20 = vld [vmem:[%s13900_s4 + $0x30] sm:$0xff]  ;;  %v4723_v28 = vld [vmem:[%s13900_s4 + $0xc8] sm:$0xff]  ;;  %v7193_v62 = vpack.c.bf16 %v1698_v14, %v1695_v13 }
 0x35f   :  { %7152 = vmatpush1.bf16.msra.mxu0 %v7151_v16  ;;  %v7848_v16 = vpack.c.bf16 %v4721_v12, %v4720_v57  ;;  %v7189_v57 = vpack.c.bf16 %v1692_v5, %v1689_v19  ;;  %v1688_v12 = vld [vmem:[%s13897_s2 + $0x3300] sm:$0xff]  ;;  %v1742_v13 = vld [vmem:[%s13897_s2 + $0x34b0] sm:$0xff]  ;;  %v1745_v14 = vld [vmem:[%s13897_s2 + $0x34c8] sm:$0xff] }
 0x360   :  { %v13308_v35 = vadd.f32 %v5757_v32, %v13207_v37  ;;  %7154 = vmatprep.subr.bf16.mxu0 %v7153_v23  ;;  %v7159_v37 = vpack.c.bf16 %v1643_v45, %v1640_v39  ;;  %v4705_v23 = vld [vmem:[%s13900_s4 + $0x38] sm:$0xff]  ;;  %v7852_v45 = vpack.c.bf16 %v4723_v28, %v4722_v24  ;;  %v1700_v24 = vld [vmem:[%s13897_s2 + $0x3360] sm:$0xff] }
 0x361   :  { %v1667_v32 = vld [vmem:[%s13897_s2 + $0x3258] sm:$0xff]  ;;  %v7850_v39 = vpack.c.bf16 %v4705_v23, %v4704_v20  ;;  %7849 = vmatprep.subr.bf16.mxu1 %v7848_v16  ;;  %v1701_v16 = vld [vmem:[%s13897_s2 + $0x3368] sm:$0xff]  ;;  %v1704_v20 = vld [vmem:[%s13897_s2 + $0x3380] sm:$0xff]  ;;  %v7195_v23 = vpack.c.bf16 %v1697_v26, %v1694_v15  ;;  %v7227_v15 = vpack.c.bf16 %v1745_v14, %v1742_v13 }
 0x362   :  { %v1703_v28 = vld [vmem:[%s13897_s2 + $0x3378] sm:$0xff] }
 0x363   :  { %7156 = vmatpush1.bf16.msra.mxu0 %v7155_v63  ;;  %v1671_v63 = vld [vmem:[%s13897_s2 + $0x3278] sm:$0xff]  ;;  %7851 = vmatpush3.bf16.msra.mxu1 %v7850_v39  ;;  %v1716_v39 = vld [vmem:[%s13897_s2 + $0x33e0] sm:$0xff] }
 0x364   :  { %7158 = vmatprep.subr.bf16.mxu0 %v7157_v36  ;;  %v1674_v36 = vld [vmem:[%s13897_s2 + $0x3290] sm:$0xff]  ;;  %7853 = vmatprep.subr.bf16.mxu1 %v7852_v45  ;;  %v4729_v13 = vld [vmem:[%s13900_s4 + $0xf8] sm:$0xff] }
 0x365   :  { %v7177_v42 = vpack.c.bf16 %v1674_v36, %v1671_v63  ;;  %v1709_v63 = vld [vmem:[%s13897_s2 + $0x33a8] sm:$0xff] }
 0x366   :  { %v1713_v36 = vld [vmem:[%s13897_s2 + $0x33c8] sm:$0xff] }
 0x367   :  { %7160 = vmatpush1.bf16.msra.mxu0 %v7159_v37  ;;  %v7175_v37 = vpack.c.bf16 %v1667_v32, %v1664_v31  ;;  %7855 = vmatpush3.bf16.msra.mxu1 %v7854_v30  ;;  %v1706_v32 = vld [vmem:[%s13897_s2 + $0x3390] sm:$0xff]  ;;  %v7205_v8 = vpack.c.bf16 %v1716_v39, %v1713_v36  ;;  %v1728_v30 = vld [vmem:[%s13897_s2 + $0x3440] sm:$0xff]  ;;  %v1763_v39 = vld [vmem:[%s13897_s2 + $0x3558] sm:$0xff] }
 0x368   :  { %7162 = vmatprep.subr.bf16.mxu0 %v7161_v51  ;;  %v4725_v51 = vld [vmem:[%s13900_s4 + $0xd8] sm:$0xff]  ;;  %v7203_v45 = vpack.c.bf16 %v1709_v63, %v1706_v32  ;;  %v1760_v36 = vld [vmem:[%s13897_s2 + $0x3540] sm:$0xff] }
 0x369   :  { %v7856_v40 = vpack.c.bf16 %v4725_v51, %v4724_v27  ;;  %v1719_v27 = vld [vmem:[%s13897_s2 + $0x33f8] sm:$0xff]  ;;  %v1722_v51 = vld [vmem:[%s13897_s2 + $0x3410] sm:$0xff] }
 0x36a   :  { %v7209_v17 = vpack.c.bf16 %v1722_v51, %v1719_v27  ;;  %v1766_v27 = vld [vmem:[%s13897_s2 + $0x3570] sm:$0xff]  ;;  %v1769_v51 = vld [vmem:[%s13897_s2 + $0x3588] sm:$0xff] }
 0x36b   :  { %7164 = vmatpush1.bf16.msra.mxu0 %v7163_v18  ;;  %v7181_v18 = vpack.c.bf16 %v1680_v11, %v1677_v49  ;;  %7857 = vmatprep.subr.bf16.mxu1 %v7856_v40  ;;  %v1721_v49 = vld [vmem:[%s13897_s2 + $0x3408] sm:$0xff] }
 0x36c   :  { %7166 = vmatprep.subr.bf16.mxu0 %v7165_v58  ;;  %v7183_v58 = vpack.c.bf16 %v1679_v46, %v1676_v34  ;;  %7859 = vmatpush3.bf16.msra.mxu1 %v7858_v6  ;;  %v1725_v11 = vld [vmem:[%s13897_s2 + $0x3428] sm:$0xff]  ;;  %v7211_v40 = vpack.c.bf16 %v1721_v49, %v1718_v48  ;;  %v1734_v34 = vld [vmem:[%s13897_s2 + $0x3470] sm:$0xff]  ;;  %v7243_v48 = vpack.c.bf16 %v1769_v51, %v1766_v27  ;;  %v4891_v27 = vld [vmem:[%s13902_s6] sm:$0xff] }
 0x36d   :  { %v7213_v47 = vpack.c.bf16 %v1728_v30, %v1725_v11  ;;  %v1730_v6 = vld [vmem:[%s13897_s2 + $0x3450] sm:$0xff]  ;;  %v1772_v11 = vld [vmem:[%s13897_s2 + $0x35a0] sm:$0xff]  ;;  %v1775_v30 = vld [vmem:[%s13897_s2 + $0x35b8] sm:$0xff] }
 0x36e   :  { %v4892_v51 = vld [vmem:[%s13902_s6 + $0x8] sm:$0xff] }
 0x36f   :  { %7168 = vmatpush1.bf16.msra.mxu0 %v7167_v10 }
 0x370   :  { %7170 = vmatprep.subr.bf16.mxu0 %v7169_v43  ;;  %v1691_v43 = vld [vmem:[%s13897_s2 + $0x3318] sm:$0xff] }
 0x373   :  { %7172 = vmatpush1.bf16.msra.mxu0 %v7171_v55  ;;  %v7197_v55 = vpack.c.bf16 %v1704_v20, %v1701_v16  ;;  %v1748_v16 = vld [vmem:[%s13897_s2 + $0x34e0] sm:$0xff]  ;;  %v1751_v20 = vld [vmem:[%s13897_s2 + $0x34f8] sm:$0xff] }
 0x374   :  { %7174 = vmatprep.subr.bf16.mxu0 %v7173_v29  ;;  %v1707_v29 = vld [vmem:[%s13897_s2 + $0x3398] sm:$0xff] }
 0x377   :  { %7176 = vmatpush1.bf16.msra.mxu0 %v7175_v37  ;;  %v1715_v37 = vld [vmem:[%s13897_s2 + $0x33d8] sm:$0xff] }
 0x378   :  { %7178 = vmatprep.subr.bf16.mxu0 %v7177_v42  ;;  %v7207_v42 = vpack.c.bf16 %v1715_v37, %v1712_v41  ;;  %v7239_v41 = vpack.c.bf16 %v1763_v39, %v1760_v36 }
 0x37b   :  { %7180 = vmatpush1.bf16.msra.mxu0 %v7179_v33  ;;  %v1727_v33 = vld [vmem:[%s13897_s2 + $0x3438] sm:$0xff] }
 0x37c   :  { %v5790_v2 = vpop.f32.mrb[32].mxu1  ;;  %7182 = vmatprep.subr.bf16.mxu0 %v7181_v18  ;;  %v1731_v18 = vld [vmem:[%s13897_s2 + $0x3458] sm:$0xff]  ;;  %v7215_v46 = vpack.c.bf16 %v1727_v33, %v1724_v44  ;;  %v7247_v44 = vpack.c.bf16 %v1775_v30, %v1772_v11  ;;  %v4895_v30 = vld [vmem:[%s13902_s6 + $0x20] sm:$0xff] }
 0x37d   :  { %v5791_v56 = vpop.f32.mrb[33].mxu1  ;;  %v7217_v3 = vpack.c.bf16 %v1734_v34, %v1731_v18  ;;  %v1778_v34 = vld [vmem:[%s13897_s2 + $0x35d0] sm:$0xff] }
 0x37e   :  { %v5792_v7 = vadd.f32 %v5791_v56, %v5790_v2 }
 0x37f   :  { %7184 = vmatpush1.bf16.msra.mxu0 %v7183_v58  ;;  %v1733_v58 = vld [vmem:[%s13897_s2 + $0x3468] sm:$0xff] }
 0x380   :  { %v13479_v10 = vadd.f32 %v5792_v7, %v13308_v35  ;;  %7186 = vmatprep.subr.bf16.mxu0 %v7185_v1  ;;  %v7191_v35 = vpack.c.bf16 %v1691_v43, %v1688_v12  ;;  %v1737_v1 = vld [vmem:[%s13897_s2 + $0x3488] sm:$0xff]  ;;  %v7219_v56 = vpack.c.bf16 %v1733_v58, %v1730_v6  ;;  %v1736_v7 = vld [vmem:[%s13897_s2 + $0x3480] sm:$0xff]  ;;  %v1746_v12 = vld [vmem:[%s13897_s2 + $0x34d0] sm:$0xff] }
 0x381   :  { %v7221_v5 = vpack.c.bf16 %v1740_v59, %v1737_v1 }
 0x383   :  { %7188 = vmatpush1.bf16.msra.mxu0 %v7187_v9  ;;  %v1739_v9 = vld [vmem:[%s13897_s2 + $0x3498] sm:$0xff] }
 0x384   :  { %7190 = vmatprep.subr.bf16.mxu0 %v7189_v57  ;;  %v1743_v57 = vld [vmem:[%s13897_s2 + $0x34b8] sm:$0xff] }
 0x385   :  { %v7225_v43 = vpack.c.bf16 %v1746_v12, %v1743_v57  ;;  %v4727_v57 = vld [vmem:[%s13900_s4 + $0xe8] sm:$0xff] }
 0x386   :  { %3217 = vmatmul.mubr.f32.vlgmr.msra.gmra.mrb[0].mxu0 %v12602_v54  ;;  %v1710_v54 = vld [vmem:[%s13897_s2 + $0x33b0] sm:$0xff]  ;;  %v4711_v12 = vld [vmem:[%s13900_s4 + $0x68] sm:$0xff] }
 0x387   :  { %7192 = vmatpush1.bf16.msra.mxu0 %v7191_v35  ;;  %3287 = vmatprep.mubr.f32.mxu0 %v12838_v22  ;;  %v7199_v22 = vpack.c.bf16 %v1703_v28, %v1700_v24  ;;  %v7201_v31 = vpack.c.bf16 %v1710_v54, %v1707_v29  ;;  %v1749_v35 = vld [vmem:[%s13897_s2 + $0x34e8] sm:$0xff]  ;;  %v7231_v24 = vpack.c.bf16 %v1751_v20, %v1748_v16  ;;  %v1754_v29 = vld [vmem:[%s13897_s2 + $0x3510] sm:$0xff]  ;;  %v1798_v16 = vsub.s32 1, %v8315_v61  ;;  %v7988_v20 = vld [vmem:[%s13899_s3] sm:$0x7] }
 0x388   :  { %7194 = vmatprep.subr.bf16.mxu0 %v7193_v62  ;;  %v1752_v62 = vld [vmem:[%s13897_s2 + $0x3500] sm:$0xff]  ;;  %v1757_v54 = vld [vmem:[%s13897_s2 + $0x3528] sm:$0xff] }
 0x389   :  { %v7229_v26 = vpack.c.bf16 %v1752_v62, %v1749_v35  ;;  %v7235_v32 = vpack.c.bf16 %v1757_v54, %v1754_v29  ;;  %v4712_v35 = vld [vmem:[%s13900_s4 + $0x70] sm:$0xff]  ;;  %v4713_v62 = vld [vmem:[%s13900_s4 + $0x78] sm:$0xff] }
 0x38b   :  { %7196 = vmatpush1.bf16.msra.mxu0 %v7195_v23  ;;  %v1755_v23 = vld [vmem:[%s13897_s2 + $0x3518] sm:$0xff] }
 0x38c   :  { %7198 = vmatprep.subr.bf16.mxu0 %v7197_v55  ;;  %v1758_v55 = vld [vmem:[%s13897_s2 + $0x3530] sm:$0xff] }
 0x38d   :  { %v7233_v28 = vpack.c.bf16 %v1758_v55, %v1755_v23  ;;  %v1799_v55 = vrot.slane %v7988_v20, %v1798_v16  ;;  %v5072_v16 = vld [vmem:[%s13905_s9 + $0x50] sm:$0xff] }
 0x38f   :  { %7200 = vmatpush1.bf16.msra.mxu0 %v7199_v22  ;;  %v1761_v22 = vld [vmem:[%s13897_s2 + $0x3548] sm:$0xff] }
 0x390   :  { %7202 = vmatprep.subr.bf16.mxu0 %v7201_v31  ;;  %v1764_v31 = vld [vmem:[%s13897_s2 + $0x3560] sm:$0xff] }
 0x391   :  { %v7237_v63 = vpack.c.bf16 %v1764_v31, %v1761_v22 }
 0x393   :  { %7204 = vmatpush1.bf16.msra.mxu0 %v7203_v45  ;;  %v1767_v45 = vld [vmem:[%s13897_s2 + $0x3578] sm:$0xff] }
 0x394   :  { %7206 = vmatprep.subr.bf16.mxu0 %v7205_v8  ;;  %v1770_v8 = vld [vmem:[%s13897_s2 + $0x3590] sm:$0xff] }
 0x395   :  { %v7241_v37 = vpack.c.bf16 %v1770_v8, %v1767_v45 }
 0x397   :  { %7208 = vmatpush1.bf16.msra.mxu0 %v7207_v42  ;;  %v1773_v42 = vld [vmem:[%s13897_s2 + $0x35a8] sm:$0xff] }
 0x398   :  { %7210 = vmatprep.subr.bf16.mxu0 %v7209_v17  ;;  %v1776_v17 = vld [vmem:[%s13897_s2 + $0x35c0] sm:$0xff] }
 0x399   :  { %v7245_v49 = vpack.c.bf16 %v1776_v17, %v1773_v42  ;;  %v4899_v42 = vld [vmem:[%s13903_s1] sm:$0x3]  ;;  %v7875_v17 = vpack.c.bf16 %v4892_v51, %v4891_v27  ;;  %v5162_v51 = vld [vmem:[%s13907_s11 + $0x30] sm:$0xff] }
 0x39b   :  { %7212 = vmatpush1.bf16.msra.mxu0 %v7211_v40  ;;  %v1779_v40 = vld [vmem:[%s13897_s2 + $0x35d8] sm:$0xff] }
 0x39c   :  { %v5825_v50 = vpop.f32.mrb[34].mxu1  ;;  %7214 = vmatprep.subr.bf16.mxu0 %v7213_v47  ;;  %v1782_v47 = vld [vmem:[%s13897_s2 + $0x35f0] sm:$0xff] }
 0x39d   :  { %v5826_v2 = vpop.f32.mrb[35].mxu1  ;;  %v7249_v18 = vpack.c.bf16 %v1782_v47, %v1779_v40  ;;  %v4896_v40 = vld [vmem:[%s13902_s6 + $0x28] sm:$0xff] }
 0x39e   :  { %v5827_v4 = vadd.f32 %v5826_v2, %v5825_v50  ;;  %v7881_v47 = vpack.c.bf16 %v4896_v40, %v4895_v30  ;;  %v5167_v30 = vld [vmem:[%s13907_s11 + $0x58] sm:$0xff] }
 0x39f   :  { %7216 = vmatpush1.bf16.msra.mxu0 %v7215_v46  ;;  %v1781_v46 = vld [vmem:[%s13897_s2 + $0x35e8] sm:$0xff] }
 0x3a0   :  { %v13580_v19 = vadd.f32 %v5827_v4, %v13479_v10  ;;  %7218 = vmatprep.subr.bf16.mxu0 %v7217_v3  ;;  %v7223_v10 = vpack.c.bf16 %v1739_v9, %v1736_v7  ;;  %v7251_v6 = vpack.c.bf16 %v1781_v46, %v1778_v34  ;;  %v4726_v9 = vld [vmem:[%s13900_s4 + $0xe0] sm:$0xff] }
 0x3a3   :  { %7220 = vmatpush1.bf16.msra.mxu0 %v7219_v56 }
 0x3a4   :  { %7222 = vmatprep.subr.bf16.mxu0 %v7221_v5 }
 0x3a7   :  { %7224 = vmatpush1.bf16.msra.mxu0 %v7223_v10 }
 0x3a8   :  { %7226 = vmatprep.subr.bf16.mxu0 %v7225_v43  ;;  %v4728_v43 = vld [vmem:[%s13900_s4 + $0xf0] sm:$0xff] }
 0x3a9   :  { %v7864_v14 = vpack.c.bf16 %v4729_v13, %v4728_v43  ;;  %v5068_v13 = vld [vmem:[%s13905_s9 + $0x30] sm:$0xff] }
 0x3ab   :  { %7228 = vmatpush1.bf16.msra.mxu0 %v7227_v15  ;;  %v7866_v15 = vpack.c.bf16 %v4713_v62, %v4712_v35  ;;  %v5070_v62 = vld [vmem:[%s13905_s9 + $0x40] sm:$0xff] }
 0x3ac   :  { %7230 = vmatprep.subr.bf16.mxu0 %v7229_v26  ;;  %v1794_v26 = vsub.s32 0, %v8315_v61  ;;  %v4730_v61 = vld [vmem:[%s13900_s4 + $0x100] sm:$0xff] }
 0x3ae   :  { %v1795_v23 = vrot.slane %v7988_v20, %v1794_v26  ;;  %v5073_v20 = vld [vmem:[%s13905_s9 + $0x58] sm:$0xff] }
 0x3af   :  { %7232 = vmatpush1.bf16.msra.mxu0 %v7231_v24 }
 0x3b0   :  { %7234 = vmatprep.subr.bf16.mxu0 %v7233_v28  ;;  %v7934_v24 = vadd.f32 %v10693_v53, %v1795_v23  ;;  %v7937_v28 = vadd.f32 %v10701_v0, %v1799_v55  ;;  %v4732_v0 = vld [vmem:[%s13900_s4 + $0x110] sm:$0xff]  ;;  %v7902_v23 = vpack.c.bf16 %v5073_v20, %v5072_v16  ;;  %v5074_v55 = vld [vmem:[%s13905_s9 + $0x60] sm:$0xff] }
 0x3b3   :  { %7236 = vmatpush1.bf16.msra.mxu0 %v7235_v32 }
 0x3b4   :  { %7238 = vmatprep.subr.bf16.mxu0 %v7237_v63  ;;  %v4731_v63 = vld [vmem:[%s13900_s4 + $0x108] sm:$0xff] }
 0x3b5   :  { %v7869_v53 = vpack.c.bf16 %v4731_v63, %v4730_v61 }
 0x3b7   :  { %7240 = vmatpush1.bf16.msra.mxu0 %v7239_v41 }
 0x3b8   :  { %7242 = vmatprep.subr.bf16.mxu0 %v7241_v37  ;;  %v4900_v37 = vld [vmem:[%s13901_s7] sm:$0x1f] }
 0x3bb   :  { %7244 = vmatpush1.bf16.msra.mxu0 %v7243_v48  ;;  %v4893_v48 = vld [vmem:[%s13902_s6 + $0x10] sm:$0xff] }
 0x3bc   :  { %v5860_v33 = vpop.f32.mrb[36].mxu1  ;;  %7246 = vmatprep.subr.bf16.mxu0 %v7245_v49  ;;  %v4894_v49 = vld [vmem:[%s13902_s6 + $0x18] sm:$0xff] }
 0x3bd   :  { %v5861_v50 = vpop.f32.mrb[37].mxu1  ;;  %v7878_v11 = vpack.c.bf16 %v4894_v49, %v4893_v48  ;;  %v5165_v48 = vld [vmem:[%s13907_s11 + $0x48] sm:$0xff] }
 0x3be   :  { %v5862_v3 = vadd.f32 %v5861_v50, %v5860_v33  ;;  %v4898_v33 = vld [vmem:[%s13902_s6 + $0x38] sm:$0xff] }
 0x3bf   :  { %7248 = vmatpush1.bf16.msra.mxu0 %v7247_v44  ;;  %v4897_v44 = vld [vmem:[%s13902_s6 + $0x30] sm:$0xff] }
 0x3c0   :  { %v4552_v58 = vadd.f32 %v5862_v3, %v13580_v19  ;;  %7250 = vmatprep.subr.bf16.mxu0 %v7249_v18  ;;  %v7860_v19 = vpack.c.bf16 %v4727_v57, %v4726_v9  ;;  %v7884_v18 = vpack.c.bf16 %v4898_v33, %v4897_v44  ;;  %v5259_v3 = vld [vmem:[%s13904_s5] ss:$0 sm:$0xff]  ;;  %v5065_v9 = vld [vmem:[%s13905_s9 + $0x18] sm:$0xff]  ;;  %v5169_v44 = vld [vmem:[%s13907_s11 + $0x68] sm:$0xff] }
 0x3c2   :  { %7861 = vmatprep.subr.bf16.mxu1 %v7860_v19 }
 0x3c3   :  { %7252 = vmatpush1.bf16.msra.mxu0 %v7251_v6 }
 0x3c6   :  { %3288 = vmatmul.mubr.f32.vlgmr.msra.gmra.mrb[0].mxu0 %v12810_v38  ;;  %v4710_v38 = vld [vmem:[%s13900_s4 + $0x60] sm:$0xff] }
 0x3c7   :  { %v7862_v10 = vpack.c.bf16 %v4711_v12, %v4710_v38  ;;  %v5066_v12 = vld [vmem:[%s13905_s9 + $0x20] sm:$0xff] }
 0x3c9   :  { %7863 = vmatpush3.bf16.msra.mxu1 %v7862_v10  ;;  %v5067_v10 = vld [vmem:[%s13905_s9 + $0x28] sm:$0xff] }
 0x3ca   :  { %7865 = vmatprep.subr.bf16.mxu1 %v7864_v14  ;;  %v7893_v43 = vpack.c.bf16 %v5067_v10, %v5066_v12  ;;  %v5069_v14 = vld [vmem:[%s13905_s9 + $0x38] sm:$0xff] }
 0x3cb   :  { %v7896_v35 = vpack.c.bf16 %v5069_v14, %v5068_v13 }
 0x3cd   :  { %7867 = vmatpush3.bf16.msra.mxu1 %v7866_v15  ;;  %v5071_v15 = vld [vmem:[%s13905_s9 + $0x48] sm:$0xff] }
 0x3ce   :  { %7868 = vmatprep.subr.bf16.mxu1 %v7991_v25  ;;  %v7899_v26 = vpack.c.bf16 %v5071_v15, %v5070_v62 }
 0x3dc   :  { %v5895_v2 = vpop.f32.mrb[38].mxu1 }
 0x3dd   :  { %v5896_v1 = vpop.f32.mrb[39].mxu1 }
 0x3de   :  { %v5897_v59 = vadd.f32 %v5896_v1, %v5895_v2  ;;  %v5063_v2 = vld [vmem:[%s13905_s9 + $0x8] sm:$0xff] }
 0x3e0   :  { %v4622_v4 = vadd.f32 %v5897_v59, %v4552_v58  ;;  %v4691_v56 = vpop.f32.mrb[40].mxu1  ;;  %v5062_v58 = vld [vmem:[%s13905_s9] sm:$0xff] }
 0x3e1   :  { %v5993_v5 = vpop.f32.mrb[41].mxu1 }
 0x3e2   :  { %v4692_v7 = vadd.f32 %v4691_v56, %v4622_v4  ;;  %v7887_v56 = vpack.c.bf16 %v5063_v2, %v5062_v58 }
 0x3e4   :  { %v4697_v41 = vmax.f32 %v4692_v7, 0.0  ;;  %v5064_v7 = vld [vmem:[%s13905_s9 + $0x10] sm:$0xff] }
 0x3e5   :  { %v7890_v38 = vpack.c.bf16 %v5065_v9, %v5064_v7 }
 0x499   :  { %v3289_v29 = vpop.f32.mrb[0].mxu0 }
 0x49a   :  { %v7935_v54 = vadd.f32 %v7934_v24, %v3289_v29  ;;  %v3291_v22 = vpop.f32.mrb[1].mxu0  ;;  %v5075_v24 = vld [vmem:[%s13905_s9 + $0x68] sm:$0xff]  ;;  %v5076_v29 = vld [vmem:[%s13905_s9 + $0x70] sm:$0xff] }
 0x49b   :  { %v7938_v31 = vadd.f32 %v7937_v28, %v3291_v22  ;;  %v7905_v28 = vpack.c.bf16 %v5075_v24, %v5074_v55 }
 0x49c   :  { %v7936_v32 = vadd.f32 %v7935_v54, %v11139_v60  ;;  %v4733_v60 = vld [vmem:[%s13900_s4 + $0x118] sm:$0xff] }
 0x49d   :  { %v7939_v36 = vadd.f32 %v7938_v31, %v11150_v52  ;;  %v7872_v8 = vpack.c.bf16 %v4733_v60, %v4732_v0  ;;  %v4734_v52 = vld [vmem:[%s13900_s4 + $0x120] sm:$0x3f]  ;;  %v5077_v54 = vld [vmem:[%s13905_s9 + $0x78] sm:$0xff]  ;;  %v5158_v60 = vld [vmem:[%s13907_s11 + $0x10] sm:$0xff] }
 0x49e   :  { %v4695_v45 = vmax.f32 %v7936_v32, 0.0  ;;  %v7908_v22 = vpack.c.bf16 %v5077_v54, %v5076_v29  ;;  %v5265_v32 = vld [vmem:[%s13906_s8] ss:$0 sm:$0xff] }
 0x49f   :  { %v4696_v39 = vmax.f32 %v7939_v36, 0.0  ;;  %v5156_v36 = vld [vmem:[%s13907_s11] sm:$0xff] }
 0x4a1   :  { %4814 = vmatprep.mubr.f32.mxu1 %v4696_v39  ;;  %v5157_v39 = vld [vmem:[%s13907_s11 + $0x8] sm:$0xff] }
 0x4a2   :  { %4815 = vmatmul.mubr.f32.vlgmr.msra.gmra.mrb[42].mxu1 %v4695_v45  ;;  %v7911_v45 = vpack.c.bf16 %v5157_v39, %v5156_v36 }
 0x4a3   :  { %7870 = vmatpush3.bf16.msra.mxu1 %v7869_v53  ;;  %6004 = vmatprep.mubr.msk.f32.mxu1 %vm7992_vm1, %v7990_v21 }
 0x4a4   :  { %7871 = vmatprep.subr.bf16.mxu1 %v7991_v25 }
 0x4a7   :  { %7873 = vmatpush3.bf16.msra.mxu1 %v7872_v8  ;;  %v5159_v8 = vld [vmem:[%s13907_s11 + $0x18] sm:$0xff] }
 0x4a8   :  { %6002 = vmatprep.subr.mxu1 %v7990_v21 }
 0x4ab   :  { %6003 = vmatpush3.msk.msra.mxu1 %vm4746_vm2, %v4734_v52  ;;  %v7914_v52 = vpack.c.bf16 %v5159_v8, %v5158_v60 }
 0x4ac   :  { %6005 = vmatmul.mubr.msk.f32.vlgmr.msra.gmra.mrb[44].mxu1 %vm4742_vm3, %v4697_v41  ;;  %6007 = vmatprep.subr.mxu1 %v7990_v21  ;;  %v5160_v41 = vld [vmem:[%s13907_s11 + $0x20] sm:$0xff] }
 0x4ad   :  { %6008 = vmatpush3.msk.msra.mxu1 %vm4905_vm4, %v4900_v37  ;;  %6009 = vmatprep.mubr.msk.f32.mxu1 %vm7992_vm1, %v7990_v21  ;;  %v5161_v37 = vld [vmem:[%s13907_s11 + $0x28] sm:$0xff] }
 0x4ae   :  { %7874 = vmatprep.subr.bf16.mxu1 %v7991_v25  ;;  %v7917_v27 = vpack.c.bf16 %v5161_v37, %v5160_v41 }
 0x4b0   :  { %6010 = vmatmul.mubr.msk.f32.vlgmr.msra.gmra.mrb[46].mxu1 %vm4901_vm5, %v4899_v42 }
 0x4b1   :  { %7876 = vmatpush3.bf16.msra.mxu1 %v7875_v17  ;;  %6028 = vmatprep.mubr.msk.f32.mxu1 %vm7992_vm1, %v7990_v21  ;;  %v5164_v17 = vld [vmem:[%s13907_s11 + $0x40] sm:$0xff] }
 0x4b2   :  { %7877 = vmatprep.subr.bf16.mxu1 %v7991_v25  ;;  %v7923_v49 = vpack.c.bf16 %v5165_v48, %v5164_v17 }
 0x4b5   :  { %7879 = vmatpush3.bf16.msra.mxu1 %v7878_v11  ;;  %v5166_v11 = vld [vmem:[%s13907_s11 + $0x50] sm:$0xff] }
 0x4b6   :  { %7880 = vmatprep.subr.bf16.mxu1 %v7991_v25  ;;  %v7926_v40 = vpack.c.bf16 %v5167_v30, %v5166_v11 }
 0x4b9   :  { %7882 = vmatpush3.bf16.msra.mxu1 %v7881_v47  ;;  %v5168_v47 = vld [vmem:[%s13907_s11 + $0x60] sm:$0xff] }
 0x4ba   :  { %7883 = vmatprep.subr.bf16.mxu1 %v7991_v25  ;;  %v7929_v33 = vpack.c.bf16 %v5169_v44, %v5168_v47 }
 0x4bd   :  { %7885 = vmatpush3.bf16.msra.mxu1 %v7884_v18  ;;  %v5170_v18 = vld [vmem:[%s13907_s11 + $0x70] sm:$0xff] }
 0x4be   :  { %7886 = vmatprep.subr.bf16.mxu1 %v7991_v25 }
 0x575   :  { %v5933_v34 = vpop.f32.mrb[42].mxu1 }
 0x576   :  { %v5934_v46 = vpop.f32.mrb[43].mxu1 }
 0x577   :  { %v5935_v50 = vadd.f32 %v5934_v46, %v5933_v34  ;;  %v5171_v34 = vld [vmem:[%s13907_s11 + $0x78] sm:$0xff] }
 0x578   :  { %v7932_v46 = vpack.c.bf16 %v5171_v34, %v5170_v18 }
 0x579   :  { %v4817_v6 = vadd.f32 %v5935_v50, %v5259_v3  ;;  %v18_v50 = vstv %s13908_s12  ;;  %v5266_v3 = vld [vmem:[%s13909_s10] ss:$0 sm:$0xff] }
 0x57a   :  { %19 = vst [vmem:[#allocation2] sm:$0x1] %v18_v50 }
 0x57f   :  { %v4886_v1 = vpop.f32.mrb[44].mxu1 }
 0x580   :  { %v4887_v59 = vadd.f32 %v4886_v1, %v4817_v6  ;;  %v6006_v4 = vpop.f32.mrb[45].mxu1 }
 0x581   :  { %v5267_v1 = vld [vmem:[#allocation2] ss:$0 sm:$0xff] }
 0x582   :  { %v4890_v5 = vmax.f32 %v4887_v59, 0.0 }
 0x583   :  { %v4975_v57 = vpop.f32.mrb[46].mxu1 }
 0x584   :  { %6029 = vmatmul.mubr.msk.f32.vlgmr.msra.gmra.mrb[48].mxu1 %vm4979_vm6, %v4890_v5  ;;  %v6011_v19 = vpop.f32.mrb[47].mxu1 }
 0x585   :  { %7888 = vmatpush3.bf16.msra.mxu1 %v7887_v56  ;;  %6063 = vmatprep.mubr.msk.f32.mxu1 %vm7992_vm1, %v7990_v21 }
 0x586   :  { %7889 = vmatprep.subr.bf16.mxu1 %v7991_v25 }
 0x589   :  { %7891 = vmatpush3.bf16.msra.mxu1 %v7890_v38 }
 0x58a   :  { %7892 = vmatprep.subr.bf16.mxu1 %v7991_v25 }
 0x58d   :  { %7894 = vmatpush3.bf16.msra.mxu1 %v7893_v43 }
 0x58e   :  { %7895 = vmatprep.subr.bf16.mxu1 %v7991_v25 }
 0x591   :  { %7897 = vmatpush3.bf16.msra.mxu1 %v7896_v35 }
 0x592   :  { %7898 = vmatprep.subr.bf16.mxu1 %v7991_v25 }
 0x595   :  { %7900 = vmatpush3.bf16.msra.mxu1 %v7899_v26 }
 0x596   :  { %7901 = vmatprep.subr.bf16.mxu1 %v7991_v25 }
 0x599   :  { %7903 = vmatpush3.bf16.msra.mxu1 %v7902_v23 }
 0x59a   :  { %7904 = vmatprep.subr.bf16.mxu1 %v7991_v25 }
 0x59d   :  { %7906 = vmatpush3.bf16.msra.mxu1 %v7905_v28 }
 0x59e   :  { %7907 = vmatprep.subr.bf16.mxu1 %v7991_v25 }
 0x5a1   :  { %7909 = vmatpush3.bf16.msra.mxu1 %v7908_v22 }
 0x5a2   :  { %7910 = vmatprep.subr.bf16.mxu1 %v7991_v25 }
 0x657   :  { %v5049_v31 = vpop.f32.mrb[48].mxu1 }
 0x658   :  { %v5050_v61 = vadd.f32 %v5049_v31, %v4975_v57  ;;  %v6030_v63 = vpop.f32.mrb[49].mxu1 }
 0x65a   :  { %v5060_v53 = vadd.f32 %v5265_v32, %v5050_v61 }
 0x65c   :  { %v5061_v0 = vmax.f32 %v5060_v53, 0.0 }
 0x65e   :  { %6064 = vmatmul.mubr.f32.vlgmr.msra.gmra.mrb[50].mxu1 %v5061_v0 }
 0x65f   :  { %7912 = vmatpush3.bf16.msra.mxu1 %v7911_v45  ;;  %6098 = vmatprep.mubr.msk.f32.mxu1 %vm7992_vm1, %v7990_v21  ;;  %v5163_v21 = vld [vmem:[%s13907_s11 + $0x38] sm:$0xff] }
 0x660   :  { %7913 = vmatprep.subr.bf16.mxu1 %v7991_v25  ;;  %v7920_v42 = vpack.c.bf16 %v5163_v21, %v5162_v51 }
 0x663   :  { %7915 = vmatpush3.bf16.msra.mxu1 %v7914_v52 }
 0x664   :  { %7916 = vmatprep.subr.bf16.mxu1 %v7991_v25 }
 0x667   :  { %7918 = vmatpush3.bf16.msra.mxu1 %v7917_v27 }
 0x668   :  { %7919 = vmatprep.subr.bf16.mxu1 %v7991_v25 }
 0x66b   :  { %7921 = vmatpush3.bf16.msra.mxu1 %v7920_v42 }
 0x66c   :  { %7922 = vmatprep.subr.bf16.mxu1 %v7991_v25 }
 0x66f   :  { %7924 = vmatpush3.bf16.msra.mxu1 %v7923_v49 }
 0x670   :  { %7925 = vmatprep.subr.bf16.mxu1 %v7991_v25 }
 0x673   :  { %7927 = vmatpush3.bf16.msra.mxu1 %v7926_v40 }
 0x674   :  { %7928 = vmatprep.subr.bf16.mxu1 %v7991_v25 }
 0x677   :  { %7930 = vmatpush3.bf16.msra.mxu1 %v7929_v33 }
 0x678   :  { %7931 = vmatprep.subr.bf16.mxu1 %v7991_v25 }
 0x67b   :  { %7933 = vmatpush3.bf16.msra.mxu1 %v7932_v46 }
 0x731   :  { %v5151_v25 = vpop.f32.mrb[50].mxu1 }
 0x732   :  { %v5152_v6 = vadd.f32 %v5266_v3, %v5151_v25  ;;  %v6065_v58 = vpop.f32.mrb[51].mxu1 }
 0x734   :  { %v5155_v2 = vmax.f32 %v5152_v6, 0.0 }
 0x736   :  { %6099 = vmatmul.mubr.f32.vlgmr.msra.gmra.mrb[52].mxu1 %v5155_v2 }
 0x809   :  { %v5245_v59 = vpop.f32.mrb[52].mxu1 }
 0x80a   :  { %v5246_v4 = vadd.f32 %v5267_v1, %v5245_v59  ;;  %v6100_v56 = vpop.f32.mrb[53].mxu1 }
 0x80c   :  { %7985 = vtanh.f32 %v5246_v4 }
 0x816   :  { %v7986_v5 = vpop.eup %7985 }
 0x817   :  { %5251 = vst.msk [vmem:[%s13910_s13] sm:$0x3] %vm5250_vm7, %v7986_v5 }

</bundles_post_ra>
